<compile_context>
chip_gen: v5e
topology: v5e:2x2
jax: 0.10.0
libtpu: 0.0.40
codegen_flags: <defaults>
</compile_context>

<pallas_src>
import functools

import jax
import jax.numpy as jnp
from jax.experimental import pallas as pl
from jax.experimental.pallas import tpu as pltpu

K = 5        # conv kernel size (fixed by the module)
P = K - 1    # spatial shrink / growth per (transpose-)conv layer
CMAX = 8     # every channel dimension is zero-padded to 8 inside the kernel


# ----------------------------------------------------------------------------
# In-kernel helper: valid 5x5 conv on a flattened spatial canvas
# ----------------------------------------------------------------------------
def _conv5x5(a, w_ref, b_ref, stride, out_size):
    """a       : (8, L_in) f32 value; lane l = row i * stride + col j.
       w_ref   : (25, 8, 8) VMEM ref, [kh*5+kw, c_out, c_in] (zero padded).
       b_ref   : (8, 1) VMEM ref (zero padded).
       returns : (8, L_out) f32 with L_out = (out_size-1)*(stride+1)+1.
       Lane i*stride+j (i, j < out_size) holds output pixel (i, j); other
       lanes hold unused (finite) garbage that is never read downstream."""
    lv = (out_size - 1) * (stride + 1) + 1
    acc = jnp.zeros((CMAX, lv), jnp.float32)
    for kh in range(K):
        for kw in range(K):
            off = kh * stride + kw
            acc = acc + jnp.dot(w_ref[kh * K + kw], a[:, off:off + lv],
                                preferred_element_type=jnp.float32)
    return jnp.maximum(acc + b_ref[...], 0.0)


# ----------------------------------------------------------------------------
# Fused whole-forward kernel (one grid step == one image)
# ----------------------------------------------------------------------------
def _make_kernel(w0):
    s1, s2, s3 = w0 - 4, w0 - 8, w0 - 12
    d = w0 + 4                       # decoder canvas side (input + zero ring)
    hidden = 8 * s3 * s3

    def kernel(x_ref,
               cw1, cb1, cw2, cb2, cw3, cb3,
               l1w, l1b, l2w, l2b,
               cw4, cb4, cw5, cb5, cw6, cb6,
               o_ref,
               a0_ref, hs_ref, p1_ref, p2_ref, p3_ref):
        f32 = jnp.float32

        # ---- load this image into the encoder canvas (channel row 0) -------
        a0_ref[...] = jnp.zeros((CMAX, w0 * w0), f32)
        for i in range(w0):
            a0_ref[0:1, i * w0:(i + 1) * w0] = x_ref[0:1, i, :]

        # ---- encoder: conv1 -> conv2 -> conv3 (ReLU fused) ------------------
        a1 = _conv5x5(a0_ref[...], cw1, cb1, w0, s1)
        a2 = _conv5x5(a1, cw2, cb2, w0, s2)
        a3 = _conv5x5(a2, cw3, cb3, w0, s3)

        # ---- flatten valid region in PyTorch NCHW .view order ---------------
        hs_ref[...] = jnp.zeros((CMAX, hidden), f32)
        for c in range(8):
            for i in range(s3):
                dst = c * s3 * s3 + i * s3
                hs_ref[0:1, dst:dst + s3] = a3[c:c + 1, i * w0:i * w0 + s3]

        # ---- bottleneck MLP (rows 1..7 of hs are zero padding) --------------
        z1 = jnp.maximum(
            jnp.dot(hs_ref[...], l1w[...], preferred_element_type=f32)
            + l1b[...], 0.0)
        z2 = jnp.maximum(
            jnp.dot(z1, l2w[...], preferred_element_type=f32)
            + l2b[...], 0.0)

        # ---- decoder: embed hidden at offset (4,4) of a zeroed canvas -------
        p1_ref[...] = jnp.zeros((CMAX, d * d), f32)
        for c in range(8):
            for i in range(s3):
                src = c * s3 * s3 + i * s3
                dst = (P + i) * d + P
                p1_ref[c:c + 1, dst:dst + s3] = z2[0:1, src:src + s3]
        d1 = _conv5x5(p1_ref[...], cw4, cb4, d, s2)       # ConvTranspose2d #1

        p2_ref[...] = jnp.zeros((CMAX, d * d), f32)
        for i in range(s2):
            dst = (P + i) * d + P
            p2_ref[:, dst:dst + s2] = d1[:, i * d:i * d + s2]
        d2 = _conv5x5(p2_ref[...], cw5, cb5, d, s1)       # ConvTranspose2d #2

        p3_ref[...] = jnp.zeros((CMAX, d * d), f32)
        for i in range(s1):
            dst = (P + i) * d + P
            p3_ref[:, dst:dst + s1] = d2[:, i * d:i * d + s1]
        d3 = _conv5x5(p3_ref[...], cw6, cb6, d, w0)       # ConvTranspose2d #3

        # ---- write this image's output (channel row 0) ----------------------
        for i in range(w0):
            o_ref[0:1, i, :] = d3[0:1, i * d:i * d + w0]

    return kernel


# ----------------------------------------------------------------------------
# One-time weight repacking (hoisted out of the forward pass)
# ----------------------------------------------------------------------------
def prepare_params(params):
    def pack_conv(w):                        # (Cout, Cin, 5, 5) -> (25, 8, 8)
        cout, cin = w.shape[0], w.shape[1]
        wt = jnp.transpose(w, (2, 3, 0, 1)).reshape(K * K, cout, cin)
        base = jnp.zeros((K * K, CMAX, CMAX), jnp.float32)
        return base.at[:, :cout, :cin].set(wt.astype(jnp.float32))

    def pack_convT(w):                       # ConvTranspose2d (Cin, Cout, 5, 5)
        w_eq = jnp.flip(w, axis=(-2, -1)).transpose(1, 0, 2, 3)
        return pack_conv(w_eq)

    def pack_cbias(b):                       # (Cout,) -> (8, 1)
        return jnp.zeros((CMAX, 1), jnp.float32).at[:b.shape[0], 0].set(
            b.astype(jnp.float32))

    return dict(
        cw1=pack_conv(params["conv1_w"]), cb1=pack_cbias(params["conv1_b"]),
        cw2=pack_conv(params["conv2_w"]), cb2=pack_cbias(params["conv2_b"]),
        cw3=pack_conv(params["conv3_w"]), cb3=pack_cbias(params["conv3_b"]),
        l1w=params["lin1_w"].T.astype(jnp.float32),
        l1b=params["lin1_b"].reshape(1, -1).astype(jnp.float32),
        l2w=params["lin2_w"].T.astype(jnp.float32),
        l2b=params["lin2_b"].reshape(1, -1).astype(jnp.float32),
        cw4=pack_convT(params["conv4_w"]), cb4=pack_cbias(params["conv4_b"]),
        cw5=pack_convT(params["conv5_w"]), cb5=pack_cbias(params["conv5_b"]),
        cw6=pack_convT(params["conv6_w"]), cb6=pack_cbias(params["conv6_b"]),
    )


# ----------------------------------------------------------------------------
# Forward wrapper: single fused pallas_call, grid over the batch
# ----------------------------------------------------------------------------
def autoencoder_forward(kparams, x, width, height):
    """x: (N, 1, H, W) f32 (NCHW).  Returns (N, 1, H, W) f32."""
    # TODO(synk): the PyTorch decoder .view swaps H and W when width != height;
    # we implement the standard square case (the module's test shapes).
    assert width == height, "kernel implements the square-input case"
    w0 = width
    n = x.shape[0]
    s3 = w0 - 12
    d = w0 + 4
    hidden = 8 * s3 * s3

    x3 = x.reshape(n, w0, w0).astype(jnp.float32)     # C == 1: free reshape

    operands = [
        x3,
        kparams["cw1"], kparams["cb1"],
        kparams["cw2"], kparams["cb2"],
        kparams["cw3"], kparams["cb3"],
        kparams["l1w"], kparams["l1b"],
        kparams["l2w"], kparams["l2b"],
        kparams["cw4"], kparams["cb4"],
        kparams["cw5"], kparams["cb5"],
        kparams["cw6"], kparams["cb6"],
    ]

    def _resident(a):             # whole array, same block every grid step
        nd = a.ndim
        return pl.BlockSpec(a.shape, lambda i: (0,) * nd)

    in_specs = [pl.BlockSpec((1, w0, w0), lambda i: (i, 0, 0))]
    in_specs += [_resident(a) for a in operands[1:]]

    out = pl.pallas_call(
        _make_kernel(w0),
        out_shape=jax.ShapeDtypeStruct((n, w0, w0), jnp.float32),
        grid=(n,),
        in_specs=in_specs,
        out_specs=pl.BlockSpec((1, w0, w0), lambda i: (i, 0, 0)),
        scratch_shapes=[
            pltpu.VMEM((CMAX, w0 * w0), jnp.float32),   # encoder canvas
            pltpu.VMEM((CMAX, hidden), jnp.float32),    # flattened hidden
            pltpu.VMEM((CMAX, d * d), jnp.float32),     # decoder canvas 1
            pltpu.VMEM((CMAX, d * d), jnp.float32),     # decoder canvas 2
            pltpu.VMEM((CMAX, d * d), jnp.float32),     # decoder canvas 3
        ],
        compiler_params=pltpu.CompilerParams(
            dimension_semantics=("parallel",)),
    )(*operands)

    return out.reshape(n, 1, w0, w0)


# ----------------------------------------------------------------------------
# Parameter init (PyTorch layout) and a pure-JAX reference for validation
# ----------------------------------------------------------------------------
def init_params(key, width, height, bottleneck):
    hidden = (width - 12) * (height - 12) * 8
    keys = jax.random.split(key, 16)
    p = {}

    def w_init(k, shape, fan_in):
        scale = 1.0 / jnp.sqrt(float(fan_in))
        return jax.random.uniform(k, shape, jnp.float32, -scale, scale)

    p["conv1_w"] = w_init(keys[0], (2, 1, 5, 5), 1 * 25)
    p["conv1_b"] = w_init(keys[1], (2,), 1 * 25)
    p["conv2_w"] = w_init(keys[2], (4, 2, 5, 5), 2 * 25)
    p["conv2_b"] = w_init(keys[3], (4,), 2 * 25)
    p["conv3_w"] = w_init(keys[4], (8, 4, 5, 5), 4 * 25)
    p["conv3_b"] = w_init(keys[5], (8,), 4 * 25)
    p["lin1_w"] = w_init(keys[6], (bottleneck, hidden), hidden)
    p["lin1_b"] = w_init(keys[7], (bottleneck,), hidden)
    p["lin2_w"] = w_init(keys[8], (hidden, bottleneck), bottleneck)
    p["lin2_b"] = w_init(keys[9], (hidden,), bottleneck)
    # ConvTranspose2d weight layout: (in_channels, out_channels, kH, kW)
    p["conv4_w"] = w_init(keys[10], (8, 4, 5, 5), 8 * 25)
    p["conv4_b"] = w_init(keys[11], (4,), 8 * 25)
    p["conv5_w"] = w_init(keys[12], (4, 2, 5, 5), 4 * 25)
    p["conv5_b"] = w_init(keys[13], (2,), 4 * 25)
    p["conv6_w"] = w_init(keys[14], (2, 1, 5, 5), 2 * 25)
    p["conv6_b"] = w_init(keys[15], (1,), 2 * 25)
    return p


def reference_forward(params, x, width, height):
    hp = jax.lax.Precision.HIGHEST
    dn = ("NCHW", "OIHW", "NCHW")

    def conv(h, w, b):
        y = jax.lax.conv_general_dilated(h, w, (1, 1), "VALID",
                                         dimension_numbers=dn, precision=hp)
        return jax.nn.relu(y + b.reshape(1, -1, 1, 1))

    def convT(h, w, b):
        w_eq = jnp.flip(w, axis=(-2, -1)).transpose(1, 0, 2, 3)
        y = jax.lax.conv_general_dilated(h, w_eq, (1, 1), [(P, P), (P, P)],
                                         dimension_numbers=dn, precision=hp)
        return jax.nn.relu(y + b.reshape(1, -1, 1, 1))

    n = x.shape[0]
    h = conv(x, params["conv1_w"], params["conv1_b"])
    h = conv(h, params["conv2_w"], params["conv2_b"])
    h = conv(h, params["conv3_w"], params["conv3_b"])
    h = h.reshape(n, -1)
    h = jax.nn.relu(jnp.dot(h, params["lin1_w"].T, precision=hp) + params["lin1_b"])
    h = jax.nn.relu(jnp.dot(h, params["lin2_w"].T, precision=hp) + params["lin2_b"])
    h = h.reshape(n, 8, width - 12, height - 12)
    h = convT(h, params["conv4_w"], params["conv4_b"])
    h = convT(h, params["conv5_w"], params["conv5_b"])
    h = convT(h, params["conv6_w"], params["conv6_b"])
    return h


if __name__ == "__main__":
    WIDTH, HEIGHT, BOTTLENECK, BATCH = 16, 16, 32, 2

    key = jax.random.PRNGKey(0)
    k_param, k_x = jax.random.split(key)
    params = init_params(k_param, WIDTH, HEIGHT, BOTTLENECK)
    x = jax.random.normal(k_x, (BATCH, 1, HEIGHT, WIDTH), jnp.float32)  # NCHW

    kparams = prepare_params(params)          # one-time weight repack (hoisted)

    fwd = jax.jit(functools.partial(autoencoder_forward, width=WIDTH, height=HEIGHT))
    y = fwd(kparams, x)
    jax.block_until_ready(y)

    assert y.shape == (BATCH, 1, HEIGHT, WIDTH), y.shape
    assert bool(jnp.all(jnp.isfinite(y))) and bool(jnp.all(y >= 0.0))

    y_ref = reference_forward(params, x, WIDTH, HEIGHT)
    err = float(jnp.max(jnp.abs(y - y_ref)))
    assert err < 3e-2, f"kernel/reference mismatch: max abs err = {err}"

    print("KERNEL_OK")
</pallas_src>

<mosaic_0001>
module attributes {stable_mosaic.version = 11 : i64} {
  func.func @kernel(%arg0: i32, %arg1: memref<1x16x16xf32, #tpu.memory_space<vmem>>, %arg2: memref<25x8x8xf32, #tpu.memory_space<vmem>>, %arg3: memref<8x1xf32, #tpu.memory_space<vmem>>, %arg4: memref<25x8x8xf32, #tpu.memory_space<vmem>>, %arg5: memref<8x1xf32, #tpu.memory_space<vmem>>, %arg6: memref<25x8x8xf32, #tpu.memory_space<vmem>>, %arg7: memref<8x1xf32, #tpu.memory_space<vmem>>, %arg8: memref<128x32xf32, #tpu.memory_space<vmem>>, %arg9: memref<1x32xf32, #tpu.memory_space<vmem>>, %arg10: memref<32x128xf32, #tpu.memory_space<vmem>>, %arg11: memref<1x128xf32, #tpu.memory_space<vmem>>, %arg12: memref<25x8x8xf32, #tpu.memory_space<vmem>>, %arg13: memref<8x1xf32, #tpu.memory_space<vmem>>, %arg14: memref<25x8x8xf32, #tpu.memory_space<vmem>>, %arg15: memref<8x1xf32, #tpu.memory_space<vmem>>, %arg16: memref<25x8x8xf32, #tpu.memory_space<vmem>>, %arg17: memref<8x1xf32, #tpu.memory_space<vmem>>, %arg18: memref<1x16x16xf32, #tpu.memory_space<vmem>>, %arg19: memref<8x256xf32, #tpu.memory_space<vmem>>, %arg20: memref<8x128xf32, #tpu.memory_space<vmem>>, %arg21: memref<8x400xf32, #tpu.memory_space<vmem>>, %arg22: memref<8x400xf32, #tpu.memory_space<vmem>>, %arg23: memref<8x400xf32, #tpu.memory_space<vmem>>) attributes {dimension_semantics = [#tpu.dimension_semantics<parallel>], iteration_bounds = array<i64: 2>, scalar_prefetch = 0 : i64, scratch_operands = 5 : i64, tpu.core_type = #tpu.core_type<tc>, window_params = [{transform_indices = @transform_0, window_bounds = array<i64: 1, 16, 16>}, {pipeline_mode = #tpu.pipeline_mode<synchronous>, transform_indices = @transform_1, window_bounds = array<i64: 25, 8, 8>}, {pipeline_mode = #tpu.pipeline_mode<synchronous>, transform_indices = @transform_2, window_bounds = array<i64: 8, 1>}, {pipeline_mode = #tpu.pipeline_mode<synchronous>, transform_indices = @transform_3, window_bounds = array<i64: 25, 8, 8>}, {pipeline_mode = #tpu.pipeline_mode<synchronous>, transform_indices = @transform_4, window_bounds = array<i64: 8, 1>}, {pipeline_mode = #tpu.pipeline_mode<synchronous>, transform_indices = @transform_5, window_bounds = array<i64: 25, 8, 8>}, {pipeline_mode = #tpu.pipeline_mode<synchronous>, transform_indices = @transform_6, window_bounds = array<i64: 8, 1>}, {pipeline_mode = #tpu.pipeline_mode<synchronous>, transform_indices = @transform_7, window_bounds = array<i64: 128, 32>}, {pipeline_mode = #tpu.pipeline_mode<synchronous>, transform_indices = @transform_8, window_bounds = array<i64: 1, 32>}, {pipeline_mode = #tpu.pipeline_mode<synchronous>, transform_indices = @transform_9, window_bounds = array<i64: 32, 128>}, {pipeline_mode = #tpu.pipeline_mode<synchronous>, transform_indices = @transform_10, window_bounds = array<i64: 1, 128>}, {pipeline_mode = #tpu.pipeline_mode<synchronous>, transform_indices = @transform_11, window_bounds = array<i64: 25, 8, 8>}, {pipeline_mode = #tpu.pipeline_mode<synchronous>, transform_indices = @transform_12, window_bounds = array<i64: 8, 1>}, {pipeline_mode = #tpu.pipeline_mode<synchronous>, transform_indices = @transform_13, window_bounds = array<i64: 25, 8, 8>}, {pipeline_mode = #tpu.pipeline_mode<synchronous>, transform_indices = @transform_14, window_bounds = array<i64: 8, 1>}, {pipeline_mode = #tpu.pipeline_mode<synchronous>, transform_indices = @transform_15, window_bounds = array<i64: 25, 8, 8>}, {pipeline_mode = #tpu.pipeline_mode<synchronous>, transform_indices = @transform_16, window_bounds = array<i64: 8, 1>}, {transform_indices = @transform_17, window_bounds = array<i64: 1, 16, 16>}]} {
    %cst = arith.constant 0.000000e+00 : f32
    %0 = vector.broadcast %cst : f32 to vector<8x256xf32>
    %c0 = arith.constant 0 : index
    %c0_0 = arith.constant 0 : index
    %1 = vector.load %arg19[%c0, %c0_0] : memref<8x256xf32, #tpu.memory_space<vmem>>, vector<8x256xf32>
    tpu.vector_store %arg19[%c0, %c0_0], %0 {strides = array<i32>} : memref<8x256xf32, #tpu.memory_space<vmem>>, vector<8x256xf32>,
    %c0_1 = arith.constant 0 : index
    %c0_2 = arith.constant 0 : index
    %c0_3 = arith.constant 0 : index
    %2 = vector.load %arg1[%c0_1, %c0_2, %c0_3] : memref<1x16x16xf32, #tpu.memory_space<vmem>>, vector<1x1x16xf32>
    %3 = vector.shape_cast %2 : vector<1x1x16xf32> to vector<1x16xf32>
    %c0_4 = arith.constant 0 : index
    %c0_5 = arith.constant 0 : index
    %4 = vector.load %arg19[%c0_4, %c0_5] : memref<8x256xf32, #tpu.memory_space<vmem>>, vector<1x16xf32>
    tpu.vector_store %arg19[%c0_4, %c0_5], %3 {strides = array<i32>} : memref<8x256xf32, #tpu.memory_space<vmem>>, vector<1x16xf32>,
    %c0_6 = arith.constant 0 : index
    %c1 = arith.constant 1 : index
    %c0_7 = arith.constant 0 : index
    %5 = vector.load %arg1[%c0_6, %c1, %c0_7] : memref<1x16x16xf32, #tpu.memory_space<vmem>>, vector<1x1x16xf32>
    %6 = vector.shape_cast %5 : vector<1x1x16xf32> to vector<1x16xf32>
    %c0_8 = arith.constant 0 : index
    %c16 = arith.constant 16 : index
    %7 = vector.load %arg19[%c0_8, %c16] : memref<8x256xf32, #tpu.memory_space<vmem>>, vector<1x16xf32>
    tpu.vector_store %arg19[%c0_8, %c16], %6 {strides = array<i32>} : memref<8x256xf32, #tpu.memory_space<vmem>>, vector<1x16xf32>,
    %c0_9 = arith.constant 0 : index
    %c2 = arith.constant 2 : index
    %c0_10 = arith.constant 0 : index
    %8 = vector.load %arg1[%c0_9, %c2, %c0_10] : memref<1x16x16xf32, #tpu.memory_space<vmem>>, vector<1x1x16xf32>
    %9 = vector.shape_cast %8 : vector<1x1x16xf32> to vector<1x16xf32>
    %c0_11 = arith.constant 0 : index
    %c32 = arith.constant 32 : index
    %10 = vector.load %arg19[%c0_11, %c32] : memref<8x256xf32, #tpu.memory_space<vmem>>, vector<1x16xf32>
    tpu.vector_store %arg19[%c0_11, %c32], %9 {strides = array<i32>} : memref<8x256xf32, #tpu.memory_space<vmem>>, vector<1x16xf32>,
    %c0_12 = arith.constant 0 : index
    %c3 = arith.constant 3 : index
    %c0_13 = arith.constant 0 : index
    %11 = vector.load %arg1[%c0_12, %c3, %c0_13] : memref<1x16x16xf32, #tpu.memory_space<vmem>>, vector<1x1x16xf32>
    %12 = vector.shape_cast %11 : vector<1x1x16xf32> to vector<1x16xf32>
    %c0_14 = arith.constant 0 : index
    %c48 = arith.constant 48 : index
    %13 = vector.load %arg19[%c0_14, %c48] : memref<8x256xf32, #tpu.memory_space<vmem>>, vector<1x16xf32>
    tpu.vector_store %arg19[%c0_14, %c48], %12 {strides = array<i32>} : memref<8x256xf32, #tpu.memory_space<vmem>>, vector<1x16xf32>,
    %c0_15 = arith.constant 0 : index
    %c4 = arith.constant 4 : index
    %c0_16 = arith.constant 0 : index
    %14 = vector.load %arg1[%c0_15, %c4, %c0_16] : memref<1x16x16xf32, #tpu.memory_space<vmem>>, vector<1x1x16xf32>
    %15 = vector.shape_cast %14 : vector<1x1x16xf32> to vector<1x16xf32>
    %c0_17 = arith.constant 0 : index
    %c64 = arith.constant 64 : index
    %16 = vector.load %arg19[%c0_17, %c64] : memref<8x256xf32, #tpu.memory_space<vmem>>, vector<1x16xf32>
    tpu.vector_store %arg19[%c0_17, %c64], %15 {strides = array<i32>} : memref<8x256xf32, #tpu.memory_space<vmem>>, vector<1x16xf32>,
    %c0_18 = arith.constant 0 : index
    %c5 = arith.constant 5 : index
    %c0_19 = arith.constant 0 : index
    %17 = vector.load %arg1[%c0_18, %c5, %c0_19] : memref<1x16x16xf32, #tpu.memory_space<vmem>>, vector<1x1x16xf32>
    %18 = vector.shape_cast %17 : vector<1x1x16xf32> to vector<1x16xf32>
    %c0_20 = arith.constant 0 : index
    %c80 = arith.constant 80 : index
    %19 = vector.load %arg19[%c0_20, %c80] : memref<8x256xf32, #tpu.memory_space<vmem>>, vector<1x16xf32>
    tpu.vector_store %arg19[%c0_20, %c80], %18 {strides = array<i32>} : memref<8x256xf32, #tpu.memory_space<vmem>>, vector<1x16xf32>,
    %c0_21 = arith.constant 0 : index
    %c6 = arith.constant 6 : index
    %c0_22 = arith.constant 0 : index
    %20 = vector.load %arg1[%c0_21, %c6, %c0_22] : memref<1x16x16xf32, #tpu.memory_space<vmem>>, vector<1x1x16xf32>
    %21 = vector.shape_cast %20 : vector<1x1x16xf32> to vector<1x16xf32>
    %c0_23 = arith.constant 0 : index
    %c96 = arith.constant 96 : index
    %22 = vector.load %arg19[%c0_23, %c96] : memref<8x256xf32, #tpu.memory_space<vmem>>, vector<1x16xf32>
    tpu.vector_store %arg19[%c0_23, %c96], %21 {strides = array<i32>} : memref<8x256xf32, #tpu.memory_space<vmem>>, vector<1x16xf32>,
    %c0_24 = arith.constant 0 : index
    %c7 = arith.constant 7 : index
    %c0_25 = arith.constant 0 : index
    %23 = vector.load %arg1[%c0_24, %c7, %c0_25] : memref<1x16x16xf32, #tpu.memory_space<vmem>>, vector<1x1x16xf32>
    %24 = vector.shape_cast %23 : vector<1x1x16xf32> to vector<1x16xf32>
    %c0_26 = arith.constant 0 : index
    %c112 = arith.constant 112 : index
    %25 = vector.load %arg19[%c0_26, %c112] : memref<8x256xf32, #tpu.memory_space<vmem>>, vector<1x16xf32>
    tpu.vector_store %arg19[%c0_26, %c112], %24 {strides = array<i32>} : memref<8x256xf32, #tpu.memory_space<vmem>>, vector<1x16xf32>,
    %c0_27 = arith.constant 0 : index
    %c8 = arith.constant 8 : index
    %c0_28 = arith.constant 0 : index
    %26 = vector.load %arg1[%c0_27, %c8, %c0_28] : memref<1x16x16xf32, #tpu.memory_space<vmem>>, vector<1x1x16xf32>
    %27 = vector.shape_cast %26 : vector<1x1x16xf32> to vector<1x16xf32>
    %c0_29 = arith.constant 0 : index
    %c128 = arith.constant 128 : index
    %28 = vector.load %arg19[%c0_29, %c128] : memref<8x256xf32, #tpu.memory_space<vmem>>, vector<1x16xf32>
    tpu.vector_store %arg19[%c0_29, %c128], %27 {strides = array<i32>} : memref<8x256xf32, #tpu.memory_space<vmem>>, vector<1x16xf32>,
    %c0_30 = arith.constant 0 : index
    %c9 = arith.constant 9 : index
    %c0_31 = arith.constant 0 : index
    %29 = vector.load %arg1[%c0_30, %c9, %c0_31] : memref<1x16x16xf32, #tpu.memory_space<vmem>>, vector<1x1x16xf32>
    %30 = vector.shape_cast %29 : vector<1x1x16xf32> to vector<1x16xf32>
    %c0_32 = arith.constant 0 : index
    %c144 = arith.constant 144 : index
    %31 = vector.load %arg19[%c0_32, %c144] : memref<8x256xf32, #tpu.memory_space<vmem>>, vector<1x16xf32>
    tpu.vector_store %arg19[%c0_32, %c144], %30 {strides = array<i32>} : memref<8x256xf32, #tpu.memory_space<vmem>>, vector<1x16xf32>,
    %c0_33 = arith.constant 0 : index
    %c10 = arith.constant 10 : index
    %c0_34 = arith.constant 0 : index
    %32 = vector.load %arg1[%c0_33, %c10, %c0_34] : memref<1x16x16xf32, #tpu.memory_space<vmem>>, vector<1x1x16xf32>
    %33 = vector.shape_cast %32 : vector<1x1x16xf32> to vector<1x16xf32>
    %c0_35 = arith.constant 0 : index
    %c160 = arith.constant 160 : index
    %34 = vector.load %arg19[%c0_35, %c160] : memref<8x256xf32, #tpu.memory_space<vmem>>, vector<1x16xf32>
    tpu.vector_store %arg19[%c0_35, %c160], %33 {strides = array<i32>} : memref<8x256xf32, #tpu.memory_space<vmem>>, vector<1x16xf32>,
    %c0_36 = arith.constant 0 : index
    %c11 = arith.constant 11 : index
    %c0_37 = arith.constant 0 : index
    %35 = vector.load %arg1[%c0_36, %c11, %c0_37] : memref<1x16x16xf32, #tpu.memory_space<vmem>>, vector<1x1x16xf32>
    %36 = vector.shape_cast %35 : vector<1x1x16xf32> to vector<1x16xf32>
    %c0_38 = arith.constant 0 : index
    %c176 = arith.constant 176 : index
    %37 = vector.load %arg19[%c0_38, %c176] : memref<8x256xf32, #tpu.memory_space<vmem>>, vector<1x16xf32>
    tpu.vector_store %arg19[%c0_38, %c176], %36 {strides = array<i32>} : memref<8x256xf32, #tpu.memory_space<vmem>>, vector<1x16xf32>,
    %c0_39 = arith.constant 0 : index
    %c12 = arith.constant 12 : index
    %c0_40 = arith.constant 0 : index
    %38 = vector.load %arg1[%c0_39, %c12, %c0_40] : memref<1x16x16xf32, #tpu.memory_space<vmem>>, vector<1x1x16xf32>
    %39 = vector.shape_cast %38 : vector<1x1x16xf32> to vector<1x16xf32>
    %c0_41 = arith.constant 0 : index
    %c192 = arith.constant 192 : index
    %40 = vector.load %arg19[%c0_41, %c192] : memref<8x256xf32, #tpu.memory_space<vmem>>, vector<1x16xf32>
    tpu.vector_store %arg19[%c0_41, %c192], %39 {strides = array<i32>} : memref<8x256xf32, #tpu.memory_space<vmem>>, vector<1x16xf32>,
    %c0_42 = arith.constant 0 : index
    %c13 = arith.constant 13 : index
    %c0_43 = arith.constant 0 : index
    %41 = vector.load %arg1[%c0_42, %c13, %c0_43] : memref<1x16x16xf32, #tpu.memory_space<vmem>>, vector<1x1x16xf32>
    %42 = vector.shape_cast %41 : vector<1x1x16xf32> to vector<1x16xf32>
    %c0_44 = arith.constant 0 : index
    %c208 = arith.constant 208 : index
    %43 = vector.load %arg19[%c0_44, %c208] : memref<8x256xf32, #tpu.memory_space<vmem>>, vector<1x16xf32>
    tpu.vector_store %arg19[%c0_44, %c208], %42 {strides = array<i32>} : memref<8x256xf32, #tpu.memory_space<vmem>>, vector<1x16xf32>,
    %c0_45 = arith.constant 0 : index
    %c14 = arith.constant 14 : index
    %c0_46 = arith.constant 0 : index
    %44 = vector.load %arg1[%c0_45, %c14, %c0_46] : memref<1x16x16xf32, #tpu.memory_space<vmem>>, vector<1x1x16xf32>
    %45 = vector.shape_cast %44 : vector<1x1x16xf32> to vector<1x16xf32>
    %c0_47 = arith.constant 0 : index
    %c224 = arith.constant 224 : index
    %46 = vector.load %arg19[%c0_47, %c224] : memref<8x256xf32, #tpu.memory_space<vmem>>, vector<1x16xf32>
    tpu.vector_store %arg19[%c0_47, %c224], %45 {strides = array<i32>} : memref<8x256xf32, #tpu.memory_space<vmem>>, vector<1x16xf32>,
    %c0_48 = arith.constant 0 : index
    %c15 = arith.constant 15 : index
    %c0_49 = arith.constant 0 : index
    %47 = vector.load %arg1[%c0_48, %c15, %c0_49] : memref<1x16x16xf32, #tpu.memory_space<vmem>>, vector<1x1x16xf32>
    %48 = vector.shape_cast %47 : vector<1x1x16xf32> to vector<1x16xf32>
    %c0_50 = arith.constant 0 : index
    %c240 = arith.constant 240 : index
    %49 = vector.load %arg19[%c0_50, %c240] : memref<8x256xf32, #tpu.memory_space<vmem>>, vector<1x16xf32>
    tpu.vector_store %arg19[%c0_50, %c240], %48 {strides = array<i32>} : memref<8x256xf32, #tpu.memory_space<vmem>>, vector<1x16xf32>,
    %c0_51 = arith.constant 0 : index
    %c0_52 = arith.constant 0 : index
    %50 = vector.load %arg19[%c0_51, %c0_52] : memref<8x256xf32, #tpu.memory_space<vmem>>, vector<8x256xf32>
    %cst_53 = arith.constant 0.000000e+00 : f32
    %51 = vector.broadcast %cst_53 : f32 to vector<8x188xf32>
    %c0_54 = arith.constant 0 : index
    %c0_55 = arith.constant 0 : index
    %c0_56 = arith.constant 0 : index
    %52 = vector.load %arg2[%c0_54, %c0_55, %c0_56] : memref<25x8x8xf32, #tpu.memory_space<vmem>>, vector<1x8x8xf32>
    %53 = vector.shape_cast %52 : vector<1x8x8xf32> to vector<8x8xf32>
    %54 = vector.extract_strided_slice %50 {offsets = [0, 0], sizes = [8, 188], strides = [1, 1]} : vector<8x256xf32> to vector<8x188xf32>
    %cst_57 = arith.constant dense<0.000000e+00> : vector<8x188xf32>
    %55 = tpu.matmul %53, %54, %cst_57 {dimension_numbers = #tpu.dot_dimension_numbers<[1], [0], [0], [1], [0, 0, 1, 1], [], []>} : vector<8x8xf32>, vector<8x188xf32>, vector<8x188xf32> -> vector<8x188xf32>
    %56 = arith.addf %51, %55 : vector<8x188xf32>
    %c1_58 = arith.constant 1 : index
    %c0_59 = arith.constant 0 : index
    %c0_60 = arith.constant 0 : index
    %57 = vector.load %arg2[%c1_58, %c0_59, %c0_60] : memref<25x8x8xf32, #tpu.memory_space<vmem>>, vector<1x8x8xf32>
    %58 = vector.shape_cast %57 : vector<1x8x8xf32> to vector<8x8xf32>
    %59 = vector.extract_strided_slice %50 {offsets = [0, 1], sizes = [8, 188], strides = [1, 1]} : vector<8x256xf32> to vector<8x188xf32>
    %cst_61 = arith.constant dense<0.000000e+00> : vector<8x188xf32>
    %60 = tpu.matmul %58, %59, %cst_61 {dimension_numbers = #tpu.dot_dimension_numbers<[1], [0], [0], [1], [0, 0, 1, 1], [], []>} : vector<8x8xf32>, vector<8x188xf32>, vector<8x188xf32> -> vector<8x188xf32>
    %61 = arith.addf %56, %60 : vector<8x188xf32>
    %c2_62 = arith.constant 2 : index
    %c0_63 = arith.constant 0 : index
    %c0_64 = arith.constant 0 : index
    %62 = vector.load %arg2[%c2_62, %c0_63, %c0_64] : memref<25x8x8xf32, #tpu.memory_space<vmem>>, vector<1x8x8xf32>
    %63 = vector.shape_cast %62 : vector<1x8x8xf32> to vector<8x8xf32>
    %64 = vector.extract_strided_slice %50 {offsets = [0, 2], sizes = [8, 188], strides = [1, 1]} : vector<8x256xf32> to vector<8x188xf32>
    %cst_65 = arith.constant dense<0.000000e+00> : vector<8x188xf32>
    %65 = tpu.matmul %63, %64, %cst_65 {dimension_numbers = #tpu.dot_dimension_numbers<[1], [0], [0], [1], [0, 0, 1, 1], [], []>} : vector<8x8xf32>, vector<8x188xf32>, vector<8x188xf32> -> vector<8x188xf32>
    %66 = arith.addf %61, %65 : vector<8x188xf32>
    %c3_66 = arith.constant 3 : index
    %c0_67 = arith.constant 0 : index
    %c0_68 = arith.constant 0 : index
    %67 = vector.load %arg2[%c3_66, %c0_67, %c0_68] : memref<25x8x8xf32, #tpu.memory_space<vmem>>, vector<1x8x8xf32>
    %68 = vector.shape_cast %67 : vector<1x8x8xf32> to vector<8x8xf32>
    %69 = vector.extract_strided_slice %50 {offsets = [0, 3], sizes = [8, 188], strides = [1, 1]} : vector<8x256xf32> to vector<8x188xf32>
    %cst_69 = arith.constant dense<0.000000e+00> : vector<8x188xf32>
    %70 = tpu.matmul %68, %69, %cst_69 {dimension_numbers = #tpu.dot_dimension_numbers<[1], [0], [0], [1], [0, 0, 1, 1], [], []>} : vector<8x8xf32>, vector<8x188xf32>, vector<8x188xf32> -> vector<8x188xf32>
    %71 = arith.addf %66, %70 : vector<8x188xf32>
    %c4_70 = arith.constant 4 : index
    %c0_71 = arith.constant 0 : index
    %c0_72 = arith.constant 0 : index
    %72 = vector.load %arg2[%c4_70, %c0_71, %c0_72] : memref<25x8x8xf32, #tpu.memory_space<vmem>>, vector<1x8x8xf32>
    %73 = vector.shape_cast %72 : vector<1x8x8xf32> to vector<8x8xf32>
    %74 = vector.extract_strided_slice %50 {offsets = [0, 4], sizes = [8, 188], strides = [1, 1]} : vector<8x256xf32> to vector<8x188xf32>
    %cst_73 = arith.constant dense<0.000000e+00> : vector<8x188xf32>
    %75 = tpu.matmul %73, %74, %cst_73 {dimension_numbers = #tpu.dot_dimension_numbers<[1], [0], [0], [1], [0, 0, 1, 1], [], []>} : vector<8x8xf32>, vector<8x188xf32>, vector<8x188xf32> -> vector<8x188xf32>
    %76 = arith.addf %71, %75 : vector<8x188xf32>
    %c5_74 = arith.constant 5 : index
    %c0_75 = arith.constant 0 : index
    %c0_76 = arith.constant 0 : index
    %77 = vector.load %arg2[%c5_74, %c0_75, %c0_76] : memref<25x8x8xf32, #tpu.memory_space<vmem>>, vector<1x8x8xf32>
    %78 = vector.shape_cast %77 : vector<1x8x8xf32> to vector<8x8xf32>
    %79 = vector.extract_strided_slice %50 {offsets = [0, 16], sizes = [8, 188], strides = [1, 1]} : vector<8x256xf32> to vector<8x188xf32>
    %cst_77 = arith.constant dense<0.000000e+00> : vector<8x188xf32>
    %80 = tpu.matmul %78, %79, %cst_77 {dimension_numbers = #tpu.dot_dimension_numbers<[1], [0], [0], [1], [0, 0, 1, 1], [], []>} : vector<8x8xf32>, vector<8x188xf32>, vector<8x188xf32> -> vector<8x188xf32>
    %81 = arith.addf %76, %80 : vector<8x188xf32>
    %c6_78 = arith.constant 6 : index
    %c0_79 = arith.constant 0 : index
    %c0_80 = arith.constant 0 : index
    %82 = vector.load %arg2[%c6_78, %c0_79, %c0_80] : memref<25x8x8xf32, #tpu.memory_space<vmem>>, vector<1x8x8xf32>
    %83 = vector.shape_cast %82 : vector<1x8x8xf32> to vector<8x8xf32>
    %84 = vector.extract_strided_slice %50 {offsets = [0, 17], sizes = [8, 188], strides = [1, 1]} : vector<8x256xf32> to vector<8x188xf32>
    %cst_81 = arith.constant dense<0.000000e+00> : vector<8x188xf32>
    %85 = tpu.matmul %83, %84, %cst_81 {dimension_numbers = #tpu.dot_dimension_numbers<[1], [0], [0], [1], [0, 0, 1, 1], [], []>} : vector<8x8xf32>, vector<8x188xf32>, vector<8x188xf32> -> vector<8x188xf32>
    %86 = arith.addf %81, %85 : vector<8x188xf32>
    %c7_82 = arith.constant 7 : index
    %c0_83 = arith.constant 0 : index
    %c0_84 = arith.constant 0 : index
    %87 = vector.load %arg2[%c7_82, %c0_83, %c0_84] : memref<25x8x8xf32, #tpu.memory_space<vmem>>, vector<1x8x8xf32>
    %88 = vector.shape_cast %87 : vector<1x8x8xf32> to vector<8x8xf32>
    %89 = vector.extract_strided_slice %50 {offsets = [0, 18], sizes = [8, 188], strides = [1, 1]} : vector<8x256xf32> to vector<8x188xf32>
    %cst_85 = arith.constant dense<0.000000e+00> : vector<8x188xf32>
    %90 = tpu.matmul %88, %89, %cst_85 {dimension_numbers = #tpu.dot_dimension_numbers<[1], [0], [0], [1], [0, 0, 1, 1], [], []>} : vector<8x8xf32>, vector<8x188xf32>, vector<8x188xf32> -> vector<8x188xf32>
    %91 = arith.addf %86, %90 : vector<8x188xf32>
    %c8_86 = arith.constant 8 : index
    %c0_87 = arith.constant 0 : index
    %c0_88 = arith.constant 0 : index
    %92 = vector.load %arg2[%c8_86, %c0_87, %c0_88] : memref<25x8x8xf32, #tpu.memory_space<vmem>>, vector<1x8x8xf32>
    %93 = vector.shape_cast %92 : vector<1x8x8xf32> to vector<8x8xf32>
    %94 = vector.extract_strided_slice %50 {offsets = [0, 19], sizes = [8, 188], strides = [1, 1]} : vector<8x256xf32> to vector<8x188xf32>
    %cst_89 = arith.constant dense<0.000000e+00> : vector<8x188xf32>
    %95 = tpu.matmul %93, %94, %cst_89 {dimension_numbers = #tpu.dot_dimension_numbers<[1], [0], [0], [1], [0, 0, 1, 1], [], []>} : vector<8x8xf32>, vector<8x188xf32>, vector<8x188xf32> -> vector<8x188xf32>
    %96 = arith.addf %91, %95 : vector<8x188xf32>
    %c9_90 = arith.constant 9 : index
    %c0_91 = arith.constant 0 : index
    %c0_92 = arith.constant 0 : index
    %97 = vector.load %arg2[%c9_90, %c0_91, %c0_92] : memref<25x8x8xf32, #tpu.memory_space<vmem>>, vector<1x8x8xf32>
    %98 = vector.shape_cast %97 : vector<1x8x8xf32> to vector<8x8xf32>
    %99 = vector.extract_strided_slice %50 {offsets = [0, 20], sizes = [8, 188], strides = [1, 1]} : vector<8x256xf32> to vector<8x188xf32>
    %cst_93 = arith.constant dense<0.000000e+00> : vector<8x188xf32>
    %100 = tpu.matmul %98, %99, %cst_93 {dimension_numbers = #tpu.dot_dimension_numbers<[1], [0], [0], [1], [0, 0, 1, 1], [], []>} : vector<8x8xf32>, vector<8x188xf32>, vector<8x188xf32> -> vector<8x188xf32>
    %101 = arith.addf %96, %100 : vector<8x188xf32>
    %c10_94 = arith.constant 10 : index
    %c0_95 = arith.constant 0 : index
    %c0_96 = arith.constant 0 : index
    %102 = vector.load %arg2[%c10_94, %c0_95, %c0_96] : memref<25x8x8xf32, #tpu.memory_space<vmem>>, vector<1x8x8xf32>
    %103 = vector.shape_cast %102 : vector<1x8x8xf32> to vector<8x8xf32>
    %104 = vector.extract_strided_slice %50 {offsets = [0, 32], sizes = [8, 188], strides = [1, 1]} : vector<8x256xf32> to vector<8x188xf32>
    %cst_97 = arith.constant dense<0.000000e+00> : vector<8x188xf32>
    %105 = tpu.matmul %103, %104, %cst_97 {dimension_numbers = #tpu.dot_dimension_numbers<[1], [0], [0], [1], [0, 0, 1, 1], [], []>} : vector<8x8xf32>, vector<8x188xf32>, vector<8x188xf32> -> vector<8x188xf32>
    %106 = arith.addf %101, %105 : vector<8x188xf32>
    %c11_98 = arith.constant 11 : index
    %c0_99 = arith.constant 0 : index
    %c0_100 = arith.constant 0 : index
    %107 = vector.load %arg2[%c11_98, %c0_99, %c0_100] : memref<25x8x8xf32, #tpu.memory_space<vmem>>, vector<1x8x8xf32>
    %108 = vector.shape_cast %107 : vector<1x8x8xf32> to vector<8x8xf32>
    %109 = vector.extract_strided_slice %50 {offsets = [0, 33], sizes = [8, 188], strides = [1, 1]} : vector<8x256xf32> to vector<8x188xf32>
    %cst_101 = arith.constant dense<0.000000e+00> : vector<8x188xf32>
    %110 = tpu.matmul %108, %109, %cst_101 {dimension_numbers = #tpu.dot_dimension_numbers<[1], [0], [0], [1], [0, 0, 1, 1], [], []>} : vector<8x8xf32>, vector<8x188xf32>, vector<8x188xf32> -> vector<8x188xf32>
    %111 = arith.addf %106, %110 : vector<8x188xf32>
    %c12_102 = arith.constant 12 : index
    %c0_103 = arith.constant 0 : index
    %c0_104 = arith.constant 0 : index
    %112 = vector.load %arg2[%c12_102, %c0_103, %c0_104] : memref<25x8x8xf32, #tpu.memory_space<vmem>>, vector<1x8x8xf32>
    %113 = vector.shape_cast %112 : vector<1x8x8xf32> to vector<8x8xf32>
    %114 = vector.extract_strided_slice %50 {offsets = [0, 34], sizes = [8, 188], strides = [1, 1]} : vector<8x256xf32> to vector<8x188xf32>
    %cst_105 = arith.constant dense<0.000000e+00> : vector<8x188xf32>
    %115 = tpu.matmul %113, %114, %cst_105 {dimension_numbers = #tpu.dot_dimension_numbers<[1], [0], [0], [1], [0, 0, 1, 1], [], []>} : vector<8x8xf32>, vector<8x188xf32>, vector<8x188xf32> -> vector<8x188xf32>
    %116 = arith.addf %111, %115 : vector<8x188xf32>
    %c13_106 = arith.constant 13 : index
    %c0_107 = arith.constant 0 : index
    %c0_108 = arith.constant 0 : index
    %117 = vector.load %arg2[%c13_106, %c0_107, %c0_108] : memref<25x8x8xf32, #tpu.memory_space<vmem>>, vector<1x8x8xf32>
    %118 = vector.shape_cast %117 : vector<1x8x8xf32> to vector<8x8xf32>
    %119 = vector.extract_strided_slice %50 {offsets = [0, 35], sizes = [8, 188], strides = [1, 1]} : vector<8x256xf32> to vector<8x188xf32>
    %cst_109 = arith.constant dense<0.000000e+00> : vector<8x188xf32>
    %120 = tpu.matmul %118, %119, %cst_109 {dimension_numbers = #tpu.dot_dimension_numbers<[1], [0], [0], [1], [0, 0, 1, 1], [], []>} : vector<8x8xf32>, vector<8x188xf32>, vector<8x188xf32> -> vector<8x188xf32>
    %121 = arith.addf %116, %120 : vector<8x188xf32>
    %c14_110 = arith.constant 14 : index
    %c0_111 = arith.constant 0 : index
    %c0_112 = arith.constant 0 : index
    %122 = vector.load %arg2[%c14_110, %c0_111, %c0_112] : memref<25x8x8xf32, #tpu.memory_space<vmem>>, vector<1x8x8xf32>
    %123 = vector.shape_cast %122 : vector<1x8x8xf32> to vector<8x8xf32>
    %124 = vector.extract_strided_slice %50 {offsets = [0, 36], sizes = [8, 188], strides = [1, 1]} : vector<8x256xf32> to vector<8x188xf32>
    %cst_113 = arith.constant dense<0.000000e+00> : vector<8x188xf32>
    %125 = tpu.matmul %123, %124, %cst_113 {dimension_numbers = #tpu.dot_dimension_numbers<[1], [0], [0], [1], [0, 0, 1, 1], [], []>} : vector<8x8xf32>, vector<8x188xf32>, vector<8x188xf32> -> vector<8x188xf32>
    %126 = arith.addf %121, %125 : vector<8x188xf32>
    %c15_114 = arith.constant 15 : index
    %c0_115 = arith.constant 0 : index
    %c0_116 = arith.constant 0 : index
    %127 = vector.load %arg2[%c15_114, %c0_115, %c0_116] : memref<25x8x8xf32, #tpu.memory_space<vmem>>, vector<1x8x8xf32>
    %128 = vector.shape_cast %127 : vector<1x8x8xf32> to vector<8x8xf32>
    %129 = vector.extract_strided_slice %50 {offsets = [0, 48], sizes = [8, 188], strides = [1, 1]} : vector<8x256xf32> to vector<8x188xf32>
    %cst_117 = arith.constant dense<0.000000e+00> : vector<8x188xf32>
    %130 = tpu.matmul %128, %129, %cst_117 {dimension_numbers = #tpu.dot_dimension_numbers<[1], [0], [0], [1], [0, 0, 1, 1], [], []>} : vector<8x8xf32>, vector<8x188xf32>, vector<8x188xf32> -> vector<8x188xf32>
    %131 = arith.addf %126, %130 : vector<8x188xf32>
    %c16_118 = arith.constant 16 : index
    %c0_119 = arith.constant 0 : index
    %c0_120 = arith.constant 0 : index
    %132 = vector.load %arg2[%c16_118, %c0_119, %c0_120] : memref<25x8x8xf32, #tpu.memory_space<vmem>>, vector<1x8x8xf32>
    %133 = vector.shape_cast %132 : vector<1x8x8xf32> to vector<8x8xf32>
    %134 = vector.extract_strided_slice %50 {offsets = [0, 49], sizes = [8, 188], strides = [1, 1]} : vector<8x256xf32> to vector<8x188xf32>
    %cst_121 = arith.constant dense<0.000000e+00> : vector<8x188xf32>
    %135 = tpu.matmul %133, %134, %cst_121 {dimension_numbers = #tpu.dot_dimension_numbers<[1], [0], [0], [1], [0, 0, 1, 1], [], []>} : vector<8x8xf32>, vector<8x188xf32>, vector<8x188xf32> -> vector<8x188xf32>
    %136 = arith.addf %131, %135 : vector<8x188xf32>
    %c17 = arith.constant 17 : index
    %c0_122 = arith.constant 0 : index
    %c0_123 = arith.constant 0 : index
    %137 = vector.load %arg2[%c17, %c0_122, %c0_123] : memref<25x8x8xf32, #tpu.memory_space<vmem>>, vector<1x8x8xf32>
    %138 = vector.shape_cast %137 : vector<1x8x8xf32> to vector<8x8xf32>
    %139 = vector.extract_strided_slice %50 {offsets = [0, 50], sizes = [8, 188], strides = [1, 1]} : vector<8x256xf32> to vector<8x188xf32>
    %cst_124 = arith.constant dense<0.000000e+00> : vector<8x188xf32>
    %140 = tpu.matmul %138, %139, %cst_124 {dimension_numbers = #tpu.dot_dimension_numbers<[1], [0], [0], [1], [0, 0, 1, 1], [], []>} : vector<8x8xf32>, vector<8x188xf32>, vector<8x188xf32> -> vector<8x188xf32>
    %141 = arith.addf %136, %140 : vector<8x188xf32>
    %c18 = arith.constant 18 : index
    %c0_125 = arith.constant 0 : index
    %c0_126 = arith.constant 0 : index
    %142 = vector.load %arg2[%c18, %c0_125, %c0_126] : memref<25x8x8xf32, #tpu.memory_space<vmem>>, vector<1x8x8xf32>
    %143 = vector.shape_cast %142 : vector<1x8x8xf32> to vector<8x8xf32>
    %144 = vector.extract_strided_slice %50 {offsets = [0, 51], sizes = [8, 188], strides = [1, 1]} : vector<8x256xf32> to vector<8x188xf32>
    %cst_127 = arith.constant dense<0.000000e+00> : vector<8x188xf32>
    %145 = tpu.matmul %143, %144, %cst_127 {dimension_numbers = #tpu.dot_dimension_numbers<[1], [0], [0], [1], [0, 0, 1, 1], [], []>} : vector<8x8xf32>, vector<8x188xf32>, vector<8x188xf32> -> vector<8x188xf32>
    %146 = arith.addf %141, %145 : vector<8x188xf32>
    %c19 = arith.constant 19 : index
    %c0_128 = arith.constant 0 : index
    %c0_129 = arith.constant 0 : index
    %147 = vector.load %arg2[%c19, %c0_128, %c0_129] : memref<25x8x8xf32, #tpu.memory_space<vmem>>, vector<1x8x8xf32>
    %148 = vector.shape_cast %147 : vector<1x8x8xf32> to vector<8x8xf32>
    %149 = vector.extract_strided_slice %50 {offsets = [0, 52], sizes = [8, 188], strides = [1, 1]} : vector<8x256xf32> to vector<8x188xf32>
    %cst_130 = arith.constant dense<0.000000e+00> : vector<8x188xf32>
    %150 = tpu.matmul %148, %149, %cst_130 {dimension_numbers = #tpu.dot_dimension_numbers<[1], [0], [0], [1], [0, 0, 1, 1], [], []>} : vector<8x8xf32>, vector<8x188xf32>, vector<8x188xf32> -> vector<8x188xf32>
    %151 = arith.addf %146, %150 : vector<8x188xf32>
    %c20 = arith.constant 20 : index
    %c0_131 = arith.constant 0 : index
    %c0_132 = arith.constant 0 : index
    %152 = vector.load %arg2[%c20, %c0_131, %c0_132] : memref<25x8x8xf32, #tpu.memory_space<vmem>>, vector<1x8x8xf32>
    %153 = vector.shape_cast %152 : vector<1x8x8xf32> to vector<8x8xf32>
    %154 = vector.extract_strided_slice %50 {offsets = [0, 64], sizes = [8, 188], strides = [1, 1]} : vector<8x256xf32> to vector<8x188xf32>
    %cst_133 = arith.constant dense<0.000000e+00> : vector<8x188xf32>
    %155 = tpu.matmul %153, %154, %cst_133 {dimension_numbers = #tpu.dot_dimension_numbers<[1], [0], [0], [1], [0, 0, 1, 1], [], []>} : vector<8x8xf32>, vector<8x188xf32>, vector<8x188xf32> -> vector<8x188xf32>
    %156 = arith.addf %151, %155 : vector<8x188xf32>
    %c21 = arith.constant 21 : index
    %c0_134 = arith.constant 0 : index
    %c0_135 = arith.constant 0 : index
    %157 = vector.load %arg2[%c21, %c0_134, %c0_135] : memref<25x8x8xf32, #tpu.memory_space<vmem>>, vector<1x8x8xf32>
    %158 = vector.shape_cast %157 : vector<1x8x8xf32> to vector<8x8xf32>
    %159 = vector.extract_strided_slice %50 {offsets = [0, 65], sizes = [8, 188], strides = [1, 1]} : vector<8x256xf32> to vector<8x188xf32>
    %cst_136 = arith.constant dense<0.000000e+00> : vector<8x188xf32>
    %160 = tpu.matmul %158, %159, %cst_136 {dimension_numbers = #tpu.dot_dimension_numbers<[1], [0], [0], [1], [0, 0, 1, 1], [], []>} : vector<8x8xf32>, vector<8x188xf32>, vector<8x188xf32> -> vector<8x188xf32>
    %161 = arith.addf %156, %160 : vector<8x188xf32>
    %c22 = arith.constant 22 : index
    %c0_137 = arith.constant 0 : index
    %c0_138 = arith.constant 0 : index
    %162 = vector.load %arg2[%c22, %c0_137, %c0_138] : memref<25x8x8xf32, #tpu.memory_space<vmem>>, vector<1x8x8xf32>
    %163 = vector.shape_cast %162 : vector<1x8x8xf32> to vector<8x8xf32>
    %164 = vector.extract_strided_slice %50 {offsets = [0, 66], sizes = [8, 188], strides = [1, 1]} : vector<8x256xf32> to vector<8x188xf32>
    %cst_139 = arith.constant dense<0.000000e+00> : vector<8x188xf32>
    %165 = tpu.matmul %163, %164, %cst_139 {dimension_numbers = #tpu.dot_dimension_numbers<[1], [0], [0], [1], [0, 0, 1, 1], [], []>} : vector<8x8xf32>, vector<8x188xf32>, vector<8x188xf32> -> vector<8x188xf32>
    %166 = arith.addf %161, %165 : vector<8x188xf32>
    %c23 = arith.constant 23 : index
    %c0_140 = arith.constant 0 : index
    %c0_141 = arith.constant 0 : index
    %167 = vector.load %arg2[%c23, %c0_140, %c0_141] : memref<25x8x8xf32, #tpu.memory_space<vmem>>, vector<1x8x8xf32>
    %168 = vector.shape_cast %167 : vector<1x8x8xf32> to vector<8x8xf32>
    %169 = vector.extract_strided_slice %50 {offsets = [0, 67], sizes = [8, 188], strides = [1, 1]} : vector<8x256xf32> to vector<8x188xf32>
    %cst_142 = arith.constant dense<0.000000e+00> : vector<8x188xf32>
    %170 = tpu.matmul %168, %169, %cst_142 {dimension_numbers = #tpu.dot_dimension_numbers<[1], [0], [0], [1], [0, 0, 1, 1], [], []>} : vector<8x8xf32>, vector<8x188xf32>, vector<8x188xf32> -> vector<8x188xf32>
    %171 = arith.addf %166, %170 : vector<8x188xf32>
    %c24 = arith.constant 24 : index
    %c0_143 = arith.constant 0 : index
    %c0_144 = arith.constant 0 : index
    %172 = vector.load %arg2[%c24, %c0_143, %c0_144] : memref<25x8x8xf32, #tpu.memory_space<vmem>>, vector<1x8x8xf32>
    %173 = vector.shape_cast %172 : vector<1x8x8xf32> to vector<8x8xf32>
    %174 = vector.extract_strided_slice %50 {offsets = [0, 68], sizes = [8, 188], strides = [1, 1]} : vector<8x256xf32> to vector<8x188xf32>
    %cst_145 = arith.constant dense<0.000000e+00> : vector<8x188xf32>
    %175 = tpu.matmul %173, %174, %cst_145 {dimension_numbers = #tpu.dot_dimension_numbers<[1], [0], [0], [1], [0, 0, 1, 1], [], []>} : vector<8x8xf32>, vector<8x188xf32>, vector<8x188xf32> -> vector<8x188xf32>
    %176 = arith.addf %171, %175 : vector<8x188xf32>
    %c0_146 = arith.constant 0 : index
    %c0_147 = arith.constant 0 : index
    %177 = vector.load %arg3[%c0_146, %c0_147] : memref<8x1xf32, #tpu.memory_space<vmem>>, vector<8x1xf32>
    %178 = vector.broadcast %177 : vector<8x1xf32> to vector<8x188xf32>
    %179 = arith.addf %176, %178 : vector<8x188xf32>
    %cst_148 = arith.constant 0.000000e+00 : f32
    %180 = vector.broadcast %cst_148 : f32 to vector<8x188xf32>
    %181 = arith.maximumf %179, %180 : vector<8x188xf32>
    %cst_149 = arith.constant 0.000000e+00 : f32
    %182 = vector.broadcast %cst_149 : f32 to vector<8x120xf32>
    %c0_150 = arith.constant 0 : index
    %c0_151 = arith.constant 0 : index
    %c0_152 = arith.constant 0 : index
    %183 = vector.load %arg4[%c0_150, %c0_151, %c0_152] : memref<25x8x8xf32, #tpu.memory_space<vmem>>, vector<1x8x8xf32>
    %184 = vector.shape_cast %183 : vector<1x8x8xf32> to vector<8x8xf32>
    %185 = vector.extract_strided_slice %181 {offsets = [0, 0], sizes = [8, 120], strides = [1, 1]} : vector<8x188xf32> to vector<8x120xf32>
    %cst_153 = arith.constant dense<0.000000e+00> : vector<8x120xf32>
    %186 = tpu.matmul %184, %185, %cst_153 {dimension_numbers = #tpu.dot_dimension_numbers<[1], [0], [0], [1], [0, 0, 1, 1], [], []>} : vector<8x8xf32>, vector<8x120xf32>, vector<8x120xf32> -> vector<8x120xf32>
    %187 = arith.addf %182, %186 : vector<8x120xf32>
    %c1_154 = arith.constant 1 : index
    %c0_155 = arith.constant 0 : index
    %c0_156 = arith.constant 0 : index
    %188 = vector.load %arg4[%c1_154, %c0_155, %c0_156] : memref<25x8x8xf32, #tpu.memory_space<vmem>>, vector<1x8x8xf32>
    %189 = vector.shape_cast %188 : vector<1x8x8xf32> to vector<8x8xf32>
    %190 = vector.extract_strided_slice %181 {offsets = [0, 1], sizes = [8, 120], strides = [1, 1]} : vector<8x188xf32> to vector<8x120xf32>
    %cst_157 = arith.constant dense<0.000000e+00> : vector<8x120xf32>
    %191 = tpu.matmul %189, %190, %cst_157 {dimension_numbers = #tpu.dot_dimension_numbers<[1], [0], [0], [1], [0, 0, 1, 1], [], []>} : vector<8x8xf32>, vector<8x120xf32>, vector<8x120xf32> -> vector<8x120xf32>
    %192 = arith.addf %187, %191 : vector<8x120xf32>
    %c2_158 = arith.constant 2 : index
    %c0_159 = arith.constant 0 : index
    %c0_160 = arith.constant 0 : index
    %193 = vector.load %arg4[%c2_158, %c0_159, %c0_160] : memref<25x8x8xf32, #tpu.memory_space<vmem>>, vector<1x8x8xf32>
    %194 = vector.shape_cast %193 : vector<1x8x8xf32> to vector<8x8xf32>
    %195 = vector.extract_strided_slice %181 {offsets = [0, 2], sizes = [8, 120], strides = [1, 1]} : vector<8x188xf32> to vector<8x120xf32>
    %cst_161 = arith.constant dense<0.000000e+00> : vector<8x120xf32>
    %196 = tpu.matmul %194, %195, %cst_161 {dimension_numbers = #tpu.dot_dimension_numbers<[1], [0], [0], [1], [0, 0, 1, 1], [], []>} : vector<8x8xf32>, vector<8x120xf32>, vector<8x120xf32> -> vector<8x120xf32>
    %197 = arith.addf %192, %196 : vector<8x120xf32>
    %c3_162 = arith.constant 3 : index
    %c0_163 = arith.constant 0 : index
    %c0_164 = arith.constant 0 : index
    %198 = vector.load %arg4[%c3_162, %c0_163, %c0_164] : memref<25x8x8xf32, #tpu.memory_space<vmem>>, vector<1x8x8xf32>
    %199 = vector.shape_cast %198 : vector<1x8x8xf32> to vector<8x8xf32>
    %200 = vector.extract_strided_slice %181 {offsets = [0, 3], sizes = [8, 120], strides = [1, 1]} : vector<8x188xf32> to vector<8x120xf32>
    %cst_165 = arith.constant dense<0.000000e+00> : vector<8x120xf32>
    %201 = tpu.matmul %199, %200, %cst_165 {dimension_numbers = #tpu.dot_dimension_numbers<[1], [0], [0], [1], [0, 0, 1, 1], [], []>} : vector<8x8xf32>, vector<8x120xf32>, vector<8x120xf32> -> vector<8x120xf32>
    %202 = arith.addf %197, %201 : vector<8x120xf32>
    %c4_166 = arith.constant 4 : index
    %c0_167 = arith.constant 0 : index
    %c0_168 = arith.constant 0 : index
    %203 = vector.load %arg4[%c4_166, %c0_167, %c0_168] : memref<25x8x8xf32, #tpu.memory_space<vmem>>, vector<1x8x8xf32>
    %204 = vector.shape_cast %203 : vector<1x8x8xf32> to vector<8x8xf32>
    %205 = vector.extract_strided_slice %181 {offsets = [0, 4], sizes = [8, 120], strides = [1, 1]} : vector<8x188xf32> to vector<8x120xf32>
    %cst_169 = arith.constant dense<0.000000e+00> : vector<8x120xf32>
    %206 = tpu.matmul %204, %205, %cst_169 {dimension_numbers = #tpu.dot_dimension_numbers<[1], [0], [0], [1], [0, 0, 1, 1], [], []>} : vector<8x8xf32>, vector<8x120xf32>, vector<8x120xf32> -> vector<8x120xf32>
    %207 = arith.addf %202, %206 : vector<8x120xf32>
    %c5_170 = arith.constant 5 : index
    %c0_171 = arith.constant 0 : index
    %c0_172 = arith.constant 0 : index
    %208 = vector.load %arg4[%c5_170, %c0_171, %c0_172] : memref<25x8x8xf32, #tpu.memory_space<vmem>>, vector<1x8x8xf32>
    %209 = vector.shape_cast %208 : vector<1x8x8xf32> to vector<8x8xf32>
    %210 = vector.extract_strided_slice %181 {offsets = [0, 16], sizes = [8, 120], strides = [1, 1]} : vector<8x188xf32> to vector<8x120xf32>
    %cst_173 = arith.constant dense<0.000000e+00> : vector<8x120xf32>
    %211 = tpu.matmul %209, %210, %cst_173 {dimension_numbers = #tpu.dot_dimension_numbers<[1], [0], [0], [1], [0, 0, 1, 1], [], []>} : vector<8x8xf32>, vector<8x120xf32>, vector<8x120xf32> -> vector<8x120xf32>
    %212 = arith.addf %207, %211 : vector<8x120xf32>
    %c6_174 = arith.constant 6 : index
    %c0_175 = arith.constant 0 : index
    %c0_176 = arith.constant 0 : index
    %213 = vector.load %arg4[%c6_174, %c0_175, %c0_176] : memref<25x8x8xf32, #tpu.memory_space<vmem>>, vector<1x8x8xf32>
    %214 = vector.shape_cast %213 : vector<1x8x8xf32> to vector<8x8xf32>
    %215 = vector.extract_strided_slice %181 {offsets = [0, 17], sizes = [8, 120], strides = [1, 1]} : vector<8x188xf32> to vector<8x120xf32>
    %cst_177 = arith.constant dense<0.000000e+00> : vector<8x120xf32>
    %216 = tpu.matmul %214, %215, %cst_177 {dimension_numbers = #tpu.dot_dimension_numbers<[1], [0], [0], [1], [0, 0, 1, 1], [], []>} : vector<8x8xf32>, vector<8x120xf32>, vector<8x120xf32> -> vector<8x120xf32>
    %217 = arith.addf %212, %216 : vector<8x120xf32>
    %c7_178 = arith.constant 7 : index
    %c0_179 = arith.constant 0 : index
    %c0_180 = arith.constant 0 : index
    %218 = vector.load %arg4[%c7_178, %c0_179, %c0_180] : memref<25x8x8xf32, #tpu.memory_space<vmem>>, vector<1x8x8xf32>
    %219 = vector.shape_cast %218 : vector<1x8x8xf32> to vector<8x8xf32>
    %220 = vector.extract_strided_slice %181 {offsets = [0, 18], sizes = [8, 120], strides = [1, 1]} : vector<8x188xf32> to vector<8x120xf32>
    %cst_181 = arith.constant dense<0.000000e+00> : vector<8x120xf32>
    %221 = tpu.matmul %219, %220, %cst_181 {dimension_numbers = #tpu.dot_dimension_numbers<[1], [0], [0], [1], [0, 0, 1, 1], [], []>} : vector<8x8xf32>, vector<8x120xf32>, vector<8x120xf32> -> vector<8x120xf32>
    %222 = arith.addf %217, %221 : vector<8x120xf32>
    %c8_182 = arith.constant 8 : index
    %c0_183 = arith.constant 0 : index
    %c0_184 = arith.constant 0 : index
    %223 = vector.load %arg4[%c8_182, %c0_183, %c0_184] : memref<25x8x8xf32, #tpu.memory_space<vmem>>, vector<1x8x8xf32>
    %224 = vector.shape_cast %223 : vector<1x8x8xf32> to vector<8x8xf32>
    %225 = vector.extract_strided_slice %181 {offsets = [0, 19], sizes = [8, 120], strides = [1, 1]} : vector<8x188xf32> to vector<8x120xf32>
    %cst_185 = arith.constant dense<0.000000e+00> : vector<8x120xf32>
    %226 = tpu.matmul %224, %225, %cst_185 {dimension_numbers = #tpu.dot_dimension_numbers<[1], [0], [0], [1], [0, 0, 1, 1], [], []>} : vector<8x8xf32>, vector<8x120xf32>, vector<8x120xf32> -> vector<8x120xf32>
    %227 = arith.addf %222, %226 : vector<8x120xf32>
    %c9_186 = arith.constant 9 : index
    %c0_187 = arith.constant 0 : index
    %c0_188 = arith.constant 0 : index
    %228 = vector.load %arg4[%c9_186, %c0_187, %c0_188] : memref<25x8x8xf32, #tpu.memory_space<vmem>>, vector<1x8x8xf32>
    %229 = vector.shape_cast %228 : vector<1x8x8xf32> to vector<8x8xf32>
    %230 = vector.extract_strided_slice %181 {offsets = [0, 20], sizes = [8, 120], strides = [1, 1]} : vector<8x188xf32> to vector<8x120xf32>
    %cst_189 = arith.constant dense<0.000000e+00> : vector<8x120xf32>
    %231 = tpu.matmul %229, %230, %cst_189 {dimension_numbers = #tpu.dot_dimension_numbers<[1], [0], [0], [1], [0, 0, 1, 1], [], []>} : vector<8x8xf32>, vector<8x120xf32>, vector<8x120xf32> -> vector<8x120xf32>
    %232 = arith.addf %227, %231 : vector<8x120xf32>
    %c10_190 = arith.constant 10 : index
    %c0_191 = arith.constant 0 : index
    %c0_192 = arith.constant 0 : index
    %233 = vector.load %arg4[%c10_190, %c0_191, %c0_192] : memref<25x8x8xf32, #tpu.memory_space<vmem>>, vector<1x8x8xf32>
    %234 = vector.shape_cast %233 : vector<1x8x8xf32> to vector<8x8xf32>
    %235 = vector.extract_strided_slice %181 {offsets = [0, 32], sizes = [8, 120], strides = [1, 1]} : vector<8x188xf32> to vector<8x120xf32>
    %cst_193 = arith.constant dense<0.000000e+00> : vector<8x120xf32>
    %236 = tpu.matmul %234, %235, %cst_193 {dimension_numbers = #tpu.dot_dimension_numbers<[1], [0], [0], [1], [0, 0, 1, 1], [], []>} : vector<8x8xf32>, vector<8x120xf32>, vector<8x120xf32> -> vector<8x120xf32>
    %237 = arith.addf %232, %236 : vector<8x120xf32>
    %c11_194 = arith.constant 11 : index
    %c0_195 = arith.constant 0 : index
    %c0_196 = arith.constant 0 : index
    %238 = vector.load %arg4[%c11_194, %c0_195, %c0_196] : memref<25x8x8xf32, #tpu.memory_space<vmem>>, vector<1x8x8xf32>
    %239 = vector.shape_cast %238 : vector<1x8x8xf32> to vector<8x8xf32>
    %240 = vector.extract_strided_slice %181 {offsets = [0, 33], sizes = [8, 120], strides = [1, 1]} : vector<8x188xf32> to vector<8x120xf32>
    %cst_197 = arith.constant dense<0.000000e+00> : vector<8x120xf32>
    %241 = tpu.matmul %239, %240, %cst_197 {dimension_numbers = #tpu.dot_dimension_numbers<[1], [0], [0], [1], [0, 0, 1, 1], [], []>} : vector<8x8xf32>, vector<8x120xf32>, vector<8x120xf32> -> vector<8x120xf32>
    %242 = arith.addf %237, %241 : vector<8x120xf32>
    %c12_198 = arith.constant 12 : index
    %c0_199 = arith.constant 0 : index
    %c0_200 = arith.constant 0 : index
    %243 = vector.load %arg4[%c12_198, %c0_199, %c0_200] : memref<25x8x8xf32, #tpu.memory_space<vmem>>, vector<1x8x8xf32>
    %244 = vector.shape_cast %243 : vector<1x8x8xf32> to vector<8x8xf32>
    %245 = vector.extract_strided_slice %181 {offsets = [0, 34], sizes = [8, 120], strides = [1, 1]} : vector<8x188xf32> to vector<8x120xf32>
    %cst_201 = arith.constant dense<0.000000e+00> : vector<8x120xf32>
    %246 = tpu.matmul %244, %245, %cst_201 {dimension_numbers = #tpu.dot_dimension_numbers<[1], [0], [0], [1], [0, 0, 1, 1], [], []>} : vector<8x8xf32>, vector<8x120xf32>, vector<8x120xf32> -> vector<8x120xf32>
    %247 = arith.addf %242, %246 : vector<8x120xf32>
    %c13_202 = arith.constant 13 : index
    %c0_203 = arith.constant 0 : index
    %c0_204 = arith.constant 0 : index
    %248 = vector.load %arg4[%c13_202, %c0_203, %c0_204] : memref<25x8x8xf32, #tpu.memory_space<vmem>>, vector<1x8x8xf32>
    %249 = vector.shape_cast %248 : vector<1x8x8xf32> to vector<8x8xf32>
    %250 = vector.extract_strided_slice %181 {offsets = [0, 35], sizes = [8, 120], strides = [1, 1]} : vector<8x188xf32> to vector<8x120xf32>
    %cst_205 = arith.constant dense<0.000000e+00> : vector<8x120xf32>
    %251 = tpu.matmul %249, %250, %cst_205 {dimension_numbers = #tpu.dot_dimension_numbers<[1], [0], [0], [1], [0, 0, 1, 1], [], []>} : vector<8x8xf32>, vector<8x120xf32>, vector<8x120xf32> -> vector<8x120xf32>
    %252 = arith.addf %247, %251 : vector<8x120xf32>
    %c14_206 = arith.constant 14 : index
    %c0_207 = arith.constant 0 : index
    %c0_208 = arith.constant 0 : index
    %253 = vector.load %arg4[%c14_206, %c0_207, %c0_208] : memref<25x8x8xf32, #tpu.memory_space<vmem>>, vector<1x8x8xf32>
    %254 = vector.shape_cast %253 : vector<1x8x8xf32> to vector<8x8xf32>
    %255 = vector.extract_strided_slice %181 {offsets = [0, 36], sizes = [8, 120], strides = [1, 1]} : vector<8x188xf32> to vector<8x120xf32>
    %cst_209 = arith.constant dense<0.000000e+00> : vector<8x120xf32>
    %256 = tpu.matmul %254, %255, %cst_209 {dimension_numbers = #tpu.dot_dimension_numbers<[1], [0], [0], [1], [0, 0, 1, 1], [], []>} : vector<8x8xf32>, vector<8x120xf32>, vector<8x120xf32> -> vector<8x120xf32>
    %257 = arith.addf %252, %256 : vector<8x120xf32>
    %c15_210 = arith.constant 15 : index
    %c0_211 = arith.constant 0 : index
    %c0_212 = arith.constant 0 : index
    %258 = vector.load %arg4[%c15_210, %c0_211, %c0_212] : memref<25x8x8xf32, #tpu.memory_space<vmem>>, vector<1x8x8xf32>
    %259 = vector.shape_cast %258 : vector<1x8x8xf32> to vector<8x8xf32>
    %260 = vector.extract_strided_slice %181 {offsets = [0, 48], sizes = [8, 120], strides = [1, 1]} : vector<8x188xf32> to vector<8x120xf32>
    %cst_213 = arith.constant dense<0.000000e+00> : vector<8x120xf32>
    %261 = tpu.matmul %259, %260, %cst_213 {dimension_numbers = #tpu.dot_dimension_numbers<[1], [0], [0], [1], [0, 0, 1, 1], [], []>} : vector<8x8xf32>, vector<8x120xf32>, vector<8x120xf32> -> vector<8x120xf32>
    %262 = arith.addf %257, %261 : vector<8x120xf32>
    %c16_214 = arith.constant 16 : index
    %c0_215 = arith.constant 0 : index
    %c0_216 = arith.constant 0 : index
    %263 = vector.load %arg4[%c16_214, %c0_215, %c0_216] : memref<25x8x8xf32, #tpu.memory_space<vmem>>, vector<1x8x8xf32>
    %264 = vector.shape_cast %263 : vector<1x8x8xf32> to vector<8x8xf32>
    %265 = vector.extract_strided_slice %181 {offsets = [0, 49], sizes = [8, 120], strides = [1, 1]} : vector<8x188xf32> to vector<8x120xf32>
    %cst_217 = arith.constant dense<0.000000e+00> : vector<8x120xf32>
    %266 = tpu.matmul %264, %265, %cst_217 {dimension_numbers = #tpu.dot_dimension_numbers<[1], [0], [0], [1], [0, 0, 1, 1], [], []>} : vector<8x8xf32>, vector<8x120xf32>, vector<8x120xf32> -> vector<8x120xf32>
    %267 = arith.addf %262, %266 : vector<8x120xf32>
    %c17_218 = arith.constant 17 : index
    %c0_219 = arith.constant 0 : index
    %c0_220 = arith.constant 0 : index
    %268 = vector.load %arg4[%c17_218, %c0_219, %c0_220] : memref<25x8x8xf32, #tpu.memory_space<vmem>>, vector<1x8x8xf32>
    %269 = vector.shape_cast %268 : vector<1x8x8xf32> to vector<8x8xf32>
    %270 = vector.extract_strided_slice %181 {offsets = [0, 50], sizes = [8, 120], strides = [1, 1]} : vector<8x188xf32> to vector<8x120xf32>
    %cst_221 = arith.constant dense<0.000000e+00> : vector<8x120xf32>
    %271 = tpu.matmul %269, %270, %cst_221 {dimension_numbers = #tpu.dot_dimension_numbers<[1], [0], [0], [1], [0, 0, 1, 1], [], []>} : vector<8x8xf32>, vector<8x120xf32>, vector<8x120xf32> -> vector<8x120xf32>
    %272 = arith.addf %267, %271 : vector<8x120xf32>
    %c18_222 = arith.constant 18 : index
    %c0_223 = arith.constant 0 : index
    %c0_224 = arith.constant 0 : index
    %273 = vector.load %arg4[%c18_222, %c0_223, %c0_224] : memref<25x8x8xf32, #tpu.memory_space<vmem>>, vector<1x8x8xf32>
    %274 = vector.shape_cast %273 : vector<1x8x8xf32> to vector<8x8xf32>
    %275 = vector.extract_strided_slice %181 {offsets = [0, 51], sizes = [8, 120], strides = [1, 1]} : vector<8x188xf32> to vector<8x120xf32>
    %cst_225 = arith.constant dense<0.000000e+00> : vector<8x120xf32>
    %276 = tpu.matmul %274, %275, %cst_225 {dimension_numbers = #tpu.dot_dimension_numbers<[1], [0], [0], [1], [0, 0, 1, 1], [], []>} : vector<8x8xf32>, vector<8x120xf32>, vector<8x120xf32> -> vector<8x120xf32>
    %277 = arith.addf %272, %276 : vector<8x120xf32>
    %c19_226 = arith.constant 19 : index
    %c0_227 = arith.constant 0 : index
    %c0_228 = arith.constant 0 : index
    %278 = vector.load %arg4[%c19_226, %c0_227, %c0_228] : memref<25x8x8xf32, #tpu.memory_space<vmem>>, vector<1x8x8xf32>
    %279 = vector.shape_cast %278 : vector<1x8x8xf32> to vector<8x8xf32>
    %280 = vector.extract_strided_slice %181 {offsets = [0, 52], sizes = [8, 120], strides = [1, 1]} : vector<8x188xf32> to vector<8x120xf32>
    %cst_229 = arith.constant dense<0.000000e+00> : vector<8x120xf32>
    %281 = tpu.matmul %279, %280, %cst_229 {dimension_numbers = #tpu.dot_dimension_numbers<[1], [0], [0], [1], [0, 0, 1, 1], [], []>} : vector<8x8xf32>, vector<8x120xf32>, vector<8x120xf32> -> vector<8x120xf32>
    %282 = arith.addf %277, %281 : vector<8x120xf32>
    %c20_230 = arith.constant 20 : index
    %c0_231 = arith.constant 0 : index
    %c0_232 = arith.constant 0 : index
    %283 = vector.load %arg4[%c20_230, %c0_231, %c0_232] : memref<25x8x8xf32, #tpu.memory_space<vmem>>, vector<1x8x8xf32>
    %284 = vector.shape_cast %283 : vector<1x8x8xf32> to vector<8x8xf32>
    %285 = vector.extract_strided_slice %181 {offsets = [0, 64], sizes = [8, 120], strides = [1, 1]} : vector<8x188xf32> to vector<8x120xf32>
    %cst_233 = arith.constant dense<0.000000e+00> : vector<8x120xf32>
    %286 = tpu.matmul %284, %285, %cst_233 {dimension_numbers = #tpu.dot_dimension_numbers<[1], [0], [0], [1], [0, 0, 1, 1], [], []>} : vector<8x8xf32>, vector<8x120xf32>, vector<8x120xf32> -> vector<8x120xf32>
    %287 = arith.addf %282, %286 : vector<8x120xf32>
    %c21_234 = arith.constant 21 : index
    %c0_235 = arith.constant 0 : index
    %c0_236 = arith.constant 0 : index
    %288 = vector.load %arg4[%c21_234, %c0_235, %c0_236] : memref<25x8x8xf32, #tpu.memory_space<vmem>>, vector<1x8x8xf32>
    %289 = vector.shape_cast %288 : vector<1x8x8xf32> to vector<8x8xf32>
    %290 = vector.extract_strided_slice %181 {offsets = [0, 65], sizes = [8, 120], strides = [1, 1]} : vector<8x188xf32> to vector<8x120xf32>
    %cst_237 = arith.constant dense<0.000000e+00> : vector<8x120xf32>
    %291 = tpu.matmul %289, %290, %cst_237 {dimension_numbers = #tpu.dot_dimension_numbers<[1], [0], [0], [1], [0, 0, 1, 1], [], []>} : vector<8x8xf32>, vector<8x120xf32>, vector<8x120xf32> -> vector<8x120xf32>
    %292 = arith.addf %287, %291 : vector<8x120xf32>
    %c22_238 = arith.constant 22 : index
    %c0_239 = arith.constant 0 : index
    %c0_240 = arith.constant 0 : index
    %293 = vector.load %arg4[%c22_238, %c0_239, %c0_240] : memref<25x8x8xf32, #tpu.memory_space<vmem>>, vector<1x8x8xf32>
    %294 = vector.shape_cast %293 : vector<1x8x8xf32> to vector<8x8xf32>
    %295 = vector.extract_strided_slice %181 {offsets = [0, 66], sizes = [8, 120], strides = [1, 1]} : vector<8x188xf32> to vector<8x120xf32>
    %cst_241 = arith.constant dense<0.000000e+00> : vector<8x120xf32>
    %296 = tpu.matmul %294, %295, %cst_241 {dimension_numbers = #tpu.dot_dimension_numbers<[1], [0], [0], [1], [0, 0, 1, 1], [], []>} : vector<8x8xf32>, vector<8x120xf32>, vector<8x120xf32> -> vector<8x120xf32>
    %297 = arith.addf %292, %296 : vector<8x120xf32>
    %c23_242 = arith.constant 23 : index
    %c0_243 = arith.constant 0 : index
    %c0_244 = arith.constant 0 : index
    %298 = vector.load %arg4[%c23_242, %c0_243, %c0_244] : memref<25x8x8xf32, #tpu.memory_space<vmem>>, vector<1x8x8xf32>
    %299 = vector.shape_cast %298 : vector<1x8x8xf32> to vector<8x8xf32>
    %300 = vector.extract_strided_slice %181 {offsets = [0, 67], sizes = [8, 120], strides = [1, 1]} : vector<8x188xf32> to vector<8x120xf32>
    %cst_245 = arith.constant dense<0.000000e+00> : vector<8x120xf32>
    %301 = tpu.matmul %299, %300, %cst_245 {dimension_numbers = #tpu.dot_dimension_numbers<[1], [0], [0], [1], [0, 0, 1, 1], [], []>} : vector<8x8xf32>, vector<8x120xf32>, vector<8x120xf32> -> vector<8x120xf32>
    %302 = arith.addf %297, %301 : vector<8x120xf32>
    %c24_246 = arith.constant 24 : index
    %c0_247 = arith.constant 0 : index
    %c0_248 = arith.constant 0 : index
    %303 = vector.load %arg4[%c24_246, %c0_247, %c0_248] : memref<25x8x8xf32, #tpu.memory_space<vmem>>, vector<1x8x8xf32>
    %304 = vector.shape_cast %303 : vector<1x8x8xf32> to vector<8x8xf32>
    %305 = vector.extract_strided_slice %181 {offsets = [0, 68], sizes = [8, 120], strides = [1, 1]} : vector<8x188xf32> to vector<8x120xf32>
    %cst_249 = arith.constant dense<0.000000e+00> : vector<8x120xf32>
    %306 = tpu.matmul %304, %305, %cst_249 {dimension_numbers = #tpu.dot_dimension_numbers<[1], [0], [0], [1], [0, 0, 1, 1], [], []>} : vector<8x8xf32>, vector<8x120xf32>, vector<8x120xf32> -> vector<8x120xf32>
    %307 = arith.addf %302, %306 : vector<8x120xf32>
    %c0_250 = arith.constant 0 : index
    %c0_251 = arith.constant 0 : index
    %308 = vector.load %arg5[%c0_250, %c0_251] : memref<8x1xf32, #tpu.memory_space<vmem>>, vector<8x1xf32>
    %309 = vector.broadcast %308 : vector<8x1xf32> to vector<8x120xf32>
    %310 = arith.addf %307, %309 : vector<8x120xf32>
    %cst_252 = arith.constant 0.000000e+00 : f32
    %311 = vector.broadcast %cst_252 : f32 to vector<8x120xf32>
    %312 = arith.maximumf %310, %311 : vector<8x120xf32>
    %cst_253 = arith.constant 0.000000e+00 : f32
    %313 = vector.broadcast %cst_253 : f32 to vector<8x52xf32>
    %c0_254 = arith.constant 0 : index
    %c0_255 = arith.constant 0 : index
    %c0_256 = arith.constant 0 : index
    %314 = vector.load %arg6[%c0_254, %c0_255, %c0_256] : memref<25x8x8xf32, #tpu.memory_space<vmem>>, vector<1x8x8xf32>
    %315 = vector.shape_cast %314 : vector<1x8x8xf32> to vector<8x8xf32>
    %316 = vector.extract_strided_slice %312 {offsets = [0, 0], sizes = [8, 52], strides = [1, 1]} : vector<8x120xf32> to vector<8x52xf32>
    %cst_257 = arith.constant dense<0.000000e+00> : vector<8x52xf32>
    %317 = tpu.matmul %315, %316, %cst_257 {dimension_numbers = #tpu.dot_dimension_numbers<[1], [0], [0], [1], [0, 0, 1, 1], [], []>} : vector<8x8xf32>, vector<8x52xf32>, vector<8x52xf32> -> vector<8x52xf32>
    %318 = arith.addf %313, %317 : vector<8x52xf32>
    %c1_258 = arith.constant 1 : index
    %c0_259 = arith.constant 0 : index
    %c0_260 = arith.constant 0 : index
    %319 = vector.load %arg6[%c1_258, %c0_259, %c0_260] : memref<25x8x8xf32, #tpu.memory_space<vmem>>, vector<1x8x8xf32>
    %320 = vector.shape_cast %319 : vector<1x8x8xf32> to vector<8x8xf32>
    %321 = vector.extract_strided_slice %312 {offsets = [0, 1], sizes = [8, 52], strides = [1, 1]} : vector<8x120xf32> to vector<8x52xf32>
    %cst_261 = arith.constant dense<0.000000e+00> : vector<8x52xf32>
    %322 = tpu.matmul %320, %321, %cst_261 {dimension_numbers = #tpu.dot_dimension_numbers<[1], [0], [0], [1], [0, 0, 1, 1], [], []>} : vector<8x8xf32>, vector<8x52xf32>, vector<8x52xf32> -> vector<8x52xf32>
    %323 = arith.addf %318, %322 : vector<8x52xf32>
    %c2_262 = arith.constant 2 : index
    %c0_263 = arith.constant 0 : index
    %c0_264 = arith.constant 0 : index
    %324 = vector.load %arg6[%c2_262, %c0_263, %c0_264] : memref<25x8x8xf32, #tpu.memory_space<vmem>>, vector<1x8x8xf32>
    %325 = vector.shape_cast %324 : vector<1x8x8xf32> to vector<8x8xf32>
    %326 = vector.extract_strided_slice %312 {offsets = [0, 2], sizes = [8, 52], strides = [1, 1]} : vector<8x120xf32> to vector<8x52xf32>
    %cst_265 = arith.constant dense<0.000000e+00> : vector<8x52xf32>
    %327 = tpu.matmul %325, %326, %cst_265 {dimension_numbers = #tpu.dot_dimension_numbers<[1], [0], [0], [1], [0, 0, 1, 1], [], []>} : vector<8x8xf32>, vector<8x52xf32>, vector<8x52xf32> -> vector<8x52xf32>
    %328 = arith.addf %323, %327 : vector<8x52xf32>
    %c3_266 = arith.constant 3 : index
    %c0_267 = arith.constant 0 : index
    %c0_268 = arith.constant 0 : index
    %329 = vector.load %arg6[%c3_266, %c0_267, %c0_268] : memref<25x8x8xf32, #tpu.memory_space<vmem>>, vector<1x8x8xf32>
    %330 = vector.shape_cast %329 : vector<1x8x8xf32> to vector<8x8xf32>
    %331 = vector.extract_strided_slice %312 {offsets = [0, 3], sizes = [8, 52], strides = [1, 1]} : vector<8x120xf32> to vector<8x52xf32>
    %cst_269 = arith.constant dense<0.000000e+00> : vector<8x52xf32>
    %332 = tpu.matmul %330, %331, %cst_269 {dimension_numbers = #tpu.dot_dimension_numbers<[1], [0], [0], [1], [0, 0, 1, 1], [], []>} : vector<8x8xf32>, vector<8x52xf32>, vector<8x52xf32> -> vector<8x52xf32>
    %333 = arith.addf %328, %332 : vector<8x52xf32>
    %c4_270 = arith.constant 4 : index
    %c0_271 = arith.constant 0 : index
    %c0_272 = arith.constant 0 : index
    %334 = vector.load %arg6[%c4_270, %c0_271, %c0_272] : memref<25x8x8xf32, #tpu.memory_space<vmem>>, vector<1x8x8xf32>
    %335 = vector.shape_cast %334 : vector<1x8x8xf32> to vector<8x8xf32>
    %336 = vector.extract_strided_slice %312 {offsets = [0, 4], sizes = [8, 52], strides = [1, 1]} : vector<8x120xf32> to vector<8x52xf32>
    %cst_273 = arith.constant dense<0.000000e+00> : vector<8x52xf32>
    %337 = tpu.matmul %335, %336, %cst_273 {dimension_numbers = #tpu.dot_dimension_numbers<[1], [0], [0], [1], [0, 0, 1, 1], [], []>} : vector<8x8xf32>, vector<8x52xf32>, vector<8x52xf32> -> vector<8x52xf32>
    %338 = arith.addf %333, %337 : vector<8x52xf32>
    %c5_274 = arith.constant 5 : index
    %c0_275 = arith.constant 0 : index
    %c0_276 = arith.constant 0 : index
    %339 = vector.load %arg6[%c5_274, %c0_275, %c0_276] : memref<25x8x8xf32, #tpu.memory_space<vmem>>, vector<1x8x8xf32>
    %340 = vector.shape_cast %339 : vector<1x8x8xf32> to vector<8x8xf32>
    %341 = vector.extract_strided_slice %312 {offsets = [0, 16], sizes = [8, 52], strides = [1, 1]} : vector<8x120xf32> to vector<8x52xf32>
    %cst_277 = arith.constant dense<0.000000e+00> : vector<8x52xf32>
    %342 = tpu.matmul %340, %341, %cst_277 {dimension_numbers = #tpu.dot_dimension_numbers<[1], [0], [0], [1], [0, 0, 1, 1], [], []>} : vector<8x8xf32>, vector<8x52xf32>, vector<8x52xf32> -> vector<8x52xf32>
    %343 = arith.addf %338, %342 : vector<8x52xf32>
    %c6_278 = arith.constant 6 : index
    %c0_279 = arith.constant 0 : index
    %c0_280 = arith.constant 0 : index
    %344 = vector.load %arg6[%c6_278, %c0_279, %c0_280] : memref<25x8x8xf32, #tpu.memory_space<vmem>>, vector<1x8x8xf32>
    %345 = vector.shape_cast %344 : vector<1x8x8xf32> to vector<8x8xf32>
    %346 = vector.extract_strided_slice %312 {offsets = [0, 17], sizes = [8, 52], strides = [1, 1]} : vector<8x120xf32> to vector<8x52xf32>
    %cst_281 = arith.constant dense<0.000000e+00> : vector<8x52xf32>
    %347 = tpu.matmul %345, %346, %cst_281 {dimension_numbers = #tpu.dot_dimension_numbers<[1], [0], [0], [1], [0, 0, 1, 1], [], []>} : vector<8x8xf32>, vector<8x52xf32>, vector<8x52xf32> -> vector<8x52xf32>
    %348 = arith.addf %343, %347 : vector<8x52xf32>
    %c7_282 = arith.constant 7 : index
    %c0_283 = arith.constant 0 : index
    %c0_284 = arith.constant 0 : index
    %349 = vector.load %arg6[%c7_282, %c0_283, %c0_284] : memref<25x8x8xf32, #tpu.memory_space<vmem>>, vector<1x8x8xf32>
    %350 = vector.shape_cast %349 : vector<1x8x8xf32> to vector<8x8xf32>
    %351 = vector.extract_strided_slice %312 {offsets = [0, 18], sizes = [8, 52], strides = [1, 1]} : vector<8x120xf32> to vector<8x52xf32>
    %cst_285 = arith.constant dense<0.000000e+00> : vector<8x52xf32>
    %352 = tpu.matmul %350, %351, %cst_285 {dimension_numbers = #tpu.dot_dimension_numbers<[1], [0], [0], [1], [0, 0, 1, 1], [], []>} : vector<8x8xf32>, vector<8x52xf32>, vector<8x52xf32> -> vector<8x52xf32>
    %353 = arith.addf %348, %352 : vector<8x52xf32>
    %c8_286 = arith.constant 8 : index
    %c0_287 = arith.constant 0 : index
    %c0_288 = arith.constant 0 : index
    %354 = vector.load %arg6[%c8_286, %c0_287, %c0_288] : memref<25x8x8xf32, #tpu.memory_space<vmem>>, vector<1x8x8xf32>
    %355 = vector.shape_cast %354 : vector<1x8x8xf32> to vector<8x8xf32>
    %356 = vector.extract_strided_slice %312 {offsets = [0, 19], sizes = [8, 52], strides = [1, 1]} : vector<8x120xf32> to vector<8x52xf32>
    %cst_289 = arith.constant dense<0.000000e+00> : vector<8x52xf32>
    %357 = tpu.matmul %355, %356, %cst_289 {dimension_numbers = #tpu.dot_dimension_numbers<[1], [0], [0], [1], [0, 0, 1, 1], [], []>} : vector<8x8xf32>, vector<8x52xf32>, vector<8x52xf32> -> vector<8x52xf32>
    %358 = arith.addf %353, %357 : vector<8x52xf32>
    %c9_290 = arith.constant 9 : index
    %c0_291 = arith.constant 0 : index
    %c0_292 = arith.constant 0 : index
    %359 = vector.load %arg6[%c9_290, %c0_291, %c0_292] : memref<25x8x8xf32, #tpu.memory_space<vmem>>, vector<1x8x8xf32>
    %360 = vector.shape_cast %359 : vector<1x8x8xf32> to vector<8x8xf32>
    %361 = vector.extract_strided_slice %312 {offsets = [0, 20], sizes = [8, 52], strides = [1, 1]} : vector<8x120xf32> to vector<8x52xf32>
    %cst_293 = arith.constant dense<0.000000e+00> : vector<8x52xf32>
    %362 = tpu.matmul %360, %361, %cst_293 {dimension_numbers = #tpu.dot_dimension_numbers<[1], [0], [0], [1], [0, 0, 1, 1], [], []>} : vector<8x8xf32>, vector<8x52xf32>, vector<8x52xf32> -> vector<8x52xf32>
    %363 = arith.addf %358, %362 : vector<8x52xf32>
    %c10_294 = arith.constant 10 : index
    %c0_295 = arith.constant 0 : index
    %c0_296 = arith.constant 0 : index
    %364 = vector.load %arg6[%c10_294, %c0_295, %c0_296] : memref<25x8x8xf32, #tpu.memory_space<vmem>>, vector<1x8x8xf32>
    %365 = vector.shape_cast %364 : vector<1x8x8xf32> to vector<8x8xf32>
    %366 = vector.extract_strided_slice %312 {offsets = [0, 32], sizes = [8, 52], strides = [1, 1]} : vector<8x120xf32> to vector<8x52xf32>
    %cst_297 = arith.constant dense<0.000000e+00> : vector<8x52xf32>
    %367 = tpu.matmul %365, %366, %cst_297 {dimension_numbers = #tpu.dot_dimension_numbers<[1], [0], [0], [1], [0, 0, 1, 1], [], []>} : vector<8x8xf32>, vector<8x52xf32>, vector<8x52xf32> -> vector<8x52xf32>
    %368 = arith.addf %363, %367 : vector<8x52xf32>
    %c11_298 = arith.constant 11 : index
    %c0_299 = arith.constant 0 : index
    %c0_300 = arith.constant 0 : index
    %369 = vector.load %arg6[%c11_298, %c0_299, %c0_300] : memref<25x8x8xf32, #tpu.memory_space<vmem>>, vector<1x8x8xf32>
    %370 = vector.shape_cast %369 : vector<1x8x8xf32> to vector<8x8xf32>
    %371 = vector.extract_strided_slice %312 {offsets = [0, 33], sizes = [8, 52], strides = [1, 1]} : vector<8x120xf32> to vector<8x52xf32>
    %cst_301 = arith.constant dense<0.000000e+00> : vector<8x52xf32>
    %372 = tpu.matmul %370, %371, %cst_301 {dimension_numbers = #tpu.dot_dimension_numbers<[1], [0], [0], [1], [0, 0, 1, 1], [], []>} : vector<8x8xf32>, vector<8x52xf32>, vector<8x52xf32> -> vector<8x52xf32>
    %373 = arith.addf %368, %372 : vector<8x52xf32>
    %c12_302 = arith.constant 12 : index
    %c0_303 = arith.constant 0 : index
    %c0_304 = arith.constant 0 : index
    %374 = vector.load %arg6[%c12_302, %c0_303, %c0_304] : memref<25x8x8xf32, #tpu.memory_space<vmem>>, vector<1x8x8xf32>
    %375 = vector.shape_cast %374 : vector<1x8x8xf32> to vector<8x8xf32>
    %376 = vector.extract_strided_slice %312 {offsets = [0, 34], sizes = [8, 52], strides = [1, 1]} : vector<8x120xf32> to vector<8x52xf32>
    %cst_305 = arith.constant dense<0.000000e+00> : vector<8x52xf32>
    %377 = tpu.matmul %375, %376, %cst_305 {dimension_numbers = #tpu.dot_dimension_numbers<[1], [0], [0], [1], [0, 0, 1, 1], [], []>} : vector<8x8xf32>, vector<8x52xf32>, vector<8x52xf32> -> vector<8x52xf32>
    %378 = arith.addf %373, %377 : vector<8x52xf32>
    %c13_306 = arith.constant 13 : index
    %c0_307 = arith.constant 0 : index
    %c0_308 = arith.constant 0 : index
    %379 = vector.load %arg6[%c13_306, %c0_307, %c0_308] : memref<25x8x8xf32, #tpu.memory_space<vmem>>, vector<1x8x8xf32>
    %380 = vector.shape_cast %379 : vector<1x8x8xf32> to vector<8x8xf32>
    %381 = vector.extract_strided_slice %312 {offsets = [0, 35], sizes = [8, 52], strides = [1, 1]} : vector<8x120xf32> to vector<8x52xf32>
    %cst_309 = arith.constant dense<0.000000e+00> : vector<8x52xf32>
    %382 = tpu.matmul %380, %381, %cst_309 {dimension_numbers = #tpu.dot_dimension_numbers<[1], [0], [0], [1], [0, 0, 1, 1], [], []>} : vector<8x8xf32>, vector<8x52xf32>, vector<8x52xf32> -> vector<8x52xf32>
    %383 = arith.addf %378, %382 : vector<8x52xf32>
    %c14_310 = arith.constant 14 : index
    %c0_311 = arith.constant 0 : index
    %c0_312 = arith.constant 0 : index
    %384 = vector.load %arg6[%c14_310, %c0_311, %c0_312] : memref<25x8x8xf32, #tpu.memory_space<vmem>>, vector<1x8x8xf32>
    %385 = vector.shape_cast %384 : vector<1x8x8xf32> to vector<8x8xf32>
    %386 = vector.extract_strided_slice %312 {offsets = [0, 36], sizes = [8, 52], strides = [1, 1]} : vector<8x120xf32> to vector<8x52xf32>
    %cst_313 = arith.constant dense<0.000000e+00> : vector<8x52xf32>
    %387 = tpu.matmul %385, %386, %cst_313 {dimension_numbers = #tpu.dot_dimension_numbers<[1], [0], [0], [1], [0, 0, 1, 1], [], []>} : vector<8x8xf32>, vector<8x52xf32>, vector<8x52xf32> -> vector<8x52xf32>
    %388 = arith.addf %383, %387 : vector<8x52xf32>
    %c15_314 = arith.constant 15 : index
    %c0_315 = arith.constant 0 : index
    %c0_316 = arith.constant 0 : index
    %389 = vector.load %arg6[%c15_314, %c0_315, %c0_316] : memref<25x8x8xf32, #tpu.memory_space<vmem>>, vector<1x8x8xf32>
    %390 = vector.shape_cast %389 : vector<1x8x8xf32> to vector<8x8xf32>
    %391 = vector.extract_strided_slice %312 {offsets = [0, 48], sizes = [8, 52], strides = [1, 1]} : vector<8x120xf32> to vector<8x52xf32>
    %cst_317 = arith.constant dense<0.000000e+00> : vector<8x52xf32>
    %392 = tpu.matmul %390, %391, %cst_317 {dimension_numbers = #tpu.dot_dimension_numbers<[1], [0], [0], [1], [0, 0, 1, 1], [], []>} : vector<8x8xf32>, vector<8x52xf32>, vector<8x52xf32> -> vector<8x52xf32>
    %393 = arith.addf %388, %392 : vector<8x52xf32>
    %c16_318 = arith.constant 16 : index
    %c0_319 = arith.constant 0 : index
    %c0_320 = arith.constant 0 : index
    %394 = vector.load %arg6[%c16_318, %c0_319, %c0_320] : memref<25x8x8xf32, #tpu.memory_space<vmem>>, vector<1x8x8xf32>
    %395 = vector.shape_cast %394 : vector<1x8x8xf32> to vector<8x8xf32>
    %396 = vector.extract_strided_slice %312 {offsets = [0, 49], sizes = [8, 52], strides = [1, 1]} : vector<8x120xf32> to vector<8x52xf32>
    %cst_321 = arith.constant dense<0.000000e+00> : vector<8x52xf32>
    %397 = tpu.matmul %395, %396, %cst_321 {dimension_numbers = #tpu.dot_dimension_numbers<[1], [0], [0], [1], [0, 0, 1, 1], [], []>} : vector<8x8xf32>, vector<8x52xf32>, vector<8x52xf32> -> vector<8x52xf32>
    %398 = arith.addf %393, %397 : vector<8x52xf32>
    %c17_322 = arith.constant 17 : index
    %c0_323 = arith.constant 0 : index
    %c0_324 = arith.constant 0 : index
    %399 = vector.load %arg6[%c17_322, %c0_323, %c0_324] : memref<25x8x8xf32, #tpu.memory_space<vmem>>, vector<1x8x8xf32>
    %400 = vector.shape_cast %399 : vector<1x8x8xf32> to vector<8x8xf32>
    %401 = vector.extract_strided_slice %312 {offsets = [0, 50], sizes = [8, 52], strides = [1, 1]} : vector<8x120xf32> to vector<8x52xf32>
    %cst_325 = arith.constant dense<0.000000e+00> : vector<8x52xf32>
    %402 = tpu.matmul %400, %401, %cst_325 {dimension_numbers = #tpu.dot_dimension_numbers<[1], [0], [0], [1], [0, 0, 1, 1], [], []>} : vector<8x8xf32>, vector<8x52xf32>, vector<8x52xf32> -> vector<8x52xf32>
    %403 = arith.addf %398, %402 : vector<8x52xf32>
    %c18_326 = arith.constant 18 : index
    %c0_327 = arith.constant 0 : index
    %c0_328 = arith.constant 0 : index
    %404 = vector.load %arg6[%c18_326, %c0_327, %c0_328] : memref<25x8x8xf32, #tpu.memory_space<vmem>>, vector<1x8x8xf32>
    %405 = vector.shape_cast %404 : vector<1x8x8xf32> to vector<8x8xf32>
    %406 = vector.extract_strided_slice %312 {offsets = [0, 51], sizes = [8, 52], strides = [1, 1]} : vector<8x120xf32> to vector<8x52xf32>
    %cst_329 = arith.constant dense<0.000000e+00> : vector<8x52xf32>
    %407 = tpu.matmul %405, %406, %cst_329 {dimension_numbers = #tpu.dot_dimension_numbers<[1], [0], [0], [1], [0, 0, 1, 1], [], []>} : vector<8x8xf32>, vector<8x52xf32>, vector<8x52xf32> -> vector<8x52xf32>
    %408 = arith.addf %403, %407 : vector<8x52xf32>
    %c19_330 = arith.constant 19 : index
    %c0_331 = arith.constant 0 : index
    %c0_332 = arith.constant 0 : index
    %409 = vector.load %arg6[%c19_330, %c0_331, %c0_332] : memref<25x8x8xf32, #tpu.memory_space<vmem>>, vector<1x8x8xf32>
    %410 = vector.shape_cast %409 : vector<1x8x8xf32> to vector<8x8xf32>
    %411 = vector.extract_strided_slice %312 {offsets = [0, 52], sizes = [8, 52], strides = [1, 1]} : vector<8x120xf32> to vector<8x52xf32>
    %cst_333 = arith.constant dense<0.000000e+00> : vector<8x52xf32>
    %412 = tpu.matmul %410, %411, %cst_333 {dimension_numbers = #tpu.dot_dimension_numbers<[1], [0], [0], [1], [0, 0, 1, 1], [], []>} : vector<8x8xf32>, vector<8x52xf32>, vector<8x52xf32> -> vector<8x52xf32>
    %413 = arith.addf %408, %412 : vector<8x52xf32>
    %c20_334 = arith.constant 20 : index
    %c0_335 = arith.constant 0 : index
    %c0_336 = arith.constant 0 : index
    %414 = vector.load %arg6[%c20_334, %c0_335, %c0_336] : memref<25x8x8xf32, #tpu.memory_space<vmem>>, vector<1x8x8xf32>
    %415 = vector.shape_cast %414 : vector<1x8x8xf32> to vector<8x8xf32>
    %416 = vector.extract_strided_slice %312 {offsets = [0, 64], sizes = [8, 52], strides = [1, 1]} : vector<8x120xf32> to vector<8x52xf32>
    %cst_337 = arith.constant dense<0.000000e+00> : vector<8x52xf32>
    %417 = tpu.matmul %415, %416, %cst_337 {dimension_numbers = #tpu.dot_dimension_numbers<[1], [0], [0], [1], [0, 0, 1, 1], [], []>} : vector<8x8xf32>, vector<8x52xf32>, vector<8x52xf32> -> vector<8x52xf32>
    %418 = arith.addf %413, %417 : vector<8x52xf32>
    %c21_338 = arith.constant 21 : index
    %c0_339 = arith.constant 0 : index
    %c0_340 = arith.constant 0 : index
    %419 = vector.load %arg6[%c21_338, %c0_339, %c0_340] : memref<25x8x8xf32, #tpu.memory_space<vmem>>, vector<1x8x8xf32>
    %420 = vector.shape_cast %419 : vector<1x8x8xf32> to vector<8x8xf32>
    %421 = vector.extract_strided_slice %312 {offsets = [0, 65], sizes = [8, 52], strides = [1, 1]} : vector<8x120xf32> to vector<8x52xf32>
    %cst_341 = arith.constant dense<0.000000e+00> : vector<8x52xf32>
    %422 = tpu.matmul %420, %421, %cst_341 {dimension_numbers = #tpu.dot_dimension_numbers<[1], [0], [0], [1], [0, 0, 1, 1], [], []>} : vector<8x8xf32>, vector<8x52xf32>, vector<8x52xf32> -> vector<8x52xf32>
    %423 = arith.addf %418, %422 : vector<8x52xf32>
    %c22_342 = arith.constant 22 : index
    %c0_343 = arith.constant 0 : index
    %c0_344 = arith.constant 0 : index
    %424 = vector.load %arg6[%c22_342, %c0_343, %c0_344] : memref<25x8x8xf32, #tpu.memory_space<vmem>>, vector<1x8x8xf32>
    %425 = vector.shape_cast %424 : vector<1x8x8xf32> to vector<8x8xf32>
    %426 = vector.extract_strided_slice %312 {offsets = [0, 66], sizes = [8, 52], strides = [1, 1]} : vector<8x120xf32> to vector<8x52xf32>
    %cst_345 = arith.constant dense<0.000000e+00> : vector<8x52xf32>
    %427 = tpu.matmul %425, %426, %cst_345 {dimension_numbers = #tpu.dot_dimension_numbers<[1], [0], [0], [1], [0, 0, 1, 1], [], []>} : vector<8x8xf32>, vector<8x52xf32>, vector<8x52xf32> -> vector<8x52xf32>
    %428 = arith.addf %423, %427 : vector<8x52xf32>
    %c23_346 = arith.constant 23 : index
    %c0_347 = arith.constant 0 : index
    %c0_348 = arith.constant 0 : index
    %429 = vector.load %arg6[%c23_346, %c0_347, %c0_348] : memref<25x8x8xf32, #tpu.memory_space<vmem>>, vector<1x8x8xf32>
    %430 = vector.shape_cast %429 : vector<1x8x8xf32> to vector<8x8xf32>
    %431 = vector.extract_strided_slice %312 {offsets = [0, 67], sizes = [8, 52], strides = [1, 1]} : vector<8x120xf32> to vector<8x52xf32>
    %cst_349 = arith.constant dense<0.000000e+00> : vector<8x52xf32>
    %432 = tpu.matmul %430, %431, %cst_349 {dimension_numbers = #tpu.dot_dimension_numbers<[1], [0], [0], [1], [0, 0, 1, 1], [], []>} : vector<8x8xf32>, vector<8x52xf32>, vector<8x52xf32> -> vector<8x52xf32>
    %433 = arith.addf %428, %432 : vector<8x52xf32>
    %c24_350 = arith.constant 24 : index
    %c0_351 = arith.constant 0 : index
    %c0_352 = arith.constant 0 : index
    %434 = vector.load %arg6[%c24_350, %c0_351, %c0_352] : memref<25x8x8xf32, #tpu.memory_space<vmem>>, vector<1x8x8xf32>
    %435 = vector.shape_cast %434 : vector<1x8x8xf32> to vector<8x8xf32>
    %436 = vector.extract_strided_slice %312 {offsets = [0, 68], sizes = [8, 52], strides = [1, 1]} : vector<8x120xf32> to vector<8x52xf32>
    %cst_353 = arith.constant dense<0.000000e+00> : vector<8x52xf32>
    %437 = tpu.matmul %435, %436, %cst_353 {dimension_numbers = #tpu.dot_dimension_numbers<[1], [0], [0], [1], [0, 0, 1, 1], [], []>} : vector<8x8xf32>, vector<8x52xf32>, vector<8x52xf32> -> vector<8x52xf32>
    %438 = arith.addf %433, %437 : vector<8x52xf32>
    %c0_354 = arith.constant 0 : index
    %c0_355 = arith.constant 0 : index
    %439 = vector.load %arg7[%c0_354, %c0_355] : memref<8x1xf32, #tpu.memory_space<vmem>>, vector<8x1xf32>
    %440 = vector.broadcast %439 : vector<8x1xf32> to vector<8x52xf32>
    %441 = arith.addf %438, %440 : vector<8x52xf32>
    %cst_356 = arith.constant 0.000000e+00 : f32
    %442 = vector.broadcast %cst_356 : f32 to vector<8x52xf32>
    %443 = arith.maximumf %441, %442 : vector<8x52xf32>
    %cst_357 = arith.constant 0.000000e+00 : f32
    %444 = vector.broadcast %cst_357 : f32 to vector<8x128xf32>
    %c0_358 = arith.constant 0 : index
    %c0_359 = arith.constant 0 : index
    %445 = vector.load %arg20[%c0_358, %c0_359] : memref<8x128xf32, #tpu.memory_space<vmem>>, vector<8x128xf32>
    tpu.vector_store %arg20[%c0_358, %c0_359], %444 {strides = array<i32>} : memref<8x128xf32, #tpu.memory_space<vmem>>, vector<8x128xf32>,
    %446 = vector.extract_strided_slice %443 {offsets = [0, 0], sizes = [1, 4], strides = [1, 1]} : vector<8x52xf32> to vector<1x4xf32>
    %c0_360 = arith.constant 0 : index
    %c0_361 = arith.constant 0 : index
    %447 = vector.load %arg20[%c0_360, %c0_361] : memref<8x128xf32, #tpu.memory_space<vmem>>, vector<1x4xf32>
    tpu.vector_store %arg20[%c0_360, %c0_361], %446 {strides = array<i32>} : memref<8x128xf32, #tpu.memory_space<vmem>>, vector<1x4xf32>,
    %448 = vector.extract_strided_slice %443 {offsets = [0, 16], sizes = [1, 4], strides = [1, 1]} : vector<8x52xf32> to vector<1x4xf32>
    %c0_362 = arith.constant 0 : index
    %c4_363 = arith.constant 4 : index
    %449 = vector.load %arg20[%c0_362, %c4_363] : memref<8x128xf32, #tpu.memory_space<vmem>>, vector<1x4xf32>
    tpu.vector_store %arg20[%c0_362, %c4_363], %448 {strides = array<i32>} : memref<8x128xf32, #tpu.memory_space<vmem>>, vector<1x4xf32>,
    %450 = vector.extract_strided_slice %443 {offsets = [0, 32], sizes = [1, 4], strides = [1, 1]} : vector<8x52xf32> to vector<1x4xf32>
    %c0_364 = arith.constant 0 : index
    %c8_365 = arith.constant 8 : index
    %451 = vector.load %arg20[%c0_364, %c8_365] : memref<8x128xf32, #tpu.memory_space<vmem>>, vector<1x4xf32>
    tpu.vector_store %arg20[%c0_364, %c8_365], %450 {strides = array<i32>} : memref<8x128xf32, #tpu.memory_space<vmem>>, vector<1x4xf32>,
    %452 = vector.extract_strided_slice %443 {offsets = [0, 48], sizes = [1, 4], strides = [1, 1]} : vector<8x52xf32> to vector<1x4xf32>
    %c0_366 = arith.constant 0 : index
    %c12_367 = arith.constant 12 : index
    %453 = vector.load %arg20[%c0_366, %c12_367] : memref<8x128xf32, #tpu.memory_space<vmem>>, vector<1x4xf32>
    tpu.vector_store %arg20[%c0_366, %c12_367], %452 {strides = array<i32>} : memref<8x128xf32, #tpu.memory_space<vmem>>, vector<1x4xf32>,
    %454 = vector.extract_strided_slice %443 {offsets = [1, 0], sizes = [1, 4], strides = [1, 1]} : vector<8x52xf32> to vector<1x4xf32>
    %c0_368 = arith.constant 0 : index
    %c16_369 = arith.constant 16 : index
    %455 = vector.load %arg20[%c0_368, %c16_369] : memref<8x128xf32, #tpu.memory_space<vmem>>, vector<1x4xf32>
    tpu.vector_store %arg20[%c0_368, %c16_369], %454 {strides = array<i32>} : memref<8x128xf32, #tpu.memory_space<vmem>>, vector<1x4xf32>,
    %456 = vector.extract_strided_slice %443 {offsets = [1, 16], sizes = [1, 4], strides = [1, 1]} : vector<8x52xf32> to vector<1x4xf32>
    %c0_370 = arith.constant 0 : index
    %c20_371 = arith.constant 20 : index
    %457 = vector.load %arg20[%c0_370, %c20_371] : memref<8x128xf32, #tpu.memory_space<vmem>>, vector<1x4xf32>
    tpu.vector_store %arg20[%c0_370, %c20_371], %456 {strides = array<i32>} : memref<8x128xf32, #tpu.memory_space<vmem>>, vector<1x4xf32>,
    %458 = vector.extract_strided_slice %443 {offsets = [1, 32], sizes = [1, 4], strides = [1, 1]} : vector<8x52xf32> to vector<1x4xf32>
    %c0_372 = arith.constant 0 : index
    %c24_373 = arith.constant 24 : index
    %459 = vector.load %arg20[%c0_372, %c24_373] : memref<8x128xf32, #tpu.memory_space<vmem>>, vector<1x4xf32>
    tpu.vector_store %arg20[%c0_372, %c24_373], %458 {strides = array<i32>} : memref<8x128xf32, #tpu.memory_space<vmem>>, vector<1x4xf32>,
    %460 = vector.extract_strided_slice %443 {offsets = [1, 48], sizes = [1, 4], strides = [1, 1]} : vector<8x52xf32> to vector<1x4xf32>
    %c0_374 = arith.constant 0 : index
    %c28 = arith.constant 28 : index
    %461 = vector.load %arg20[%c0_374, %c28] : memref<8x128xf32, #tpu.memory_space<vmem>>, vector<1x4xf32>
    tpu.vector_store %arg20[%c0_374, %c28], %460 {strides = array<i32>} : memref<8x128xf32, #tpu.memory_space<vmem>>, vector<1x4xf32>,
    %462 = vector.extract_strided_slice %443 {offsets = [2, 0], sizes = [1, 4], strides = [1, 1]} : vector<8x52xf32> to vector<1x4xf32>
    %c0_375 = arith.constant 0 : index
    %c32_376 = arith.constant 32 : index
    %463 = vector.load %arg20[%c0_375, %c32_376] : memref<8x128xf32, #tpu.memory_space<vmem>>, vector<1x4xf32>
    tpu.vector_store %arg20[%c0_375, %c32_376], %462 {strides = array<i32>} : memref<8x128xf32, #tpu.memory_space<vmem>>, vector<1x4xf32>,
    %464 = vector.extract_strided_slice %443 {offsets = [2, 16], sizes = [1, 4], strides = [1, 1]} : vector<8x52xf32> to vector<1x4xf32>
    %c0_377 = arith.constant 0 : index
    %c36 = arith.constant 36 : index
    %465 = vector.load %arg20[%c0_377, %c36] : memref<8x128xf32, #tpu.memory_space<vmem>>, vector<1x4xf32>
    tpu.vector_store %arg20[%c0_377, %c36], %464 {strides = array<i32>} : memref<8x128xf32, #tpu.memory_space<vmem>>, vector<1x4xf32>,
    %466 = vector.extract_strided_slice %443 {offsets = [2, 32], sizes = [1, 4], strides = [1, 1]} : vector<8x52xf32> to vector<1x4xf32>
    %c0_378 = arith.constant 0 : index
    %c40 = arith.constant 40 : index
    %467 = vector.load %arg20[%c0_378, %c40] : memref<8x128xf32, #tpu.memory_space<vmem>>, vector<1x4xf32>
    tpu.vector_store %arg20[%c0_378, %c40], %466 {strides = array<i32>} : memref<8x128xf32, #tpu.memory_space<vmem>>, vector<1x4xf32>,
    %468 = vector.extract_strided_slice %443 {offsets = [2, 48], sizes = [1, 4], strides = [1, 1]} : vector<8x52xf32> to vector<1x4xf32>
    %c0_379 = arith.constant 0 : index
    %c44 = arith.constant 44 : index
    %469 = vector.load %arg20[%c0_379, %c44] : memref<8x128xf32, #tpu.memory_space<vmem>>, vector<1x4xf32>
    tpu.vector_store %arg20[%c0_379, %c44], %468 {strides = array<i32>} : memref<8x128xf32, #tpu.memory_space<vmem>>, vector<1x4xf32>,
    %470 = vector.extract_strided_slice %443 {offsets = [3, 0], sizes = [1, 4], strides = [1, 1]} : vector<8x52xf32> to vector<1x4xf32>
    %c0_380 = arith.constant 0 : index
    %c48_381 = arith.constant 48 : index
    %471 = vector.load %arg20[%c0_380, %c48_381] : memref<8x128xf32, #tpu.memory_space<vmem>>, vector<1x4xf32>
    tpu.vector_store %arg20[%c0_380, %c48_381], %470 {strides = array<i32>} : memref<8x128xf32, #tpu.memory_space<vmem>>, vector<1x4xf32>,
    %472 = vector.extract_strided_slice %443 {offsets = [3, 16], sizes = [1, 4], strides = [1, 1]} : vector<8x52xf32> to vector<1x4xf32>
    %c0_382 = arith.constant 0 : index
    %c52 = arith.constant 52 : index
    %473 = vector.load %arg20[%c0_382, %c52] : memref<8x128xf32, #tpu.memory_space<vmem>>, vector<1x4xf32>
    tpu.vector_store %arg20[%c0_382, %c52], %472 {strides = array<i32>} : memref<8x128xf32, #tpu.memory_space<vmem>>, vector<1x4xf32>,
    %474 = vector.extract_strided_slice %443 {offsets = [3, 32], sizes = [1, 4], strides = [1, 1]} : vector<8x52xf32> to vector<1x4xf32>
    %c0_383 = arith.constant 0 : index
    %c56 = arith.constant 56 : index
    %475 = vector.load %arg20[%c0_383, %c56] : memref<8x128xf32, #tpu.memory_space<vmem>>, vector<1x4xf32>
    tpu.vector_store %arg20[%c0_383, %c56], %474 {strides = array<i32>} : memref<8x128xf32, #tpu.memory_space<vmem>>, vector<1x4xf32>,
    %476 = vector.extract_strided_slice %443 {offsets = [3, 48], sizes = [1, 4], strides = [1, 1]} : vector<8x52xf32> to vector<1x4xf32>
    %c0_384 = arith.constant 0 : index
    %c60 = arith.constant 60 : index
    %477 = vector.load %arg20[%c0_384, %c60] : memref<8x128xf32, #tpu.memory_space<vmem>>, vector<1x4xf32>
    tpu.vector_store %arg20[%c0_384, %c60], %476 {strides = array<i32>} : memref<8x128xf32, #tpu.memory_space<vmem>>, vector<1x4xf32>,
    %478 = vector.extract_strided_slice %443 {offsets = [4, 0], sizes = [1, 4], strides = [1, 1]} : vector<8x52xf32> to vector<1x4xf32>
    %c0_385 = arith.constant 0 : index
    %c64_386 = arith.constant 64 : index
    %479 = vector.load %arg20[%c0_385, %c64_386] : memref<8x128xf32, #tpu.memory_space<vmem>>, vector<1x4xf32>
    tpu.vector_store %arg20[%c0_385, %c64_386], %478 {strides = array<i32>} : memref<8x128xf32, #tpu.memory_space<vmem>>, vector<1x4xf32>,
    %480 = vector.extract_strided_slice %443 {offsets = [4, 16], sizes = [1, 4], strides = [1, 1]} : vector<8x52xf32> to vector<1x4xf32>
    %c0_387 = arith.constant 0 : index
    %c68 = arith.constant 68 : index
    %481 = vector.load %arg20[%c0_387, %c68] : memref<8x128xf32, #tpu.memory_space<vmem>>, vector<1x4xf32>
    tpu.vector_store %arg20[%c0_387, %c68], %480 {strides = array<i32>} : memref<8x128xf32, #tpu.memory_space<vmem>>, vector<1x4xf32>,
    %482 = vector.extract_strided_slice %443 {offsets = [4, 32], sizes = [1, 4], strides = [1, 1]} : vector<8x52xf32> to vector<1x4xf32>
    %c0_388 = arith.constant 0 : index
    %c72 = arith.constant 72 : index
    %483 = vector.load %arg20[%c0_388, %c72] : memref<8x128xf32, #tpu.memory_space<vmem>>, vector<1x4xf32>
    tpu.vector_store %arg20[%c0_388, %c72], %482 {strides = array<i32>} : memref<8x128xf32, #tpu.memory_space<vmem>>, vector<1x4xf32>,
    %484 = vector.extract_strided_slice %443 {offsets = [4, 48], sizes = [1, 4], strides = [1, 1]} : vector<8x52xf32> to vector<1x4xf32>
    %c0_389 = arith.constant 0 : index
    %c76 = arith.constant 76 : index
    %485 = vector.load %arg20[%c0_389, %c76] : memref<8x128xf32, #tpu.memory_space<vmem>>, vector<1x4xf32>
    tpu.vector_store %arg20[%c0_389, %c76], %484 {strides = array<i32>} : memref<8x128xf32, #tpu.memory_space<vmem>>, vector<1x4xf32>,
    %486 = vector.extract_strided_slice %443 {offsets = [5, 0], sizes = [1, 4], strides = [1, 1]} : vector<8x52xf32> to vector<1x4xf32>
    %c0_390 = arith.constant 0 : index
    %c80_391 = arith.constant 80 : index
    %487 = vector.load %arg20[%c0_390, %c80_391] : memref<8x128xf32, #tpu.memory_space<vmem>>, vector<1x4xf32>
    tpu.vector_store %arg20[%c0_390, %c80_391], %486 {strides = array<i32>} : memref<8x128xf32, #tpu.memory_space<vmem>>, vector<1x4xf32>,
    %488 = vector.extract_strided_slice %443 {offsets = [5, 16], sizes = [1, 4], strides = [1, 1]} : vector<8x52xf32> to vector<1x4xf32>
    %c0_392 = arith.constant 0 : index
    %c84 = arith.constant 84 : index
    %489 = vector.load %arg20[%c0_392, %c84] : memref<8x128xf32, #tpu.memory_space<vmem>>, vector<1x4xf32>
    tpu.vector_store %arg20[%c0_392, %c84], %488 {strides = array<i32>} : memref<8x128xf32, #tpu.memory_space<vmem>>, vector<1x4xf32>,
    %490 = vector.extract_strided_slice %443 {offsets = [5, 32], sizes = [1, 4], strides = [1, 1]} : vector<8x52xf32> to vector<1x4xf32>
    %c0_393 = arith.constant 0 : index
    %c88 = arith.constant 88 : index
    %491 = vector.load %arg20[%c0_393, %c88] : memref<8x128xf32, #tpu.memory_space<vmem>>, vector<1x4xf32>
    tpu.vector_store %arg20[%c0_393, %c88], %490 {strides = array<i32>} : memref<8x128xf32, #tpu.memory_space<vmem>>, vector<1x4xf32>,
    %492 = vector.extract_strided_slice %443 {offsets = [5, 48], sizes = [1, 4], strides = [1, 1]} : vector<8x52xf32> to vector<1x4xf32>
    %c0_394 = arith.constant 0 : index
    %c92 = arith.constant 92 : index
    %493 = vector.load %arg20[%c0_394, %c92] : memref<8x128xf32, #tpu.memory_space<vmem>>, vector<1x4xf32>
    tpu.vector_store %arg20[%c0_394, %c92], %492 {strides = array<i32>} : memref<8x128xf32, #tpu.memory_space<vmem>>, vector<1x4xf32>,
    %494 = vector.extract_strided_slice %443 {offsets = [6, 0], sizes = [1, 4], strides = [1, 1]} : vector<8x52xf32> to vector<1x4xf32>
    %c0_395 = arith.constant 0 : index
    %c96_396 = arith.constant 96 : index
    %495 = vector.load %arg20[%c0_395, %c96_396] : memref<8x128xf32, #tpu.memory_space<vmem>>, vector<1x4xf32>
    tpu.vector_store %arg20[%c0_395, %c96_396], %494 {strides = array<i32>} : memref<8x128xf32, #tpu.memory_space<vmem>>, vector<1x4xf32>,
    %496 = vector.extract_strided_slice %443 {offsets = [6, 16], sizes = [1, 4], strides = [1, 1]} : vector<8x52xf32> to vector<1x4xf32>
    %c0_397 = arith.constant 0 : index
    %c100 = arith.constant 100 : index
    %497 = vector.load %arg20[%c0_397, %c100] : memref<8x128xf32, #tpu.memory_space<vmem>>, vector<1x4xf32>
    tpu.vector_store %arg20[%c0_397, %c100], %496 {strides = array<i32>} : memref<8x128xf32, #tpu.memory_space<vmem>>, vector<1x4xf32>,
    %498 = vector.extract_strided_slice %443 {offsets = [6, 32], sizes = [1, 4], strides = [1, 1]} : vector<8x52xf32> to vector<1x4xf32>
    %c0_398 = arith.constant 0 : index
    %c104 = arith.constant 104 : index
    %499 = vector.load %arg20[%c0_398, %c104] : memref<8x128xf32, #tpu.memory_space<vmem>>, vector<1x4xf32>
    tpu.vector_store %arg20[%c0_398, %c104], %498 {strides = array<i32>} : memref<8x128xf32, #tpu.memory_space<vmem>>, vector<1x4xf32>,
    %500 = vector.extract_strided_slice %443 {offsets = [6, 48], sizes = [1, 4], strides = [1, 1]} : vector<8x52xf32> to vector<1x4xf32>
    %c0_399 = arith.constant 0 : index
    %c108 = arith.constant 108 : index
    %501 = vector.load %arg20[%c0_399, %c108] : memref<8x128xf32, #tpu.memory_space<vmem>>, vector<1x4xf32>
    tpu.vector_store %arg20[%c0_399, %c108], %500 {strides = array<i32>} : memref<8x128xf32, #tpu.memory_space<vmem>>, vector<1x4xf32>,
    %502 = vector.extract_strided_slice %443 {offsets = [7, 0], sizes = [1, 4], strides = [1, 1]} : vector<8x52xf32> to vector<1x4xf32>
    %c0_400 = arith.constant 0 : index
    %c112_401 = arith.constant 112 : index
    %503 = vector.load %arg20[%c0_400, %c112_401] : memref<8x128xf32, #tpu.memory_space<vmem>>, vector<1x4xf32>
    tpu.vector_store %arg20[%c0_400, %c112_401], %502 {strides = array<i32>} : memref<8x128xf32, #tpu.memory_space<vmem>>, vector<1x4xf32>,
    %504 = vector.extract_strided_slice %443 {offsets = [7, 16], sizes = [1, 4], strides = [1, 1]} : vector<8x52xf32> to vector<1x4xf32>
    %c0_402 = arith.constant 0 : index
    %c116 = arith.constant 116 : index
    %505 = vector.load %arg20[%c0_402, %c116] : memref<8x128xf32, #tpu.memory_space<vmem>>, vector<1x4xf32>
    tpu.vector_store %arg20[%c0_402, %c116], %504 {strides = array<i32>} : memref<8x128xf32, #tpu.memory_space<vmem>>, vector<1x4xf32>,
    %506 = vector.extract_strided_slice %443 {offsets = [7, 32], sizes = [1, 4], strides = [1, 1]} : vector<8x52xf32> to vector<1x4xf32>
    %c0_403 = arith.constant 0 : index
    %c120 = arith.constant 120 : index
    %507 = vector.load %arg20[%c0_403, %c120] : memref<8x128xf32, #tpu.memory_space<vmem>>, vector<1x4xf32>
    tpu.vector_store %arg20[%c0_403, %c120], %506 {strides = array<i32>} : memref<8x128xf32, #tpu.memory_space<vmem>>, vector<1x4xf32>,
    %508 = vector.extract_strided_slice %443 {offsets = [7, 48], sizes = [1, 4], strides = [1, 1]} : vector<8x52xf32> to vector<1x4xf32>
    %c0_404 = arith.constant 0 : index
    %c124 = arith.constant 124 : index
    %509 = vector.load %arg20[%c0_404, %c124] : memref<8x128xf32, #tpu.memory_space<vmem>>, vector<1x4xf32>
    tpu.vector_store %arg20[%c0_404, %c124], %508 {strides = array<i32>} : memref<8x128xf32, #tpu.memory_space<vmem>>, vector<1x4xf32>,
    %c0_405 = arith.constant 0 : index
    %c0_406 = arith.constant 0 : index
    %510 = vector.load %arg20[%c0_405, %c0_406] : memref<8x128xf32, #tpu.memory_space<vmem>>, vector<8x128xf32>
    %c0_407 = arith.constant 0 : index
    %c0_408 = arith.constant 0 : index
    %511 = vector.load %arg8[%c0_407, %c0_408] : memref<128x32xf32, #tpu.memory_space<vmem>>, vector<128x32xf32>
    %cst_409 = arith.constant dense<0.000000e+00> : vector<8x32xf32>
    %512 = tpu.matmul %510, %511, %cst_409 {dimension_numbers = #tpu.dot_dimension_numbers<[1], [0], [0], [1], [0, 0, 1, 1], [], []>} : vector<8x128xf32>, vector<128x32xf32>, vector<8x32xf32> -> vector<8x32xf32>
    %c0_410 = arith.constant 0 : index
    %c0_411 = arith.constant 0 : index
    %513 = vector.load %arg9[%c0_410, %c0_411] : memref<1x32xf32, #tpu.memory_space<vmem>>, vector<1x32xf32>
    %514 = vector.broadcast %513 : vector<1x32xf32> to vector<8x32xf32>
    %515 = arith.addf %512, %514 : vector<8x32xf32>
    %cst_412 = arith.constant 0.000000e+00 : f32
    %516 = vector.broadcast %cst_412 : f32 to vector<8x32xf32>
    %517 = arith.maximumf %515, %516 : vector<8x32xf32>
    %c0_413 = arith.constant 0 : index
    %c0_414 = arith.constant 0 : index
    %518 = vector.load %arg10[%c0_413, %c0_414] : memref<32x128xf32, #tpu.memory_space<vmem>>, vector<32x128xf32>
    %cst_415 = arith.constant dense<0.000000e+00> : vector<8x128xf32>
    %519 = tpu.matmul %517, %518, %cst_415 {dimension_numbers = #tpu.dot_dimension_numbers<[1], [0], [0], [1], [0, 0, 1, 1], [], []>} : vector<8x32xf32>, vector<32x128xf32>, vector<8x128xf32> -> vector<8x128xf32>
    %c0_416 = arith.constant 0 : index
    %c0_417 = arith.constant 0 : index
    %520 = vector.load %arg11[%c0_416, %c0_417] : memref<1x128xf32, #tpu.memory_space<vmem>>, vector<1x128xf32>
    %521 = vector.broadcast %520 : vector<1x128xf32> to vector<8x128xf32>
    %522 = arith.addf %519, %521 : vector<8x128xf32>
    %cst_418 = arith.constant 0.000000e+00 : f32
    %523 = vector.broadcast %cst_418 : f32 to vector<8x128xf32>
    %524 = arith.maximumf %522, %523 : vector<8x128xf32>
    %cst_419 = arith.constant 0.000000e+00 : f32
    %525 = vector.broadcast %cst_419 : f32 to vector<8x400xf32>
    %c0_420 = arith.constant 0 : index
    %c0_421 = arith.constant 0 : index
    %526 = vector.load %arg21[%c0_420, %c0_421] : memref<8x400xf32, #tpu.memory_space<vmem>>, vector<8x400xf32>
    tpu.vector_store %arg21[%c0_420, %c0_421], %525 {strides = array<i32>} : memref<8x400xf32, #tpu.memory_space<vmem>>, vector<8x400xf32>,
    %527 = vector.extract_strided_slice %524 {offsets = [0, 0], sizes = [1, 4], strides = [1, 1]} : vector<8x128xf32> to vector<1x4xf32>
    %c0_422 = arith.constant 0 : index
    %c84_423 = arith.constant 84 : index
    %528 = vector.load %arg21[%c0_422, %c84_423] : memref<8x400xf32, #tpu.memory_space<vmem>>, vector<1x4xf32>
    tpu.vector_store %arg21[%c0_422, %c84_423], %527 {strides = array<i32>} : memref<8x400xf32, #tpu.memory_space<vmem>>, vector<1x4xf32>,
    %529 = vector.extract_strided_slice %524 {offsets = [0, 4], sizes = [1, 4], strides = [1, 1]} : vector<8x128xf32> to vector<1x4xf32>
    %c0_424 = arith.constant 0 : index
    %c104_425 = arith.constant 104 : index
    %530 = vector.load %arg21[%c0_424, %c104_425] : memref<8x400xf32, #tpu.memory_space<vmem>>, vector<1x4xf32>
    tpu.vector_store %arg21[%c0_424, %c104_425], %529 {strides = array<i32>} : memref<8x400xf32, #tpu.memory_space<vmem>>, vector<1x4xf32>,
    %531 = vector.extract_strided_slice %524 {offsets = [0, 8], sizes = [1, 4], strides = [1, 1]} : vector<8x128xf32> to vector<1x4xf32>
    %c0_426 = arith.constant 0 : index
    %c124_427 = arith.constant 124 : index
    %532 = vector.load %arg21[%c0_426, %c124_427] : memref<8x400xf32, #tpu.memory_space<vmem>>, vector<1x4xf32>
    tpu.vector_store %arg21[%c0_426, %c124_427], %531 {strides = array<i32>} : memref<8x400xf32, #tpu.memory_space<vmem>>, vector<1x4xf32>,
    %533 = vector.extract_strided_slice %524 {offsets = [0, 12], sizes = [1, 4], strides = [1, 1]} : vector<8x128xf32> to vector<1x4xf32>
    %c0_428 = arith.constant 0 : index
    %c144_429 = arith.constant 144 : index
    %534 = vector.load %arg21[%c0_428, %c144_429] : memref<8x400xf32, #tpu.memory_space<vmem>>, vector<1x4xf32>
    tpu.vector_store %arg21[%c0_428, %c144_429], %533 {strides = array<i32>} : memref<8x400xf32, #tpu.memory_space<vmem>>, vector<1x4xf32>,
    %535 = vector.extract_strided_slice %524 {offsets = [0, 16], sizes = [1, 4], strides = [1, 1]} : vector<8x128xf32> to vector<1x4xf32>
    %c1_430 = arith.constant 1 : index
    %c84_431 = arith.constant 84 : index
    %536 = vector.load %arg21[%c1_430, %c84_431] : memref<8x400xf32, #tpu.memory_space<vmem>>, vector<1x4xf32>
    tpu.vector_store %arg21[%c1_430, %c84_431], %535 {strides = array<i32>} : memref<8x400xf32, #tpu.memory_space<vmem>>, vector<1x4xf32>,
    %537 = vector.extract_strided_slice %524 {offsets = [0, 20], sizes = [1, 4], strides = [1, 1]} : vector<8x128xf32> to vector<1x4xf32>
    %c1_432 = arith.constant 1 : index
    %c104_433 = arith.constant 104 : index
    %538 = vector.load %arg21[%c1_432, %c104_433] : memref<8x400xf32, #tpu.memory_space<vmem>>, vector<1x4xf32>
    tpu.vector_store %arg21[%c1_432, %c104_433], %537 {strides = array<i32>} : memref<8x400xf32, #tpu.memory_space<vmem>>, vector<1x4xf32>,
    %539 = vector.extract_strided_slice %524 {offsets = [0, 24], sizes = [1, 4], strides = [1, 1]} : vector<8x128xf32> to vector<1x4xf32>
    %c1_434 = arith.constant 1 : index
    %c124_435 = arith.constant 124 : index
    %540 = vector.load %arg21[%c1_434, %c124_435] : memref<8x400xf32, #tpu.memory_space<vmem>>, vector<1x4xf32>
    tpu.vector_store %arg21[%c1_434, %c124_435], %539 {strides = array<i32>} : memref<8x400xf32, #tpu.memory_space<vmem>>, vector<1x4xf32>,
    %541 = vector.extract_strided_slice %524 {offsets = [0, 28], sizes = [1, 4], strides = [1, 1]} : vector<8x128xf32> to vector<1x4xf32>
    %c1_436 = arith.constant 1 : index
    %c144_437 = arith.constant 144 : index
    %542 = vector.load %arg21[%c1_436, %c144_437] : memref<8x400xf32, #tpu.memory_space<vmem>>, vector<1x4xf32>
    tpu.vector_store %arg21[%c1_436, %c144_437], %541 {strides = array<i32>} : memref<8x400xf32, #tpu.memory_space<vmem>>, vector<1x4xf32>,
    %543 = vector.extract_strided_slice %524 {offsets = [0, 32], sizes = [1, 4], strides = [1, 1]} : vector<8x128xf32> to vector<1x4xf32>
    %c2_438 = arith.constant 2 : index
    %c84_439 = arith.constant 84 : index
    %544 = vector.load %arg21[%c2_438, %c84_439] : memref<8x400xf32, #tpu.memory_space<vmem>>, vector<1x4xf32>
    tpu.vector_store %arg21[%c2_438, %c84_439], %543 {strides = array<i32>} : memref<8x400xf32, #tpu.memory_space<vmem>>, vector<1x4xf32>,
    %545 = vector.extract_strided_slice %524 {offsets = [0, 36], sizes = [1, 4], strides = [1, 1]} : vector<8x128xf32> to vector<1x4xf32>
    %c2_440 = arith.constant 2 : index
    %c104_441 = arith.constant 104 : index
    %546 = vector.load %arg21[%c2_440, %c104_441] : memref<8x400xf32, #tpu.memory_space<vmem>>, vector<1x4xf32>
    tpu.vector_store %arg21[%c2_440, %c104_441], %545 {strides = array<i32>} : memref<8x400xf32, #tpu.memory_space<vmem>>, vector<1x4xf32>,
    %547 = vector.extract_strided_slice %524 {offsets = [0, 40], sizes = [1, 4], strides = [1, 1]} : vector<8x128xf32> to vector<1x4xf32>
    %c2_442 = arith.constant 2 : index
    %c124_443 = arith.constant 124 : index
    %548 = vector.load %arg21[%c2_442, %c124_443] : memref<8x400xf32, #tpu.memory_space<vmem>>, vector<1x4xf32>
    tpu.vector_store %arg21[%c2_442, %c124_443], %547 {strides = array<i32>} : memref<8x400xf32, #tpu.memory_space<vmem>>, vector<1x4xf32>,
    %549 = vector.extract_strided_slice %524 {offsets = [0, 44], sizes = [1, 4], strides = [1, 1]} : vector<8x128xf32> to vector<1x4xf32>
    %c2_444 = arith.constant 2 : index
    %c144_445 = arith.constant 144 : index
    %550 = vector.load %arg21[%c2_444, %c144_445] : memref<8x400xf32, #tpu.memory_space<vmem>>, vector<1x4xf32>
    tpu.vector_store %arg21[%c2_444, %c144_445], %549 {strides = array<i32>} : memref<8x400xf32, #tpu.memory_space<vmem>>, vector<1x4xf32>,
    %551 = vector.extract_strided_slice %524 {offsets = [0, 48], sizes = [1, 4], strides = [1, 1]} : vector<8x128xf32> to vector<1x4xf32>
    %c3_446 = arith.constant 3 : index
    %c84_447 = arith.constant 84 : index
    %552 = vector.load %arg21[%c3_446, %c84_447] : memref<8x400xf32, #tpu.memory_space<vmem>>, vector<1x4xf32>
    tpu.vector_store %arg21[%c3_446, %c84_447], %551 {strides = array<i32>} : memref<8x400xf32, #tpu.memory_space<vmem>>, vector<1x4xf32>,
    %553 = vector.extract_strided_slice %524 {offsets = [0, 52], sizes = [1, 4], strides = [1, 1]} : vector<8x128xf32> to vector<1x4xf32>
    %c3_448 = arith.constant 3 : index
    %c104_449 = arith.constant 104 : index
    %554 = vector.load %arg21[%c3_448, %c104_449] : memref<8x400xf32, #tpu.memory_space<vmem>>, vector<1x4xf32>
    tpu.vector_store %arg21[%c3_448, %c104_449], %553 {strides = array<i32>} : memref<8x400xf32, #tpu.memory_space<vmem>>, vector<1x4xf32>,
    %555 = vector.extract_strided_slice %524 {offsets = [0, 56], sizes = [1, 4], strides = [1, 1]} : vector<8x128xf32> to vector<1x4xf32>
    %c3_450 = arith.constant 3 : index
    %c124_451 = arith.constant 124 : index
    %556 = vector.load %arg21[%c3_450, %c124_451] : memref<8x400xf32, #tpu.memory_space<vmem>>, vector<1x4xf32>
    tpu.vector_store %arg21[%c3_450, %c124_451], %555 {strides = array<i32>} : memref<8x400xf32, #tpu.memory_space<vmem>>, vector<1x4xf32>,
    %557 = vector.extract_strided_slice %524 {offsets = [0, 60], sizes = [1, 4], strides = [1, 1]} : vector<8x128xf32> to vector<1x4xf32>
    %c3_452 = arith.constant 3 : index
    %c144_453 = arith.constant 144 : index
    %558 = vector.load %arg21[%c3_452, %c144_453] : memref<8x400xf32, #tpu.memory_space<vmem>>, vector<1x4xf32>
    tpu.vector_store %arg21[%c3_452, %c144_453], %557 {strides = array<i32>} : memref<8x400xf32, #tpu.memory_space<vmem>>, vector<1x4xf32>,
    %559 = vector.extract_strided_slice %524 {offsets = [0, 64], sizes = [1, 4], strides = [1, 1]} : vector<8x128xf32> to vector<1x4xf32>
    %c4_454 = arith.constant 4 : index
    %c84_455 = arith.constant 84 : index
    %560 = vector.load %arg21[%c4_454, %c84_455] : memref<8x400xf32, #tpu.memory_space<vmem>>, vector<1x4xf32>
    tpu.vector_store %arg21[%c4_454, %c84_455], %559 {strides = array<i32>} : memref<8x400xf32, #tpu.memory_space<vmem>>, vector<1x4xf32>,
    %561 = vector.extract_strided_slice %524 {offsets = [0, 68], sizes = [1, 4], strides = [1, 1]} : vector<8x128xf32> to vector<1x4xf32>
    %c4_456 = arith.constant 4 : index
    %c104_457 = arith.constant 104 : index
    %562 = vector.load %arg21[%c4_456, %c104_457] : memref<8x400xf32, #tpu.memory_space<vmem>>, vector<1x4xf32>
    tpu.vector_store %arg21[%c4_456, %c104_457], %561 {strides = array<i32>} : memref<8x400xf32, #tpu.memory_space<vmem>>, vector<1x4xf32>,
    %563 = vector.extract_strided_slice %524 {offsets = [0, 72], sizes = [1, 4], strides = [1, 1]} : vector<8x128xf32> to vector<1x4xf32>
    %c4_458 = arith.constant 4 : index
    %c124_459 = arith.constant 124 : index
    %564 = vector.load %arg21[%c4_458, %c124_459] : memref<8x400xf32, #tpu.memory_space<vmem>>, vector<1x4xf32>
    tpu.vector_store %arg21[%c4_458, %c124_459], %563 {strides = array<i32>} : memref<8x400xf32, #tpu.memory_space<vmem>>, vector<1x4xf32>,
    %565 = vector.extract_strided_slice %524 {offsets = [0, 76], sizes = [1, 4], strides = [1, 1]} : vector<8x128xf32> to vector<1x4xf32>
    %c4_460 = arith.constant 4 : index
    %c144_461 = arith.constant 144 : index
    %566 = vector.load %arg21[%c4_460, %c144_461] : memref<8x400xf32, #tpu.memory_space<vmem>>, vector<1x4xf32>
    tpu.vector_store %arg21[%c4_460, %c144_461], %565 {strides = array<i32>} : memref<8x400xf32, #tpu.memory_space<vmem>>, vector<1x4xf32>,
    %567 = vector.extract_strided_slice %524 {offsets = [0, 80], sizes = [1, 4], strides = [1, 1]} : vector<8x128xf32> to vector<1x4xf32>
    %c5_462 = arith.constant 5 : index
    %c84_463 = arith.constant 84 : index
    %568 = vector.load %arg21[%c5_462, %c84_463] : memref<8x400xf32, #tpu.memory_space<vmem>>, vector<1x4xf32>
    tpu.vector_store %arg21[%c5_462, %c84_463], %567 {strides = array<i32>} : memref<8x400xf32, #tpu.memory_space<vmem>>, vector<1x4xf32>,
    %569 = vector.extract_strided_slice %524 {offsets = [0, 84], sizes = [1, 4], strides = [1, 1]} : vector<8x128xf32> to vector<1x4xf32>
    %c5_464 = arith.constant 5 : index
    %c104_465 = arith.constant 104 : index
    %570 = vector.load %arg21[%c5_464, %c104_465] : memref<8x400xf32, #tpu.memory_space<vmem>>, vector<1x4xf32>
    tpu.vector_store %arg21[%c5_464, %c104_465], %569 {strides = array<i32>} : memref<8x400xf32, #tpu.memory_space<vmem>>, vector<1x4xf32>,
    %571 = vector.extract_strided_slice %524 {offsets = [0, 88], sizes = [1, 4], strides = [1, 1]} : vector<8x128xf32> to vector<1x4xf32>
    %c5_466 = arith.constant 5 : index
    %c124_467 = arith.constant 124 : index
    %572 = vector.load %arg21[%c5_466, %c124_467] : memref<8x400xf32, #tpu.memory_space<vmem>>, vector<1x4xf32>
    tpu.vector_store %arg21[%c5_466, %c124_467], %571 {strides = array<i32>} : memref<8x400xf32, #tpu.memory_space<vmem>>, vector<1x4xf32>,
    %573 = vector.extract_strided_slice %524 {offsets = [0, 92], sizes = [1, 4], strides = [1, 1]} : vector<8x128xf32> to vector<1x4xf32>
    %c5_468 = arith.constant 5 : index
    %c144_469 = arith.constant 144 : index
    %574 = vector.load %arg21[%c5_468, %c144_469] : memref<8x400xf32, #tpu.memory_space<vmem>>, vector<1x4xf32>
    tpu.vector_store %arg21[%c5_468, %c144_469], %573 {strides = array<i32>} : memref<8x400xf32, #tpu.memory_space<vmem>>, vector<1x4xf32>,
    %575 = vector.extract_strided_slice %524 {offsets = [0, 96], sizes = [1, 4], strides = [1, 1]} : vector<8x128xf32> to vector<1x4xf32>
    %c6_470 = arith.constant 6 : index
    %c84_471 = arith.constant 84 : index
    %576 = vector.load %arg21[%c6_470, %c84_471] : memref<8x400xf32, #tpu.memory_space<vmem>>, vector<1x4xf32>
    tpu.vector_store %arg21[%c6_470, %c84_471], %575 {strides = array<i32>} : memref<8x400xf32, #tpu.memory_space<vmem>>, vector<1x4xf32>,
    %577 = vector.extract_strided_slice %524 {offsets = [0, 100], sizes = [1, 4], strides = [1, 1]} : vector<8x128xf32> to vector<1x4xf32>
    %c6_472 = arith.constant 6 : index
    %c104_473 = arith.constant 104 : index
    %578 = vector.load %arg21[%c6_472, %c104_473] : memref<8x400xf32, #tpu.memory_space<vmem>>, vector<1x4xf32>
    tpu.vector_store %arg21[%c6_472, %c104_473], %577 {strides = array<i32>} : memref<8x400xf32, #tpu.memory_space<vmem>>, vector<1x4xf32>,
    %579 = vector.extract_strided_slice %524 {offsets = [0, 104], sizes = [1, 4], strides = [1, 1]} : vector<8x128xf32> to vector<1x4xf32>
    %c6_474 = arith.constant 6 : index
    %c124_475 = arith.constant 124 : index
    %580 = vector.load %arg21[%c6_474, %c124_475] : memref<8x400xf32, #tpu.memory_space<vmem>>, vector<1x4xf32>
    tpu.vector_store %arg21[%c6_474, %c124_475], %579 {strides = array<i32>} : memref<8x400xf32, #tpu.memory_space<vmem>>, vector<1x4xf32>,
    %581 = vector.extract_strided_slice %524 {offsets = [0, 108], sizes = [1, 4], strides = [1, 1]} : vector<8x128xf32> to vector<1x4xf32>
    %c6_476 = arith.constant 6 : index
    %c144_477 = arith.constant 144 : index
    %582 = vector.load %arg21[%c6_476, %c144_477] : memref<8x400xf32, #tpu.memory_space<vmem>>, vector<1x4xf32>
    tpu.vector_store %arg21[%c6_476, %c144_477], %581 {strides = array<i32>} : memref<8x400xf32, #tpu.memory_space<vmem>>, vector<1x4xf32>,
    %583 = vector.extract_strided_slice %524 {offsets = [0, 112], sizes = [1, 4], strides = [1, 1]} : vector<8x128xf32> to vector<1x4xf32>
    %c7_478 = arith.constant 7 : index
    %c84_479 = arith.constant 84 : index
    %584 = vector.load %arg21[%c7_478, %c84_479] : memref<8x400xf32, #tpu.memory_space<vmem>>, vector<1x4xf32>
    tpu.vector_store %arg21[%c7_478, %c84_479], %583 {strides = array<i32>} : memref<8x400xf32, #tpu.memory_space<vmem>>, vector<1x4xf32>,
    %585 = vector.extract_strided_slice %524 {offsets = [0, 116], sizes = [1, 4], strides = [1, 1]} : vector<8x128xf32> to vector<1x4xf32>
    %c7_480 = arith.constant 7 : index
    %c104_481 = arith.constant 104 : index
    %586 = vector.load %arg21[%c7_480, %c104_481] : memref<8x400xf32, #tpu.memory_space<vmem>>, vector<1x4xf32>
    tpu.vector_store %arg21[%c7_480, %c104_481], %585 {strides = array<i32>} : memref<8x400xf32, #tpu.memory_space<vmem>>, vector<1x4xf32>,
    %587 = vector.extract_strided_slice %524 {offsets = [0, 120], sizes = [1, 4], strides = [1, 1]} : vector<8x128xf32> to vector<1x4xf32>
    %c7_482 = arith.constant 7 : index
    %c124_483 = arith.constant 124 : index
    %588 = vector.load %arg21[%c7_482, %c124_483] : memref<8x400xf32, #tpu.memory_space<vmem>>, vector<1x4xf32>
    tpu.vector_store %arg21[%c7_482, %c124_483], %587 {strides = array<i32>} : memref<8x400xf32, #tpu.memory_space<vmem>>, vector<1x4xf32>,
    %589 = vector.extract_strided_slice %524 {offsets = [0, 124], sizes = [1, 4], strides = [1, 1]} : vector<8x128xf32> to vector<1x4xf32>
    %c7_484 = arith.constant 7 : index
    %c144_485 = arith.constant 144 : index
    %590 = vector.load %arg21[%c7_484, %c144_485] : memref<8x400xf32, #tpu.memory_space<vmem>>, vector<1x4xf32>
    tpu.vector_store %arg21[%c7_484, %c144_485], %589 {strides = array<i32>} : memref<8x400xf32, #tpu.memory_space<vmem>>, vector<1x4xf32>,
    %c0_486 = arith.constant 0 : index
    %c0_487 = arith.constant 0 : index
    %591 = vector.load %arg21[%c0_486, %c0_487] : memref<8x400xf32, #tpu.memory_space<vmem>>, vector<8x400xf32>
    %cst_488 = arith.constant 0.000000e+00 : f32
    %592 = vector.broadcast %cst_488 : f32 to vector<8x148xf32>
    %c0_489 = arith.constant 0 : index
    %c0_490 = arith.constant 0 : index
    %c0_491 = arith.constant 0 : index
    %593 = vector.load %arg12[%c0_489, %c0_490, %c0_491] : memref<25x8x8xf32, #tpu.memory_space<vmem>>, vector<1x8x8xf32>
    %594 = vector.shape_cast %593 : vector<1x8x8xf32> to vector<8x8xf32>
    %595 = vector.extract_strided_slice %591 {offsets = [0, 0], sizes = [8, 148], strides = [1, 1]} : vector<8x400xf32> to vector<8x148xf32>
    %cst_492 = arith.constant dense<0.000000e+00> : vector<8x148xf32>
    %596 = tpu.matmul %594, %595, %cst_492 {dimension_numbers = #tpu.dot_dimension_numbers<[1], [0], [0], [1], [0, 0, 1, 1], [], []>} : vector<8x8xf32>, vector<8x148xf32>, vector<8x148xf32> -> vector<8x148xf32>
    %597 = arith.addf %592, %596 : vector<8x148xf32>
    %c1_493 = arith.constant 1 : index
    %c0_494 = arith.constant 0 : index
    %c0_495 = arith.constant 0 : index
    %598 = vector.load %arg12[%c1_493, %c0_494, %c0_495] : memref<25x8x8xf32, #tpu.memory_space<vmem>>, vector<1x8x8xf32>
    %599 = vector.shape_cast %598 : vector<1x8x8xf32> to vector<8x8xf32>
    %600 = vector.extract_strided_slice %591 {offsets = [0, 1], sizes = [8, 148], strides = [1, 1]} : vector<8x400xf32> to vector<8x148xf32>
    %cst_496 = arith.constant dense<0.000000e+00> : vector<8x148xf32>
    %601 = tpu.matmul %599, %600, %cst_496 {dimension_numbers = #tpu.dot_dimension_numbers<[1], [0], [0], [1], [0, 0, 1, 1], [], []>} : vector<8x8xf32>, vector<8x148xf32>, vector<8x148xf32> -> vector<8x148xf32>
    %602 = arith.addf %597, %601 : vector<8x148xf32>
    %c2_497 = arith.constant 2 : index
    %c0_498 = arith.constant 0 : index
    %c0_499 = arith.constant 0 : index
    %603 = vector.load %arg12[%c2_497, %c0_498, %c0_499] : memref<25x8x8xf32, #tpu.memory_space<vmem>>, vector<1x8x8xf32>
    %604 = vector.shape_cast %603 : vector<1x8x8xf32> to vector<8x8xf32>
    %605 = vector.extract_strided_slice %591 {offsets = [0, 2], sizes = [8, 148], strides = [1, 1]} : vector<8x400xf32> to vector<8x148xf32>
    %cst_500 = arith.constant dense<0.000000e+00> : vector<8x148xf32>
    %606 = tpu.matmul %604, %605, %cst_500 {dimension_numbers = #tpu.dot_dimension_numbers<[1], [0], [0], [1], [0, 0, 1, 1], [], []>} : vector<8x8xf32>, vector<8x148xf32>, vector<8x148xf32> -> vector<8x148xf32>
    %607 = arith.addf %602, %606 : vector<8x148xf32>
    %c3_501 = arith.constant 3 : index
    %c0_502 = arith.constant 0 : index
    %c0_503 = arith.constant 0 : index
    %608 = vector.load %arg12[%c3_501, %c0_502, %c0_503] : memref<25x8x8xf32, #tpu.memory_space<vmem>>, vector<1x8x8xf32>
    %609 = vector.shape_cast %608 : vector<1x8x8xf32> to vector<8x8xf32>
    %610 = vector.extract_strided_slice %591 {offsets = [0, 3], sizes = [8, 148], strides = [1, 1]} : vector<8x400xf32> to vector<8x148xf32>
    %cst_504 = arith.constant dense<0.000000e+00> : vector<8x148xf32>
    %611 = tpu.matmul %609, %610, %cst_504 {dimension_numbers = #tpu.dot_dimension_numbers<[1], [0], [0], [1], [0, 0, 1, 1], [], []>} : vector<8x8xf32>, vector<8x148xf32>, vector<8x148xf32> -> vector<8x148xf32>
    %612 = arith.addf %607, %611 : vector<8x148xf32>
    %c4_505 = arith.constant 4 : index
    %c0_506 = arith.constant 0 : index
    %c0_507 = arith.constant 0 : index
    %613 = vector.load %arg12[%c4_505, %c0_506, %c0_507] : memref<25x8x8xf32, #tpu.memory_space<vmem>>, vector<1x8x8xf32>
    %614 = vector.shape_cast %613 : vector<1x8x8xf32> to vector<8x8xf32>
    %615 = vector.extract_strided_slice %591 {offsets = [0, 4], sizes = [8, 148], strides = [1, 1]} : vector<8x400xf32> to vector<8x148xf32>
    %cst_508 = arith.constant dense<0.000000e+00> : vector<8x148xf32>
    %616 = tpu.matmul %614, %615, %cst_508 {dimension_numbers = #tpu.dot_dimension_numbers<[1], [0], [0], [1], [0, 0, 1, 1], [], []>} : vector<8x8xf32>, vector<8x148xf32>, vector<8x148xf32> -> vector<8x148xf32>
    %617 = arith.addf %612, %616 : vector<8x148xf32>
    %c5_509 = arith.constant 5 : index
    %c0_510 = arith.constant 0 : index
    %c0_511 = arith.constant 0 : index
    %618 = vector.load %arg12[%c5_509, %c0_510, %c0_511] : memref<25x8x8xf32, #tpu.memory_space<vmem>>, vector<1x8x8xf32>
    %619 = vector.shape_cast %618 : vector<1x8x8xf32> to vector<8x8xf32>
    %620 = vector.extract_strided_slice %591 {offsets = [0, 20], sizes = [8, 148], strides = [1, 1]} : vector<8x400xf32> to vector<8x148xf32>
    %cst_512 = arith.constant dense<0.000000e+00> : vector<8x148xf32>
    %621 = tpu.matmul %619, %620, %cst_512 {dimension_numbers = #tpu.dot_dimension_numbers<[1], [0], [0], [1], [0, 0, 1, 1], [], []>} : vector<8x8xf32>, vector<8x148xf32>, vector<8x148xf32> -> vector<8x148xf32>
    %622 = arith.addf %617, %621 : vector<8x148xf32>
    %c6_513 = arith.constant 6 : index
    %c0_514 = arith.constant 0 : index
    %c0_515 = arith.constant 0 : index
    %623 = vector.load %arg12[%c6_513, %c0_514, %c0_515] : memref<25x8x8xf32, #tpu.memory_space<vmem>>, vector<1x8x8xf32>
    %624 = vector.shape_cast %623 : vector<1x8x8xf32> to vector<8x8xf32>
    %625 = vector.extract_strided_slice %591 {offsets = [0, 21], sizes = [8, 148], strides = [1, 1]} : vector<8x400xf32> to vector<8x148xf32>
    %cst_516 = arith.constant dense<0.000000e+00> : vector<8x148xf32>
    %626 = tpu.matmul %624, %625, %cst_516 {dimension_numbers = #tpu.dot_dimension_numbers<[1], [0], [0], [1], [0, 0, 1, 1], [], []>} : vector<8x8xf32>, vector<8x148xf32>, vector<8x148xf32> -> vector<8x148xf32>
    %627 = arith.addf %622, %626 : vector<8x148xf32>
    %c7_517 = arith.constant 7 : index
    %c0_518 = arith.constant 0 : index
    %c0_519 = arith.constant 0 : index
    %628 = vector.load %arg12[%c7_517, %c0_518, %c0_519] : memref<25x8x8xf32, #tpu.memory_space<vmem>>, vector<1x8x8xf32>
    %629 = vector.shape_cast %628 : vector<1x8x8xf32> to vector<8x8xf32>
    %630 = vector.extract_strided_slice %591 {offsets = [0, 22], sizes = [8, 148], strides = [1, 1]} : vector<8x400xf32> to vector<8x148xf32>
    %cst_520 = arith.constant dense<0.000000e+00> : vector<8x148xf32>
    %631 = tpu.matmul %629, %630, %cst_520 {dimension_numbers = #tpu.dot_dimension_numbers<[1], [0], [0], [1], [0, 0, 1, 1], [], []>} : vector<8x8xf32>, vector<8x148xf32>, vector<8x148xf32> -> vector<8x148xf32>
    %632 = arith.addf %627, %631 : vector<8x148xf32>
    %c8_521 = arith.constant 8 : index
    %c0_522 = arith.constant 0 : index
    %c0_523 = arith.constant 0 : index
    %633 = vector.load %arg12[%c8_521, %c0_522, %c0_523] : memref<25x8x8xf32, #tpu.memory_space<vmem>>, vector<1x8x8xf32>
    %634 = vector.shape_cast %633 : vector<1x8x8xf32> to vector<8x8xf32>
    %635 = vector.extract_strided_slice %591 {offsets = [0, 23], sizes = [8, 148], strides = [1, 1]} : vector<8x400xf32> to vector<8x148xf32>
    %cst_524 = arith.constant dense<0.000000e+00> : vector<8x148xf32>
    %636 = tpu.matmul %634, %635, %cst_524 {dimension_numbers = #tpu.dot_dimension_numbers<[1], [0], [0], [1], [0, 0, 1, 1], [], []>} : vector<8x8xf32>, vector<8x148xf32>, vector<8x148xf32> -> vector<8x148xf32>
    %637 = arith.addf %632, %636 : vector<8x148xf32>
    %c9_525 = arith.constant 9 : index
    %c0_526 = arith.constant 0 : index
    %c0_527 = arith.constant 0 : index
    %638 = vector.load %arg12[%c9_525, %c0_526, %c0_527] : memref<25x8x8xf32, #tpu.memory_space<vmem>>, vector<1x8x8xf32>
    %639 = vector.shape_cast %638 : vector<1x8x8xf32> to vector<8x8xf32>
    %640 = vector.extract_strided_slice %591 {offsets = [0, 24], sizes = [8, 148], strides = [1, 1]} : vector<8x400xf32> to vector<8x148xf32>
    %cst_528 = arith.constant dense<0.000000e+00> : vector<8x148xf32>
    %641 = tpu.matmul %639, %640, %cst_528 {dimension_numbers = #tpu.dot_dimension_numbers<[1], [0], [0], [1], [0, 0, 1, 1], [], []>} : vector<8x8xf32>, vector<8x148xf32>, vector<8x148xf32> -> vector<8x148xf32>
    %642 = arith.addf %637, %641 : vector<8x148xf32>
    %c10_529 = arith.constant 10 : index
    %c0_530 = arith.constant 0 : index
    %c0_531 = arith.constant 0 : index
    %643 = vector.load %arg12[%c10_529, %c0_530, %c0_531] : memref<25x8x8xf32, #tpu.memory_space<vmem>>, vector<1x8x8xf32>
    %644 = vector.shape_cast %643 : vector<1x8x8xf32> to vector<8x8xf32>
    %645 = vector.extract_strided_slice %591 {offsets = [0, 40], sizes = [8, 148], strides = [1, 1]} : vector<8x400xf32> to vector<8x148xf32>
    %cst_532 = arith.constant dense<0.000000e+00> : vector<8x148xf32>
    %646 = tpu.matmul %644, %645, %cst_532 {dimension_numbers = #tpu.dot_dimension_numbers<[1], [0], [0], [1], [0, 0, 1, 1], [], []>} : vector<8x8xf32>, vector<8x148xf32>, vector<8x148xf32> -> vector<8x148xf32>
    %647 = arith.addf %642, %646 : vector<8x148xf32>
    %c11_533 = arith.constant 11 : index
    %c0_534 = arith.constant 0 : index
    %c0_535 = arith.constant 0 : index
    %648 = vector.load %arg12[%c11_533, %c0_534, %c0_535] : memref<25x8x8xf32, #tpu.memory_space<vmem>>, vector<1x8x8xf32>
    %649 = vector.shape_cast %648 : vector<1x8x8xf32> to vector<8x8xf32>
    %650 = vector.extract_strided_slice %591 {offsets = [0, 41], sizes = [8, 148], strides = [1, 1]} : vector<8x400xf32> to vector<8x148xf32>
    %cst_536 = arith.constant dense<0.000000e+00> : vector<8x148xf32>
    %651 = tpu.matmul %649, %650, %cst_536 {dimension_numbers = #tpu.dot_dimension_numbers<[1], [0], [0], [1], [0, 0, 1, 1], [], []>} : vector<8x8xf32>, vector<8x148xf32>, vector<8x148xf32> -> vector<8x148xf32>
    %652 = arith.addf %647, %651 : vector<8x148xf32>
    %c12_537 = arith.constant 12 : index
    %c0_538 = arith.constant 0 : index
    %c0_539 = arith.constant 0 : index
    %653 = vector.load %arg12[%c12_537, %c0_538, %c0_539] : memref<25x8x8xf32, #tpu.memory_space<vmem>>, vector<1x8x8xf32>
    %654 = vector.shape_cast %653 : vector<1x8x8xf32> to vector<8x8xf32>
    %655 = vector.extract_strided_slice %591 {offsets = [0, 42], sizes = [8, 148], strides = [1, 1]} : vector<8x400xf32> to vector<8x148xf32>
    %cst_540 = arith.constant dense<0.000000e+00> : vector<8x148xf32>
    %656 = tpu.matmul %654, %655, %cst_540 {dimension_numbers = #tpu.dot_dimension_numbers<[1], [0], [0], [1], [0, 0, 1, 1], [], []>} : vector<8x8xf32>, vector<8x148xf32>, vector<8x148xf32> -> vector<8x148xf32>
    %657 = arith.addf %652, %656 : vector<8x148xf32>
    %c13_541 = arith.constant 13 : index
    %c0_542 = arith.constant 0 : index
    %c0_543 = arith.constant 0 : index
    %658 = vector.load %arg12[%c13_541, %c0_542, %c0_543] : memref<25x8x8xf32, #tpu.memory_space<vmem>>, vector<1x8x8xf32>
    %659 = vector.shape_cast %658 : vector<1x8x8xf32> to vector<8x8xf32>
    %660 = vector.extract_strided_slice %591 {offsets = [0, 43], sizes = [8, 148], strides = [1, 1]} : vector<8x400xf32> to vector<8x148xf32>
    %cst_544 = arith.constant dense<0.000000e+00> : vector<8x148xf32>
    %661 = tpu.matmul %659, %660, %cst_544 {dimension_numbers = #tpu.dot_dimension_numbers<[1], [0], [0], [1], [0, 0, 1, 1], [], []>} : vector<8x8xf32>, vector<8x148xf32>, vector<8x148xf32> -> vector<8x148xf32>
    %662 = arith.addf %657, %661 : vector<8x148xf32>
    %c14_545 = arith.constant 14 : index
    %c0_546 = arith.constant 0 : index
    %c0_547 = arith.constant 0 : index
    %663 = vector.load %arg12[%c14_545, %c0_546, %c0_547] : memref<25x8x8xf32, #tpu.memory_space<vmem>>, vector<1x8x8xf32>
    %664 = vector.shape_cast %663 : vector<1x8x8xf32> to vector<8x8xf32>
    %665 = vector.extract_strided_slice %591 {offsets = [0, 44], sizes = [8, 148], strides = [1, 1]} : vector<8x400xf32> to vector<8x148xf32>
    %cst_548 = arith.constant dense<0.000000e+00> : vector<8x148xf32>
    %666 = tpu.matmul %664, %665, %cst_548 {dimension_numbers = #tpu.dot_dimension_numbers<[1], [0], [0], [1], [0, 0, 1, 1], [], []>} : vector<8x8xf32>, vector<8x148xf32>, vector<8x148xf32> -> vector<8x148xf32>
    %667 = arith.addf %662, %666 : vector<8x148xf32>
    %c15_549 = arith.constant 15 : index
    %c0_550 = arith.constant 0 : index
    %c0_551 = arith.constant 0 : index
    %668 = vector.load %arg12[%c15_549, %c0_550, %c0_551] : memref<25x8x8xf32, #tpu.memory_space<vmem>>, vector<1x8x8xf32>
    %669 = vector.shape_cast %668 : vector<1x8x8xf32> to vector<8x8xf32>
    %670 = vector.extract_strided_slice %591 {offsets = [0, 60], sizes = [8, 148], strides = [1, 1]} : vector<8x400xf32> to vector<8x148xf32>
    %cst_552 = arith.constant dense<0.000000e+00> : vector<8x148xf32>
    %671 = tpu.matmul %669, %670, %cst_552 {dimension_numbers = #tpu.dot_dimension_numbers<[1], [0], [0], [1], [0, 0, 1, 1], [], []>} : vector<8x8xf32>, vector<8x148xf32>, vector<8x148xf32> -> vector<8x148xf32>
    %672 = arith.addf %667, %671 : vector<8x148xf32>
    %c16_553 = arith.constant 16 : index
    %c0_554 = arith.constant 0 : index
    %c0_555 = arith.constant 0 : index
    %673 = vector.load %arg12[%c16_553, %c0_554, %c0_555] : memref<25x8x8xf32, #tpu.memory_space<vmem>>, vector<1x8x8xf32>
    %674 = vector.shape_cast %673 : vector<1x8x8xf32> to vector<8x8xf32>
    %675 = vector.extract_strided_slice %591 {offsets = [0, 61], sizes = [8, 148], strides = [1, 1]} : vector<8x400xf32> to vector<8x148xf32>
    %cst_556 = arith.constant dense<0.000000e+00> : vector<8x148xf32>
    %676 = tpu.matmul %674, %675, %cst_556 {dimension_numbers = #tpu.dot_dimension_numbers<[1], [0], [0], [1], [0, 0, 1, 1], [], []>} : vector<8x8xf32>, vector<8x148xf32>, vector<8x148xf32> -> vector<8x148xf32>
    %677 = arith.addf %672, %676 : vector<8x148xf32>
    %c17_557 = arith.constant 17 : index
    %c0_558 = arith.constant 0 : index
    %c0_559 = arith.constant 0 : index
    %678 = vector.load %arg12[%c17_557, %c0_558, %c0_559] : memref<25x8x8xf32, #tpu.memory_space<vmem>>, vector<1x8x8xf32>
    %679 = vector.shape_cast %678 : vector<1x8x8xf32> to vector<8x8xf32>
    %680 = vector.extract_strided_slice %591 {offsets = [0, 62], sizes = [8, 148], strides = [1, 1]} : vector<8x400xf32> to vector<8x148xf32>
    %cst_560 = arith.constant dense<0.000000e+00> : vector<8x148xf32>
    %681 = tpu.matmul %679, %680, %cst_560 {dimension_numbers = #tpu.dot_dimension_numbers<[1], [0], [0], [1], [0, 0, 1, 1], [], []>} : vector<8x8xf32>, vector<8x148xf32>, vector<8x148xf32> -> vector<8x148xf32>
    %682 = arith.addf %677, %681 : vector<8x148xf32>
    %c18_561 = arith.constant 18 : index
    %c0_562 = arith.constant 0 : index
    %c0_563 = arith.constant 0 : index
    %683 = vector.load %arg12[%c18_561, %c0_562, %c0_563] : memref<25x8x8xf32, #tpu.memory_space<vmem>>, vector<1x8x8xf32>
    %684 = vector.shape_cast %683 : vector<1x8x8xf32> to vector<8x8xf32>
    %685 = vector.extract_strided_slice %591 {offsets = [0, 63], sizes = [8, 148], strides = [1, 1]} : vector<8x400xf32> to vector<8x148xf32>
    %cst_564 = arith.constant dense<0.000000e+00> : vector<8x148xf32>
    %686 = tpu.matmul %684, %685, %cst_564 {dimension_numbers = #tpu.dot_dimension_numbers<[1], [0], [0], [1], [0, 0, 1, 1], [], []>} : vector<8x8xf32>, vector<8x148xf32>, vector<8x148xf32> -> vector<8x148xf32>
    %687 = arith.addf %682, %686 : vector<8x148xf32>
    %c19_565 = arith.constant 19 : index
    %c0_566 = arith.constant 0 : index
    %c0_567 = arith.constant 0 : index
    %688 = vector.load %arg12[%c19_565, %c0_566, %c0_567] : memref<25x8x8xf32, #tpu.memory_space<vmem>>, vector<1x8x8xf32>
    %689 = vector.shape_cast %688 : vector<1x8x8xf32> to vector<8x8xf32>
    %690 = vector.extract_strided_slice %591 {offsets = [0, 64], sizes = [8, 148], strides = [1, 1]} : vector<8x400xf32> to vector<8x148xf32>
    %cst_568 = arith.constant dense<0.000000e+00> : vector<8x148xf32>
    %691 = tpu.matmul %689, %690, %cst_568 {dimension_numbers = #tpu.dot_dimension_numbers<[1], [0], [0], [1], [0, 0, 1, 1], [], []>} : vector<8x8xf32>, vector<8x148xf32>, vector<8x148xf32> -> vector<8x148xf32>
    %692 = arith.addf %687, %691 : vector<8x148xf32>
    %c20_569 = arith.constant 20 : index
    %c0_570 = arith.constant 0 : index
    %c0_571 = arith.constant 0 : index
    %693 = vector.load %arg12[%c20_569, %c0_570, %c0_571] : memref<25x8x8xf32, #tpu.memory_space<vmem>>, vector<1x8x8xf32>
    %694 = vector.shape_cast %693 : vector<1x8x8xf32> to vector<8x8xf32>
    %695 = vector.extract_strided_slice %591 {offsets = [0, 80], sizes = [8, 148], strides = [1, 1]} : vector<8x400xf32> to vector<8x148xf32>
    %cst_572 = arith.constant dense<0.000000e+00> : vector<8x148xf32>
    %696 = tpu.matmul %694, %695, %cst_572 {dimension_numbers = #tpu.dot_dimension_numbers<[1], [0], [0], [1], [0, 0, 1, 1], [], []>} : vector<8x8xf32>, vector<8x148xf32>, vector<8x148xf32> -> vector<8x148xf32>
    %697 = arith.addf %692, %696 : vector<8x148xf32>
    %c21_573 = arith.constant 21 : index
    %c0_574 = arith.constant 0 : index
    %c0_575 = arith.constant 0 : index
    %698 = vector.load %arg12[%c21_573, %c0_574, %c0_575] : memref<25x8x8xf32, #tpu.memory_space<vmem>>, vector<1x8x8xf32>
    %699 = vector.shape_cast %698 : vector<1x8x8xf32> to vector<8x8xf32>
    %700 = vector.extract_strided_slice %591 {offsets = [0, 81], sizes = [8, 148], strides = [1, 1]} : vector<8x400xf32> to vector<8x148xf32>
    %cst_576 = arith.constant dense<0.000000e+00> : vector<8x148xf32>
    %701 = tpu.matmul %699, %700, %cst_576 {dimension_numbers = #tpu.dot_dimension_numbers<[1], [0], [0], [1], [0, 0, 1, 1], [], []>} : vector<8x8xf32>, vector<8x148xf32>, vector<8x148xf32> -> vector<8x148xf32>
    %702 = arith.addf %697, %701 : vector<8x148xf32>
    %c22_577 = arith.constant 22 : index
    %c0_578 = arith.constant 0 : index
    %c0_579 = arith.constant 0 : index
    %703 = vector.load %arg12[%c22_577, %c0_578, %c0_579] : memref<25x8x8xf32, #tpu.memory_space<vmem>>, vector<1x8x8xf32>
    %704 = vector.shape_cast %703 : vector<1x8x8xf32> to vector<8x8xf32>
    %705 = vector.extract_strided_slice %591 {offsets = [0, 82], sizes = [8, 148], strides = [1, 1]} : vector<8x400xf32> to vector<8x148xf32>
    %cst_580 = arith.constant dense<0.000000e+00> : vector<8x148xf32>
    %706 = tpu.matmul %704, %705, %cst_580 {dimension_numbers = #tpu.dot_dimension_numbers<[1], [0], [0], [1], [0, 0, 1, 1], [], []>} : vector<8x8xf32>, vector<8x148xf32>, vector<8x148xf32> -> vector<8x148xf32>
    %707 = arith.addf %702, %706 : vector<8x148xf32>
    %c23_581 = arith.constant 23 : index
    %c0_582 = arith.constant 0 : index
    %c0_583 = arith.constant 0 : index
    %708 = vector.load %arg12[%c23_581, %c0_582, %c0_583] : memref<25x8x8xf32, #tpu.memory_space<vmem>>, vector<1x8x8xf32>
    %709 = vector.shape_cast %708 : vector<1x8x8xf32> to vector<8x8xf32>
    %710 = vector.extract_strided_slice %591 {offsets = [0, 83], sizes = [8, 148], strides = [1, 1]} : vector<8x400xf32> to vector<8x148xf32>
    %cst_584 = arith.constant dense<0.000000e+00> : vector<8x148xf32>
    %711 = tpu.matmul %709, %710, %cst_584 {dimension_numbers = #tpu.dot_dimension_numbers<[1], [0], [0], [1], [0, 0, 1, 1], [], []>} : vector<8x8xf32>, vector<8x148xf32>, vector<8x148xf32> -> vector<8x148xf32>
    %712 = arith.addf %707, %711 : vector<8x148xf32>
    %c24_585 = arith.constant 24 : index
    %c0_586 = arith.constant 0 : index
    %c0_587 = arith.constant 0 : index
    %713 = vector.load %arg12[%c24_585, %c0_586, %c0_587] : memref<25x8x8xf32, #tpu.memory_space<vmem>>, vector<1x8x8xf32>
    %714 = vector.shape_cast %713 : vector<1x8x8xf32> to vector<8x8xf32>
    %715 = vector.extract_strided_slice %591 {offsets = [0, 84], sizes = [8, 148], strides = [1, 1]} : vector<8x400xf32> to vector<8x148xf32>
    %cst_588 = arith.constant dense<0.000000e+00> : vector<8x148xf32>
    %716 = tpu.matmul %714, %715, %cst_588 {dimension_numbers = #tpu.dot_dimension_numbers<[1], [0], [0], [1], [0, 0, 1, 1], [], []>} : vector<8x8xf32>, vector<8x148xf32>, vector<8x148xf32> -> vector<8x148xf32>
    %717 = arith.addf %712, %716 : vector<8x148xf32>
    %c0_589 = arith.constant 0 : index
    %c0_590 = arith.constant 0 : index
    %718 = vector.load %arg13[%c0_589, %c0_590] : memref<8x1xf32, #tpu.memory_space<vmem>>, vector<8x1xf32>
    %719 = vector.broadcast %718 : vector<8x1xf32> to vector<8x148xf32>
    %720 = arith.addf %717, %719 : vector<8x148xf32>
    %cst_591 = arith.constant 0.000000e+00 : f32
    %721 = vector.broadcast %cst_591 : f32 to vector<8x148xf32>
    %722 = arith.maximumf %720, %721 : vector<8x148xf32>
    %cst_592 = arith.constant 0.000000e+00 : f32
    %723 = vector.broadcast %cst_592 : f32 to vector<8x400xf32>
    %c0_593 = arith.constant 0 : index
    %c0_594 = arith.constant 0 : index
    %724 = vector.load %arg22[%c0_593, %c0_594] : memref<8x400xf32, #tpu.memory_space<vmem>>, vector<8x400xf32>
    tpu.vector_store %arg22[%c0_593, %c0_594], %723 {strides = array<i32>} : memref<8x400xf32, #tpu.memory_space<vmem>>, vector<8x400xf32>,
    %725 = vector.extract_strided_slice %722 {offsets = [0, 0], sizes = [8, 8], strides = [1, 1]} : vector<8x148xf32> to vector<8x8xf32>
    %c0_595 = arith.constant 0 : index
    %c84_596 = arith.constant 84 : index
    %726 = vector.load %arg22[%c0_595, %c84_596] : memref<8x400xf32, #tpu.memory_space<vmem>>, vector<8x8xf32>
    tpu.vector_store %arg22[%c0_595, %c84_596], %725 {strides = array<i32>} : memref<8x400xf32, #tpu.memory_space<vmem>>, vector<8x8xf32>,
    %727 = vector.extract_strided_slice %722 {offsets = [0, 20], sizes = [8, 8], strides = [1, 1]} : vector<8x148xf32> to vector<8x8xf32>
    %c0_597 = arith.constant 0 : index
    %c104_598 = arith.constant 104 : index
    %728 = vector.load %arg22[%c0_597, %c104_598] : memref<8x400xf32, #tpu.memory_space<vmem>>, vector<8x8xf32>
    tpu.vector_store %arg22[%c0_597, %c104_598], %727 {strides = array<i32>} : memref<8x400xf32, #tpu.memory_space<vmem>>, vector<8x8xf32>,
    %729 = vector.extract_strided_slice %722 {offsets = [0, 40], sizes = [8, 8], strides = [1, 1]} : vector<8x148xf32> to vector<8x8xf32>
    %c0_599 = arith.constant 0 : index
    %c124_600 = arith.constant 124 : index
    %730 = vector.load %arg22[%c0_599, %c124_600] : memref<8x400xf32, #tpu.memory_space<vmem>>, vector<8x8xf32>
    tpu.vector_store %arg22[%c0_599, %c124_600], %729 {strides = array<i32>} : memref<8x400xf32, #tpu.memory_space<vmem>>, vector<8x8xf32>,
    %731 = vector.extract_strided_slice %722 {offsets = [0, 60], sizes = [8, 8], strides = [1, 1]} : vector<8x148xf32> to vector<8x8xf32>
    %c0_601 = arith.constant 0 : index
    %c144_602 = arith.constant 144 : index
    %732 = vector.load %arg22[%c0_601, %c144_602] : memref<8x400xf32, #tpu.memory_space<vmem>>, vector<8x8xf32>
    tpu.vector_store %arg22[%c0_601, %c144_602], %731 {strides = array<i32>} : memref<8x400xf32, #tpu.memory_space<vmem>>, vector<8x8xf32>,
    %733 = vector.extract_strided_slice %722 {offsets = [0, 80], sizes = [8, 8], strides = [1, 1]} : vector<8x148xf32> to vector<8x8xf32>
    %c0_603 = arith.constant 0 : index
    %c164 = arith.constant 164 : index
    %734 = vector.load %arg22[%c0_603, %c164] : memref<8x400xf32, #tpu.memory_space<vmem>>, vector<8x8xf32>
    tpu.vector_store %arg22[%c0_603, %c164], %733 {strides = array<i32>} : memref<8x400xf32, #tpu.memory_space<vmem>>, vector<8x8xf32>,
    %735 = vector.extract_strided_slice %722 {offsets = [0, 100], sizes = [8, 8], strides = [1, 1]} : vector<8x148xf32> to vector<8x8xf32>
    %c0_604 = arith.constant 0 : index
    %c184 = arith.constant 184 : index
    %736 = vector.load %arg22[%c0_604, %c184] : memref<8x400xf32, #tpu.memory_space<vmem>>, vector<8x8xf32>
    tpu.vector_store %arg22[%c0_604, %c184], %735 {strides = array<i32>} : memref<8x400xf32, #tpu.memory_space<vmem>>, vector<8x8xf32>,
    %737 = vector.extract_strided_slice %722 {offsets = [0, 120], sizes = [8, 8], strides = [1, 1]} : vector<8x148xf32> to vector<8x8xf32>
    %c0_605 = arith.constant 0 : index
    %c204 = arith.constant 204 : index
    %738 = vector.load %arg22[%c0_605, %c204] : memref<8x400xf32, #tpu.memory_space<vmem>>, vector<8x8xf32>
    tpu.vector_store %arg22[%c0_605, %c204], %737 {strides = array<i32>} : memref<8x400xf32, #tpu.memory_space<vmem>>, vector<8x8xf32>,
    %739 = vector.extract_strided_slice %722 {offsets = [0, 140], sizes = [8, 8], strides = [1, 1]} : vector<8x148xf32> to vector<8x8xf32>
    %c0_606 = arith.constant 0 : index
    %c224_607 = arith.constant 224 : index
    %740 = vector.load %arg22[%c0_606, %c224_607] : memref<8x400xf32, #tpu.memory_space<vmem>>, vector<8x8xf32>
    tpu.vector_store %arg22[%c0_606, %c224_607], %739 {strides = array<i32>} : memref<8x400xf32, #tpu.memory_space<vmem>>, vector<8x8xf32>,
    %c0_608 = arith.constant 0 : index
    %c0_609 = arith.constant 0 : index
    %741 = vector.load %arg22[%c0_608, %c0_609] : memref<8x400xf32, #tpu.memory_space<vmem>>, vector<8x400xf32>
    %cst_610 = arith.constant 0.000000e+00 : f32
    %742 = vector.broadcast %cst_610 : f32 to vector<8x232xf32>
    %c0_611 = arith.constant 0 : index
    %c0_612 = arith.constant 0 : index
    %c0_613 = arith.constant 0 : index
    %743 = vector.load %arg14[%c0_611, %c0_612, %c0_613] : memref<25x8x8xf32, #tpu.memory_space<vmem>>, vector<1x8x8xf32>
    %744 = vector.shape_cast %743 : vector<1x8x8xf32> to vector<8x8xf32>
    %745 = vector.extract_strided_slice %741 {offsets = [0, 0], sizes = [8, 232], strides = [1, 1]} : vector<8x400xf32> to vector<8x232xf32>
    %cst_614 = arith.constant dense<0.000000e+00> : vector<8x232xf32>
    %746 = tpu.matmul %744, %745, %cst_614 {dimension_numbers = #tpu.dot_dimension_numbers<[1], [0], [0], [1], [0, 0, 1, 1], [], []>} : vector<8x8xf32>, vector<8x232xf32>, vector<8x232xf32> -> vector<8x232xf32>
    %747 = arith.addf %742, %746 : vector<8x232xf32>
    %c1_615 = arith.constant 1 : index
    %c0_616 = arith.constant 0 : index
    %c0_617 = arith.constant 0 : index
    %748 = vector.load %arg14[%c1_615, %c0_616, %c0_617] : memref<25x8x8xf32, #tpu.memory_space<vmem>>, vector<1x8x8xf32>
    %749 = vector.shape_cast %748 : vector<1x8x8xf32> to vector<8x8xf32>
    %750 = vector.extract_strided_slice %741 {offsets = [0, 1], sizes = [8, 232], strides = [1, 1]} : vector<8x400xf32> to vector<8x232xf32>
    %cst_618 = arith.constant dense<0.000000e+00> : vector<8x232xf32>
    %751 = tpu.matmul %749, %750, %cst_618 {dimension_numbers = #tpu.dot_dimension_numbers<[1], [0], [0], [1], [0, 0, 1, 1], [], []>} : vector<8x8xf32>, vector<8x232xf32>, vector<8x232xf32> -> vector<8x232xf32>
    %752 = arith.addf %747, %751 : vector<8x232xf32>
    %c2_619 = arith.constant 2 : index
    %c0_620 = arith.constant 0 : index
    %c0_621 = arith.constant 0 : index
    %753 = vector.load %arg14[%c2_619, %c0_620, %c0_621] : memref<25x8x8xf32, #tpu.memory_space<vmem>>, vector<1x8x8xf32>
    %754 = vector.shape_cast %753 : vector<1x8x8xf32> to vector<8x8xf32>
    %755 = vector.extract_strided_slice %741 {offsets = [0, 2], sizes = [8, 232], strides = [1, 1]} : vector<8x400xf32> to vector<8x232xf32>
    %cst_622 = arith.constant dense<0.000000e+00> : vector<8x232xf32>
    %756 = tpu.matmul %754, %755, %cst_622 {dimension_numbers = #tpu.dot_dimension_numbers<[1], [0], [0], [1], [0, 0, 1, 1], [], []>} : vector<8x8xf32>, vector<8x232xf32>, vector<8x232xf32> -> vector<8x232xf32>
    %757 = arith.addf %752, %756 : vector<8x232xf32>
    %c3_623 = arith.constant 3 : index
    %c0_624 = arith.constant 0 : index
    %c0_625 = arith.constant 0 : index
    %758 = vector.load %arg14[%c3_623, %c0_624, %c0_625] : memref<25x8x8xf32, #tpu.memory_space<vmem>>, vector<1x8x8xf32>
    %759 = vector.shape_cast %758 : vector<1x8x8xf32> to vector<8x8xf32>
    %760 = vector.extract_strided_slice %741 {offsets = [0, 3], sizes = [8, 232], strides = [1, 1]} : vector<8x400xf32> to vector<8x232xf32>
    %cst_626 = arith.constant dense<0.000000e+00> : vector<8x232xf32>
    %761 = tpu.matmul %759, %760, %cst_626 {dimension_numbers = #tpu.dot_dimension_numbers<[1], [0], [0], [1], [0, 0, 1, 1], [], []>} : vector<8x8xf32>, vector<8x232xf32>, vector<8x232xf32> -> vector<8x232xf32>
    %762 = arith.addf %757, %761 : vector<8x232xf32>
    %c4_627 = arith.constant 4 : index
    %c0_628 = arith.constant 0 : index
    %c0_629 = arith.constant 0 : index
    %763 = vector.load %arg14[%c4_627, %c0_628, %c0_629] : memref<25x8x8xf32, #tpu.memory_space<vmem>>, vector<1x8x8xf32>
    %764 = vector.shape_cast %763 : vector<1x8x8xf32> to vector<8x8xf32>
    %765 = vector.extract_strided_slice %741 {offsets = [0, 4], sizes = [8, 232], strides = [1, 1]} : vector<8x400xf32> to vector<8x232xf32>
    %cst_630 = arith.constant dense<0.000000e+00> : vector<8x232xf32>
    %766 = tpu.matmul %764, %765, %cst_630 {dimension_numbers = #tpu.dot_dimension_numbers<[1], [0], [0], [1], [0, 0, 1, 1], [], []>} : vector<8x8xf32>, vector<8x232xf32>, vector<8x232xf32> -> vector<8x232xf32>
    %767 = arith.addf %762, %766 : vector<8x232xf32>
    %c5_631 = arith.constant 5 : index
    %c0_632 = arith.constant 0 : index
    %c0_633 = arith.constant 0 : index
    %768 = vector.load %arg14[%c5_631, %c0_632, %c0_633] : memref<25x8x8xf32, #tpu.memory_space<vmem>>, vector<1x8x8xf32>
    %769 = vector.shape_cast %768 : vector<1x8x8xf32> to vector<8x8xf32>
    %770 = vector.extract_strided_slice %741 {offsets = [0, 20], sizes = [8, 232], strides = [1, 1]} : vector<8x400xf32> to vector<8x232xf32>
    %cst_634 = arith.constant dense<0.000000e+00> : vector<8x232xf32>
    %771 = tpu.matmul %769, %770, %cst_634 {dimension_numbers = #tpu.dot_dimension_numbers<[1], [0], [0], [1], [0, 0, 1, 1], [], []>} : vector<8x8xf32>, vector<8x232xf32>, vector<8x232xf32> -> vector<8x232xf32>
    %772 = arith.addf %767, %771 : vector<8x232xf32>
    %c6_635 = arith.constant 6 : index
    %c0_636 = arith.constant 0 : index
    %c0_637 = arith.constant 0 : index
    %773 = vector.load %arg14[%c6_635, %c0_636, %c0_637] : memref<25x8x8xf32, #tpu.memory_space<vmem>>, vector<1x8x8xf32>
    %774 = vector.shape_cast %773 : vector<1x8x8xf32> to vector<8x8xf32>
    %775 = vector.extract_strided_slice %741 {offsets = [0, 21], sizes = [8, 232], strides = [1, 1]} : vector<8x400xf32> to vector<8x232xf32>
    %cst_638 = arith.constant dense<0.000000e+00> : vector<8x232xf32>
    %776 = tpu.matmul %774, %775, %cst_638 {dimension_numbers = #tpu.dot_dimension_numbers<[1], [0], [0], [1], [0, 0, 1, 1], [], []>} : vector<8x8xf32>, vector<8x232xf32>, vector<8x232xf32> -> vector<8x232xf32>
    %777 = arith.addf %772, %776 : vector<8x232xf32>
    %c7_639 = arith.constant 7 : index
    %c0_640 = arith.constant 0 : index
    %c0_641 = arith.constant 0 : index
    %778 = vector.load %arg14[%c7_639, %c0_640, %c0_641] : memref<25x8x8xf32, #tpu.memory_space<vmem>>, vector<1x8x8xf32>
    %779 = vector.shape_cast %778 : vector<1x8x8xf32> to vector<8x8xf32>
    %780 = vector.extract_strided_slice %741 {offsets = [0, 22], sizes = [8, 232], strides = [1, 1]} : vector<8x400xf32> to vector<8x232xf32>
    %cst_642 = arith.constant dense<0.000000e+00> : vector<8x232xf32>
    %781 = tpu.matmul %779, %780, %cst_642 {dimension_numbers = #tpu.dot_dimension_numbers<[1], [0], [0], [1], [0, 0, 1, 1], [], []>} : vector<8x8xf32>, vector<8x232xf32>, vector<8x232xf32> -> vector<8x232xf32>
    %782 = arith.addf %777, %781 : vector<8x232xf32>
    %c8_643 = arith.constant 8 : index
    %c0_644 = arith.constant 0 : index
    %c0_645 = arith.constant 0 : index
    %783 = vector.load %arg14[%c8_643, %c0_644, %c0_645] : memref<25x8x8xf32, #tpu.memory_space<vmem>>, vector<1x8x8xf32>
    %784 = vector.shape_cast %783 : vector<1x8x8xf32> to vector<8x8xf32>
    %785 = vector.extract_strided_slice %741 {offsets = [0, 23], sizes = [8, 232], strides = [1, 1]} : vector<8x400xf32> to vector<8x232xf32>
    %cst_646 = arith.constant dense<0.000000e+00> : vector<8x232xf32>
    %786 = tpu.matmul %784, %785, %cst_646 {dimension_numbers = #tpu.dot_dimension_numbers<[1], [0], [0], [1], [0, 0, 1, 1], [], []>} : vector<8x8xf32>, vector<8x232xf32>, vector<8x232xf32> -> vector<8x232xf32>
    %787 = arith.addf %782, %786 : vector<8x232xf32>
    %c9_647 = arith.constant 9 : index
    %c0_648 = arith.constant 0 : index
    %c0_649 = arith.constant 0 : index
    %788 = vector.load %arg14[%c9_647, %c0_648, %c0_649] : memref<25x8x8xf32, #tpu.memory_space<vmem>>, vector<1x8x8xf32>
    %789 = vector.shape_cast %788 : vector<1x8x8xf32> to vector<8x8xf32>
    %790 = vector.extract_strided_slice %741 {offsets = [0, 24], sizes = [8, 232], strides = [1, 1]} : vector<8x400xf32> to vector<8x232xf32>
    %cst_650 = arith.constant dense<0.000000e+00> : vector<8x232xf32>
    %791 = tpu.matmul %789, %790, %cst_650 {dimension_numbers = #tpu.dot_dimension_numbers<[1], [0], [0], [1], [0, 0, 1, 1], [], []>} : vector<8x8xf32>, vector<8x232xf32>, vector<8x232xf32> -> vector<8x232xf32>
    %792 = arith.addf %787, %791 : vector<8x232xf32>
    %c10_651 = arith.constant 10 : index
    %c0_652 = arith.constant 0 : index
    %c0_653 = arith.constant 0 : index
    %793 = vector.load %arg14[%c10_651, %c0_652, %c0_653] : memref<25x8x8xf32, #tpu.memory_space<vmem>>, vector<1x8x8xf32>
    %794 = vector.shape_cast %793 : vector<1x8x8xf32> to vector<8x8xf32>
    %795 = vector.extract_strided_slice %741 {offsets = [0, 40], sizes = [8, 232], strides = [1, 1]} : vector<8x400xf32> to vector<8x232xf32>
    %cst_654 = arith.constant dense<0.000000e+00> : vector<8x232xf32>
    %796 = tpu.matmul %794, %795, %cst_654 {dimension_numbers = #tpu.dot_dimension_numbers<[1], [0], [0], [1], [0, 0, 1, 1], [], []>} : vector<8x8xf32>, vector<8x232xf32>, vector<8x232xf32> -> vector<8x232xf32>
    %797 = arith.addf %792, %796 : vector<8x232xf32>
    %c11_655 = arith.constant 11 : index
    %c0_656 = arith.constant 0 : index
    %c0_657 = arith.constant 0 : index
    %798 = vector.load %arg14[%c11_655, %c0_656, %c0_657] : memref<25x8x8xf32, #tpu.memory_space<vmem>>, vector<1x8x8xf32>
    %799 = vector.shape_cast %798 : vector<1x8x8xf32> to vector<8x8xf32>
    %800 = vector.extract_strided_slice %741 {offsets = [0, 41], sizes = [8, 232], strides = [1, 1]} : vector<8x400xf32> to vector<8x232xf32>
    %cst_658 = arith.constant dense<0.000000e+00> : vector<8x232xf32>
    %801 = tpu.matmul %799, %800, %cst_658 {dimension_numbers = #tpu.dot_dimension_numbers<[1], [0], [0], [1], [0, 0, 1, 1], [], []>} : vector<8x8xf32>, vector<8x232xf32>, vector<8x232xf32> -> vector<8x232xf32>
    %802 = arith.addf %797, %801 : vector<8x232xf32>
    %c12_659 = arith.constant 12 : index
    %c0_660 = arith.constant 0 : index
    %c0_661 = arith.constant 0 : index
    %803 = vector.load %arg14[%c12_659, %c0_660, %c0_661] : memref<25x8x8xf32, #tpu.memory_space<vmem>>, vector<1x8x8xf32>
    %804 = vector.shape_cast %803 : vector<1x8x8xf32> to vector<8x8xf32>
    %805 = vector.extract_strided_slice %741 {offsets = [0, 42], sizes = [8, 232], strides = [1, 1]} : vector<8x400xf32> to vector<8x232xf32>
    %cst_662 = arith.constant dense<0.000000e+00> : vector<8x232xf32>
    %806 = tpu.matmul %804, %805, %cst_662 {dimension_numbers = #tpu.dot_dimension_numbers<[1], [0], [0], [1], [0, 0, 1, 1], [], []>} : vector<8x8xf32>, vector<8x232xf32>, vector<8x232xf32> -> vector<8x232xf32>
    %807 = arith.addf %802, %806 : vector<8x232xf32>
    %c13_663 = arith.constant 13 : index
    %c0_664 = arith.constant 0 : index
    %c0_665 = arith.constant 0 : index
    %808 = vector.load %arg14[%c13_663, %c0_664, %c0_665] : memref<25x8x8xf32, #tpu.memory_space<vmem>>, vector<1x8x8xf32>
    %809 = vector.shape_cast %808 : vector<1x8x8xf32> to vector<8x8xf32>
    %810 = vector.extract_strided_slice %741 {offsets = [0, 43], sizes = [8, 232], strides = [1, 1]} : vector<8x400xf32> to vector<8x232xf32>
    %cst_666 = arith.constant dense<0.000000e+00> : vector<8x232xf32>
    %811 = tpu.matmul %809, %810, %cst_666 {dimension_numbers = #tpu.dot_dimension_numbers<[1], [0], [0], [1], [0, 0, 1, 1], [], []>} : vector<8x8xf32>, vector<8x232xf32>, vector<8x232xf32> -> vector<8x232xf32>
    %812 = arith.addf %807, %811 : vector<8x232xf32>
    %c14_667 = arith.constant 14 : index
    %c0_668 = arith.constant 0 : index
    %c0_669 = arith.constant 0 : index
    %813 = vector.load %arg14[%c14_667, %c0_668, %c0_669] : memref<25x8x8xf32, #tpu.memory_space<vmem>>, vector<1x8x8xf32>
    %814 = vector.shape_cast %813 : vector<1x8x8xf32> to vector<8x8xf32>
    %815 = vector.extract_strided_slice %741 {offsets = [0, 44], sizes = [8, 232], strides = [1, 1]} : vector<8x400xf32> to vector<8x232xf32>
    %cst_670 = arith.constant dense<0.000000e+00> : vector<8x232xf32>
    %816 = tpu.matmul %814, %815, %cst_670 {dimension_numbers = #tpu.dot_dimension_numbers<[1], [0], [0], [1], [0, 0, 1, 1], [], []>} : vector<8x8xf32>, vector<8x232xf32>, vector<8x232xf32> -> vector<8x232xf32>
    %817 = arith.addf %812, %816 : vector<8x232xf32>
    %c15_671 = arith.constant 15 : index
    %c0_672 = arith.constant 0 : index
    %c0_673 = arith.constant 0 : index
    %818 = vector.load %arg14[%c15_671, %c0_672, %c0_673] : memref<25x8x8xf32, #tpu.memory_space<vmem>>, vector<1x8x8xf32>
    %819 = vector.shape_cast %818 : vector<1x8x8xf32> to vector<8x8xf32>
    %820 = vector.extract_strided_slice %741 {offsets = [0, 60], sizes = [8, 232], strides = [1, 1]} : vector<8x400xf32> to vector<8x232xf32>
    %cst_674 = arith.constant dense<0.000000e+00> : vector<8x232xf32>
    %821 = tpu.matmul %819, %820, %cst_674 {dimension_numbers = #tpu.dot_dimension_numbers<[1], [0], [0], [1], [0, 0, 1, 1], [], []>} : vector<8x8xf32>, vector<8x232xf32>, vector<8x232xf32> -> vector<8x232xf32>
    %822 = arith.addf %817, %821 : vector<8x232xf32>
    %c16_675 = arith.constant 16 : index
    %c0_676 = arith.constant 0 : index
    %c0_677 = arith.constant 0 : index
    %823 = vector.load %arg14[%c16_675, %c0_676, %c0_677] : memref<25x8x8xf32, #tpu.memory_space<vmem>>, vector<1x8x8xf32>
    %824 = vector.shape_cast %823 : vector<1x8x8xf32> to vector<8x8xf32>
    %825 = vector.extract_strided_slice %741 {offsets = [0, 61], sizes = [8, 232], strides = [1, 1]} : vector<8x400xf32> to vector<8x232xf32>
    %cst_678 = arith.constant dense<0.000000e+00> : vector<8x232xf32>
    %826 = tpu.matmul %824, %825, %cst_678 {dimension_numbers = #tpu.dot_dimension_numbers<[1], [0], [0], [1], [0, 0, 1, 1], [], []>} : vector<8x8xf32>, vector<8x232xf32>, vector<8x232xf32> -> vector<8x232xf32>
    %827 = arith.addf %822, %826 : vector<8x232xf32>
    %c17_679 = arith.constant 17 : index
    %c0_680 = arith.constant 0 : index
    %c0_681 = arith.constant 0 : index
    %828 = vector.load %arg14[%c17_679, %c0_680, %c0_681] : memref<25x8x8xf32, #tpu.memory_space<vmem>>, vector<1x8x8xf32>
    %829 = vector.shape_cast %828 : vector<1x8x8xf32> to vector<8x8xf32>
    %830 = vector.extract_strided_slice %741 {offsets = [0, 62], sizes = [8, 232], strides = [1, 1]} : vector<8x400xf32> to vector<8x232xf32>
    %cst_682 = arith.constant dense<0.000000e+00> : vector<8x232xf32>
    %831 = tpu.matmul %829, %830, %cst_682 {dimension_numbers = #tpu.dot_dimension_numbers<[1], [0], [0], [1], [0, 0, 1, 1], [], []>} : vector<8x8xf32>, vector<8x232xf32>, vector<8x232xf32> -> vector<8x232xf32>
    %832 = arith.addf %827, %831 : vector<8x232xf32>
    %c18_683 = arith.constant 18 : index
    %c0_684 = arith.constant 0 : index
    %c0_685 = arith.constant 0 : index
    %833 = vector.load %arg14[%c18_683, %c0_684, %c0_685] : memref<25x8x8xf32, #tpu.memory_space<vmem>>, vector<1x8x8xf32>
    %834 = vector.shape_cast %833 : vector<1x8x8xf32> to vector<8x8xf32>
    %835 = vector.extract_strided_slice %741 {offsets = [0, 63], sizes = [8, 232], strides = [1, 1]} : vector<8x400xf32> to vector<8x232xf32>
    %cst_686 = arith.constant dense<0.000000e+00> : vector<8x232xf32>
    %836 = tpu.matmul %834, %835, %cst_686 {dimension_numbers = #tpu.dot_dimension_numbers<[1], [0], [0], [1], [0, 0, 1, 1], [], []>} : vector<8x8xf32>, vector<8x232xf32>, vector<8x232xf32> -> vector<8x232xf32>
    %837 = arith.addf %832, %836 : vector<8x232xf32>
    %c19_687 = arith.constant 19 : index
    %c0_688 = arith.constant 0 : index
    %c0_689 = arith.constant 0 : index
    %838 = vector.load %arg14[%c19_687, %c0_688, %c0_689] : memref<25x8x8xf32, #tpu.memory_space<vmem>>, vector<1x8x8xf32>
    %839 = vector.shape_cast %838 : vector<1x8x8xf32> to vector<8x8xf32>
    %840 = vector.extract_strided_slice %741 {offsets = [0, 64], sizes = [8, 232], strides = [1, 1]} : vector<8x400xf32> to vector<8x232xf32>
    %cst_690 = arith.constant dense<0.000000e+00> : vector<8x232xf32>
    %841 = tpu.matmul %839, %840, %cst_690 {dimension_numbers = #tpu.dot_dimension_numbers<[1], [0], [0], [1], [0, 0, 1, 1], [], []>} : vector<8x8xf32>, vector<8x232xf32>, vector<8x232xf32> -> vector<8x232xf32>
    %842 = arith.addf %837, %841 : vector<8x232xf32>
    %c20_691 = arith.constant 20 : index
    %c0_692 = arith.constant 0 : index
    %c0_693 = arith.constant 0 : index
    %843 = vector.load %arg14[%c20_691, %c0_692, %c0_693] : memref<25x8x8xf32, #tpu.memory_space<vmem>>, vector<1x8x8xf32>
    %844 = vector.shape_cast %843 : vector<1x8x8xf32> to vector<8x8xf32>
    %845 = vector.extract_strided_slice %741 {offsets = [0, 80], sizes = [8, 232], strides = [1, 1]} : vector<8x400xf32> to vector<8x232xf32>
    %cst_694 = arith.constant dense<0.000000e+00> : vector<8x232xf32>
    %846 = tpu.matmul %844, %845, %cst_694 {dimension_numbers = #tpu.dot_dimension_numbers<[1], [0], [0], [1], [0, 0, 1, 1], [], []>} : vector<8x8xf32>, vector<8x232xf32>, vector<8x232xf32> -> vector<8x232xf32>
    %847 = arith.addf %842, %846 : vector<8x232xf32>
    %c21_695 = arith.constant 21 : index
    %c0_696 = arith.constant 0 : index
    %c0_697 = arith.constant 0 : index
    %848 = vector.load %arg14[%c21_695, %c0_696, %c0_697] : memref<25x8x8xf32, #tpu.memory_space<vmem>>, vector<1x8x8xf32>
    %849 = vector.shape_cast %848 : vector<1x8x8xf32> to vector<8x8xf32>
    %850 = vector.extract_strided_slice %741 {offsets = [0, 81], sizes = [8, 232], strides = [1, 1]} : vector<8x400xf32> to vector<8x232xf32>
    %cst_698 = arith.constant dense<0.000000e+00> : vector<8x232xf32>
    %851 = tpu.matmul %849, %850, %cst_698 {dimension_numbers = #tpu.dot_dimension_numbers<[1], [0], [0], [1], [0, 0, 1, 1], [], []>} : vector<8x8xf32>, vector<8x232xf32>, vector<8x232xf32> -> vector<8x232xf32>
    %852 = arith.addf %847, %851 : vector<8x232xf32>
    %c22_699 = arith.constant 22 : index
    %c0_700 = arith.constant 0 : index
    %c0_701 = arith.constant 0 : index
    %853 = vector.load %arg14[%c22_699, %c0_700, %c0_701] : memref<25x8x8xf32, #tpu.memory_space<vmem>>, vector<1x8x8xf32>
    %854 = vector.shape_cast %853 : vector<1x8x8xf32> to vector<8x8xf32>
    %855 = vector.extract_strided_slice %741 {offsets = [0, 82], sizes = [8, 232], strides = [1, 1]} : vector<8x400xf32> to vector<8x232xf32>
    %cst_702 = arith.constant dense<0.000000e+00> : vector<8x232xf32>
    %856 = tpu.matmul %854, %855, %cst_702 {dimension_numbers = #tpu.dot_dimension_numbers<[1], [0], [0], [1], [0, 0, 1, 1], [], []>} : vector<8x8xf32>, vector<8x232xf32>, vector<8x232xf32> -> vector<8x232xf32>
    %857 = arith.addf %852, %856 : vector<8x232xf32>
    %c23_703 = arith.constant 23 : index
    %c0_704 = arith.constant 0 : index
    %c0_705 = arith.constant 0 : index
    %858 = vector.load %arg14[%c23_703, %c0_704, %c0_705] : memref<25x8x8xf32, #tpu.memory_space<vmem>>, vector<1x8x8xf32>
    %859 = vector.shape_cast %858 : vector<1x8x8xf32> to vector<8x8xf32>
    %860 = vector.extract_strided_slice %741 {offsets = [0, 83], sizes = [8, 232], strides = [1, 1]} : vector<8x400xf32> to vector<8x232xf32>
    %cst_706 = arith.constant dense<0.000000e+00> : vector<8x232xf32>
    %861 = tpu.matmul %859, %860, %cst_706 {dimension_numbers = #tpu.dot_dimension_numbers<[1], [0], [0], [1], [0, 0, 1, 1], [], []>} : vector<8x8xf32>, vector<8x232xf32>, vector<8x232xf32> -> vector<8x232xf32>
    %862 = arith.addf %857, %861 : vector<8x232xf32>
    %c24_707 = arith.constant 24 : index
    %c0_708 = arith.constant 0 : index
    %c0_709 = arith.constant 0 : index
    %863 = vector.load %arg14[%c24_707, %c0_708, %c0_709] : memref<25x8x8xf32, #tpu.memory_space<vmem>>, vector<1x8x8xf32>
    %864 = vector.shape_cast %863 : vector<1x8x8xf32> to vector<8x8xf32>
    %865 = vector.extract_strided_slice %741 {offsets = [0, 84], sizes = [8, 232], strides = [1, 1]} : vector<8x400xf32> to vector<8x232xf32>
    %cst_710 = arith.constant dense<0.000000e+00> : vector<8x232xf32>
    %866 = tpu.matmul %864, %865, %cst_710 {dimension_numbers = #tpu.dot_dimension_numbers<[1], [0], [0], [1], [0, 0, 1, 1], [], []>} : vector<8x8xf32>, vector<8x232xf32>, vector<8x232xf32> -> vector<8x232xf32>
    %867 = arith.addf %862, %866 : vector<8x232xf32>
    %c0_711 = arith.constant 0 : index
    %c0_712 = arith.constant 0 : index
    %868 = vector.load %arg15[%c0_711, %c0_712] : memref<8x1xf32, #tpu.memory_space<vmem>>, vector<8x1xf32>
    %869 = vector.broadcast %868 : vector<8x1xf32> to vector<8x232xf32>
    %870 = arith.addf %867, %869 : vector<8x232xf32>
    %cst_713 = arith.constant 0.000000e+00 : f32
    %871 = vector.broadcast %cst_713 : f32 to vector<8x232xf32>
    %872 = arith.maximumf %870, %871 : vector<8x232xf32>
    %cst_714 = arith.constant 0.000000e+00 : f32
    %873 = vector.broadcast %cst_714 : f32 to vector<8x400xf32>
    %c0_715 = arith.constant 0 : index
    %c0_716 = arith.constant 0 : index
    %874 = vector.load %arg23[%c0_715, %c0_716] : memref<8x400xf32, #tpu.memory_space<vmem>>, vector<8x400xf32>
    tpu.vector_store %arg23[%c0_715, %c0_716], %873 {strides = array<i32>} : memref<8x400xf32, #tpu.memory_space<vmem>>, vector<8x400xf32>,
    %875 = vector.extract_strided_slice %872 {offsets = [0, 0], sizes = [8, 12], strides = [1, 1]} : vector<8x232xf32> to vector<8x12xf32>
    %c0_717 = arith.constant 0 : index
    %c84_718 = arith.constant 84 : index
    %876 = vector.load %arg23[%c0_717, %c84_718] : memref<8x400xf32, #tpu.memory_space<vmem>>, vector<8x12xf32>
    tpu.vector_store %arg23[%c0_717, %c84_718], %875 {strides = array<i32>} : memref<8x400xf32, #tpu.memory_space<vmem>>, vector<8x12xf32>,
    %877 = vector.extract_strided_slice %872 {offsets = [0, 20], sizes = [8, 12], strides = [1, 1]} : vector<8x232xf32> to vector<8x12xf32>
    %c0_719 = arith.constant 0 : index
    %c104_720 = arith.constant 104 : index
    %878 = vector.load %arg23[%c0_719, %c104_720] : memref<8x400xf32, #tpu.memory_space<vmem>>, vector<8x12xf32>
    tpu.vector_store %arg23[%c0_719, %c104_720], %877 {strides = array<i32>} : memref<8x400xf32, #tpu.memory_space<vmem>>, vector<8x12xf32>,
    %879 = vector.extract_strided_slice %872 {offsets = [0, 40], sizes = [8, 12], strides = [1, 1]} : vector<8x232xf32> to vector<8x12xf32>
    %c0_721 = arith.constant 0 : index
    %c124_722 = arith.constant 124 : index
    %880 = vector.load %arg23[%c0_721, %c124_722] : memref<8x400xf32, #tpu.memory_space<vmem>>, vector<8x12xf32>
    tpu.vector_store %arg23[%c0_721, %c124_722], %879 {strides = array<i32>} : memref<8x400xf32, #tpu.memory_space<vmem>>, vector<8x12xf32>,
    %881 = vector.extract_strided_slice %872 {offsets = [0, 60], sizes = [8, 12], strides = [1, 1]} : vector<8x232xf32> to vector<8x12xf32>
    %c0_723 = arith.constant 0 : index
    %c144_724 = arith.constant 144 : index
    %882 = vector.load %arg23[%c0_723, %c144_724] : memref<8x400xf32, #tpu.memory_space<vmem>>, vector<8x12xf32>
    tpu.vector_store %arg23[%c0_723, %c144_724], %881 {strides = array<i32>} : memref<8x400xf32, #tpu.memory_space<vmem>>, vector<8x12xf32>,
    %883 = vector.extract_strided_slice %872 {offsets = [0, 80], sizes = [8, 12], strides = [1, 1]} : vector<8x232xf32> to vector<8x12xf32>
    %c0_725 = arith.constant 0 : index
    %c164_726 = arith.constant 164 : index
    %884 = vector.load %arg23[%c0_725, %c164_726] : memref<8x400xf32, #tpu.memory_space<vmem>>, vector<8x12xf32>
    tpu.vector_store %arg23[%c0_725, %c164_726], %883 {strides = array<i32>} : memref<8x400xf32, #tpu.memory_space<vmem>>, vector<8x12xf32>,
    %885 = vector.extract_strided_slice %872 {offsets = [0, 100], sizes = [8, 12], strides = [1, 1]} : vector<8x232xf32> to vector<8x12xf32>
    %c0_727 = arith.constant 0 : index
    %c184_728 = arith.constant 184 : index
    %886 = vector.load %arg23[%c0_727, %c184_728] : memref<8x400xf32, #tpu.memory_space<vmem>>, vector<8x12xf32>
    tpu.vector_store %arg23[%c0_727, %c184_728], %885 {strides = array<i32>} : memref<8x400xf32, #tpu.memory_space<vmem>>, vector<8x12xf32>,
    %887 = vector.extract_strided_slice %872 {offsets = [0, 120], sizes = [8, 12], strides = [1, 1]} : vector<8x232xf32> to vector<8x12xf32>
    %c0_729 = arith.constant 0 : index
    %c204_730 = arith.constant 204 : index
    %888 = vector.load %arg23[%c0_729, %c204_730] : memref<8x400xf32, #tpu.memory_space<vmem>>, vector<8x12xf32>
    tpu.vector_store %arg23[%c0_729, %c204_730], %887 {strides = array<i32>} : memref<8x400xf32, #tpu.memory_space<vmem>>, vector<8x12xf32>,
    %889 = vector.extract_strided_slice %872 {offsets = [0, 140], sizes = [8, 12], strides = [1, 1]} : vector<8x232xf32> to vector<8x12xf32>
    %c0_731 = arith.constant 0 : index
    %c224_732 = arith.constant 224 : index
    %890 = vector.load %arg23[%c0_731, %c224_732] : memref<8x400xf32, #tpu.memory_space<vmem>>, vector<8x12xf32>
    tpu.vector_store %arg23[%c0_731, %c224_732], %889 {strides = array<i32>} : memref<8x400xf32, #tpu.memory_space<vmem>>, vector<8x12xf32>,
    %891 = vector.extract_strided_slice %872 {offsets = [0, 160], sizes = [8, 12], strides = [1, 1]} : vector<8x232xf32> to vector<8x12xf32>
    %c0_733 = arith.constant 0 : index
    %c244 = arith.constant 244 : index
    %892 = vector.load %arg23[%c0_733, %c244] : memref<8x400xf32, #tpu.memory_space<vmem>>, vector<8x12xf32>
    tpu.vector_store %arg23[%c0_733, %c244], %891 {strides = array<i32>} : memref<8x400xf32, #tpu.memory_space<vmem>>, vector<8x12xf32>,
    %893 = vector.extract_strided_slice %872 {offsets = [0, 180], sizes = [8, 12], strides = [1, 1]} : vector<8x232xf32> to vector<8x12xf32>
    %c0_734 = arith.constant 0 : index
    %c264 = arith.constant 264 : index
    %894 = vector.load %arg23[%c0_734, %c264] : memref<8x400xf32, #tpu.memory_space<vmem>>, vector<8x12xf32>
    tpu.vector_store %arg23[%c0_734, %c264], %893 {strides = array<i32>} : memref<8x400xf32, #tpu.memory_space<vmem>>, vector<8x12xf32>,
    %895 = vector.extract_strided_slice %872 {offsets = [0, 200], sizes = [8, 12], strides = [1, 1]} : vector<8x232xf32> to vector<8x12xf32>
    %c0_735 = arith.constant 0 : index
    %c284 = arith.constant 284 : index
    %896 = vector.load %arg23[%c0_735, %c284] : memref<8x400xf32, #tpu.memory_space<vmem>>, vector<8x12xf32>
    tpu.vector_store %arg23[%c0_735, %c284], %895 {strides = array<i32>} : memref<8x400xf32, #tpu.memory_space<vmem>>, vector<8x12xf32>,
    %897 = vector.extract_strided_slice %872 {offsets = [0, 220], sizes = [8, 12], strides = [1, 1]} : vector<8x232xf32> to vector<8x12xf32>
    %c0_736 = arith.constant 0 : index
    %c304 = arith.constant 304 : index
    %898 = vector.load %arg23[%c0_736, %c304] : memref<8x400xf32, #tpu.memory_space<vmem>>, vector<8x12xf32>
    tpu.vector_store %arg23[%c0_736, %c304], %897 {strides = array<i32>} : memref<8x400xf32, #tpu.memory_space<vmem>>, vector<8x12xf32>,
    %c0_737 = arith.constant 0 : index
    %c0_738 = arith.constant 0 : index
    %899 = vector.load %arg23[%c0_737, %c0_738] : memref<8x400xf32, #tpu.memory_space<vmem>>, vector<8x400xf32>
    %cst_739 = arith.constant 0.000000e+00 : f32
    %900 = vector.broadcast %cst_739 : f32 to vector<8x316xf32>
    %c0_740 = arith.constant 0 : index
    %c0_741 = arith.constant 0 : index
    %c0_742 = arith.constant 0 : index
    %901 = vector.load %arg16[%c0_740, %c0_741, %c0_742] : memref<25x8x8xf32, #tpu.memory_space<vmem>>, vector<1x8x8xf32>
    %902 = vector.shape_cast %901 : vector<1x8x8xf32> to vector<8x8xf32>
    %903 = vector.extract_strided_slice %899 {offsets = [0, 0], sizes = [8, 316], strides = [1, 1]} : vector<8x400xf32> to vector<8x316xf32>
    %cst_743 = arith.constant dense<0.000000e+00> : vector<8x316xf32>
    %904 = tpu.matmul %902, %903, %cst_743 {dimension_numbers = #tpu.dot_dimension_numbers<[1], [0], [0], [1], [0, 0, 1, 1], [], []>} : vector<8x8xf32>, vector<8x316xf32>, vector<8x316xf32> -> vector<8x316xf32>
    %905 = arith.addf %900, %904 : vector<8x316xf32>
    %c1_744 = arith.constant 1 : index
    %c0_745 = arith.constant 0 : index
    %c0_746 = arith.constant 0 : index
    %906 = vector.load %arg16[%c1_744, %c0_745, %c0_746] : memref<25x8x8xf32, #tpu.memory_space<vmem>>, vector<1x8x8xf32>
    %907 = vector.shape_cast %906 : vector<1x8x8xf32> to vector<8x8xf32>
    %908 = vector.extract_strided_slice %899 {offsets = [0, 1], sizes = [8, 316], strides = [1, 1]} : vector<8x400xf32> to vector<8x316xf32>
    %cst_747 = arith.constant dense<0.000000e+00> : vector<8x316xf32>
    %909 = tpu.matmul %907, %908, %cst_747 {dimension_numbers = #tpu.dot_dimension_numbers<[1], [0], [0], [1], [0, 0, 1, 1], [], []>} : vector<8x8xf32>, vector<8x316xf32>, vector<8x316xf32> -> vector<8x316xf32>
    %910 = arith.addf %905, %909 : vector<8x316xf32>
    %c2_748 = arith.constant 2 : index
    %c0_749 = arith.constant 0 : index
    %c0_750 = arith.constant 0 : index
    %911 = vector.load %arg16[%c2_748, %c0_749, %c0_750] : memref<25x8x8xf32, #tpu.memory_space<vmem>>, vector<1x8x8xf32>
    %912 = vector.shape_cast %911 : vector<1x8x8xf32> to vector<8x8xf32>
    %913 = vector.extract_strided_slice %899 {offsets = [0, 2], sizes = [8, 316], strides = [1, 1]} : vector<8x400xf32> to vector<8x316xf32>
    %cst_751 = arith.constant dense<0.000000e+00> : vector<8x316xf32>
    %914 = tpu.matmul %912, %913, %cst_751 {dimension_numbers = #tpu.dot_dimension_numbers<[1], [0], [0], [1], [0, 0, 1, 1], [], []>} : vector<8x8xf32>, vector<8x316xf32>, vector<8x316xf32> -> vector<8x316xf32>
    %915 = arith.addf %910, %914 : vector<8x316xf32>
    %c3_752 = arith.constant 3 : index
    %c0_753 = arith.constant 0 : index
    %c0_754 = arith.constant 0 : index
    %916 = vector.load %arg16[%c3_752, %c0_753, %c0_754] : memref<25x8x8xf32, #tpu.memory_space<vmem>>, vector<1x8x8xf32>
    %917 = vector.shape_cast %916 : vector<1x8x8xf32> to vector<8x8xf32>
    %918 = vector.extract_strided_slice %899 {offsets = [0, 3], sizes = [8, 316], strides = [1, 1]} : vector<8x400xf32> to vector<8x316xf32>
    %cst_755 = arith.constant dense<0.000000e+00> : vector<8x316xf32>
    %919 = tpu.matmul %917, %918, %cst_755 {dimension_numbers = #tpu.dot_dimension_numbers<[1], [0], [0], [1], [0, 0, 1, 1], [], []>} : vector<8x8xf32>, vector<8x316xf32>, vector<8x316xf32> -> vector<8x316xf32>
    %920 = arith.addf %915, %919 : vector<8x316xf32>
    %c4_756 = arith.constant 4 : index
    %c0_757 = arith.constant 0 : index
    %c0_758 = arith.constant 0 : index
    %921 = vector.load %arg16[%c4_756, %c0_757, %c0_758] : memref<25x8x8xf32, #tpu.memory_space<vmem>>, vector<1x8x8xf32>
    %922 = vector.shape_cast %921 : vector<1x8x8xf32> to vector<8x8xf32>
    %923 = vector.extract_strided_slice %899 {offsets = [0, 4], sizes = [8, 316], strides = [1, 1]} : vector<8x400xf32> to vector<8x316xf32>
    %cst_759 = arith.constant dense<0.000000e+00> : vector<8x316xf32>
    %924 = tpu.matmul %922, %923, %cst_759 {dimension_numbers = #tpu.dot_dimension_numbers<[1], [0], [0], [1], [0, 0, 1, 1], [], []>} : vector<8x8xf32>, vector<8x316xf32>, vector<8x316xf32> -> vector<8x316xf32>
    %925 = arith.addf %920, %924 : vector<8x316xf32>
    %c5_760 = arith.constant 5 : index
    %c0_761 = arith.constant 0 : index
    %c0_762 = arith.constant 0 : index
    %926 = vector.load %arg16[%c5_760, %c0_761, %c0_762] : memref<25x8x8xf32, #tpu.memory_space<vmem>>, vector<1x8x8xf32>
    %927 = vector.shape_cast %926 : vector<1x8x8xf32> to vector<8x8xf32>
    %928 = vector.extract_strided_slice %899 {offsets = [0, 20], sizes = [8, 316], strides = [1, 1]} : vector<8x400xf32> to vector<8x316xf32>
    %cst_763 = arith.constant dense<0.000000e+00> : vector<8x316xf32>
    %929 = tpu.matmul %927, %928, %cst_763 {dimension_numbers = #tpu.dot_dimension_numbers<[1], [0], [0], [1], [0, 0, 1, 1], [], []>} : vector<8x8xf32>, vector<8x316xf32>, vector<8x316xf32> -> vector<8x316xf32>
    %930 = arith.addf %925, %929 : vector<8x316xf32>
    %c6_764 = arith.constant 6 : index
    %c0_765 = arith.constant 0 : index
    %c0_766 = arith.constant 0 : index
    %931 = vector.load %arg16[%c6_764, %c0_765, %c0_766] : memref<25x8x8xf32, #tpu.memory_space<vmem>>, vector<1x8x8xf32>
    %932 = vector.shape_cast %931 : vector<1x8x8xf32> to vector<8x8xf32>
    %933 = vector.extract_strided_slice %899 {offsets = [0, 21], sizes = [8, 316], strides = [1, 1]} : vector<8x400xf32> to vector<8x316xf32>
    %cst_767 = arith.constant dense<0.000000e+00> : vector<8x316xf32>
    %934 = tpu.matmul %932, %933, %cst_767 {dimension_numbers = #tpu.dot_dimension_numbers<[1], [0], [0], [1], [0, 0, 1, 1], [], []>} : vector<8x8xf32>, vector<8x316xf32>, vector<8x316xf32> -> vector<8x316xf32>
    %935 = arith.addf %930, %934 : vector<8x316xf32>
    %c7_768 = arith.constant 7 : index
    %c0_769 = arith.constant 0 : index
    %c0_770 = arith.constant 0 : index
    %936 = vector.load %arg16[%c7_768, %c0_769, %c0_770] : memref<25x8x8xf32, #tpu.memory_space<vmem>>, vector<1x8x8xf32>
    %937 = vector.shape_cast %936 : vector<1x8x8xf32> to vector<8x8xf32>
    %938 = vector.extract_strided_slice %899 {offsets = [0, 22], sizes = [8, 316], strides = [1, 1]} : vector<8x400xf32> to vector<8x316xf32>
    %cst_771 = arith.constant dense<0.000000e+00> : vector<8x316xf32>
    %939 = tpu.matmul %937, %938, %cst_771 {dimension_numbers = #tpu.dot_dimension_numbers<[1], [0], [0], [1], [0, 0, 1, 1], [], []>} : vector<8x8xf32>, vector<8x316xf32>, vector<8x316xf32> -> vector<8x316xf32>
    %940 = arith.addf %935, %939 : vector<8x316xf32>
    %c8_772 = arith.constant 8 : index
    %c0_773 = arith.constant 0 : index
    %c0_774 = arith.constant 0 : index
    %941 = vector.load %arg16[%c8_772, %c0_773, %c0_774] : memref<25x8x8xf32, #tpu.memory_space<vmem>>, vector<1x8x8xf32>
    %942 = vector.shape_cast %941 : vector<1x8x8xf32> to vector<8x8xf32>
    %943 = vector.extract_strided_slice %899 {offsets = [0, 23], sizes = [8, 316], strides = [1, 1]} : vector<8x400xf32> to vector<8x316xf32>
    %cst_775 = arith.constant dense<0.000000e+00> : vector<8x316xf32>
    %944 = tpu.matmul %942, %943, %cst_775 {dimension_numbers = #tpu.dot_dimension_numbers<[1], [0], [0], [1], [0, 0, 1, 1], [], []>} : vector<8x8xf32>, vector<8x316xf32>, vector<8x316xf32> -> vector<8x316xf32>
    %945 = arith.addf %940, %944 : vector<8x316xf32>
    %c9_776 = arith.constant 9 : index
    %c0_777 = arith.constant 0 : index
    %c0_778 = arith.constant 0 : index
    %946 = vector.load %arg16[%c9_776, %c0_777, %c0_778] : memref<25x8x8xf32, #tpu.memory_space<vmem>>, vector<1x8x8xf32>
    %947 = vector.shape_cast %946 : vector<1x8x8xf32> to vector<8x8xf32>
    %948 = vector.extract_strided_slice %899 {offsets = [0, 24], sizes = [8, 316], strides = [1, 1]} : vector<8x400xf32> to vector<8x316xf32>
    %cst_779 = arith.constant dense<0.000000e+00> : vector<8x316xf32>
    %949 = tpu.matmul %947, %948, %cst_779 {dimension_numbers = #tpu.dot_dimension_numbers<[1], [0], [0], [1], [0, 0, 1, 1], [], []>} : vector<8x8xf32>, vector<8x316xf32>, vector<8x316xf32> -> vector<8x316xf32>
    %950 = arith.addf %945, %949 : vector<8x316xf32>
    %c10_780 = arith.constant 10 : index
    %c0_781 = arith.constant 0 : index
    %c0_782 = arith.constant 0 : index
    %951 = vector.load %arg16[%c10_780, %c0_781, %c0_782] : memref<25x8x8xf32, #tpu.memory_space<vmem>>, vector<1x8x8xf32>
    %952 = vector.shape_cast %951 : vector<1x8x8xf32> to vector<8x8xf32>
    %953 = vector.extract_strided_slice %899 {offsets = [0, 40], sizes = [8, 316], strides = [1, 1]} : vector<8x400xf32> to vector<8x316xf32>
    %cst_783 = arith.constant dense<0.000000e+00> : vector<8x316xf32>
    %954 = tpu.matmul %952, %953, %cst_783 {dimension_numbers = #tpu.dot_dimension_numbers<[1], [0], [0], [1], [0, 0, 1, 1], [], []>} : vector<8x8xf32>, vector<8x316xf32>, vector<8x316xf32> -> vector<8x316xf32>
    %955 = arith.addf %950, %954 : vector<8x316xf32>
    %c11_784 = arith.constant 11 : index
    %c0_785 = arith.constant 0 : index
    %c0_786 = arith.constant 0 : index
    %956 = vector.load %arg16[%c11_784, %c0_785, %c0_786] : memref<25x8x8xf32, #tpu.memory_space<vmem>>, vector<1x8x8xf32>
    %957 = vector.shape_cast %956 : vector<1x8x8xf32> to vector<8x8xf32>
    %958 = vector.extract_strided_slice %899 {offsets = [0, 41], sizes = [8, 316], strides = [1, 1]} : vector<8x400xf32> to vector<8x316xf32>
    %cst_787 = arith.constant dense<0.000000e+00> : vector<8x316xf32>
    %959 = tpu.matmul %957, %958, %cst_787 {dimension_numbers = #tpu.dot_dimension_numbers<[1], [0], [0], [1], [0, 0, 1, 1], [], []>} : vector<8x8xf32>, vector<8x316xf32>, vector<8x316xf32> -> vector<8x316xf32>
    %960 = arith.addf %955, %959 : vector<8x316xf32>
    %c12_788 = arith.constant 12 : index
    %c0_789 = arith.constant 0 : index
    %c0_790 = arith.constant 0 : index
    %961 = vector.load %arg16[%c12_788, %c0_789, %c0_790] : memref<25x8x8xf32, #tpu.memory_space<vmem>>, vector<1x8x8xf32>
    %962 = vector.shape_cast %961 : vector<1x8x8xf32> to vector<8x8xf32>
    %963 = vector.extract_strided_slice %899 {offsets = [0, 42], sizes = [8, 316], strides = [1, 1]} : vector<8x400xf32> to vector<8x316xf32>
    %cst_791 = arith.constant dense<0.000000e+00> : vector<8x316xf32>
    %964 = tpu.matmul %962, %963, %cst_791 {dimension_numbers = #tpu.dot_dimension_numbers<[1], [0], [0], [1], [0, 0, 1, 1], [], []>} : vector<8x8xf32>, vector<8x316xf32>, vector<8x316xf32> -> vector<8x316xf32>
    %965 = arith.addf %960, %964 : vector<8x316xf32>
    %c13_792 = arith.constant 13 : index
    %c0_793 = arith.constant 0 : index
    %c0_794 = arith.constant 0 : index
    %966 = vector.load %arg16[%c13_792, %c0_793, %c0_794] : memref<25x8x8xf32, #tpu.memory_space<vmem>>, vector<1x8x8xf32>
    %967 = vector.shape_cast %966 : vector<1x8x8xf32> to vector<8x8xf32>
    %968 = vector.extract_strided_slice %899 {offsets = [0, 43], sizes = [8, 316], strides = [1, 1]} : vector<8x400xf32> to vector<8x316xf32>
    %cst_795 = arith.constant dense<0.000000e+00> : vector<8x316xf32>
    %969 = tpu.matmul %967, %968, %cst_795 {dimension_numbers = #tpu.dot_dimension_numbers<[1], [0], [0], [1], [0, 0, 1, 1], [], []>} : vector<8x8xf32>, vector<8x316xf32>, vector<8x316xf32> -> vector<8x316xf32>
    %970 = arith.addf %965, %969 : vector<8x316xf32>
    %c14_796 = arith.constant 14 : index
    %c0_797 = arith.constant 0 : index
    %c0_798 = arith.constant 0 : index
    %971 = vector.load %arg16[%c14_796, %c0_797, %c0_798] : memref<25x8x8xf32, #tpu.memory_space<vmem>>, vector<1x8x8xf32>
    %972 = vector.shape_cast %971 : vector<1x8x8xf32> to vector<8x8xf32>
    %973 = vector.extract_strided_slice %899 {offsets = [0, 44], sizes = [8, 316], strides = [1, 1]} : vector<8x400xf32> to vector<8x316xf32>
    %cst_799 = arith.constant dense<0.000000e+00> : vector<8x316xf32>
    %974 = tpu.matmul %972, %973, %cst_799 {dimension_numbers = #tpu.dot_dimension_numbers<[1], [0], [0], [1], [0, 0, 1, 1], [], []>} : vector<8x8xf32>, vector<8x316xf32>, vector<8x316xf32> -> vector<8x316xf32>
    %975 = arith.addf %970, %974 : vector<8x316xf32>
    %c15_800 = arith.constant 15 : index
    %c0_801 = arith.constant 0 : index
    %c0_802 = arith.constant 0 : index
    %976 = vector.load %arg16[%c15_800, %c0_801, %c0_802] : memref<25x8x8xf32, #tpu.memory_space<vmem>>, vector<1x8x8xf32>
    %977 = vector.shape_cast %976 : vector<1x8x8xf32> to vector<8x8xf32>
    %978 = vector.extract_strided_slice %899 {offsets = [0, 60], sizes = [8, 316], strides = [1, 1]} : vector<8x400xf32> to vector<8x316xf32>
    %cst_803 = arith.constant dense<0.000000e+00> : vector<8x316xf32>
    %979 = tpu.matmul %977, %978, %cst_803 {dimension_numbers = #tpu.dot_dimension_numbers<[1], [0], [0], [1], [0, 0, 1, 1], [], []>} : vector<8x8xf32>, vector<8x316xf32>, vector<8x316xf32> -> vector<8x316xf32>
    %980 = arith.addf %975, %979 : vector<8x316xf32>
    %c16_804 = arith.constant 16 : index
    %c0_805 = arith.constant 0 : index
    %c0_806 = arith.constant 0 : index
    %981 = vector.load %arg16[%c16_804, %c0_805, %c0_806] : memref<25x8x8xf32, #tpu.memory_space<vmem>>, vector<1x8x8xf32>
    %982 = vector.shape_cast %981 : vector<1x8x8xf32> to vector<8x8xf32>
    %983 = vector.extract_strided_slice %899 {offsets = [0, 61], sizes = [8, 316], strides = [1, 1]} : vector<8x400xf32> to vector<8x316xf32>
    %cst_807 = arith.constant dense<0.000000e+00> : vector<8x316xf32>
    %984 = tpu.matmul %982, %983, %cst_807 {dimension_numbers = #tpu.dot_dimension_numbers<[1], [0], [0], [1], [0, 0, 1, 1], [], []>} : vector<8x8xf32>, vector<8x316xf32>, vector<8x316xf32> -> vector<8x316xf32>
    %985 = arith.addf %980, %984 : vector<8x316xf32>
    %c17_808 = arith.constant 17 : index
    %c0_809 = arith.constant 0 : index
    %c0_810 = arith.constant 0 : index
    %986 = vector.load %arg16[%c17_808, %c0_809, %c0_810] : memref<25x8x8xf32, #tpu.memory_space<vmem>>, vector<1x8x8xf32>
    %987 = vector.shape_cast %986 : vector<1x8x8xf32> to vector<8x8xf32>
    %988 = vector.extract_strided_slice %899 {offsets = [0, 62], sizes = [8, 316], strides = [1, 1]} : vector<8x400xf32> to vector<8x316xf32>
    %cst_811 = arith.constant dense<0.000000e+00> : vector<8x316xf32>
    %989 = tpu.matmul %987, %988, %cst_811 {dimension_numbers = #tpu.dot_dimension_numbers<[1], [0], [0], [1], [0, 0, 1, 1], [], []>} : vector<8x8xf32>, vector<8x316xf32>, vector<8x316xf32> -> vector<8x316xf32>
    %990 = arith.addf %985, %989 : vector<8x316xf32>
    %c18_812 = arith.constant 18 : index
    %c0_813 = arith.constant 0 : index
    %c0_814 = arith.constant 0 : index
    %991 = vector.load %arg16[%c18_812, %c0_813, %c0_814] : memref<25x8x8xf32, #tpu.memory_space<vmem>>, vector<1x8x8xf32>
    %992 = vector.shape_cast %991 : vector<1x8x8xf32> to vector<8x8xf32>
    %993 = vector.extract_strided_slice %899 {offsets = [0, 63], sizes = [8, 316], strides = [1, 1]} : vector<8x400xf32> to vector<8x316xf32>
    %cst_815 = arith.constant dense<0.000000e+00> : vector<8x316xf32>
    %994 = tpu.matmul %992, %993, %cst_815 {dimension_numbers = #tpu.dot_dimension_numbers<[1], [0], [0], [1], [0, 0, 1, 1], [], []>} : vector<8x8xf32>, vector<8x316xf32>, vector<8x316xf32> -> vector<8x316xf32>
    %995 = arith.addf %990, %994 : vector<8x316xf32>
    %c19_816 = arith.constant 19 : index
    %c0_817 = arith.constant 0 : index
    %c0_818 = arith.constant 0 : index
    %996 = vector.load %arg16[%c19_816, %c0_817, %c0_818] : memref<25x8x8xf32, #tpu.memory_space<vmem>>, vector<1x8x8xf32>
    %997 = vector.shape_cast %996 : vector<1x8x8xf32> to vector<8x8xf32>
    %998 = vector.extract_strided_slice %899 {offsets = [0, 64], sizes = [8, 316], strides = [1, 1]} : vector<8x400xf32> to vector<8x316xf32>
    %cst_819 = arith.constant dense<0.000000e+00> : vector<8x316xf32>
    %999 = tpu.matmul %997, %998, %cst_819 {dimension_numbers = #tpu.dot_dimension_numbers<[1], [0], [0], [1], [0, 0, 1, 1], [], []>} : vector<8x8xf32>, vector<8x316xf32>, vector<8x316xf32> -> vector<8x316xf32>
    %1000 = arith.addf %995, %999 : vector<8x316xf32>
    %c20_820 = arith.constant 20 : index
    %c0_821 = arith.constant 0 : index
    %c0_822 = arith.constant 0 : index
    %1001 = vector.load %arg16[%c20_820, %c0_821, %c0_822] : memref<25x8x8xf32, #tpu.memory_space<vmem>>, vector<1x8x8xf32>
    %1002 = vector.shape_cast %1001 : vector<1x8x8xf32> to vector<8x8xf32>
    %1003 = vector.extract_strided_slice %899 {offsets = [0, 80], sizes = [8, 316], strides = [1, 1]} : vector<8x400xf32> to vector<8x316xf32>
    %cst_823 = arith.constant dense<0.000000e+00> : vector<8x316xf32>
    %1004 = tpu.matmul %1002, %1003, %cst_823 {dimension_numbers = #tpu.dot_dimension_numbers<[1], [0], [0], [1], [0, 0, 1, 1], [], []>} : vector<8x8xf32>, vector<8x316xf32>, vector<8x316xf32> -> vector<8x316xf32>
    %1005 = arith.addf %1000, %1004 : vector<8x316xf32>
    %c21_824 = arith.constant 21 : index
    %c0_825 = arith.constant 0 : index
    %c0_826 = arith.constant 0 : index
    %1006 = vector.load %arg16[%c21_824, %c0_825, %c0_826] : memref<25x8x8xf32, #tpu.memory_space<vmem>>, vector<1x8x8xf32>
    %1007 = vector.shape_cast %1006 : vector<1x8x8xf32> to vector<8x8xf32>
    %1008 = vector.extract_strided_slice %899 {offsets = [0, 81], sizes = [8, 316], strides = [1, 1]} : vector<8x400xf32> to vector<8x316xf32>
    %cst_827 = arith.constant dense<0.000000e+00> : vector<8x316xf32>
    %1009 = tpu.matmul %1007, %1008, %cst_827 {dimension_numbers = #tpu.dot_dimension_numbers<[1], [0], [0], [1], [0, 0, 1, 1], [], []>} : vector<8x8xf32>, vector<8x316xf32>, vector<8x316xf32> -> vector<8x316xf32>
    %1010 = arith.addf %1005, %1009 : vector<8x316xf32>
    %c22_828 = arith.constant 22 : index
    %c0_829 = arith.constant 0 : index
    %c0_830 = arith.constant 0 : index
    %1011 = vector.load %arg16[%c22_828, %c0_829, %c0_830] : memref<25x8x8xf32, #tpu.memory_space<vmem>>, vector<1x8x8xf32>
    %1012 = vector.shape_cast %1011 : vector<1x8x8xf32> to vector<8x8xf32>
    %1013 = vector.extract_strided_slice %899 {offsets = [0, 82], sizes = [8, 316], strides = [1, 1]} : vector<8x400xf32> to vector<8x316xf32>
    %cst_831 = arith.constant dense<0.000000e+00> : vector<8x316xf32>
    %1014 = tpu.matmul %1012, %1013, %cst_831 {dimension_numbers = #tpu.dot_dimension_numbers<[1], [0], [0], [1], [0, 0, 1, 1], [], []>} : vector<8x8xf32>, vector<8x316xf32>, vector<8x316xf32> -> vector<8x316xf32>
    %1015 = arith.addf %1010, %1014 : vector<8x316xf32>
    %c23_832 = arith.constant 23 : index
    %c0_833 = arith.constant 0 : index
    %c0_834 = arith.constant 0 : index
    %1016 = vector.load %arg16[%c23_832, %c0_833, %c0_834] : memref<25x8x8xf32, #tpu.memory_space<vmem>>, vector<1x8x8xf32>
    %1017 = vector.shape_cast %1016 : vector<1x8x8xf32> to vector<8x8xf32>
    %1018 = vector.extract_strided_slice %899 {offsets = [0, 83], sizes = [8, 316], strides = [1, 1]} : vector<8x400xf32> to vector<8x316xf32>
    %cst_835 = arith.constant dense<0.000000e+00> : vector<8x316xf32>
    %1019 = tpu.matmul %1017, %1018, %cst_835 {dimension_numbers = #tpu.dot_dimension_numbers<[1], [0], [0], [1], [0, 0, 1, 1], [], []>} : vector<8x8xf32>, vector<8x316xf32>, vector<8x316xf32> -> vector<8x316xf32>
    %1020 = arith.addf %1015, %1019 : vector<8x316xf32>
    %c24_836 = arith.constant 24 : index
    %c0_837 = arith.constant 0 : index
    %c0_838 = arith.constant 0 : index
    %1021 = vector.load %arg16[%c24_836, %c0_837, %c0_838] : memref<25x8x8xf32, #tpu.memory_space<vmem>>, vector<1x8x8xf32>
    %1022 = vector.shape_cast %1021 : vector<1x8x8xf32> to vector<8x8xf32>
    %1023 = vector.extract_strided_slice %899 {offsets = [0, 84], sizes = [8, 316], strides = [1, 1]} : vector<8x400xf32> to vector<8x316xf32>
    %cst_839 = arith.constant dense<0.000000e+00> : vector<8x316xf32>
    %1024 = tpu.matmul %1022, %1023, %cst_839 {dimension_numbers = #tpu.dot_dimension_numbers<[1], [0], [0], [1], [0, 0, 1, 1], [], []>} : vector<8x8xf32>, vector<8x316xf32>, vector<8x316xf32> -> vector<8x316xf32>
    %1025 = arith.addf %1020, %1024 : vector<8x316xf32>
    %c0_840 = arith.constant 0 : index
    %c0_841 = arith.constant 0 : index
    %1026 = vector.load %arg17[%c0_840, %c0_841] : memref<8x1xf32, #tpu.memory_space<vmem>>, vector<8x1xf32>
    %1027 = vector.broadcast %1026 : vector<8x1xf32> to vector<8x316xf32>
    %1028 = arith.addf %1025, %1027 : vector<8x316xf32>
    %cst_842 = arith.constant 0.000000e+00 : f32
    %1029 = vector.broadcast %cst_842 : f32 to vector<8x316xf32>
    %1030 = arith.maximumf %1028, %1029 : vector<8x316xf32>
    %1031 = vector.extract_strided_slice %1030 {offsets = [0, 0], sizes = [1, 16], strides = [1, 1]} : vector<8x316xf32> to vector<1x16xf32>
    %c0_843 = arith.constant 0 : index
    %c0_844 = arith.constant 0 : index
    %c0_845 = arith.constant 0 : index
    %1032 = vector.load %arg18[%c0_843, %c0_844, %c0_845] : memref<1x16x16xf32, #tpu.memory_space<vmem>>, vector<1x1x16xf32>
    %1033 = vector.shape_cast %1032 : vector<1x1x16xf32> to vector<1x16xf32>
    %1034 = vector.shape_cast %1031 : vector<1x16xf32> to vector<1x1x16xf32>
    tpu.vector_store %arg18[%c0_843, %c0_844, %c0_845], %1034 {strides = array<i32>} : memref<1x16x16xf32, #tpu.memory_space<vmem>>, vector<1x1x16xf32>,
    %1035 = vector.extract_strided_slice %1030 {offsets = [0, 20], sizes = [1, 16], strides = [1, 1]} : vector<8x316xf32> to vector<1x16xf32>
    %c0_846 = arith.constant 0 : index
    %c1_847 = arith.constant 1 : index
    %c0_848 = arith.constant 0 : index
    %1036 = vector.load %arg18[%c0_846, %c1_847, %c0_848] : memref<1x16x16xf32, #tpu.memory_space<vmem>>, vector<1x1x16xf32>
    %1037 = vector.shape_cast %1036 : vector<1x1x16xf32> to vector<1x16xf32>
    %1038 = vector.shape_cast %1035 : vector<1x16xf32> to vector<1x1x16xf32>
    tpu.vector_store %arg18[%c0_846, %c1_847, %c0_848], %1038 {strides = array<i32>} : memref<1x16x16xf32, #tpu.memory_space<vmem>>, vector<1x1x16xf32>,
    %1039 = vector.extract_strided_slice %1030 {offsets = [0, 40], sizes = [1, 16], strides = [1, 1]} : vector<8x316xf32> to vector<1x16xf32>
    %c0_849 = arith.constant 0 : index
    %c2_850 = arith.constant 2 : index
    %c0_851 = arith.constant 0 : index
    %1040 = vector.load %arg18[%c0_849, %c2_850, %c0_851] : memref<1x16x16xf32, #tpu.memory_space<vmem>>, vector<1x1x16xf32>
    %1041 = vector.shape_cast %1040 : vector<1x1x16xf32> to vector<1x16xf32>
    %1042 = vector.shape_cast %1039 : vector<1x16xf32> to vector<1x1x16xf32>
    tpu.vector_store %arg18[%c0_849, %c2_850, %c0_851], %1042 {strides = array<i32>} : memref<1x16x16xf32, #tpu.memory_space<vmem>>, vector<1x1x16xf32>,
    %1043 = vector.extract_strided_slice %1030 {offsets = [0, 60], sizes = [1, 16], strides = [1, 1]} : vector<8x316xf32> to vector<1x16xf32>
    %c0_852 = arith.constant 0 : index
    %c3_853 = arith.constant 3 : index
    %c0_854 = arith.constant 0 : index
    %1044 = vector.load %arg18[%c0_852, %c3_853, %c0_854] : memref<1x16x16xf32, #tpu.memory_space<vmem>>, vector<1x1x16xf32>
    %1045 = vector.shape_cast %1044 : vector<1x1x16xf32> to vector<1x16xf32>
    %1046 = vector.shape_cast %1043 : vector<1x16xf32> to vector<1x1x16xf32>
    tpu.vector_store %arg18[%c0_852, %c3_853, %c0_854], %1046 {strides = array<i32>} : memref<1x16x16xf32, #tpu.memory_space<vmem>>, vector<1x1x16xf32>,
    %1047 = vector.extract_strided_slice %1030 {offsets = [0, 80], sizes = [1, 16], strides = [1, 1]} : vector<8x316xf32> to vector<1x16xf32>
    %c0_855 = arith.constant 0 : index
    %c4_856 = arith.constant 4 : index
    %c0_857 = arith.constant 0 : index
    %1048 = vector.load %arg18[%c0_855, %c4_856, %c0_857] : memref<1x16x16xf32, #tpu.memory_space<vmem>>, vector<1x1x16xf32>
    %1049 = vector.shape_cast %1048 : vector<1x1x16xf32> to vector<1x16xf32>
    %1050 = vector.shape_cast %1047 : vector<1x16xf32> to vector<1x1x16xf32>
    tpu.vector_store %arg18[%c0_855, %c4_856, %c0_857], %1050 {strides = array<i32>} : memref<1x16x16xf32, #tpu.memory_space<vmem>>, vector<1x1x16xf32>,
    %1051 = vector.extract_strided_slice %1030 {offsets = [0, 100], sizes = [1, 16], strides = [1, 1]} : vector<8x316xf32> to vector<1x16xf32>
    %c0_858 = arith.constant 0 : index
    %c5_859 = arith.constant 5 : index
    %c0_860 = arith.constant 0 : index
    %1052 = vector.load %arg18[%c0_858, %c5_859, %c0_860] : memref<1x16x16xf32, #tpu.memory_space<vmem>>, vector<1x1x16xf32>
    %1053 = vector.shape_cast %1052 : vector<1x1x16xf32> to vector<1x16xf32>
    %1054 = vector.shape_cast %1051 : vector<1x16xf32> to vector<1x1x16xf32>
    tpu.vector_store %arg18[%c0_858, %c5_859, %c0_860], %1054 {strides = array<i32>} : memref<1x16x16xf32, #tpu.memory_space<vmem>>, vector<1x1x16xf32>,
    %1055 = vector.extract_strided_slice %1030 {offsets = [0, 120], sizes = [1, 16], strides = [1, 1]} : vector<8x316xf32> to vector<1x16xf32>
    %c0_861 = arith.constant 0 : index
    %c6_862 = arith.constant 6 : index
    %c0_863 = arith.constant 0 : index
    %1056 = vector.load %arg18[%c0_861, %c6_862, %c0_863] : memref<1x16x16xf32, #tpu.memory_space<vmem>>, vector<1x1x16xf32>
    %1057 = vector.shape_cast %1056 : vector<1x1x16xf32> to vector<1x16xf32>
    %1058 = vector.shape_cast %1055 : vector<1x16xf32> to vector<1x1x16xf32>
    tpu.vector_store %arg18[%c0_861, %c6_862, %c0_863], %1058 {strides = array<i32>} : memref<1x16x16xf32, #tpu.memory_space<vmem>>, vector<1x1x16xf32>,
    %1059 = vector.extract_strided_slice %1030 {offsets = [0, 140], sizes = [1, 16], strides = [1, 1]} : vector<8x316xf32> to vector<1x16xf32>
    %c0_864 = arith.constant 0 : index
    %c7_865 = arith.constant 7 : index
    %c0_866 = arith.constant 0 : index
    %1060 = vector.load %arg18[%c0_864, %c7_865, %c0_866] : memref<1x16x16xf32, #tpu.memory_space<vmem>>, vector<1x1x16xf32>
    %1061 = vector.shape_cast %1060 : vector<1x1x16xf32> to vector<1x16xf32>
    %1062 = vector.shape_cast %1059 : vector<1x16xf32> to vector<1x1x16xf32>
    tpu.vector_store %arg18[%c0_864, %c7_865, %c0_866], %1062 {strides = array<i32>} : memref<1x16x16xf32, #tpu.memory_space<vmem>>, vector<1x1x16xf32>,
    %1063 = vector.extract_strided_slice %1030 {offsets = [0, 160], sizes = [1, 16], strides = [1, 1]} : vector<8x316xf32> to vector<1x16xf32>
    %c0_867 = arith.constant 0 : index
    %c8_868 = arith.constant 8 : index
    %c0_869 = arith.constant 0 : index
    %1064 = vector.load %arg18[%c0_867, %c8_868, %c0_869] : memref<1x16x16xf32, #tpu.memory_space<vmem>>, vector<1x1x16xf32>
    %1065 = vector.shape_cast %1064 : vector<1x1x16xf32> to vector<1x16xf32>
    %1066 = vector.shape_cast %1063 : vector<1x16xf32> to vector<1x1x16xf32>
    tpu.vector_store %arg18[%c0_867, %c8_868, %c0_869], %1066 {strides = array<i32>} : memref<1x16x16xf32, #tpu.memory_space<vmem>>, vector<1x1x16xf32>,
    %1067 = vector.extract_strided_slice %1030 {offsets = [0, 180], sizes = [1, 16], strides = [1, 1]} : vector<8x316xf32> to vector<1x16xf32>
    %c0_870 = arith.constant 0 : index
    %c9_871 = arith.constant 9 : index
    %c0_872 = arith.constant 0 : index
    %1068 = vector.load %arg18[%c0_870, %c9_871, %c0_872] : memref<1x16x16xf32, #tpu.memory_space<vmem>>, vector<1x1x16xf32>
    %1069 = vector.shape_cast %1068 : vector<1x1x16xf32> to vector<1x16xf32>
    %1070 = vector.shape_cast %1067 : vector<1x16xf32> to vector<1x1x16xf32>
    tpu.vector_store %arg18[%c0_870, %c9_871, %c0_872], %1070 {strides = array<i32>} : memref<1x16x16xf32, #tpu.memory_space<vmem>>, vector<1x1x16xf32>,
    %1071 = vector.extract_strided_slice %1030 {offsets = [0, 200], sizes = [1, 16], strides = [1, 1]} : vector<8x316xf32> to vector<1x16xf32>
    %c0_873 = arith.constant 0 : index
    %c10_874 = arith.constant 10 : index
    %c0_875 = arith.constant 0 : index
    %1072 = vector.load %arg18[%c0_873, %c10_874, %c0_875] : memref<1x16x16xf32, #tpu.memory_space<vmem>>, vector<1x1x16xf32>
    %1073 = vector.shape_cast %1072 : vector<1x1x16xf32> to vector<1x16xf32>
    %1074 = vector.shape_cast %1071 : vector<1x16xf32> to vector<1x1x16xf32>
    tpu.vector_store %arg18[%c0_873, %c10_874, %c0_875], %1074 {strides = array<i32>} : memref<1x16x16xf32, #tpu.memory_space<vmem>>, vector<1x1x16xf32>,
    %1075 = vector.extract_strided_slice %1030 {offsets = [0, 220], sizes = [1, 16], strides = [1, 1]} : vector<8x316xf32> to vector<1x16xf32>
    %c0_876 = arith.constant 0 : index
    %c11_877 = arith.constant 11 : index
    %c0_878 = arith.constant 0 : index
    %1076 = vector.load %arg18[%c0_876, %c11_877, %c0_878] : memref<1x16x16xf32, #tpu.memory_space<vmem>>, vector<1x1x16xf32>
    %1077 = vector.shape_cast %1076 : vector<1x1x16xf32> to vector<1x16xf32>
    %1078 = vector.shape_cast %1075 : vector<1x16xf32> to vector<1x1x16xf32>
    tpu.vector_store %arg18[%c0_876, %c11_877, %c0_878], %1078 {strides = array<i32>} : memref<1x16x16xf32, #tpu.memory_space<vmem>>, vector<1x1x16xf32>,
    %1079 = vector.extract_strided_slice %1030 {offsets = [0, 240], sizes = [1, 16], strides = [1, 1]} : vector<8x316xf32> to vector<1x16xf32>
    %c0_879 = arith.constant 0 : index
    %c12_880 = arith.constant 12 : index
    %c0_881 = arith.constant 0 : index
    %1080 = vector.load %arg18[%c0_879, %c12_880, %c0_881] : memref<1x16x16xf32, #tpu.memory_space<vmem>>, vector<1x1x16xf32>
    %1081 = vector.shape_cast %1080 : vector<1x1x16xf32> to vector<1x16xf32>
    %1082 = vector.shape_cast %1079 : vector<1x16xf32> to vector<1x1x16xf32>
    tpu.vector_store %arg18[%c0_879, %c12_880, %c0_881], %1082 {strides = array<i32>} : memref<1x16x16xf32, #tpu.memory_space<vmem>>, vector<1x1x16xf32>,
    %1083 = vector.extract_strided_slice %1030 {offsets = [0, 260], sizes = [1, 16], strides = [1, 1]} : vector<8x316xf32> to vector<1x16xf32>
    %c0_882 = arith.constant 0 : index
    %c13_883 = arith.constant 13 : index
    %c0_884 = arith.constant 0 : index
    %1084 = vector.load %arg18[%c0_882, %c13_883, %c0_884] : memref<1x16x16xf32, #tpu.memory_space<vmem>>, vector<1x1x16xf32>
    %1085 = vector.shape_cast %1084 : vector<1x1x16xf32> to vector<1x16xf32>
    %1086 = vector.shape_cast %1083 : vector<1x16xf32> to vector<1x1x16xf32>
    tpu.vector_store %arg18[%c0_882, %c13_883, %c0_884], %1086 {strides = array<i32>} : memref<1x16x16xf32, #tpu.memory_space<vmem>>, vector<1x1x16xf32>,
    %1087 = vector.extract_strided_slice %1030 {offsets = [0, 280], sizes = [1, 16], strides = [1, 1]} : vector<8x316xf32> to vector<1x16xf32>
    %c0_885 = arith.constant 0 : index
    %c14_886 = arith.constant 14 : index
    %c0_887 = arith.constant 0 : index
    %1088 = vector.load %arg18[%c0_885, %c14_886, %c0_887] : memref<1x16x16xf32, #tpu.memory_space<vmem>>, vector<1x1x16xf32>
    %1089 = vector.shape_cast %1088 : vector<1x1x16xf32> to vector<1x16xf32>
    %1090 = vector.shape_cast %1087 : vector<1x16xf32> to vector<1x1x16xf32>
    tpu.vector_store %arg18[%c0_885, %c14_886, %c0_887], %1090 {strides = array<i32>} : memref<1x16x16xf32, #tpu.memory_space<vmem>>, vector<1x1x16xf32>,
    %1091 = vector.extract_strided_slice %1030 {offsets = [0, 300], sizes = [1, 16], strides = [1, 1]} : vector<8x316xf32> to vector<1x16xf32>
    %c0_888 = arith.constant 0 : index
    %c15_889 = arith.constant 15 : index
    %c0_890 = arith.constant 0 : index
    %1092 = vector.load %arg18[%c0_888, %c15_889, %c0_890] : memref<1x16x16xf32, #tpu.memory_space<vmem>>, vector<1x1x16xf32>
    %1093 = vector.shape_cast %1092 : vector<1x1x16xf32> to vector<1x16xf32>
    %1094 = vector.shape_cast %1091 : vector<1x16xf32> to vector<1x1x16xf32>
    tpu.vector_store %arg18[%c0_888, %c15_889, %c0_890], %1094 {strides = array<i32>} : memref<1x16x16xf32, #tpu.memory_space<vmem>>, vector<1x1x16xf32>,
    return
  }
  func.func @transform_0(%arg0: i32) -> (i32, i32, i32) {
    %c0_i32 = arith.constant 0 : i32
    %c0_i32_0 = arith.constant 0 : i32
    %c0_i32_1 = arith.constant 0 : i32
    return %arg0, %c0_i32, %c0_i32_0 : i32, i32, i32
  }
  func.func @transform_1(%arg0: i32) -> (i32, i32, i32) {
    %c0_i32 = arith.constant 0 : i32
    %c0_i32_0 = arith.constant 0 : i32
    %c0_i32_1 = arith.constant 0 : i32
    %c0_i32_2 = arith.constant 0 : i32
    return %c0_i32, %c0_i32_0, %c0_i32_1 : i32, i32, i32
  }
  func.func @transform_2(%arg0: i32) -> (i32, i32) {
    %c0_i32 = arith.constant 0 : i32
    %c0_i32_0 = arith.constant 0 : i32
    %c0_i32_1 = arith.constant 0 : i32
    return %c0_i32, %c0_i32_0 : i32, i32
  }
  func.func @transform_3(%arg0: i32) -> (i32, i32, i32) {
    %c0_i32 = arith.constant 0 : i32
    %c0_i32_0 = arith.constant 0 : i32
    %c0_i32_1 = arith.constant 0 : i32
    %c0_i32_2 = arith.constant 0 : i32
    return %c0_i32, %c0_i32_0, %c0_i32_1 : i32, i32, i32
  }
  func.func @transform_4(%arg0: i32) -> (i32, i32) {
    %c0_i32 = arith.constant 0 : i32
    %c0_i32_0 = arith.constant 0 : i32
    %c0_i32_1 = arith.constant 0 : i32
    return %c0_i32, %c0_i32_0 : i32, i32
  }
  func.func @transform_5(%arg0: i32) -> (i32, i32, i32) {
    %c0_i32 = arith.constant 0 : i32
    %c0_i32_0 = arith.constant 0 : i32
    %c0_i32_1 = arith.constant 0 : i32
    %c0_i32_2 = arith.constant 0 : i32
    return %c0_i32, %c0_i32_0, %c0_i32_1 : i32, i32, i32
  }
  func.func @transform_6(%arg0: i32) -> (i32, i32) {
    %c0_i32 = arith.constant 0 : i32
    %c0_i32_0 = arith.constant 0 : i32
    %c0_i32_1 = arith.constant 0 : i32
    return %c0_i32, %c0_i32_0 : i32, i32
  }
  func.func @transform_7(%arg0: i32) -> (i32, i32) {
    %c0_i32 = arith.constant 0 : i32
    %c0_i32_0 = arith.constant 0 : i32
    %c0_i32_1 = arith.constant 0 : i32
    return %c0_i32, %c0_i32_0 : i32, i32
  }
  func.func @transform_8(%arg0: i32) -> (i32, i32) {
    %c0_i32 = arith.constant 0 : i32
    %c0_i32_0 = arith.constant 0 : i32
    %c0_i32_1 = arith.constant 0 : i32
    return %c0_i32, %c0_i32_0 : i32, i32
  }
  func.func @transform_9(%arg0: i32) -> (i32, i32) {
    %c0_i32 = arith.constant 0 : i32
    %c0_i32_0 = arith.constant 0 : i32
    %c0_i32_1 = arith.constant 0 : i32
    return %c0_i32, %c0_i32_0 : i32, i32
  }
  func.func @transform_10(%arg0: i32) -> (i32, i32) {
    %c0_i32 = arith.constant 0 : i32
    %c0_i32_0 = arith.constant 0 : i32
    %c0_i32_1 = arith.constant 0 : i32
    return %c0_i32, %c0_i32_0 : i32, i32
  }
  func.func @transform_11(%arg0: i32) -> (i32, i32, i32) {
    %c0_i32 = arith.constant 0 : i32
    %c0_i32_0 = arith.constant 0 : i32
    %c0_i32_1 = arith.constant 0 : i32
    %c0_i32_2 = arith.constant 0 : i32
    return %c0_i32, %c0_i32_0, %c0_i32_1 : i32, i32, i32
  }
  func.func @transform_12(%arg0: i32) -> (i32, i32) {
    %c0_i32 = arith.constant 0 : i32
    %c0_i32_0 = arith.constant 0 : i32
    %c0_i32_1 = arith.constant 0 : i32
    return %c0_i32, %c0_i32_0 : i32, i32
  }
  func.func @transform_13(%arg0: i32) -> (i32, i32, i32) {
    %c0_i32 = arith.constant 0 : i32
    %c0_i32_0 = arith.constant 0 : i32
    %c0_i32_1 = arith.constant 0 : i32
    %c0_i32_2 = arith.constant 0 : i32
    return %c0_i32, %c0_i32_0, %c0_i32_1 : i32, i32, i32
  }
  func.func @transform_14(%arg0: i32) -> (i32, i32) {
    %c0_i32 = arith.constant 0 : i32
    %c0_i32_0 = arith.constant 0 : i32
    %c0_i32_1 = arith.constant 0 : i32
    return %c0_i32, %c0_i32_0 : i32, i32
  }
  func.func @transform_15(%arg0: i32) -> (i32, i32, i32) {
    %c0_i32 = arith.constant 0 : i32
    %c0_i32_0 = arith.constant 0 : i32
    %c0_i32_1 = arith.constant 0 : i32
    %c0_i32_2 = arith.constant 0 : i32
    return %c0_i32, %c0_i32_0, %c0_i32_1 : i32, i32, i32
  }
  func.func @transform_16(%arg0: i32) -> (i32, i32) {
    %c0_i32 = arith.constant 0 : i32
    %c0_i32_0 = arith.constant 0 : i32
    %c0_i32_1 = arith.constant 0 : i32
    return %c0_i32, %c0_i32_0 : i32, i32
  }
  func.func @transform_17(%arg0: i32) -> (i32, i32, i32) {
    %c0_i32 = arith.constant 0 : i32
    %c0_i32_0 = arith.constant 0 : i32
    %c0_i32_1 = arith.constant 0 : i32
    return %arg0, %c0_i32, %c0_i32_0 : i32, i32, i32
  }
}

</mosaic_0001>

<bundles_post_ra>
// kernel: autoencoder_forward.1
= control target key start
LH: loop header
LB: loop body
LE: loop exit
PB: predicated region body
PF: predicated region fallthrough
CT: control target
= control target key end

     0   :  { %s11681_s0 = inlined_call_operand.vmem [shape: f32[2,16,16], index: 0, kind: input, shape index: {}]   ;;  %s11682_s1 = inlined_call_operand.vmem [shape: f32[25,8,8], index: 1, kind: input, shape index: {}]   ;;  %s11683_s2 = inlined_call_operand.vmem [shape: f32[8,1], index: 2, kind: input, shape index: {}]   ;;  %s11684_s3 = inlined_call_operand.vmem [shape: f32[25,8,8], index: 3, kind: input, shape index: {}]   ;;  %s11685_s4 = inlined_call_operand.vmem [shape: f32[8,1], index: 4, kind: input, shape index: {}]   ;;  %s11686_s5 = inlined_call_operand.vmem [shape: f32[25,8,8], index: 5, kind: input, shape index: {}]   ;;  %s11687_s6 = inlined_call_operand.vmem [shape: f32[8,1], index: 6, kind: input, shape index: {}]   ;;  %s11688_s7 = inlined_call_operand.vmem [shape: f32[128,32], index: 7, kind: input, shape index: {}]   ;;  %s11689_s8 = inlined_call_operand.vmem [shape: f32[1,32], index: 8, kind: input, shape index: {}]   ;;  %s11690_s9 = inlined_call_operand.vmem [shape: f32[32,128], index: 9, kind: input, shape index: {}]   ;;  %s11691_s10 = inlined_call_operand.vmem [shape: f32[1,128], index: 10, kind: input, shape index: {}]   ;;  %s11692_s11 = inlined_call_operand.vmem [shape: f32[25,8,8], index: 11, kind: input, shape index: {}]   ;;  %s11693_s12 = inlined_call_operand.vmem [shape: f32[8,1], index: 12, kind: input, shape index: {}]   ;;  %s11694_s13 = inlined_call_operand.vmem [shape: f32[25,8,8], index: 13, kind: input, shape index: {}]   ;;  %s11695_s14 = inlined_call_operand.vmem [shape: f32[8,1], index: 14, kind: input, shape index: {}]   ;;  %s11696_s15 = inlined_call_operand.vmem [shape: f32[25,8,8], index: 15, kind: input, shape index: {}]   ;;  %s11697_s16 = inlined_call_operand.vmem [shape: f32[8,1], index: 16, kind: input, shape index: {}]   ;;  %s11698_s17 = inlined_call_operand.hbm [shape: f32[2,16,16], index: 17, kind: output, shape index: {}]  }
   0x1   :  { %11844 = sst [smem:[#allocation19_spill]] %s11681_s0 }
   0x2   :  { %11845 = sst [smem:[#allocation20_spill]] %s11682_s1 }
   0x3   :  { %11846 = sst [smem:[#allocation21_spill]] %s11683_s2 }
   0x4   :  { %11847 = sst [smem:[#allocation22_spill]] %s11684_s3 }
   0x5   :  { %11848 = sst [smem:[#allocation23_spill]] %s11685_s4 }
   0x6   :  { %11849 = sst [smem:[#allocation24_spill]] %s11686_s5 }
   0x7   :  { %11850 = sst [smem:[#allocation25_spill]] %s11687_s6 }
   0x8   :  { %11851 = sst [smem:[#allocation26_spill]] %s11688_s7 }
   0x9   :  { %11852 = sst [smem:[#allocation27_spill]] %s11689_s8 }
   0xa   :  { %11853 = sst [smem:[#allocation28_spill]] %s11690_s9 }
   0xb   :  { %11854 = sst [smem:[#allocation29_spill]] %s11691_s10 }
   0xc   :  { %11855 = sst [smem:[#allocation30_spill]] %s11692_s11 }
   0xd   :  { %11856 = sst [smem:[#allocation31_spill]] %s11693_s12 }
   0xe   :  { %11857 = sst [smem:[#allocation32_spill]] %s11694_s13 }
   0xf   :  { %11858 = sst [smem:[#allocation33_spill]] %s11695_s14 }
  0x10   :  { %11859 = sst [smem:[#allocation34_spill]] %s11696_s15 }
  0x11   :  { %11860 = sst [smem:[#allocation35_spill]] %s11697_s16 }
  0x12   :  { %11861 = sst [smem:[#allocation36_spill]] %s11698_s17 }
  0x13   :  { %22 = vsyncpa [#allocation8], 0 }
  0x14   :  { %24 = vsyncpa [#allocation8 + $0x1], 0  ;;  %s10162_s24 = smov 0   ;;  %s10164_s25 = smov 0  }
  0x15   :  { %s10166_s26 = smov 0   ;;  %s10168_s27 = smov 0  }
  0x16 LB: > { %11862 = sst [smem:[#allocation10_spill]] %s9997_s24  ;;  %s10183_s28 = sadd.s32 4294967295, %s10009_s27   ;;  %s10009_s27 = sphi %s10168_s27, %s12052_s27   ;;  %s10005_s26 = sphi %s10166_s26, %s12055_s26   ;;  %s10001_s25 = sphi %s10164_s25, %s12054_s25   ;;  %s9997_s24 = sphi %s10162_s24, %s12053_s24  }
  0x17   : > { %11863 = sst [smem:[#allocation11_spill]] %s10001_s25  ;;  %s8813_s29 = sadd.s32 4294967294, %s10009_s27  }
  0x18   : > { %11864 = sst [smem:[#allocation12_spill]] %s10005_s26  ;;  %s10187_s0 = sadd.s32 1, %s10009_s27  }
  0x19   : > { %11865 = sst [smem:[#allocation13_spill]] %s10009_s27  ;;  %s399_s30 = sadd.s32 1, %s10005_s26 }
  0x1a   : > { %11866 = sst [smem:[#allocation14_spill]] %s10183_s28  ;;  %s396_s18 = ssub.s32 %s10009_s27, %s10187_s0 }
  0x1b   : > { %11867 = sst [smem:[#allocation15_spill]] %s10187_s0  ;;  %p409_p0 = scmp.ne.s32.totalorder %s10005_s26, %s10001_s25 }
  0x1c   : > { %p397_p1 = scmp.eq.s32.totalorder %s396_s18, 0  ;;  %p410_p2 = scmp.eq.s32.totalorder %s10183_s28, 1 }
  0x1d   : > { %p415_p3 = scmp.ne.s32.totalorder %s10001_s25, %s9997_s24  ;;  %p416_p4 = scmp.eq.s32.totalorder %s8813_s29, 1 }
  0x1e   : > { %s10198_s19 = scalar_select %p397_p1, %s10005_s26, %s399_s30  }
  0x1f   : > { %p10200_p5 = por %p410_p2, %p409_p0  ;;  %p10204_p6 = por %p416_p4, %p415_p3 }
  0x20   : > { %11868 = sst [smem:[#allocation16_spill]] %s10198_s19  ;;  %p8816_p7 = scmp.ge.s32.totalorder %s10009_s27, 1 }
  0x21   : > { %s11869_s1 = scalar_select %p10200_p5, 1, 0 }
  0x22   : > { %s11871_s20 = scalar_select %p10204_p6, 1, 0 }
  0x23   : > { %11870 = sst [smem:[#allocation17_spill]] %s11869_s1  ;;  %p490_p8 = scmp.lt.s32.totalorder %s10009_s27, 3 }
  0x24   : > { %11872 = sst [smem:[#allocation18_spill]] %s11871_s20 }
  0x25   : > { %p491_p9 = pnand %p8816_p7, %p490_p8 }
  0x26   : > { %p542_p10 = scmp.lt.s32.totalorder (!%p491_p9), %s10183_s28, 1  ;;  %s11873_s30 = sld [smem:[#allocation19_spill]] (!%p491_p9) }
  0x27   : > { %494 = sbr.rel (%p491_p9) target bundleno = 3326 (0xcfe), region = 88  ;;  %s11703_s19 = smov (!%p491_p9), 32  }
  0x28   : > { %s11704_s26 = smov (!%p491_p9), 16   ;;  %s11708_s23 = smov (!%p491_p9), 80  }
  0x29   : > { %s11710_s29 = smov (!%p491_p9), 96   ;;  %s11876_s0 = smov (!%p491_p9), 64  }
  0x2a   : > { %s11750_s20 = smov (!%p491_p9), 76   ;;  %s11878_s2 = sld [smem:[#allocation21_spill]] (!%p491_p9) }
  0x2b   : > { %s11879_s24 = smov (!%p491_p9), 124   ;;  %s11888_s27 = smov (!%p491_p9), 94  }
  0x2c   : > { %s543_s21 = scalar_select %p542_p10, %s10183_s28, 1  ;;  %v10018_v14 = vmov 0.0   ;;  %vm11752_vm0 = vcmask 122880   ;;  %vm557_vm1 = vcmask 254080   ;;  %vm564_vm2 = vcmask 385280  }
  0x2d   : > { %547 = vst [vmem:[#allocation2] sm:$0xff] %v10018_v14  ;;  %vm571_vm3 = vcmask 516480   ;;  %vm578_vm4 = vcmask 647680   ;;  %vm585_vm5 = vcmask 778880   ;;  %vm592_vm6 = vcmask 910080   ;;  %s11889_s17 = smov 93  }
  0x2e   : > { %s9245_s22 = sshll.u32 %s543_s21, 4  ;;  %s11701_s21 = smov 48   ;;  %548 = vst [vmem:[#allocation2 + $0x8] sm:$0xff] %v10018_v14  ;;  %vm599_vm7 = vcmask 1041280   ;;  %vm660_vm8 = vcmask 64512   ;;  %vm11755_vm9 = vcmask 1039360  }
  0x2f   : > { %s10215_s18 = scalar_lea.vmem %s11873_s30, %s9245_s22  ;;  %s11706_s22 = smov 64   ;;  %3539 = vst [vmem:[#allocation3] sm:$0xff] %v10018_v14  ;;  %vm11756_vm10 = vcmask 1031168   ;;  %vm11754_vm11 = vcmask 1022976   ;;  %vm11753_vm12 = vcmask 1014784   ;;  %vm918_vm13 = vcmask 916480  }
  0x30   : > { %v559_v0 = vld [vmem:[%s10215_s18 + $0x2] sm:$0x1]  ;;  %v552_v1 = vld [vmem:[%s10215_s18 + $0x1] sm:$0x1]  ;;  %v566_v2 = vld [vmem:[%s10215_s18 + $0x3] sm:$0x1] }
  0x31   : > { %561 = vrot.lane.b32.xlu1 %v559_v0, %s11703_s19  ;;  %554 = vrot.lane.b32.xlu0 %v552_v1, %s11704_s26  ;;  %v609_v3 = vld [vmem:[%s10215_s18 + $0xa] sm:$0x1]  ;;  %v603_v4 = vld [vmem:[%s10215_s18 + $0x9] sm:$0x1]  ;;  %s11720_s30 = smov 112   ;;  %3773 = vst [vmem:[#allocation4] sm:$0xff] %v10018_v14 }
  0x32   : > { %568 = vrot.lane.b32.xlu2 %v566_v2, %s11701_s21  ;;  %v615_v5 = vld [vmem:[%s10215_s18 + $0xb] sm:$0x1]  ;;  %v621_v6 = vld [vmem:[%s10215_s18 + $0xc] sm:$0x1]  ;;  %v573_v7 = vld [vmem:[%s10215_s18 + $0x4] sm:$0x1] }
  0x33   : > { %v580_v8 = vld [vmem:[%s10215_s18 + $0x5] sm:$0x1]  ;;  %v587_v9 = vld [vmem:[%s10215_s18 + $0x6] sm:$0x1]  ;;  %v627_v10 = vld [vmem:[%s10215_s18 + $0xd] sm:$0x1] }
  0x34   : > { %v633_v11 = vld [vmem:[%s10215_s18 + $0xe] sm:$0x1]  ;;  %v639_v12 = vld [vmem:[%s10215_s18 + $0xf] sm:$0x1]  ;;  %v594_v13 = vld [vmem:[%s10215_s18 + $0x7] sm:$0x1] }
  0x35   : > { %v549_v15 = vld [vmem:[%s10215_s18] sm:$0x1]  ;;  %3774 = vst [vmem:[#allocation4 + $0x8] sm:$0xff] %v10018_v14  ;;  %v601_v16 = vld [vmem:[%s10215_s18 + $0x8] sm:$0x1]  ;;  %s11712_s18 = smov 125  }
  0x36   : > { %551 = vst.msk [vmem:[#allocation2] sm:$0x1] %vm11752_vm0, %v549_v15  ;;  %vm973_vm14 = vcmask 908288   ;;  %vm1028_vm15 = vcmask 900096   ;;  %s11890_s1 = smov 79   ;;  %s11891_s28 = smov 95  }
  0x37   : > { %3775 = vst [vmem:[#allocation4 + $0x10] sm:$0xff] %v10018_v14  ;;  %s11892_s25 = smov 92   ;;  %s11893_s16 = smov 78  }
  0x38   : > { %5209 = vst [vmem:[#allocation5] sm:$0xff] %v10018_v14  ;;  %s11894_s15 = smov 63   ;;  %s11895_s14 = smov 77  }
  0x39   : > { %611 = vrot.lane.b32.xlu1 %v609_v3, %s11703_s19  ;;  %605 = vrot.lane.b32.xlu0 %v603_v4, %s11704_s26  ;;  %5210 = vst [vmem:[#allocation5 + $0x8] sm:$0xff] %v10018_v14  ;;  %s11716_s19 = smov 127   ;;  %s11718_s26 = smov 111  }
  0x3a   : > { %617 = vrot.lane.b32.xlu2 %v615_v5, %s11701_s21  ;;  %6638 = vst [vmem:[#allocation6] sm:$0xff] %v10018_v14  ;;  %s11714_s21 = smov 126   ;;  %s11896_s13 = smov 76  }
  0x3b   : > { %6639 = vst [vmem:[#allocation6 + $0x8] sm:$0xff] %v10018_v14  ;;  %s11897_s11 = smov 62   ;;  %s11898_s12 = smov 60  }
  0x3c   : > { %6640 = vst [vmem:[#allocation6 + $0x10] sm:$0xff] %v10018_v14  ;;  %s11899_s10 = smov 61   ;;  %s11900_s3 = sld [smem:[#allocation22_spill]] }
  0x3d   : > { %602 = vst.msk [vmem:[#allocation2 + $0x8] sm:$0x1] %vm11752_vm0, %v601_v16  ;;  %vm11760_vm0 = vcmask 654336   ;;  %s11901_s4 = sld [smem:[#allocation23_spill]]  ;;  %s11794_s8 = smov 20  }
  0x3e   : > { %s11911_s6 = smov 32   ;;  %s11784_s5 = smov 8  }
  0x3f   : > { %s10046_s7 = smov 12   ;;  %s10047_s9 = smov 24  }
  0x41   : > { %623 = vrot.lane.b32.xlu1 %v621_v6, %s11706_s22  ;;  %575 = vrot.lane.b32.xlu0 %v573_v7, %s11706_s22  ;;  %s11722_s22 = smov 124  }
  0x42   : > { %582 = vrot.lane.b32.xlu2 %v580_v8, %s11708_s23 }
  0x49   : > { %589 = vrot.lane.b32.xlu1 %v587_v9, %s11710_s29  ;;  %629 = vrot.lane.b32.xlu0 %v627_v10, %s11708_s23  ;;  %s11724_s23 = smov 108  }
  0x4a   : > { %635 = vrot.lane.b32.xlu2 %v633_v11, %s11710_s29  ;;  %s11726_s29 = smov 109  }
  0x51   : > { %641 = vrot.lane.b32.xlu1 %v639_v12, %s11720_s30  ;;  %596 = vrot.lane.b32.xlu0 %v594_v13, %s11720_s30 }
  0x8c   : > { %v569_v17 = vpop.permute.xlu2 %568 }
  0x94   : > { %v618_v20 = vpop.permute.xlu2 %617 }
  0x9c   : > { %v583_v23 = vpop.permute.xlu2 %582 }
  0xa3   : > { %v562_v18 = vpop.permute.xlu1 %561  ;;  %v555_v19 = vpop.permute.xlu0 %554 }
  0xa4   : > { %558 = vst.msk [vmem:[#allocation2] sm:$0x1] %vm557_vm1, %v555_v19  ;;  %v636_v26 = vpop.permute.xlu2 %635 }
  0xa5   : > { %565 = vst.msk [vmem:[#allocation2] sm:$0x1] %vm564_vm2, %v562_v18 }
  0xa6   : > { %572 = vst.msk [vmem:[#allocation2] sm:$0x1] %vm571_vm3, %v569_v17 }
  0xab   : > { %v612_v21 = vpop.permute.xlu1 %611  ;;  %v606_v22 = vpop.permute.xlu0 %605 }
  0xac   : > { %608 = vst.msk [vmem:[#allocation2 + $0x8] sm:$0x1] %vm557_vm1, %v606_v22  ;;  %vm1083_vm1 = vcmask 891904  }
  0xad   : > { %614 = vst.msk [vmem:[#allocation2 + $0x8] sm:$0x1] %vm564_vm2, %v612_v21  ;;  %vm1138_vm2 = vcmask 883712  }
  0xae   : > { %620 = vst.msk [vmem:[#allocation2 + $0x8] sm:$0x1] %vm571_vm3, %v618_v20  ;;  %vm1193_vm3 = vcmask 785408  }
  0xb3   : > { %v624_v24 = vpop.permute.xlu1 %623  ;;  %v576_v25 = vpop.permute.xlu0 %575 }
  0xb4   : > { %626 = vst.msk [vmem:[#allocation2 + $0x8] sm:$0x1] %vm578_vm4, %v624_v24 }
  0xb5   : > { %579 = vst.msk [vmem:[#allocation2] sm:$0x1] %vm578_vm4, %v576_v25  ;;  %vm1248_vm4 = vcmask 777216  }
  0xb6   : > { %586 = vst.msk [vmem:[#allocation2] sm:$0x1] %vm585_vm5, %v583_v23 }
  0xbb   : > { %v590_v27 = vpop.permute.xlu1 %589  ;;  %v630_v28 = vpop.permute.xlu0 %629 }
  0xbc   : > { %593 = vst.msk [vmem:[#allocation2] sm:$0x1] %vm592_vm6, %v590_v27 }
  0xbd   : > { %632 = vst.msk [vmem:[#allocation2 + $0x8] sm:$0x1] %vm585_vm5, %v630_v28  ;;  %vm1303_vm5 = vcmask 769024  }
  0xbe   : > { %638 = vst.msk [vmem:[#allocation2 + $0x8] sm:$0x1] %vm592_vm6, %v636_v26  ;;  %vm1358_vm6 = vcmask 760832  }
  0xc3   : > { %v642_v29 = vpop.permute.xlu1 %641  ;;  %v597_v30 = vpop.permute.xlu0 %596 }
  0xc4   : > { %644 = vst.msk [vmem:[#allocation2 + $0x8] sm:$0x1] %vm599_vm7, %v642_v29 }
  0xc5   : > { %600 = vst.msk [vmem:[#allocation2] sm:$0x1] %vm599_vm7, %v597_v30  ;;  %vm1413_vm7 = vcmask 752640  }
  0xcb   : > { %v646_v31 = vld [vmem:[#allocation2 + $0x8] sm:$0xff] }
  0xcc   : > { %v645_v32 = vld [vmem:[#allocation2] sm:$0xff]  ;;  %742 = vmatpush.msra.mxu3 %v646_v31 }
  0xcd   : > { %722 = vmatpush.msra.mxu2 %v645_v32  ;;  %v9357_v33 = vpack.i.bf16 %v646_v31, %v645_v32 }
  0xcf   : > { %9358 = vrot.lane.b32.xlu1 %v9357_v33, %s11712_s18  ;;  %9353 = vrot.lane.b32.xlu0 %v9357_v33, %s11714_s21  ;;  %s11728_s18 = smov 110   ;;  %s11730_s21 = smov 94  }
  0xd0   : > { %9348 = vrot.lane.b32.xlu2 %v9357_v33, %s11716_s19  ;;  %s11732_s19 = smov 95  }
  0xd7   : > { %9373 = vrot.lane.b32.xlu1 %v9357_v33, %s11718_s26  ;;  %9368 = vrot.lane.b32.xlu0 %v9357_v33, %s11720_s30  ;;  %s11874_s26 = smov 96   ;;  %s11875_s30 = smov 80  }
  0xd8   : > { %9363 = vrot.lane.b32.xlu2 %v9357_v33, %s11722_s22  ;;  %s11737_s22 = smov 92  }
  0xdf   : > { %9388 = vrot.lane.b32.xlu1 %v9357_v33, %s11724_s23  ;;  %9383 = vrot.lane.b32.xlu0 %v9357_v33, %s11726_s29  ;;  %s11739_s23 = smov 93   ;;  %s11741_s29 = smov 77  }
  0xe0   : > { %9378 = vrot.lane.b32.xlu2 %v9357_v33, %s11728_s18  ;;  %s11743_s18 = smov 78  }
  0xe7   : > { %9403 = vrot.lane.b32.xlu1 %v9357_v33, %s11730_s21  ;;  %9398 = vrot.lane.b32.xlu0 %v9357_v33, %s11732_s19  ;;  %s11746_s21 = smov 79   ;;  %s11766_s19 = smov 63  }
  0xe8   : > { %9393 = vrot.lane.b32.xlu2 %v9357_v33, %s11874_s26 }
  0xef   : > { %9418 = vrot.lane.b32.xlu1 %v9357_v33, %s11875_s30  ;;  %9413 = vrot.lane.b32.xlu0 %v9357_v33, %s11737_s22  ;;  %s11748_s22 = smov 60  }
  0xf0   : > { %9408 = vrot.lane.b32.xlu2 %v9357_v33, %s11739_s23  ;;  %s11762_s23 = smov 61  }
  0xf7   : > { %9433 = vrot.lane.b32.xlu1 %v9357_v33, %s11741_s29  ;;  %9428 = vrot.lane.b32.xlu0 %v9357_v33, %s11743_s18  ;;  %s11764_s29 = smov 62   ;;  %s11882_s18 = smov 125  }
  0xf8   : > { %9423 = vrot.lane.b32.xlu2 %v9357_v33, %s11746_s21  ;;  %s11877_s21 = sld [smem:[#allocation20_spill]] }
  0xfe   : > { %v647_v34 = vld [vmem:[%s11877_s21] sm:$0xff]  ;;  %v8820_v38 = vld [vmem:[%s11877_s21 + $0x8] sm:$0xff]  ;;  %v8825_v47 = vld [vmem:[%s11877_s21 + $0x10] sm:$0xff] }
  0xff   : > { %9448 = vrot.lane.b32.xlu1 %v9357_v33, %s11766_s19  ;;  %9443 = vrot.lane.b32.xlu0 %v9357_v33, %s11876_s0  ;;  %v8828_v50 = vld [vmem:[%s11877_s21 + $0x18] sm:$0xff]  ;;  %v8831_v61 = vld [vmem:[%s11877_s21 + $0x20] sm:$0xff]  ;;  %s11885_s19 = smov 108  }
 0x100   : > { %9438 = vrot.lane.b32.xlu2 %v9357_v33, %s11750_s20  ;;  %8823 = vmatmul.msk.f32.vlgmr.msra.gmra.mxu2 %vm660_vm8, %v647_v34  ;;  %v8834_v62 = vld [vmem:[%s11877_s21 + $0x28] sm:$0xff]  ;;  %v8837_v11 = vld [vmem:[%s11877_s21 + $0x30] sm:$0xff]  ;;  %v8840_v14 = vld [vmem:[%s11877_s21 + $0x38] sm:$0xff]  ;;  %s11880_s20 = smov 127  }
 0x101   : > { %8824 = vmatmul.msk.f32.vlgmr.msra.gmra.mxu3 %vm660_vm8, %v647_v34  ;;  %v8843_v25 = vld [vmem:[%s11877_s21 + $0x40] sm:$0xff]  ;;  %v8846_v26 = vld [vmem:[%s11877_s21 + $0x48] sm:$0xff] }
 0x107   : > { %9463 = vrot.lane.b32.xlu1 %v9357_v33, %s11748_s22  ;;  %9458 = vrot.lane.b32.xlu0 %v9357_v33, %s11762_s23  ;;  %s11881_s22 = smov 112   ;;  %s11883_s23 = smov 126  }
 0x108   : > { %9453 = vrot.lane.b32.xlu2 %v9357_v33, %s11764_s29  ;;  %s11884_s29 = smov 109  }
 0x12a   : > { %v9349_v35 = vpop.permute.xlu2 %9348 }
 0x12b   : > { %v9350_v36 = vunpack.i.l.bf16 %v9349_v35  ;;  %v9351_v37 = vunpack.i.h.bf16 %v9349_v35 }
 0x12d   : > { %699 = vmatpush.msra.mxu1 %v9351_v37  ;;  %v657_v39 = vsel %vm11755_vm9, %v9350_v36, %v9351_v37  ;;  %vm11757_vm9 = vcmask 629760  }
 0x12e   : > { %679 = vmatpush.msra.mxu0 %v657_v39  ;;  %8822 = vmatmul.msk.f32.vlgmr.msra.gmra.mxu1 %vm660_vm8, %v8820_v38  ;;  %v8852_v39 = vld [vmem:[%s11877_s21 + $0x58] sm:$0xff] }
 0x12f   : > { %8821 = vmatmul.msk.f32.vlgmr.msra.gmra.mxu0 %vm660_vm8, %v8820_v38  ;;  %v8849_v38 = vld [vmem:[%s11877_s21 + $0x50] sm:$0xff] }
 0x132   : > { %v9364_v40 = vpop.permute.xlu2 %9363 }
 0x133   : > { %v9366_v48 = vunpack.i.h.bf16 %v9364_v40  ;;  %v9365_v49 = vunpack.i.l.bf16 %v9364_v40 }
 0x135   : > { %v864_v54 = vsel %vm11753_vm12, %v9365_v49, %v9366_v48  ;;  %v8858_v49 = vld [vmem:[%s11877_s21 + $0x68] sm:$0xff]  ;;  %vm11758_vm12 = vcmask 637952  }
 0x13a   : > { %v9379_v51 = vpop.permute.xlu2 %9378 }
 0x13b   : > { %v9381_v63 = vunpack.i.h.bf16 %v9379_v51  ;;  %v9380_v0 = vunpack.i.l.bf16 %v9379_v51 }
 0x13d   : > { %v1029_v4 = vsel %vm1028_vm15, %v9380_v0, %v9381_v63  ;;  %v8867_v0 = vld [vmem:[%s11877_s21 + $0x80] sm:$0xff] }
 0x141   : > { %v9359_v41 = vpop.permute.xlu1 %9358  ;;  %v9354_v42 = vpop.permute.xlu0 %9353 }
 0x142   : > { %v9360_v43 = vunpack.i.l.bf16 %v9359_v41  ;;  %v9355_v44 = vunpack.i.l.bf16 %v9354_v42  ;;  %v9356_v45 = vunpack.i.h.bf16 %v9354_v42  ;;  %v9361_v46 = vunpack.i.h.bf16 %v9359_v41  ;;  %v9394_v3 = vpop.permute.xlu2 %9393 }
 0x143   : > { %v9396_v12 = vunpack.i.h.bf16 %v9394_v3  ;;  %v9395_v13 = vunpack.i.l.bf16 %v9394_v3  ;;  %v8870_v3 = vld [vmem:[%s11877_s21 + $0x88] sm:$0xff] }
 0x144   : > { %795 = vmatpush.msrb.mxu1 %v9356_v45  ;;  %850 = vmatpush.msrb.mxu3 %v9361_v46  ;;  %v754_v52 = vsel %vm11756_vm10, %v9355_v44, %v9356_v45  ;;  %v809_v53 = vsel %vm11754_vm11, %v9360_v43, %v9361_v46  ;;  %v8855_v46 = vld [vmem:[%s11877_s21 + $0x60] sm:$0xff]  ;;  %vm1523_vm11 = vcmask 646144   ;;  %vm11759_vm10 = vcmask 621568  }
 0x145   : > { %775 = vmatpush.msrb.mxu0 %v754_v52  ;;  %8827 = vmatmul.msk.f32.vlgmr.msrb.gmra.mxu1 %vm660_vm8, %v8825_v47  ;;  %v1194_v17 = vsel %vm1193_vm3, %v9395_v13, %v9396_v12  ;;  %v8876_v13 = vld [vmem:[%s11877_s21 + $0x98] sm:$0xff] }
 0x146   : > { %830 = vmatpush.msrb.mxu2 %v809_v53  ;;  %8830 = vmatmul.msk.f32.vlgmr.msrb.gmra.mxu3 %vm660_vm8, %v8828_v50 }
 0x147   : > { %905 = vmatpush.msra.mxu1 %v9366_v48  ;;  %8826 = vmatmul.msk.f32.vlgmr.msrb.gmra.mxu0 %vm660_vm8, %v8825_v47 }
 0x148   : > { %8829 = vmatmul.msk.f32.vlgmr.msrb.gmra.mxu2 %vm660_vm8, %v8828_v50  ;;  %885 = vmatpush.msra.mxu0 %v864_v54  ;;  %v8861_v54 = vld [vmem:[%s11877_s21 + $0x70] sm:$0xff] }
 0x149   : > { %v9374_v55 = vpop.permute.xlu1 %9373  ;;  %v9369_v56 = vpop.permute.xlu0 %9368 }
 0x14a   : > { %v9376_v57 = vunpack.i.h.bf16 %v9374_v55  ;;  %v9375_v58 = vunpack.i.l.bf16 %v9374_v55  ;;  %v9371_v59 = vunpack.i.h.bf16 %v9369_v56  ;;  %v9370_v60 = vunpack.i.l.bf16 %v9369_v56  ;;  %v9409_v18 = vpop.permute.xlu2 %9408 }
 0x14b   : > { %v9411_v27 = vunpack.i.h.bf16 %v9409_v18  ;;  %v9410_v28 = vunpack.i.l.bf16 %v9409_v18 }
 0x14c   : > { %960 = vmatpush.msra.mxu3 %v9371_v59  ;;  %1015 = vmatpush.msrb.mxu1 %v9376_v57  ;;  %v919_v1 = vsel %vm918_vm13, %v9370_v60, %v9371_v59  ;;  %v974_v2 = vsel %vm973_vm14, %v9375_v58, %v9376_v57  ;;  %v8864_v57 = vld [vmem:[%s11877_s21 + $0x78] sm:$0xff] }
 0x14d   : > { %8833 = vmatmul.msk.f32.vlgmr.msra.gmra.mxu1 %vm660_vm8, %v8831_v61  ;;  %940 = vmatpush.msra.mxu2 %v919_v1  ;;  %v1359_v31 = vsel %vm1358_vm6, %v9410_v28, %v9411_v27  ;;  %v8891_v28 = vld [vmem:[%s11877_s21 + $0xc0] sm:$0xff] }
 0x14e   : > { %8836 = vmatmul.msk.f32.vlgmr.msra.gmra.mxu3 %vm660_vm8, %v8834_v62  ;;  %995 = vmatpush.msrb.mxu0 %v974_v2 }
 0x14f   : > { %1070 = vmatpush.msrb.mxu3 %v9381_v63  ;;  %8832 = vmatmul.msk.f32.vlgmr.msra.gmra.mxu0 %vm660_vm8, %v8831_v61 }
 0x150   : > { %8835 = vmatmul.msk.f32.vlgmr.msra.gmra.mxu2 %vm660_vm8, %v8834_v62 }
 0x151   : > { %1050 = vmatpush.msrb.mxu2 %v1029_v4  ;;  %v9389_v5 = vpop.permute.xlu1 %9388  ;;  %v9384_v6 = vpop.permute.xlu0 %9383 }
 0x152   : > { %v9391_v7 = vunpack.i.h.bf16 %v9389_v5  ;;  %v9390_v8 = vunpack.i.l.bf16 %v9389_v5  ;;  %v9386_v9 = vunpack.i.h.bf16 %v9384_v6  ;;  %v9385_v10 = vunpack.i.l.bf16 %v9384_v6  ;;  %v9424_v42 = vpop.permute.xlu2 %9423 }
 0x153   : > { %v9426_v47 = vunpack.i.h.bf16 %v9424_v42  ;;  %v9425_v48 = vunpack.i.l.bf16 %v9424_v42 }
 0x154   : > { %1125 = vmatpush.msra.mxu1 %v9386_v9  ;;  %1180 = vmatpush.msra.mxu3 %v9391_v7  ;;  %v1084_v15 = vsel %vm1083_vm1, %v9385_v10, %v9386_v9  ;;  %v1139_v16 = vsel %vm1138_vm2, %v9390_v8, %v9391_v7  ;;  %v8873_v10 = vld [vmem:[%s11877_s21 + $0x90] sm:$0xff] }
 0x155   : > { %8839 = vmatmul.msk.f32.vlgmr.msrb.gmra.mxu1 %vm660_vm8, %v8837_v11  ;;  %1105 = vmatpush.msra.mxu0 %v1084_v15  ;;  %v1524_v52 = vsel %vm1523_vm11, %v9425_v48, %v9426_v47 }
 0x156   : > { %8842 = vmatmul.msk.f32.vlgmr.msrb.gmra.mxu3 %vm660_vm8, %v8840_v14  ;;  %1160 = vmatpush.msra.mxu2 %v1139_v16 }
 0x157   : > { %1235 = vmatpush.msrb.mxu1 %v9396_v12  ;;  %8838 = vmatmul.msk.f32.vlgmr.msrb.gmra.mxu0 %vm660_vm8, %v8837_v11 }
 0x158   : > { %8841 = vmatmul.msk.f32.vlgmr.msrb.gmra.mxu2 %vm660_vm8, %v8840_v14  ;;  %1215 = vmatpush.msrb.mxu0 %v1194_v17 }
 0x159   : > { %v9404_v19 = vpop.permute.xlu1 %9403  ;;  %v9399_v20 = vpop.permute.xlu0 %9398 }
 0x15a   : > { %v9406_v21 = vunpack.i.h.bf16 %v9404_v19  ;;  %v9405_v22 = vunpack.i.l.bf16 %v9404_v19  ;;  %v9401_v23 = vunpack.i.h.bf16 %v9399_v20  ;;  %v9400_v24 = vunpack.i.l.bf16 %v9399_v20  ;;  %v9439_v53 = vpop.permute.xlu2 %9438  ;;  %v8879_v19 = vld [vmem:[%s11877_s21 + $0xa0] sm:$0xff] }
 0x15b   : > { %v9441_v58 = vunpack.i.h.bf16 %v9439_v53  ;;  %v9440_v59 = vunpack.i.l.bf16 %v9439_v53 }
 0x15c   : > { %1290 = vmatpush.msrb.mxu3 %v9401_v23  ;;  %v1249_v29 = vsel %vm1248_vm4, %v9400_v24, %v9401_v23  ;;  %v1304_v30 = vsel %vm1303_vm5, %v9405_v22, %v9406_v21  ;;  %v8882_v22 = vld [vmem:[%s11877_s21 + $0xa8] sm:$0xff]  ;;  %v2012_v23 = vld [vmem:[%s11878_s2] sm:$0xff]  ;;  %s11886_s2 = smov 111  }
 0x15d   : > { %8845 = vmatmul.msk.f32.vlgmr.msra.gmra.mxu1 %vm660_vm8, %v8843_v25  ;;  %1270 = vmatpush.msrb.mxu2 %v1249_v29  ;;  %v1689_v62 = vsel %vm11759_vm10, %v9440_v59, %v9441_v58  ;;  %vm1853_vm10 = vcmask 506880  }
 0x15e   : > { %8848 = vmatmul.msk.f32.vlgmr.msra.gmra.mxu3 %vm660_vm8, %v8846_v26  ;;  %1345 = vmatpush.msra.mxu1 %v9406_v21 }
 0x15f   : > { %1400 = vmatpush.msra.mxu3 %v9411_v27  ;;  %8844 = vmatmul.msk.f32.vlgmr.msra.gmra.mxu0 %vm660_vm8, %v8843_v25  ;;  %v10039_v25 = vmov 0   ;;  %v8888_v27 = vld [vmem:[%s11877_s21 + $0xb8] sm:$0xff] }
 0x160   : > { %8847 = vmatmul.msk.f32.vlgmr.msra.gmra.mxu2 %vm660_vm8, %v8846_v26  ;;  %1325 = vmatpush.msra.mxu0 %v1304_v30  ;;  %v8885_v26 = vld [vmem:[%s11877_s21 + $0xb0] sm:$0xff]  ;;  %s11887_s21 = smov 110  }
 0x161   : > { %1380 = vmatpush.msra.mxu2 %v1359_v31  ;;  %v9419_v32 = vpop.permute.xlu1 %9418  ;;  %v9414_v33 = vpop.permute.xlu0 %9413  ;;  %9467 = vset.pattern.permute.xlu2 %v10039_v25 }
 0x162   : > { %v9421_v34 = vunpack.i.h.bf16 %v9419_v32  ;;  %v9420_v35 = vunpack.i.l.bf16 %v9419_v32  ;;  %v9416_v36 = vunpack.i.h.bf16 %v9414_v33  ;;  %v9415_v37 = vunpack.i.l.bf16 %v9414_v33  ;;  %v9454_v7 = vpop.permute.xlu2 %9453  ;;  %2015 = vperm.xlu2 %9467, %v2012_v23   ;;  %9568 = vset.pattern.permute.xlu0 %v10039_v25 }
 0x163   : > { %v9456_v11 = vunpack.i.h.bf16 %v9454_v7  ;;  %v9455_v12 = vunpack.i.l.bf16 %v9454_v7 }
 0x164   : > { %v1414_v40 = vsel %vm1413_vm7, %v9415_v37, %v9416_v36  ;;  %v1469_v41 = vsel %vm11760_vm0, %v9420_v35, %v9421_v34  ;;  %vm1908_vm0 = vcmask 498688  }
 0x165   : > { %8851 = vmatmul.msk.f32.vlgmr.msrb.gmra.mxu1 %vm660_vm8, %v8849_v38  ;;  %v1854_v16 = vsel %vm1853_vm10, %v9455_v12, %v9456_v11 }
 0x166   : > { %8854 = vmatmul.msk.f32.vlgmr.msrb.gmra.mxu3 %vm660_vm8, %v8852_v39  ;;  %1455 = vmatpush.msrb.mxu1 %v9416_v36 }
 0x167   : > { %1510 = vmatpush.msrb.mxu3 %v9421_v34  ;;  %8850 = vmatmul.msk.f32.vlgmr.msrb.gmra.mxu0 %vm660_vm8, %v8849_v38 }
 0x168   : > { %8853 = vmatmul.msk.f32.vlgmr.msrb.gmra.mxu2 %vm660_vm8, %v8852_v39  ;;  %1435 = vmatpush.msrb.mxu0 %v1414_v40 }
 0x169   : > { %1490 = vmatpush.msrb.mxu2 %v1469_v41  ;;  %v9429_v43 = vpop.permute.xlu0 %9428  ;;  %v9434_v51 = vpop.permute.xlu1 %9433 }
 0x16a   : > { %v9431_v44 = vunpack.i.h.bf16 %v9429_v43  ;;  %v9430_v45 = vunpack.i.l.bf16 %v9429_v43  ;;  %v9436_v55 = vunpack.i.h.bf16 %v9434_v51  ;;  %v9435_v56 = vunpack.i.l.bf16 %v9434_v51 }
 0x16c   : > { %v1579_v50 = vsel %vm11758_vm12, %v9430_v45, %v9431_v44  ;;  %v1634_v61 = vsel %vm11757_vm9, %v9435_v56, %v9436_v55  ;;  %vm11819_vm9 = vcmask 523264   ;;  %vm11761_vm12 = vcmask 515072  }
 0x16d   : > { %8857 = vmatmul.msk.f32.vlgmr.msra.gmra.mxu1 %vm660_vm8, %v8855_v46 }
 0x16e   : > { %8860 = vmatmul.msk.f32.vlgmr.msra.gmra.mxu3 %vm660_vm8, %v8858_v49  ;;  %1565 = vmatpush.msra.mxu1 %v9426_v47 }
 0x16f   : > { %1620 = vmatpush.msra.mxu3 %v9431_v44  ;;  %8856 = vmatmul.msk.f32.vlgmr.msra.gmra.mxu0 %vm660_vm8, %v8855_v46 }
 0x170   : > { %8859 = vmatmul.msk.f32.vlgmr.msra.gmra.mxu2 %vm660_vm8, %v8858_v49  ;;  %1545 = vmatpush.msra.mxu0 %v1524_v52 }
 0x171   : > { %1600 = vmatpush.msra.mxu2 %v1579_v50  ;;  %v9444_v60 = vpop.permute.xlu0 %9443  ;;  %v9449_v63 = vpop.permute.xlu1 %9448 }
 0x172   : > { %v9446_v1 = vunpack.i.h.bf16 %v9444_v60  ;;  %v9445_v2 = vunpack.i.l.bf16 %v9444_v60  ;;  %v9451_v4 = vunpack.i.h.bf16 %v9449_v63  ;;  %v9450_v5 = vunpack.i.l.bf16 %v9449_v63 }
 0x174   : > { %v1744_v6 = vsel %vm11819_vm9, %v9445_v2, %v9446_v1  ;;  %v1799_v8 = vsel %vm11761_vm12, %v9450_v5, %v9451_v4  ;;  %vm1963_vm12 = vcmask 490496  }
 0x175   : > { %8863 = vmatmul.msk.f32.vlgmr.msrb.gmra.mxu1 %vm660_vm8, %v8861_v54 }
 0x176   : > { %8866 = vmatmul.msk.f32.vlgmr.msrb.gmra.mxu3 %vm660_vm8, %v8864_v57  ;;  %1675 = vmatpush.msrb.mxu1 %v9436_v55 }
 0x177   : > { %1730 = vmatpush.msrb.mxu3 %v9441_v58  ;;  %8862 = vmatmul.msk.f32.vlgmr.msrb.gmra.mxu0 %vm660_vm8, %v8861_v54 }
 0x178   : > { %8865 = vmatmul.msk.f32.vlgmr.msrb.gmra.mxu2 %vm660_vm8, %v8864_v57  ;;  %1655 = vmatpush.msrb.mxu0 %v1634_v61 }
 0x179   : > { %1710 = vmatpush.msrb.mxu2 %v1689_v62  ;;  %v9459_v9 = vpop.permute.xlu0 %9458  ;;  %v9464_v17 = vpop.permute.xlu1 %9463 }
 0x17a   : > { %v9461_v14 = vunpack.i.h.bf16 %v9459_v9  ;;  %v9460_v15 = vunpack.i.l.bf16 %v9459_v9  ;;  %v9466_v20 = vunpack.i.h.bf16 %v9464_v17  ;;  %v9465_v21 = vunpack.i.l.bf16 %v9464_v17 }
 0x17c   : > { %v1909_v18 = vsel %vm1908_vm0, %v9460_v15, %v9461_v14  ;;  %v1964_v24 = vsel %vm1963_vm12, %v9465_v21, %v9466_v20 }
 0x17d   : > { %8869 = vmatmul.msk.f32.vlgmr.msra.gmra.mxu1 %vm660_vm8, %v8867_v0 }
 0x17e   : > { %8872 = vmatmul.msk.f32.vlgmr.msra.gmra.mxu3 %vm660_vm8, %v8870_v3  ;;  %1785 = vmatpush.msra.mxu1 %v9446_v1 }
 0x17f   : > { %1840 = vmatpush.msra.mxu3 %v9451_v4  ;;  %8868 = vmatmul.msk.f32.vlgmr.msra.gmra.mxu0 %vm660_vm8, %v8867_v0 }
 0x180   : > { %8871 = vmatmul.msk.f32.vlgmr.msra.gmra.mxu2 %vm660_vm8, %v8870_v3  ;;  %1765 = vmatpush.msra.mxu0 %v1744_v6 }
 0x181   : > { %1820 = vmatpush.msra.mxu2 %v1799_v8 }
 0x183   : > { %v724_v33 = vpop.f32.mrf.mxu2 }
 0x184   : > { %v744_v31 = vpop.f32.mrf.mxu3 }
 0x185   : > { %8875 = vmatmul.msk.f32.vlgmr.msrb.gmra.mxu1 %vm660_vm8, %v8873_v10 }
 0x186   : > { %8878 = vmatmul.msk.f32.vlgmr.msrb.gmra.mxu3 %vm660_vm8, %v8876_v13  ;;  %1895 = vmatpush.msrb.mxu1 %v9456_v11 }
 0x187   : > { %1950 = vmatpush.msrb.mxu3 %v9461_v14  ;;  %8874 = vmatmul.msk.f32.vlgmr.msrb.gmra.mxu0 %vm660_vm8, %v8873_v10 }
 0x188   : > { %8877 = vmatmul.msk.f32.vlgmr.msrb.gmra.mxu2 %vm660_vm8, %v8876_v13  ;;  %1875 = vmatpush.msrb.mxu0 %v1854_v16 }
 0x189   : > { %1930 = vmatpush.msrb.mxu2 %v1909_v18 }
 0x18d   : > { %8881 = vmatmul.msk.f32.vlgmr.msra.gmra.mxu1 %vm660_vm8, %v8879_v19 }
 0x18e   : > { %8884 = vmatmul.msk.f32.vlgmr.msra.gmra.mxu3 %vm660_vm8, %v8882_v22  ;;  %2005 = vmatpush.msra.mxu1 %v9466_v20 }
 0x18f   : > { %8880 = vmatmul.msk.f32.vlgmr.msra.gmra.mxu0 %vm660_vm8, %v8879_v19 }
 0x190   : > { %8883 = vmatmul.msk.f32.vlgmr.msra.gmra.mxu2 %vm660_vm8, %v8882_v22  ;;  %1985 = vmatpush.msra.mxu0 %v1964_v24 }
 0x195   : > { %8887 = vmatmul.msk.f32.vlgmr.msrb.gmra.mxu1 %vm660_vm8, %v8885_v26 }
 0x196   : > { %8890 = vmatmul.msk.f32.vlgmr.msrb.gmra.mxu3 %vm660_vm8, %v8888_v27 }
 0x197   : > { %8886 = vmatmul.msk.f32.vlgmr.msrb.gmra.mxu0 %vm660_vm8, %v8885_v26 }
 0x198   : > { %8889 = vmatmul.msk.f32.vlgmr.msrb.gmra.mxu2 %vm660_vm8, %v8888_v27 }
 0x19d   : > { %8893 = vmatmul.msk.f32.vlgmr.msra.gmra.mxu1 %vm660_vm8, %v8891_v28 }
 0x19f   : > { %8892 = vmatmul.msk.f32.vlgmr.msra.gmra.mxu0 %vm660_vm8, %v8891_v28 }
 0x1ab   : > { %v701_v29 = vpop.f32.mrf.mxu1 }
 0x1ac   : > { %v681_v30 = vpop.f32.mrf.mxu0  ;;  %v745_v42 = vadd.f32 %v744_v31, %v701_v29 }
 0x1ad   : > { %v725_v48 = vadd.f32 %v724_v33, %v681_v30 }
 0x1c2   : > { %v797_v32 = vpop.f32.mrf.mxu1 }
 0x1c3   : > { %v801_v44 = vadd.f32 %v797_v32, %v745_v42 }
 0x1c4   : > { %v777_v34 = vpop.f32.mrf.mxu0 }
 0x1c5   : > { %v800_v51 = vadd.f32 %v777_v34, %v725_v48 }
 0x1c9   : > { %v852_v35 = vpop.f32.mrf.mxu3 }
 0x1ca   : > { %v907_v36 = vpop.f32.mrf.mxu1  ;;  %v856_v49 = vadd.f32 %v852_v35, %v801_v44 }
 0x1cb   : > { %v832_v37 = vpop.f32.mrf.mxu2 }
 0x1cc   : > { %v887_v38 = vpop.f32.mrf.mxu0  ;;  %v855_v52 = vadd.f32 %v832_v37, %v800_v51  ;;  %v911_v53 = vadd.f32 %v907_v36, %v856_v49 }
 0x1ce   : > { %v910_v57 = vadd.f32 %v887_v38, %v855_v52 }
 0x1d1   : > { %v962_v39 = vpop.f32.mrf.mxu3 }
 0x1d2   : > { %v1017_v40 = vpop.f32.mrf.mxu1  ;;  %v966_v58 = vadd.f32 %v962_v39, %v911_v53 }
 0x1d3   : > { %v942_v41 = vpop.f32.mrf.mxu2 }
 0x1d4   : > { %v997_v43 = vpop.f32.mrf.mxu0  ;;  %v965_v60 = vadd.f32 %v942_v41, %v910_v57  ;;  %v1021_v61 = vadd.f32 %v1017_v40, %v966_v58 }
 0x1d6   : > { %v1020_v63 = vadd.f32 %v997_v43, %v965_v60 }
 0x1d9   : > { %v1072_v45 = vpop.f32.mrf.mxu3 }
 0x1da   : > { %v1127_v46 = vpop.f32.mrf.mxu1  ;;  %v1076_v0 = vadd.f32 %v1072_v45, %v1021_v61 }
 0x1db   : > { %v1052_v47 = vpop.f32.mrf.mxu2 }
 0x1dc   : > { %v1107_v50 = vpop.f32.mrf.mxu0  ;;  %v1075_v3 = vadd.f32 %v1052_v47, %v1020_v63  ;;  %v1131_v5 = vadd.f32 %v1127_v46, %v1076_v0 }
 0x1de   : > { %v1130_v6 = vadd.f32 %v1107_v50, %v1075_v3 }
 0x1e1   : > { %v1182_v54 = vpop.f32.mrf.mxu3 }
 0x1e2   : > { %v1237_v55 = vpop.f32.mrf.mxu1  ;;  %v1186_v7 = vadd.f32 %v1182_v54, %v1131_v5 }
 0x1e3   : > { %v1162_v56 = vpop.f32.mrf.mxu2 }
 0x1e4   : > { %v1217_v59 = vpop.f32.mrf.mxu0  ;;  %v1185_v9 = vadd.f32 %v1162_v56, %v1130_v6  ;;  %v1241_v12 = vadd.f32 %v1237_v55, %v1186_v7 }
 0x1e6   : > { %v1240_v14 = vadd.f32 %v1217_v59, %v1185_v9  ;;  %v2016_v59 = vpop.permute.xlu2 %2015 }
 0x1e9   : > { %v1292_v62 = vpop.f32.mrf.mxu3 }
 0x1ea   : > { %v1347_v1 = vpop.f32.mrf.mxu1  ;;  %v1296_v15 = vadd.f32 %v1292_v62, %v1241_v12 }
 0x1eb   : > { %v1272_v2 = vpop.f32.mrf.mxu2 }
 0x1ec   : > { %v1327_v4 = vpop.f32.mrf.mxu0  ;;  %v1295_v16 = vadd.f32 %v1272_v2, %v1240_v14  ;;  %v1351_v18 = vadd.f32 %v1347_v1, %v1296_v15 }
 0x1ee   : > { %v1350_v21 = vadd.f32 %v1327_v4, %v1295_v16 }
 0x1f1   : > { %v1402_v8 = vpop.f32.mrf.mxu3 }
 0x1f2   : > { %v1457_v10 = vpop.f32.mrf.mxu1  ;;  %v1406_v22 = vadd.f32 %v1402_v8, %v1351_v18  ;;  %v2022_v8 = vld [vmem:[%s11900_s3] sm:$0xff] }
 0x1f3   : > { %v1382_v11 = vpop.f32.mrf.mxu2 }
 0x1f4   : > { %v1437_v13 = vpop.f32.mrf.mxu0  ;;  %v1405_v24 = vadd.f32 %v1382_v11, %v1350_v21  ;;  %v1461_v25 = vadd.f32 %v1457_v10, %v1406_v22  ;;  %v8903_v11 = vld [vmem:[%s11900_s3 + $0x28] sm:$0xff]  ;;  %v8897_v22 = vld [vmem:[%s11900_s3 + $0x10] sm:$0xff] }
 0x1f6   : > { %v1460_v27 = vadd.f32 %v1437_v13, %v1405_v24 }
 0x1f9   : > { %v1512_v17 = vpop.f32.mrf.mxu3 }
 0x1fa   : > { %v1567_v19 = vpop.f32.mrf.mxu1  ;;  %v1516_v28 = vadd.f32 %v1512_v17, %v1461_v25  ;;  %v8894_v17 = vld [vmem:[%s11900_s3 + $0x8] sm:$0xff]  ;;  %v8901_v25 = vld [vmem:[%s11900_s3 + $0x20] sm:$0xff] }
 0x1fb   : > { %v1492_v20 = vpop.f32.mrf.mxu2 }
 0x1fc   : > { %v1547_v23 = vpop.f32.mrf.mxu0  ;;  %v1515_v31 = vadd.f32 %v1492_v20, %v1460_v27  ;;  %v1571_v33 = vadd.f32 %v1567_v19, %v1516_v28 }
 0x1fe   : > { %v1570_v34 = vadd.f32 %v1547_v23, %v1515_v31 }
 0x201   : > { %v1622_v26 = vpop.f32.mrf.mxu3 }
 0x202   : > { %v1677_v29 = vpop.f32.mrf.mxu1  ;;  %v1626_v35 = vadd.f32 %v1622_v26, %v1571_v33  ;;  %v8899_v26 = vld [vmem:[%s11900_s3 + $0x18] sm:$0xff]  ;;  %v8909_v33 = vld [vmem:[%s11900_s3 + $0x40] sm:$0xff] }
 0x203   : > { %v1602_v30 = vpop.f32.mrf.mxu2 }
 0x204   : > { %v1657_v32 = vpop.f32.mrf.mxu0  ;;  %v1625_v37 = vadd.f32 %v1602_v30, %v1570_v34  ;;  %v1681_v40 = vadd.f32 %v1677_v29, %v1626_v35  ;;  %v8907_v34 = vld [vmem:[%s11900_s3 + $0x38] sm:$0xff] }
 0x206   : > { %v1680_v42 = vadd.f32 %v1657_v32, %v1625_v37 }
 0x209   : > { %v1732_v36 = vpop.f32.mrf.mxu3 }
 0x20a   : > { %v1787_v38 = vpop.f32.mrf.mxu1  ;;  %v1736_v43 = vadd.f32 %v1732_v36, %v1681_v40 }
 0x20b   : > { %v1712_v39 = vpop.f32.mrf.mxu2 }
 0x20c   : > { %v1767_v41 = vpop.f32.mrf.mxu0  ;;  %v1735_v44 = vadd.f32 %v1712_v39, %v1680_v42  ;;  %v1791_v46 = vadd.f32 %v1787_v38, %v1736_v43  ;;  %v8905_v39 = vld [vmem:[%s11900_s3 + $0x30] sm:$0xff]  ;;  %v8911_v43 = vld [vmem:[%s11900_s3 + $0x48] sm:$0xff] }
 0x20e   : > { %v1790_v49 = vadd.f32 %v1767_v41, %v1735_v44 }
 0x211   : > { %v1842_v45 = vpop.f32.mrf.mxu3 }
 0x212   : > { %v1897_v47 = vpop.f32.mrf.mxu1  ;;  %v1846_v50 = vadd.f32 %v1842_v45, %v1791_v46 }
 0x213   : > { %v1822_v48 = vpop.f32.mrf.mxu2 }
 0x214   : > { %v1877_v51 = vpop.f32.mrf.mxu0  ;;  %v1845_v52 = vadd.f32 %v1822_v48, %v1790_v49  ;;  %v1901_v53 = vadd.f32 %v1897_v47, %v1846_v50 }
 0x216   : > { %v1900_v55 = vadd.f32 %v1877_v51, %v1845_v52 }
 0x219   : > { %v1952_v54 = vpop.f32.mrf.mxu3 }
 0x21a   : > { %v1956_v56 = vadd.f32 %v1952_v54, %v1901_v53  ;;  %v2007_v57 = vpop.f32.mrf.mxu1  ;;  %v8917_v53 = vld [vmem:[%s11900_s3 + $0x60] sm:$0xff] }
 0x21b   : > { %v1932_v58 = vpop.f32.mrf.mxu2 }
 0x21c   : > { %v1955_v60 = vadd.f32 %v1932_v58, %v1900_v55  ;;  %v2011_v61 = vadd.f32 %v2007_v57, %v1956_v56  ;;  %v1987_v62 = vpop.f32.mrf.mxu0  ;;  %v8913_v56 = vld [vmem:[%s11900_s3 + $0x50] sm:$0xff]  ;;  %v8919_v57 = vld [vmem:[%s11900_s3 + $0x68] sm:$0xff] }
 0x21e   : > { %v2010_v63 = vadd.f32 %v1987_v62, %v1955_v60  ;;  %v2019_v0 = vadd.f32 %v2016_v59, %v2011_v61  ;;  %v2803_v60 = vld [vmem:[%s11901_s4] sm:$0xff]  ;;  %s11937_s4 = sld [smem:[#allocation32_spill]] }
 0x220   : > { %v2018_v1 = vadd.f32 %v2016_v59, %v2010_v63  ;;  %v2021_v2 = vmax.f32 %v2019_v0, 0.0 }
 0x222   : > { %v2020_v3 = vmax.f32 %v2018_v1, 0.0 }
 0x224   : > { %2135 = vrot.lane.b32.xlu1 %v2020_v3, %s11879_s24  ;;  %2026 = vrot.lane.b32.xlu0 %v2020_v3, %s11880_s20  ;;  %v9468_v4 = vpack.i.bf16 %v2021_v2, %v2020_v3 }
 0x225   : > { %2070 = vmatpush.msra.mxu3 %v2020_v3 }
 0x226   : > { %9469 = vrot.lane.b32.xlu2 %v9468_v4, %s11881_s22  ;;  %8896 = vmatmul.msk.f32.vlgmr.msra.gmra.mxu3 %vm660_vm8, %v2022_v8  ;;  %v8925_v8 = vld [vmem:[%s11900_s3 + $0x80] sm:$0xff] }
 0x22c   : > { %2106 = vrot.lane.b32.xlu1 %v2020_v3, %s11882_s18  ;;  %2077 = vrot.lane.b32.xlu0 %v2020_v3, %s11883_s23 }
 0x22e   : > { %9474 = vrot.lane.b32.xlu2 %v9468_v4, %s11884_s29 }
 0x234   : > { %9484 = vrot.lane.b32.xlu1 %v9468_v4, %s11885_s19  ;;  %9479 = vrot.lane.b32.xlu0 %v9468_v4, %s11886_s2 }
 0x236   : > { %9489 = vrot.lane.b32.xlu2 %v9468_v4, %s11887_s21 }
 0x23c   : > { %9499 = vrot.lane.b32.xlu1 %v9468_v4, %s11874_s26  ;;  %9494 = vrot.lane.b32.xlu0 %v9468_v4, %s11888_s27 }
 0x23e   : > { %9504 = vrot.lane.b32.xlu2 %v9468_v4, %s11889_s17 }
 0x244   : > { %9514 = vrot.lane.b32.xlu1 %v9468_v4, %s11890_s1  ;;  %9509 = vrot.lane.b32.xlu0 %v9468_v4, %s11891_s28 }
 0x246   : > { %9519 = vrot.lane.b32.xlu2 %v9468_v4, %s11892_s25 }
 0x24c   : > { %9529 = vrot.lane.b32.xlu1 %v9468_v4, %s11875_s30  ;;  %9524 = vrot.lane.b32.xlu0 %v9468_v4, %s11893_s16 }
 0x24e   : > { %9534 = vrot.lane.b32.xlu2 %v9468_v4, %s11876_s0 }
 0x254   : > { %9544 = vrot.lane.b32.xlu1 %v9468_v4, %s11894_s15  ;;  %9539 = vrot.lane.b32.xlu0 %v9468_v4, %s11895_s14 }
 0x256   : > { %9549 = vrot.lane.b32.xlu2 %v9468_v4, %s11896_s13 }
 0x25c   : > { %9559 = vrot.lane.b32.xlu1 %v9468_v4, %s11897_s11  ;;  %9554 = vrot.lane.b32.xlu0 %v9468_v4, %s11898_s12  ;;  %s11910_s11 = smov 16  }
 0x25e   : > { %9564 = vrot.lane.b32.xlu2 %v9468_v4, %s11899_s10 }
 0x264   : > { %2806 = vperm.xlu0 %9568, %v2803_v60  }
 0x280   : > { %v9470_v5 = vpop.permute.xlu2 %9469 }
 0x281   : > { %v9472_v6 = vunpack.i.h.bf16 %v9470_v5  ;;  %v9471_v7 = vunpack.i.l.bf16 %v9470_v5  ;;  %v8915_v5 = vld [vmem:[%s11900_s3 + $0x58] sm:$0xff] }
 0x283   : > { %v2169_v9 = vsel %vm918_vm13, %v9471_v7, %v9472_v6  ;;  %vm11903_vm13 = vcmask 637952  }
 0x284   : > { %2189 = vmatpush.msrb.mxu3 %v2169_v9  ;;  %v8921_v9 = vld [vmem:[%s11900_s3 + $0x70] sm:$0xff] }
 0x285   : > { %8904 = vmatmul.msk.f32.vlgmr.msrb.gmra.mxu3 %vm660_vm8, %v8903_v11 }
 0x288   : > { %v9475_v10 = vpop.permute.xlu2 %9474 }
 0x289   : > { %v9477_v13 = vunpack.i.h.bf16 %v9475_v10  ;;  %v9476_v14 = vunpack.i.l.bf16 %v9475_v10 }
 0x28b   : > { %v2265_v19 = vsel %vm1083_vm1, %v9476_v14, %v9477_v13  ;;  %vm3551_vm1 = vcmask 90176  }
 0x290   : > { %v9490_v12 = vpop.permute.xlu2 %9489 }
 0x291   : > { %v9492_v20 = vunpack.i.h.bf16 %v9490_v12  ;;  %v9491_v21 = vunpack.i.l.bf16 %v9490_v12 }
 0x293   : > { %v2233_v27 = vsel %vm1028_vm15, %v9491_v21, %v9492_v20  ;;  %vm11905_vm15 = vcmask 629760  }
 0x296   : > { %v2136_v15 = vpop.permute.xlu1 %2135  ;;  %v2027_v16 = vpop.permute.xlu0 %2026 }
 0x297   : > { %2047 = vmatpush.msra.mxu2 %v2027_v16 }
 0x298   : > { %v9505_v18 = vpop.permute.xlu2 %9504  ;;  %8895 = vmatmul.msk.f32.vlgmr.msra.gmra.mxu2 %vm660_vm8, %v8894_v17 }
 0x299   : > { %2156 = vmatpush.msrb.mxu2 %v2136_v15  ;;  %v9507_v29 = vunpack.i.h.bf16 %v9505_v18  ;;  %v9506_v30 = vunpack.i.l.bf16 %v9505_v18 }
 0x29b   : > { %2285 = vmatpush.msra.mxu2 %v2265_v19  ;;  %v2425_v44 = vsel %vm1358_vm6, %v9506_v30, %v9507_v29  ;;  %vm3571_vm6 = vcmask 222401  }
 0x29e   : > { %v2107_v23 = vpop.permute.xlu1 %2106  ;;  %v2078_v24 = vpop.permute.xlu0 %2077 }
 0x29f   : > { %2098 = vmatpush.msrb.mxu0 %v2078_v24  ;;  %2127 = vmatpush.msrb.mxu1 %v2107_v23 }
 0x2a0   : > { %v9520_v28 = vpop.permute.xlu2 %9519  ;;  %8898 = vmatmul.msk.f32.vlgmr.msrb.gmra.mxu0 %vm660_vm8, %v8897_v22  ;;  %8902 = vmatmul.msk.f32.vlgmr.msrb.gmra.mxu2 %vm660_vm8, %v8901_v25  ;;  %v8927_v22 = vld [vmem:[%s11900_s3 + $0x88] sm:$0xff]  ;;  %v8923_v25 = vld [vmem:[%s11900_s3 + $0x78] sm:$0xff] }
 0x2a1   : > { %2253 = vmatpush.msra.mxu1 %v2233_v27  ;;  %v9522_v45 = vunpack.i.h.bf16 %v9520_v28  ;;  %v9521_v46 = vunpack.i.l.bf16 %v9520_v28 }
 0x2a2   : > { %8900 = vmatmul.msk.f32.vlgmr.msrb.gmra.mxu1 %vm660_vm8, %v8899_v26  ;;  %v8933_v26 = vld [vmem:[%s11900_s3 + $0xa0] sm:$0xff] }
 0x2a3   : > { %v2457_v58 = vsel %vm1413_vm7, %v9521_v46, %v9522_v45  ;;  %v8937_v46 = vld [vmem:[%s11900_s3 + $0xb0] sm:$0xff]  ;;  %vm3576_vm7 = vcmask 255201  }
 0x2a6   : > { %v9485_v31 = vpop.permute.xlu1 %9484  ;;  %v9480_v32 = vpop.permute.xlu0 %9479 }
 0x2a7   : > { %v9487_v35 = vunpack.i.h.bf16 %v9485_v31  ;;  %v9486_v36 = vunpack.i.l.bf16 %v9485_v31  ;;  %v9482_v37 = vunpack.i.h.bf16 %v9480_v32  ;;  %v9481_v38 = vunpack.i.l.bf16 %v9480_v32 }
 0x2a8   : > { %v9535_v40 = vpop.permute.xlu2 %9534  ;;  %8910 = vmatmul.msk.f32.vlgmr.msra.gmra.mxu2 %vm660_vm8, %v8909_v33 }
 0x2a9   : > { %v2201_v41 = vsel %vm973_vm14, %v9481_v38, %v9482_v37  ;;  %v2297_v42 = vsel %vm1138_vm2, %v9486_v36, %v9487_v35  ;;  %v9537_v61 = vunpack.i.h.bf16 %v9535_v40  ;;  %v9536_v62 = vunpack.i.l.bf16 %v9535_v40  ;;  %v8929_v35 = vld [vmem:[%s11900_s3 + $0x90] sm:$0xff]  ;;  %v8935_v36 = vld [vmem:[%s11900_s3 + $0xa8] sm:$0xff] }
 0x2aa   : > { %8908 = vmatmul.msk.f32.vlgmr.msra.gmra.mxu1 %vm660_vm8, %v8907_v34  ;;  %2221 = vmatpush.msra.mxu0 %v2201_v41  ;;  %vm11904_vm14 = vcmask 621568  }
 0x2ab   : > { %2317 = vmatpush.msra.mxu3 %v2297_v42  ;;  %8906 = vmatmul.msk.f32.vlgmr.msra.gmra.mxu0 %vm660_vm8, %v8905_v39  ;;  %v2649_v10 = vsel %vm11819_vm9, %v9536_v62, %v9537_v61  ;;  %v8931_v39 = vld [vmem:[%s11900_s3 + $0x98] sm:$0xff] }
 0x2ac   : > { %8912 = vmatmul.msk.f32.vlgmr.msra.gmra.mxu3 %vm660_vm8, %v8911_v43 }
 0x2ad   : > { %2445 = vmatpush.msrb.mxu3 %v2425_v44 }
 0x2ae   : > { %v9500_v47 = vpop.permute.xlu1 %9499  ;;  %v9495_v48 = vpop.permute.xlu0 %9494 }
 0x2af   : > { %v9502_v49 = vunpack.i.h.bf16 %v9500_v47  ;;  %v9501_v50 = vunpack.i.l.bf16 %v9500_v47  ;;  %v9497_v51 = vunpack.i.h.bf16 %v9495_v48  ;;  %v9496_v52 = vunpack.i.l.bf16 %v9495_v48  ;;  %v8941_v47 = vld [vmem:[%s11900_s3 + $0xc0] sm:$0xff] }
 0x2b0   : > { %v9550_v59 = vpop.permute.xlu2 %9549 }
 0x2b1   : > { %v2329_v54 = vsel %vm1193_vm3, %v9501_v50, %v9502_v49  ;;  %v2393_v55 = vsel %vm1303_vm5, %v9496_v52, %v9497_v51  ;;  %v9552_v12 = vunpack.i.h.bf16 %v9550_v59  ;;  %v9551_v13 = vunpack.i.l.bf16 %v9550_v59  ;;  %v8939_v50 = vld [vmem:[%s11900_s3 + $0xb8] sm:$0xff]  ;;  %v2072_v51 = vpop.f32.mrf.mxu3 }
 0x2b2   : > { %2349 = vmatpush.msrb.mxu0 %v2329_v54  ;;  %2413 = vmatpush.msrb.mxu2 %v2393_v55  ;;  %vm3556_vm3 = vcmask 122976   ;;  %vm3566_vm5 = vcmask 189601  }
 0x2b3   : > { %8918 = vmatmul.msk.f32.vlgmr.msrb.gmra.mxu2 %vm660_vm8, %v8917_v53  ;;  %8914 = vmatmul.msk.f32.vlgmr.msrb.gmra.mxu0 %vm660_vm8, %v8913_v56  ;;  %v2617_v27 = vsel %vm11904_vm14, %v9551_v13, %v9552_v12  ;;  %vm3591_vm14 = vcmask 354626  }
 0x2b4   : > { %2477 = vmatpush.msra.mxu0 %v2457_v58  ;;  %8920 = vmatmul.msk.f32.vlgmr.msrb.gmra.mxu3 %vm660_vm8, %v8919_v57 }
 0x2b6   : > { %v9515_v63 = vpop.permute.xlu1 %9514  ;;  %v9510_v0 = vpop.permute.xlu0 %9509 }
 0x2b7   : > { %v9517_v1 = vunpack.i.h.bf16 %v9515_v63  ;;  %v9516_v2 = vunpack.i.l.bf16 %v9515_v63  ;;  %v9512_v3 = vunpack.i.h.bf16 %v9510_v0  ;;  %v9511_v4 = vunpack.i.l.bf16 %v9510_v0 }
 0x2b8   : > { %v9565_v11 = vpop.permute.xlu2 %9564 }
 0x2b9   : > { %v2361_v6 = vsel %vm1248_vm4, %v9511_v4, %v9512_v3  ;;  %v2521_v7 = vsel %vm1523_vm11, %v9516_v2, %v9517_v1  ;;  %v9567_v20 = vunpack.i.h.bf16 %v9565_v11  ;;  %v9566_v21 = vunpack.i.l.bf16 %v9565_v11 }
 0x2ba   : > { %2381 = vmatpush.msrb.mxu1 %v2361_v6  ;;  %2541 = vmatpush.msra.mxu2 %v2521_v7  ;;  %vm11902_vm11 = vcmask 654336   ;;  %vm3561_vm4 = vcmask 156801  }
 0x2bb   : > { %8916 = vmatmul.msk.f32.vlgmr.msrb.gmra.mxu1 %vm660_vm8, %v8915_v5  ;;  %8926 = vmatmul.msk.f32.vlgmr.msra.gmra.mxu2 %vm660_vm8, %v8925_v8  ;;  %v2745_v28 = vsel %vm1908_vm0, %v9566_v21, %v9567_v20  ;;  %vm11906_vm0 = vcmask 515072  }
 0x2bc   : > { %2669 = vmatpush.msrb.mxu2 %v2649_v10  ;;  %8922 = vmatmul.msk.f32.vlgmr.msra.gmra.mxu0 %vm660_vm8, %v8921_v9 }
 0x2be   : > { %v9530_v14 = vpop.permute.xlu1 %9529  ;;  %v9525_v15 = vpop.permute.xlu0 %9524 }
 0x2bf   : > { %v9532_v16 = vunpack.i.h.bf16 %v9530_v14  ;;  %v9531_v17 = vunpack.i.l.bf16 %v9530_v14  ;;  %v9527_v18 = vunpack.i.h.bf16 %v9525_v15  ;;  %v9526_v19 = vunpack.i.l.bf16 %v9525_v15 }
 0x2c1   : > { %v2489_v23 = vsel %vm11902_vm11, %v9531_v17, %v9532_v16  ;;  %v2553_v24 = vsel %vm11903_vm13, %v9526_v19, %v9527_v18  ;;  %vm3581_vm11 = vcmask 289026   ;;  %vm3586_vm13 = vcmask 321826  }
 0x2c2   : > { %2509 = vmatpush.msra.mxu1 %v2489_v23  ;;  %2573 = vmatpush.msra.mxu3 %v2553_v24 }
 0x2c3   : > { %8928 = vmatmul.msk.f32.vlgmr.msra.gmra.mxu3 %vm660_vm8, %v8927_v22  ;;  %8924 = vmatmul.msk.f32.vlgmr.msra.gmra.mxu1 %vm660_vm8, %v8923_v25 }
 0x2c4   : > { %2637 = vmatpush.msrb.mxu1 %v2617_v27  ;;  %8934 = vmatmul.msk.f32.vlgmr.msrb.gmra.mxu2 %vm660_vm8, %v8933_v26 }
 0x2c6   : > { %2765 = vmatpush.msra.mxu1 %v2745_v28  ;;  %v9545_v29 = vpop.permute.xlu1 %9544  ;;  %v9540_v30 = vpop.permute.xlu0 %9539 }
 0x2c7   : > { %v9547_v31 = vunpack.i.h.bf16 %v9545_v29  ;;  %v9546_v32 = vunpack.i.l.bf16 %v9545_v29  ;;  %v9542_v33 = vunpack.i.h.bf16 %v9540_v30  ;;  %v9541_v34 = vunpack.i.l.bf16 %v9540_v30 }
 0x2c9   : > { %v2585_v37 = vsel %vm11905_vm15, %v9541_v34, %v9542_v33  ;;  %v2681_v38 = vsel %vm11906_vm0, %v9546_v32, %v9547_v31  ;;  %vm3596_vm15 = vcmask 387426   ;;  %vm3601_vm0 = vcmask 421251  }
 0x2ca   : > { %2605 = vmatpush.msrb.mxu0 %v2585_v37  ;;  %2701 = vmatpush.msrb.mxu3 %v2681_v38 }
 0x2cb   : > { %8930 = vmatmul.msk.f32.vlgmr.msrb.gmra.mxu0 %vm660_vm8, %v8929_v35  ;;  %8936 = vmatmul.msk.f32.vlgmr.msrb.gmra.mxu3 %vm660_vm8, %v8935_v36 }
 0x2cc   : > { %8932 = vmatmul.msk.f32.vlgmr.msrb.gmra.mxu1 %vm660_vm8, %v8931_v39 }
 0x2ce   : > { %v9560_v40 = vpop.permute.xlu1 %9559  ;;  %v9555_v41 = vpop.permute.xlu0 %9554 }
 0x2cf   : > { %v9562_v42 = vunpack.i.h.bf16 %v9560_v40  ;;  %v9561_v43 = vunpack.i.l.bf16 %v9560_v40  ;;  %v9557_v44 = vunpack.i.h.bf16 %v9555_v41  ;;  %v9556_v45 = vunpack.i.l.bf16 %v9555_v41 }
 0x2d1   : > { %v2713_v48 = vsel %vm1853_vm10, %v9561_v43, %v9562_v42  ;;  %v2777_v49 = vsel %vm1963_vm12, %v9556_v45, %v9557_v44  ;;  %vm3540_vm10 = vcmask 24576   ;;  %vm3546_vm12 = vcmask 57376  }
 0x2d2   : > { %2733 = vmatpush.msra.mxu0 %v2713_v48  ;;  %2797 = vmatpush.msra.mxu2 %v2777_v49 }
 0x2d3   : > { %8938 = vmatmul.msk.f32.vlgmr.msra.gmra.mxu0 %vm660_vm8, %v8937_v46  ;;  %8942 = vmatmul.msk.f32.vlgmr.msra.gmra.mxu2 %vm660_vm8, %v8941_v47 }
 0x2d4   : > { %8940 = vmatmul.msk.f32.vlgmr.msra.gmra.mxu1 %vm660_vm8, %v8939_v50 }
 0x2d6   : > { %v2807_v35 = vpop.permute.xlu0 %2806 }
 0x308   : > { %v2191_v59 = vpop.f32.mrf.mxu3 }
 0x31b   : > { %v2049_v52 = vpop.f32.mrf.mxu2 }
 0x31c   : > { %v2073_v53 = vadd.f32 %v2072_v51, %v2049_v52 }
 0x31d   : > { %v2100_v54 = vpop.f32.mrf.mxu0 }
 0x31e   : > { %v2103_v56 = vadd.f32 %v2100_v54, %v2073_v53 }
 0x31f   : > { %v2129_v55 = vpop.f32.mrf.mxu1 }
 0x320   : > { %v2132_v57 = vadd.f32 %v2129_v55, %v2103_v56 }
 0x323   : > { %v2158_v58 = vpop.f32.mrf.mxu2 }
 0x324   : > { %v2161_v60 = vadd.f32 %v2158_v58, %v2132_v57 }
 0x326   : > { %v2194_v61 = vadd.f32 %v2191_v59, %v2161_v60 }
 0x327   : > { %v2255_v63 = vpop.f32.mrf.mxu1 }
 0x328   : > { %v2223_v62 = vpop.f32.mrf.mxu0 }
 0x329   : > { %v2226_v0 = vadd.f32 %v2223_v62, %v2194_v61 }
 0x32b   : > { %v2258_v1 = vadd.f32 %v2255_v63, %v2226_v0  ;;  %v2287_v2 = vpop.f32.mrf.mxu2 }
 0x32d   : > { %v2290_v3 = vadd.f32 %v2287_v2, %v2258_v1 }
 0x32f   : > { %v2319_v4 = vpop.f32.mrf.mxu3 }
 0x330   : > { %v2322_v5 = vadd.f32 %v2319_v4, %v2290_v3  ;;  %v2351_v6 = vpop.f32.mrf.mxu0 }
 0x332   : > { %v2354_v7 = vadd.f32 %v2351_v6, %v2322_v5 }
 0x336   : > { %v2415_v8 = vpop.f32.mrf.mxu2 }
 0x337   : > { %v2447_v11 = vpop.f32.mrf.mxu3 }
 0x338   : > { %v2383_v9 = vpop.f32.mrf.mxu1 }
 0x339   : > { %v2386_v10 = vadd.f32 %v2383_v9, %v2354_v7  ;;  %v2479_v13 = vpop.f32.mrf.mxu0 }
 0x33b   : > { %v2418_v12 = vadd.f32 %v2415_v8, %v2386_v10 }
 0x33d   : > { %v2450_v14 = vadd.f32 %v2447_v11, %v2418_v12 }
 0x33e   : > { %v2543_v16 = vpop.f32.mrf.mxu2 }
 0x33f   : > { %v2482_v15 = vadd.f32 %v2479_v13, %v2450_v14 }
 0x340   : > { %v2511_v17 = vpop.f32.mrf.mxu1 }
 0x341   : > { %v2514_v18 = vadd.f32 %v2511_v17, %v2482_v15 }
 0x343   : > { %v2546_v19 = vadd.f32 %v2543_v16, %v2514_v18 }
 0x346   : > { %v2575_v20 = vpop.f32.mrf.mxu3 }
 0x347   : > { %v2578_v21 = vadd.f32 %v2575_v20, %v2546_v19  ;;  %v2671_v25 = vpop.f32.mrf.mxu2 }
 0x348   : > { %v2607_v22 = vpop.f32.mrf.mxu0 }
 0x349   : > { %v2610_v23 = vadd.f32 %v2607_v22, %v2578_v21  ;;  %v2639_v24 = vpop.f32.mrf.mxu1 }
 0x34b   : > { %v2642_v26 = vadd.f32 %v2639_v24, %v2610_v23 }
 0x34d   : > { %v2674_v27 = vadd.f32 %v2671_v25, %v2642_v26 }
 0x34e   : > { %v2703_v28 = vpop.f32.mrf.mxu3 }
 0x34f   : > { %v2706_v29 = vadd.f32 %v2703_v28, %v2674_v27 }
 0x350   : > { %v2735_v30 = vpop.f32.mrf.mxu0 }
 0x351   : > { %v2738_v31 = vadd.f32 %v2735_v30, %v2706_v29  ;;  %v2767_v32 = vpop.f32.mrf.mxu1 }
 0x353   : > { %v2770_v33 = vadd.f32 %v2767_v32, %v2738_v31 }
 0x356   : > { %v2799_v34 = vpop.f32.mrf.mxu2 }
 0x357   : > { %v2802_v36 = vadd.f32 %v2799_v34, %v2770_v33 }
 0x359   : > { %v2809_v37 = vadd.f32 %v2807_v35, %v2802_v36 }
 0x35b   : > { %v2810_v38 = vmax.f32 %v2809_v37, 0.0 }
 0x35d   : > { %3011 = vrot.lane.b32.xlu0 %v2810_v38, %s11887_s21  ;;  %2895 = vrot.lane.b32.xlu2 %v2810_v38, %s11882_s18  ;;  %s11909_s21 = sld [smem:[#allocation24_spill]] }
 0x35e   : > { %2815 = vrot.lane.b32.xlu1 %v2810_v38, %s11880_s20  ;;  %2859 = vmatpush.msrb.mxu0 %v2810_v38 }
 0x363   : > { %v2811_v42 = vld [vmem:[%s11909_s21] sm:$0xff]  ;;  %v8948_v43 = vld [vmem:[%s11909_s21 + $0x18] sm:$0xff]  ;;  %v8946_v44 = vld [vmem:[%s11909_s21 + $0x10] sm:$0xff] }
 0x364   : > { %8945 = vmatmul.msk.f32.vlgmr.msrb.gmra.mxu0 %vm660_vm8, %v2811_v42  ;;  %v8956_v45 = vld [vmem:[%s11909_s21 + $0x38] sm:$0xff]  ;;  %v8943_v48 = vld [vmem:[%s11909_s21 + $0x8] sm:$0xff]  ;;  %v8954_v50 = vld [vmem:[%s11909_s21 + $0x30] sm:$0xff] }
 0x365   : > { %2982 = vrot.lane.b32.xlu0 %v2810_v38, %s11886_s2  ;;  %2866 = vrot.lane.b32.xlu2 %v2810_v38, %s11883_s23  ;;  %v8950_v53 = vld [vmem:[%s11909_s21 + $0x20] sm:$0xff]  ;;  %v8952_v57 = vld [vmem:[%s11909_s21 + $0x28] sm:$0xff]  ;;  %s11792_s2 = smov 36  }
 0x366   : > { %2924 = vrot.lane.b32.xlu1 %v2810_v38, %s11879_s24  ;;  %v8958_v58 = vld [vmem:[%s11909_s21 + $0x40] sm:$0xff]  ;;  %v8964_v62 = vld [vmem:[%s11909_s21 + $0x58] sm:$0xff]  ;;  %v8960_v63 = vld [vmem:[%s11909_s21 + $0x48] sm:$0xff] }
 0x367   : > { %v8966_v0 = vld [vmem:[%s11909_s21 + $0x60] sm:$0xff]  ;;  %v8962_v4 = vld [vmem:[%s11909_s21 + $0x50] sm:$0xff]  ;;  %v8972_v5 = vld [vmem:[%s11909_s21 + $0x78] sm:$0xff] }
 0x368   : > { %v8968_v6 = vld [vmem:[%s11909_s21 + $0x68] sm:$0xff]  ;;  %v8974_v10 = vld [vmem:[%s11909_s21 + $0x80] sm:$0xff]  ;;  %v8970_v11 = vld [vmem:[%s11909_s21 + $0x70] sm:$0xff] }
 0x369   : > { %v8980_v12 = vld [vmem:[%s11909_s21 + $0x98] sm:$0xff]  ;;  %v8976_v15 = vld [vmem:[%s11909_s21 + $0x88] sm:$0xff]  ;;  %v8982_v16 = vld [vmem:[%s11909_s21 + $0xa0] sm:$0xff] }
 0x36a   : > { %v8978_v18 = vld [vmem:[%s11909_s21 + $0x90] sm:$0xff]  ;;  %v8988_v19 = vld [vmem:[%s11909_s21 + $0xb8] sm:$0xff]  ;;  %v8984_v21 = vld [vmem:[%s11909_s21 + $0xa8] sm:$0xff] }
 0x36b   : > { %v8990_v22 = vld [vmem:[%s11909_s21 + $0xc0] sm:$0xff]  ;;  %v8986_v23 = vld [vmem:[%s11909_s21 + $0xb0] sm:$0xff] }
 0x36d   : > { %3156 = vrot.lane.b32.xlu0 %v2810_v38, %s11888_s27  ;;  %3040 = vrot.lane.b32.xlu2 %v2810_v38, %s11884_s29  ;;  %s11907_s27 = sld [smem:[#allocation25_spill]]  ;;  %s11795_s29 = smov 116  }
 0x36e   : > { %2953 = vrot.lane.b32.xlu1 %v2810_v38, %s11881_s22 }
 0x373   : > { %v3531_v39 = vld [vmem:[%s11907_s27] sm:$0xff]  ;;  %s10050_s27 = smov 52  }
 0x375   : > { %3185 = vrot.lane.b32.xlu0 %v2810_v38, %s11889_s17  ;;  %3069 = vrot.lane.b32.xlu2 %v2810_v38, %s11885_s19  ;;  %s10049_s17 = smov 40  }
 0x376   : > { %3127 = vrot.lane.b32.xlu1 %v2810_v38, %s11891_s28  ;;  %s11783_s28 = smov 28  }
 0x37d   : > { %3359 = vrot.lane.b32.xlu0 %v2810_v38, %s11896_s13  ;;  %3243 = vrot.lane.b32.xlu2 %v2810_v38, %s11875_s30 }
 0x37e   : > { %3098 = vrot.lane.b32.xlu1 %v2810_v38, %s11874_s26 }
 0x385   : > { %3330 = vrot.lane.b32.xlu0 %v2810_v38, %s11895_s14  ;;  %3214 = vrot.lane.b32.xlu2 %v2810_v38, %s11892_s25  ;;  %s11908_s14 = smov 62  }
 0x386   : > { %3272 = vrot.lane.b32.xlu1 %v2810_v38, %s11890_s1  ;;  %s11786_s1 = smov 44  }
 0x38d   : > { %3504 = vrot.lane.b32.xlu0 %v2810_v38, %s11898_s12  ;;  %3388 = vrot.lane.b32.xlu2 %v2810_v38, %s11876_s0 }
 0x38e   : > { %3301 = vrot.lane.b32.xlu1 %v2810_v38, %s11893_s16  ;;  %s11790_s16 = smov 104  }
 0x395   : > { %3417 = vrot.lane.b32.xlu2 %v2810_v38, %s11894_s15  ;;  %s10043_s15 = smov 4  }
 0x396   : > { %3475 = vrot.lane.b32.xlu1 %v2810_v38, %s11899_s10  ;;  %s10042_s10 = smov 120  }
 0x39d   : > { %3534 = vperm.xlu2 %9467, %v3531_v39  }
 0x39e   : > { %3446 = vrot.lane.b32.xlu1 %v2810_v38, %s11908_s14  ;;  %s11796_s14 = smov 68  }
 0x3b7   : > { %v2896_v40 = vpop.permute.xlu2 %2895 }
 0x3b8   : > { %2916 = vmatpush.msrb.mxu2 %v2896_v40 }
 0x3b9   : > { %8949 = vmatmul.msk.f32.vlgmr.msrb.gmra.mxu2 %vm660_vm8, %v8948_v43 }
 0x3bf   : > { %v2867_v41 = vpop.permute.xlu2 %2866 }
 0x3c0   : > { %2887 = vmatpush.msrb.mxu1 %v2867_v41 }
 0x3c1   : > { %8947 = vmatmul.msk.f32.vlgmr.msrb.gmra.mxu1 %vm660_vm8, %v8946_v44 }
 0x3c7   : > { %v3041_v46 = vpop.permute.xlu2 %3040 }
 0x3cf   : > { %v3012_v47 = vpop.permute.xlu0 %3011  ;;  %v3070_v54 = vpop.permute.xlu2 %3069 }
 0x3d0   : > { %v2816_v49 = vpop.permute.xlu1 %2815  ;;  %3032 = vmatpush.msra.mxu2 %v3012_v47 }
 0x3d1   : > { %2836 = vmatpush.msra.mxu3 %v2816_v49  ;;  %8957 = vmatmul.msk.f32.vlgmr.msra.gmra.mxu2 %vm660_vm8, %v8956_v45 }
 0x3d2   : > { %8944 = vmatmul.msk.f32.vlgmr.msra.gmra.mxu3 %vm660_vm8, %v8943_v48 }
 0x3d7   : > { %v2983_v51 = vpop.permute.xlu0 %2982  ;;  %v3244_v59 = vpop.permute.xlu2 %3243 }
 0x3d8   : > { %v2925_v52 = vpop.permute.xlu1 %2924  ;;  %3003 = vmatpush.msra.mxu1 %v2983_v51 }
 0x3d9   : > { %2945 = vmatpush.msrb.mxu3 %v2925_v52  ;;  %8955 = vmatmul.msk.f32.vlgmr.msra.gmra.mxu1 %vm660_vm8, %v8954_v50 }
 0x3da   : > { %8951 = vmatmul.msk.f32.vlgmr.msrb.gmra.mxu3 %vm660_vm8, %v8950_v53 }
 0x3db   : > { %3061 = vmatpush.msra.mxu3 %v3041_v46 }
 0x3df   : > { %v3157_v55 = vpop.permute.xlu0 %3156  ;;  %v3215_v1 = vpop.permute.xlu2 %3214 }
 0x3e0   : > { %v2954_v56 = vpop.permute.xlu1 %2953  ;;  %3177 = vmatpush.msrb.mxu3 %v3157_v55 }
 0x3e1   : > { %2974 = vmatpush.msra.mxu0 %v2954_v56  ;;  %v2861_v25 = vpop.f32.mrf.mxu0 }
 0x3e2   : > { %8953 = vmatmul.msk.f32.vlgmr.msra.gmra.mxu0 %vm660_vm8, %v8952_v57  ;;  %8959 = vmatmul.msk.f32.vlgmr.msra.gmra.mxu3 %vm660_vm8, %v8958_v58 }
 0x3e3   : > { %3090 = vmatpush.msrb.mxu0 %v3070_v54 }
 0x3e7   : > { %v3186_v60 = vpop.permute.xlu0 %3185  ;;  %v3389_v7 = vpop.permute.xlu2 %3388 }
 0x3e8   : > { %v3128_v61 = vpop.permute.xlu1 %3127  ;;  %3206 = vmatpush.msra.mxu0 %v3186_v60 }
 0x3e9   : > { %3148 = vmatpush.msrb.mxu2 %v3128_v61 }
 0x3ea   : > { %8965 = vmatmul.msk.f32.vlgmr.msrb.gmra.mxu2 %vm660_vm8, %v8964_v62  ;;  %8961 = vmatmul.msk.f32.vlgmr.msrb.gmra.mxu0 %vm660_vm8, %v8960_v63 }
 0x3eb   : > { %3264 = vmatpush.msra.mxu2 %v3244_v59  ;;  %8967 = vmatmul.msk.f32.vlgmr.msrb.gmra.mxu3 %vm660_vm8, %v8966_v0 }
 0x3ef   : > { %v3360_v2 = vpop.permute.xlu0 %3359  ;;  %v3418_v17 = vpop.permute.xlu2 %3417 }
 0x3f0   : > { %v3099_v3 = vpop.permute.xlu1 %3098  ;;  %3380 = vmatpush.msrb.mxu2 %v3360_v2 }
 0x3f1   : > { %3119 = vmatpush.msrb.mxu1 %v3099_v3 }
 0x3f2   : > { %8963 = vmatmul.msk.f32.vlgmr.msrb.gmra.mxu1 %vm660_vm8, %v8962_v4  ;;  %8973 = vmatmul.msk.f32.vlgmr.msra.gmra.mxu2 %vm660_vm8, %v8972_v5 }
 0x3f3   : > { %3235 = vmatpush.msra.mxu1 %v3215_v1  ;;  %8969 = vmatmul.msk.f32.vlgmr.msra.gmra.mxu0 %vm660_vm8, %v8968_v6 }
 0x3f7   : > { %v3331_v8 = vpop.permute.xlu0 %3330 }
 0x3f8   : > { %v3273_v9 = vpop.permute.xlu1 %3272  ;;  %3351 = vmatpush.msrb.mxu1 %v3331_v8 }
 0x3f9   : > { %3293 = vmatpush.msra.mxu3 %v3273_v9 }
 0x3fa   : > { %8975 = vmatmul.msk.f32.vlgmr.msra.gmra.mxu3 %vm660_vm8, %v8974_v10  ;;  %8971 = vmatmul.msk.f32.vlgmr.msra.gmra.mxu1 %vm660_vm8, %v8970_v11  ;;  %v3535_v10 = vpop.permute.xlu2 %3534 }
 0x3fb   : > { %3409 = vmatpush.msrb.mxu3 %v3389_v7  ;;  %8981 = vmatmul.msk.f32.vlgmr.msrb.gmra.mxu2 %vm660_vm8, %v8980_v12 }
 0x3ff   : > { %v3505_v13 = vpop.permute.xlu0 %3504 }
 0x400   : > { %v3302_v14 = vpop.permute.xlu1 %3301  ;;  %3525 = vmatpush.msra.mxu3 %v3505_v13 }
 0x401   : > { %3322 = vmatpush.msrb.mxu0 %v3302_v14 }
 0x402   : > { %8977 = vmatmul.msk.f32.vlgmr.msrb.gmra.mxu0 %vm660_vm8, %v8976_v15  ;;  %8983 = vmatmul.msk.f32.vlgmr.msrb.gmra.mxu3 %vm660_vm8, %v8982_v16 }
 0x403   : > { %3438 = vmatpush.msra.mxu0 %v3418_v17  ;;  %8979 = vmatmul.msk.f32.vlgmr.msrb.gmra.mxu1 %vm660_vm8, %v8978_v18 }
 0x408   : > { %v3476_v20 = vpop.permute.xlu1 %3475 }
 0x409   : > { %3496 = vmatpush.msra.mxu2 %v3476_v20 }
 0x40a   : > { %8989 = vmatmul.msk.f32.vlgmr.msra.gmra.mxu2 %vm660_vm8, %v8988_v19  ;;  %8985 = vmatmul.msk.f32.vlgmr.msra.gmra.mxu0 %vm660_vm8, %v8984_v21 }
 0x40b   : > { %8991 = vmatmul.msk.f32.vlgmr.msra.gmra.mxu3 %vm660_vm8, %v8990_v22 }
 0x410   : > { %v3447_v24 = vpop.permute.xlu1 %3446 }
 0x411   : > { %3467 = vmatpush.msra.mxu1 %v3447_v24 }
 0x412   : > { %8987 = vmatmul.msk.f32.vlgmr.msra.gmra.mxu1 %vm660_vm8, %v8986_v23 }
 0x43c   : > { %v2918_v30 = vpop.f32.mrf.mxu2 }
 0x43e   : > { %v2889_v27 = vpop.f32.mrf.mxu1 }
 0x454   : > { %v3034_v37 = vpop.f32.mrf.mxu2 }
 0x455   : > { %v2838_v26 = vpop.f32.mrf.mxu3 }
 0x456   : > { %v2862_v28 = vadd.f32 %v2861_v25, %v2838_v26  ;;  %v3005_v35 = vpop.f32.mrf.mxu1 }
 0x458   : > { %v2892_v29 = vadd.f32 %v2889_v27, %v2862_v28 }
 0x45a   : > { %v2921_v31 = vadd.f32 %v2918_v30, %v2892_v29 }
 0x45d   : > { %v2947_v32 = vpop.f32.mrf.mxu3 }
 0x45e   : > { %v2950_v33 = vadd.f32 %v2947_v32, %v2921_v31 }
 0x45f   : > { %v2976_v34 = vpop.f32.mrf.mxu0 }
 0x460   : > { %v2979_v36 = vadd.f32 %v2976_v34, %v2950_v33 }
 0x462   : > { %v3008_v38 = vadd.f32 %v3005_v35, %v2979_v36 }
 0x464   : > { %v3037_v39 = vadd.f32 %v3034_v37, %v3008_v38 }
 0x465   : > { %v3063_v40 = vpop.f32.mrf.mxu3 }
 0x466   : > { %v3066_v41 = vadd.f32 %v3063_v40, %v3037_v39 }
 0x467   : > { %v3092_v42 = vpop.f32.mrf.mxu0 }
 0x468   : > { %v3095_v43 = vadd.f32 %v3092_v42, %v3066_v41 }
 0x46d   : > { %v3150_v44 = vpop.f32.mrf.mxu2 }
 0x46e   : > { %v3179_v47 = vpop.f32.mrf.mxu3 }
 0x46f   : > { %v3121_v45 = vpop.f32.mrf.mxu1 }
 0x470   : > { %v3124_v46 = vadd.f32 %v3121_v45, %v3095_v43  ;;  %v3208_v49 = vpop.f32.mrf.mxu0 }
 0x472   : > { %v3153_v48 = vadd.f32 %v3150_v44, %v3124_v46 }
 0x474   : > { %v3182_v50 = vadd.f32 %v3179_v47, %v3153_v48 }
 0x475   : > { %v3266_v53 = vpop.f32.mrf.mxu2 }
 0x476   : > { %v3211_v51 = vadd.f32 %v3208_v49, %v3182_v50 }
 0x477   : > { %v3237_v52 = vpop.f32.mrf.mxu1 }
 0x478   : > { %v3240_v54 = vadd.f32 %v3237_v52, %v3211_v51 }
 0x47a   : > { %v3269_v55 = vadd.f32 %v3266_v53, %v3240_v54 }
 0x47d   : > { %v3295_v56 = vpop.f32.mrf.mxu3 }
 0x47e   : > { %v3298_v57 = vadd.f32 %v3295_v56, %v3269_v55  ;;  %v3382_v62 = vpop.f32.mrf.mxu2 }
 0x47f   : > { %v3324_v58 = vpop.f32.mrf.mxu0 }
 0x480   : > { %v3327_v59 = vadd.f32 %v3324_v58, %v3298_v57  ;;  %v3353_v60 = vpop.f32.mrf.mxu1 }
 0x482   : > { %v3356_v61 = vadd.f32 %v3353_v60, %v3327_v59 }
 0x484   : > { %v3385_v63 = vadd.f32 %v3382_v62, %v3356_v61 }
 0x485   : > { %v3411_v0 = vpop.f32.mrf.mxu3 }
 0x486   : > { %v3414_v1 = vadd.f32 %v3411_v0, %v3385_v63 }
 0x487   : > { %v3440_v2 = vpop.f32.mrf.mxu0 }
 0x488   : > { %v3443_v3 = vadd.f32 %v3440_v2, %v3414_v1 }
 0x48d   : > { %v3498_v5 = vpop.f32.mrf.mxu2 }
 0x48e   : > { %v3527_v7 = vpop.f32.mrf.mxu3 }
 0x48f   : > { %v3469_v4 = vpop.f32.mrf.mxu1 }
 0x490   : > { %v3472_v6 = vadd.f32 %v3469_v4, %v3443_v3 }
 0x492   : > { %v3501_v8 = vadd.f32 %v3498_v5, %v3472_v6 }
 0x494   : > { %v3530_v9 = vadd.f32 %v3527_v7, %v3501_v8 }
 0x496   : > { %v3537_v11 = vadd.f32 %v3535_v10, %v3530_v9 }
 0x498   : > { %v3538_v12 = vmax.f32 %v3537_v11, 0.0 }
 0x49a   : > { %3553 = vrot.lane.b32.xlu2 %v3538_v12, %s11892_s25  ;;  %3548 = vrot.lane.b32.xlu1 %v3538_v12, %s11790_s16  ;;  %3541 = vst.msk [vmem:[#allocation3] sm:$0x1] %vm3540_vm10, %v3538_v12  ;;  %s11912_s25 = smov 48   ;;  %vm3606_vm10 = vcmask 454051   ;;  %s11917_s16 = smov 20  }
 0x49b   : > { %3543 = vrot.lane.b32.xlu0 %v3538_v12, %s11795_s29 }
 0x4a2   : > { %3568 = vrot.lane.b32.xlu2 %v3538_v12, %s10042_s10  ;;  %3563 = vrot.lane.b32.xlu1 %v3538_v12, %s10043_s15  ;;  %s11782_s10 = smov 56  }
 0x4a3   : > { %3558 = vrot.lane.b32.xlu0 %v3538_v12, %s11910_s11 }
 0x4aa   : > { %3583 = vrot.lane.b32.xlu2 %v3538_v12, %s11794_s8  ;;  %3578 = vrot.lane.b32.xlu1 %v3538_v12, %s11911_s6  ;;  %s10055_s6 = smov 72   ;;  %s11916_s8 = sld [smem:[#allocation29_spill]] }
 0x4ab   : > { %3573 = vrot.lane.b32.xlu0 %v3538_v12, %s11885_s19 }
 0x4b0   : > { %v9945_v5 = vld [vmem:[%s11916_s8] ss:$0 sm:$0xff]  ;;  %s11919_s8 = smov 104  }
 0x4b2   : > { %3598 = vrot.lane.b32.xlu2 %v3538_v12, %s11912_s25  ;;  %3593 = vrot.lane.b32.xlu1 %v3538_v12, %s11879_s24 }
 0x4b3   : > { %3588 = vrot.lane.b32.xlu0 %v3538_v12, %s11784_s5  ;;  %s11914_s5 = sld [smem:[#allocation28_spill]] }
 0x4b9   : > { %v3743_v53 = vld [vmem:[%s11914_s5 + $0x18] sm:$0xff]  ;;  %v3742_v62 = vld [vmem:[%s11914_s5 + $0x10] sm:$0xff]  ;;  %v3741_v63 = vld [vmem:[%s11914_s5 + $0x8] sm:$0xff] }
 0x4ba   : > { %3613 = vrot.lane.b32.xlu2 %v3538_v12, %s10046_s7  ;;  %3608 = vrot.lane.b32.xlu1 %v3538_v12, %s10047_s9  ;;  %s11834_s7 = smov 84   ;;  %s11788_s9 = smov 88   ;;  %v3740_v0 = vld [vmem:[%s11914_s5] sm:$0xff] }
 0x4bb   : > { %3603 = vrot.lane.b32.xlu0 %v3538_v12, %s11792_s2  ;;  %3764 = vmatpush.msrb.mxu1 %v3743_v53  ;;  %s11915_s2 = sld [smem:[#allocation27_spill]]  ;;  %s11938_s5 = smov 45  }
 0x4bd   : > { %3765 = vmatpush.msrb.mxu1 %v3742_v62 }
 0x4bf   : > { %3766 = vmatpush.msrb.mxu1 %v3741_v63 }
 0x4c1   : > { %3767 = vmatpush.msrb.mxu1 %v3740_v0  ;;  %v9944_v1 = vld [vmem:[%s11915_s2] ss:$0 sm:$0xff]  ;;  %s11918_s2 = smov 36  }
 0x4c2   : > { %3628 = vrot.lane.b32.xlu2 %v3538_v12, %s10049_s17  ;;  %3623 = vrot.lane.b32.xlu1 %v3538_v12, %s10050_s27  ;;  %s11913_s17 = sld [smem:[#allocation26_spill]] }
 0x4c3   : > { %3618 = vrot.lane.b32.xlu0 %v3538_v12, %s11876_s0 }
 0x4c8   : > { %v3714_v26 = vld [vmem:[%s11913_s17 + $0x78] sm:$0xff]  ;;  %v3713_v27 = vld [vmem:[%s11913_s17 + $0x70] sm:$0xff]  ;;  %v3712_v28 = vld [vmem:[%s11913_s17 + $0x68] sm:$0xff] }
 0x4c9   : > { %3719 = vmatpush.msrb.mxu0 %v3714_v26  ;;  %v3711_v29 = vld [vmem:[%s11913_s17 + $0x60] sm:$0xff]  ;;  %v3710_v33 = vld [vmem:[%s11913_s17 + $0x58] sm:$0xff]  ;;  %v3709_v34 = vld [vmem:[%s11913_s17 + $0x50] sm:$0xff] }
 0x4ca   : > { %3643 = vrot.lane.b32.xlu2 %v3538_v12, %s11796_s14  ;;  %3638 = vrot.lane.b32.xlu1 %v3538_v12, %s11875_s30  ;;  %s10058_s30 = smov 100   ;;  %v3708_v35 = vld [vmem:[%s11913_s17 + $0x48] sm:$0xff]  ;;  %v3707_v36 = vld [vmem:[%s11913_s17 + $0x40] sm:$0xff] }
 0x4cb   : > { %3633 = vrot.lane.b32.xlu0 %v3538_v12, %s11783_s28  ;;  %3720 = vmatpush.msrb.mxu0 %v3713_v27  ;;  %v3706_v39 = vld [vmem:[%s11913_s17 + $0x38] sm:$0xff]  ;;  %v3705_v40 = vld [vmem:[%s11913_s17 + $0x30] sm:$0xff]  ;;  %v3704_v42 = vld [vmem:[%s11913_s17 + $0x28] sm:$0xff]  ;;  %s11802_s28 = smov 66  }
 0x4cc   : > { %v3703_v43 = vld [vmem:[%s11913_s17 + $0x20] sm:$0xff]  ;;  %v3702_v46 = vld [vmem:[%s11913_s17 + $0x18] sm:$0xff]  ;;  %v3701_v47 = vld [vmem:[%s11913_s17 + $0x10] sm:$0xff] }
 0x4cd   : > { %3721 = vmatpush.msrb.mxu0 %v3712_v28  ;;  %v3700_v48 = vld [vmem:[%s11913_s17 + $0x8] sm:$0xff]  ;;  %v3699_v50 = vld [vmem:[%s11913_s17] sm:$0xff]  ;;  %s11939_s17 = sld [smem:[#allocation33_spill]] }
 0x4cf   : > { %3722 = vmatpush.msrb.mxu0 %v3711_v29 }
 0x4d1   : > { %3723 = vmatpush.msrb.mxu0 %v3710_v33 }
 0x4d2   : > { %3658 = vrot.lane.b32.xlu2 %v3538_v12, %s11874_s26  ;;  %3653 = vrot.lane.b32.xlu1 %v3538_v12, %s11786_s1  ;;  %s11806_s1 = smov 67  }
 0x4d3   : > { %3648 = vrot.lane.b32.xlu0 %v3538_v12, %s11782_s10  ;;  %3724 = vmatpush.msrb.mxu0 %v3709_v34  ;;  %s11798_s10 = smov 85  }
 0x4d5   : > { %3725 = vmatpush.msrb.mxu0 %v3708_v35 }
 0x4d7   : > { %3726 = vmatpush.msrb.mxu0 %v3707_v36 }
 0x4d9   : > { %3727 = vmatpush.msrb.mxu0 %v3706_v39 }
 0x4da   : > { %3673 = vrot.lane.b32.xlu2 %v3538_v12, %s11898_s12  ;;  %3668 = vrot.lane.b32.xlu1 %v3538_v12, %s10055_s6  ;;  %s11920_s6 = smov 88   ;;  %s11800_s12 = smov 65  }
 0x4db   : > { %3663 = vrot.lane.b32.xlu0 %v3538_v12, %s11834_s7  ;;  %3728 = vmatpush.msrb.mxu0 %v3705_v40 }
 0x4dd   : > { %3729 = vmatpush.msrb.mxu0 %v3704_v42 }
 0x4df   : > { %3730 = vmatpush.msrb.mxu0 %v3703_v43 }
 0x4e1   : > { %3731 = vmatpush.msrb.mxu0 %v3702_v46 }
 0x4e2   : > { %3688 = vrot.lane.b32.xlu2 %v3538_v12, %s11788_s9  ;;  %3683 = vrot.lane.b32.xlu1 %v3538_v12, %s10058_s30  ;;  %s11830_s9 = smov 86  }
 0x4e3   : > { %3678 = vrot.lane.b32.xlu0 %v3538_v12, %s11881_s22  ;;  %3732 = vmatpush.msrb.mxu0 %v3701_v47  ;;  %s11832_s22 = smov 87  }
 0x4e5   : > { %3733 = vmatpush.msrb.mxu0 %v3700_v48 }
 0x4e7   : > { %3734 = vmatpush.msrb.mxu0 %v3699_v50 }
 0x4eb   : > { %3693 = vrot.lane.b32.xlu0 %v3538_v12, %s11896_s13 }
 0x4f4   : > { %v3554_v13 = vpop.permute.xlu2 %3553 }
 0x4fc   : > { %v3569_v14 = vpop.permute.xlu2 %3568 }
 0x504   : > { %v3584_v17 = vpop.permute.xlu2 %3583 }
 0x50c   : > { %v3549_v15 = vpop.permute.xlu1 %3548  ;;  %v3599_v20 = vpop.permute.xlu2 %3598 }
 0x50d   : > { %v3544_v16 = vpop.permute.xlu0 %3543 }
 0x50e   : > { %3547 = vst.msk [vmem:[#allocation3] sm:$0x1] %vm3546_vm12, %v3544_v16  ;;  %vm3611_vm12 = vcmask 486851  }
 0x50f   : > { %3552 = vst.msk [vmem:[#allocation3] sm:$0x1] %vm3551_vm1, %v3549_v15  ;;  %vm3616_vm1 = vcmask 519651  }
 0x510   : > { %3557 = vst.msk [vmem:[#allocation3] sm:$0x1] %vm3556_vm3, %v3554_v13  ;;  %vm3621_vm3 = vcmask 553476  }
 0x514   : > { %v3564_v18 = vpop.permute.xlu1 %3563  ;;  %v3614_v24 = vpop.permute.xlu2 %3613 }
 0x515   : > { %v3559_v19 = vpop.permute.xlu0 %3558 }
 0x516   : > { %3562 = vst.msk [vmem:[#allocation3 - $0x1] sm:$0x2] %vm3561_vm4, %v3559_v19  ;;  %vm3626_vm4 = vcmask 586276  }
 0x517   : > { %3567 = vst.msk [vmem:[#allocation3 - $0x1] sm:$0x2] %vm3566_vm5, %v3564_v18  ;;  %vm3631_vm5 = vcmask 619076  }
 0x518   : > { %3572 = vst.msk [vmem:[#allocation3 - $0x1] sm:$0x2] %vm3571_vm6, %v3569_v14  ;;  %vm3636_vm6 = vcmask 651876  }
 0x51c   : > { %v3579_v21 = vpop.permute.xlu1 %3578  ;;  %v3629_v32 = vpop.permute.xlu2 %3628 }
 0x51d   : > { %v3574_v22 = vpop.permute.xlu0 %3573 }
 0x51e   : > { %3577 = vst.msk [vmem:[#allocation3 - $0x1] sm:$0x2] %vm3576_vm7, %v3574_v22  ;;  %vm3641_vm7 = vcmask 685701  }
 0x51f   : > { %3582 = vst.msk [vmem:[#allocation3 - $0x2] sm:$0x4] %vm3581_vm11, %v3579_v21  ;;  %vm3646_vm11 = vcmask 718501  }
 0x520   : > { %3587 = vst.msk [vmem:[#allocation3 - $0x2] sm:$0x4] %vm3586_vm13, %v3584_v17  ;;  %vm3651_vm13 = vcmask 751301  }
 0x524   : > { %v3594_v23 = vpop.permute.xlu1 %3593  ;;  %v3644_v41 = vpop.permute.xlu2 %3643 }
 0x525   : > { %v3589_v25 = vpop.permute.xlu0 %3588 }
 0x526   : > { %3592 = vst.msk [vmem:[#allocation3 - $0x2] sm:$0x4] %vm3591_vm14, %v3589_v25  ;;  %vm3656_vm14 = vcmask 784101  }
 0x527   : > { %3597 = vst.msk [vmem:[#allocation3 - $0x2] sm:$0x4] %vm3596_vm15, %v3594_v23  ;;  %vm3661_vm15 = vcmask 817926  }
 0x528   : > { %3602 = vst.msk [vmem:[#allocation3 - $0x3] sm:$0x8] %vm3601_vm0, %v3599_v20  ;;  %vm3666_vm0 = vcmask 850726  }
 0x52c   : > { %v3609_v30 = vpop.permute.xlu1 %3608  ;;  %v3659_v49 = vpop.permute.xlu2 %3658 }
 0x52d   : > { %v3604_v31 = vpop.permute.xlu0 %3603 }
 0x52e   : > { %3607 = vst.msk [vmem:[#allocation3 - $0x3] sm:$0x8] %vm3606_vm10, %v3604_v31  ;;  %vm3671_vm10 = vcmask 883526  }
 0x52f   : > { %3612 = vst.msk [vmem:[#allocation3 - $0x3] sm:$0x8] %vm3611_vm12, %v3609_v30  ;;  %vm3676_vm12 = vcmask 916326  }
 0x530   : > { %3617 = vst.msk [vmem:[#allocation3 - $0x3] sm:$0x8] %vm3616_vm1, %v3614_v24  ;;  %vm3681_vm1 = vcmask 950151  }
 0x534   : > { %v3624_v37 = vpop.permute.xlu1 %3623  ;;  %v3674_v55 = vpop.permute.xlu2 %3673 }
 0x535   : > { %v3619_v38 = vpop.permute.xlu0 %3618 }
 0x536   : > { %3622 = vst.msk [vmem:[#allocation3 - $0x4] sm:$0x10] %vm3621_vm3, %v3619_v38  ;;  %vm3686_vm3 = vcmask 982951  }
 0x537   : > { %3627 = vst.msk [vmem:[#allocation3 - $0x4] sm:$0x10] %vm3626_vm4, %v3624_v37  ;;  %vm3691_vm4 = vcmask 1015751  }
 0x538   : > { %3632 = vst.msk [vmem:[#allocation3 - $0x4] sm:$0x10] %vm3631_vm5, %v3629_v32  ;;  %vm3696_vm5 = vcmask 1048551  }
 0x53c   : > { %v3639_v44 = vpop.permute.xlu1 %3638  ;;  %v3689_v59 = vpop.permute.xlu2 %3688 }
 0x53d   : > { %v3634_v45 = vpop.permute.xlu0 %3633 }
 0x53e   : > { %3637 = vst.msk [vmem:[#allocation3 - $0x4] sm:$0x10] %vm3636_vm6, %v3634_v45  ;;  %vm3748_vm6 = vcmask 261120  }
 0x53f   : > { %3642 = vst.msk [vmem:[#allocation3 - $0x5] sm:$0x20] %vm3641_vm7, %v3639_v44  ;;  %vm3797_vm7 = vcmask 155776  }
 0x540   : > { %3647 = vst.msk [vmem:[#allocation3 - $0x5] sm:$0x20] %vm3646_vm11, %v3644_v41  ;;  %vm3782_vm11 = vcmask 713376  }
 0x544   : > { %v3654_v51 = vpop.permute.xlu1 %3653 }
 0x545   : > { %v3649_v52 = vpop.permute.xlu0 %3648 }
 0x546   : > { %3652 = vst.msk [vmem:[#allocation3 - $0x5] sm:$0x20] %vm3651_vm13, %v3649_v52  ;;  %vm3787_vm13 = vcmask 877376  }
 0x547   : > { %3657 = vst.msk [vmem:[#allocation3 - $0x5] sm:$0x20] %vm3656_vm14, %v3654_v51  ;;  %vm3792_vm14 = vcmask 1041376  }
 0x548   : > { %3662 = vst.msk [vmem:[#allocation3 - $0x6] sm:$0x40] %vm3661_vm15, %v3659_v49  ;;  %vm11924_vm15 = vcmask 1031168  }
 0x54c   : > { %v3669_v54 = vpop.permute.xlu1 %3668 }
 0x54d   : > { %v3664_v56 = vpop.permute.xlu0 %3663 }
 0x54e   : > { %3667 = vst.msk [vmem:[#allocation3 - $0x6] sm:$0x40] %vm3666_vm0, %v3664_v56  ;;  %vm11925_vm0 = vcmask 1039360  }
 0x54f   : > { %3672 = vst.msk [vmem:[#allocation3 - $0x6] sm:$0x40] %vm3671_vm10, %v3669_v54  ;;  %vm11926_vm10 = vcmask 1022976  }
 0x550   : > { %3677 = vst.msk [vmem:[#allocation3 - $0x6] sm:$0x40] %vm3676_vm12, %v3674_v55  ;;  %vm11927_vm12 = vcmask 1014784  }
 0x554   : > { %v3684_v57 = vpop.permute.xlu1 %3683 }
 0x555   : > { %v3679_v58 = vpop.permute.xlu0 %3678 }
 0x556   : > { %3682 = vst.msk [vmem:[#allocation3 - $0x7] sm:$0x80] %vm3681_vm1, %v3679_v58  ;;  %vm4161_vm1 = vcmask 875520  }
 0x557   : > { %3687 = vst.msk [vmem:[#allocation3 - $0x7] sm:$0x80] %vm3686_vm3, %v3684_v57  ;;  %vm11843_vm3 = vcmask 859136  }
 0x558   : > { %3692 = vst.msk [vmem:[#allocation3 - $0x7] sm:$0x80] %vm3691_vm4, %v3689_v59  ;;  %vm4216_vm4 = vcmask 867328  }
 0x55d   : > { %v3694_v60 = vpop.permute.xlu0 %3693 }
 0x55e   : > { %3697 = vst.msk [vmem:[#allocation3 - $0x7] sm:$0x80] %vm3696_vm5, %v3694_v60  ;;  %vm11842_vm5 = vcmask 719872  }
 0x565   : > { %v3698_v61 = vld [vmem:[#allocation3] sm:$0xff] }
 0x566   : > { %3735 = vmatmul.f32.vlgmr.msrb.gmra.mxu0 %v3698_v61 }
 0x5e3   : > { %v3736_v2 = vpop.f32.mrf.mxu0 }
 0x5e4   : > { %v3737_v3 = vadd.f32 %v9944_v1, %v3736_v2 }
 0x5e6   : > { %v3739_v4 = vmax.f32 %v3737_v3, 0.0 }
 0x5e8   : > { %8992 = vmatmul.msk.f32.vlgmr.msrb.gmra.mxu1 %vm3748_vm6, %v3739_v4  ;;  %vm11829_vm6 = vcmask 850944  }
 0x665   : > { %v3769_v6 = vpop.f32.mrf.mxu1 }
 0x666   : > { %v3770_v7 = vadd.f32 %v9945_v5, %v3769_v6 }
 0x668   : > { %v3772_v8 = vmax.f32 %v3770_v7, 0.0 }
 0x66a   : > { %3789 = vrot.lane.b32.xlu0 %v3772_v8, %s11795_s29  ;;  %3784 = vrot.lane.b32.xlu2 %v3772_v8, %s10058_s30  ;;  %s11808_s30 = smov 106   ;;  %s11921_s29 = smov 44  }
 0x66b   : > { %3779 = vrot.lane.b32.xlu1 %v3772_v8, %s11834_s7 }
 0x672   : > { %3806 = vrot.lane.b32.xlu0 %v3772_v8, %s10050_s27  ;;  %3799 = vrot.lane.b32.xlu2 %v3772_v8, %s11796_s14  ;;  %s11804_s27 = smov 105  }
 0x673   : > { %3794 = vrot.lane.b32.xlu1 %v3772_v8, %s10043_s15  ;;  %s11814_s15 = smov 107  }
 0x67a   : > { %3820 = vrot.lane.b32.xlu2 %v3772_v8, %s11917_s16  ;;  %s11810_s16 = smov 47  }
 0x67b   : > { %3813 = vrot.lane.b32.xlu1 %v3772_v8, %s11918_s2 }
 0x6c4   : > { %v3785_v9 = vpop.permute.xlu2 %3784 }
 0x6c5   : > { %3812 = vst.msk [vmem:[#allocation4 + $0xa] sm:$0x1] %vm3797_vm7, %v3785_v9 }
 0x6c6   : > { %3835 = vst.msk [vmem:[#allocation4 + $0x7] sm:$0x1] %vm3782_vm11, %v3785_v9 }
 0x6cc   : > { %v3800_v10 = vpop.permute.xlu2 %3799 }
 0x6cd   : > { %3802 = vst.msk [vmem:[#allocation4 + $0x1] sm:$0x1] %vm3782_vm11, %v3800_v10 }
 0x6ce   : > { %3826 = vst.msk [vmem:[#allocation4 + $0xc] sm:$0x1] %vm3797_vm7, %v3800_v10 }
 0x6d4   : > { %v3821_v11 = vpop.permute.xlu2 %3820 }
 0x6d5   : > { %3823 = vst.msk [vmem:[#allocation4 + $0x4] sm:$0x1] %vm3782_vm11, %v3821_v11 }
 0x6d6   : > { %3838 = vst.msk [vmem:[#allocation4 + $0xf] sm:$0x1] %vm3797_vm7, %v3821_v11 }
 0x6dc   : > { %v3790_v12 = vpop.permute.xlu0 %3789 }
 0x6dd   : > { %3805 = vst.msk [vmem:[#allocation4 + $0x9] sm:$0x1] %vm3797_vm7, %v3790_v12  ;;  %v3780_v13 = vpop.permute.xlu1 %3779 }
 0x6de   : > { %3831 = vst.msk [vmem:[#allocation4 + $0x6] sm:$0x1] %vm3782_vm11, %v3790_v12 }
 0x6df   : > { %3836 = vst.msk [vmem:[#allocation4 + $0x7] sm:$0x1] %vm3787_vm13, %v3790_v12 }
 0x6e0   : > { %3783 = vst.msk [vmem:[#allocation4] sm:$0x1] %vm3782_vm11, %v3780_v13 }
 0x6e1   : > { %3788 = vst.msk [vmem:[#allocation4] sm:$0x1] %vm3787_vm13, %v3785_v9 }
 0x6e2   : > { %3793 = vst.msk [vmem:[#allocation4] sm:$0x1] %vm3792_vm14, %v3790_v12 }
 0x6e3   : > { %3803 = vst.msk [vmem:[#allocation4 + $0x1] sm:$0x1] %vm3787_vm13, %v3780_v13 }
 0x6e4   : > { %3804 = vst.msk [vmem:[#allocation4 + $0x1] sm:$0x1] %vm3792_vm14, %v3785_v9  ;;  %v3807_v14 = vpop.permute.xlu0 %3806 }
 0x6e5   : > { %3819 = vst.msk [vmem:[#allocation4 + $0xb] sm:$0x1] %vm3797_vm7, %v3780_v13  ;;  %v3795_v15 = vpop.permute.xlu1 %3794 }
 0x6e6   : > { %3809 = vst.msk [vmem:[#allocation4 + $0x2] sm:$0x1] %vm3782_vm11, %v3807_v14 }
 0x6e7   : > { %3810 = vst.msk [vmem:[#allocation4 + $0x2] sm:$0x1] %vm3787_vm13, %v3800_v10 }
 0x6e8   : > { %3811 = vst.msk [vmem:[#allocation4 + $0x2] sm:$0x1] %vm3792_vm14, %v3780_v13 }
 0x6e9   : > { %3830 = vst.msk [vmem:[#allocation4 + $0xd] sm:$0x1] %vm3797_vm7, %v3807_v14 }
 0x6ea   : > { %3798 = vst.msk [vmem:[#allocation4 + $0x8] sm:$0x1] %vm3797_vm7, %v3795_v15 }
 0x6eb   : > { %3827 = vst.msk [vmem:[#allocation4 + $0x5] sm:$0x1] %vm3782_vm11, %v3795_v15 }
 0x6ec   : > { %3832 = vst.msk [vmem:[#allocation4 + $0x6] sm:$0x1] %vm3787_vm13, %v3795_v15 }
 0x6ed   : > { %3833 = vst.msk [vmem:[#allocation4 + $0x6] sm:$0x1] %vm3792_vm14, %v3821_v11  ;;  %v3814_v16 = vpop.permute.xlu1 %3813 }
 0x6ee   : > { %3837 = vst.msk [vmem:[#allocation4 + $0x7] sm:$0x1] %vm3792_vm14, %v3795_v15 }
 0x6ef   : > { %3828 = vst.msk [vmem:[#allocation4 + $0x5] sm:$0x1] %vm3787_vm13, %v3821_v11 }
 0x6f0   : > { %3816 = vst.msk [vmem:[#allocation4 + $0x3] sm:$0x1] %vm3782_vm11, %v3814_v16  ;;  %vm11826_vm11 = vcmask 711680  }
 0x6f1   : > { %3817 = vst.msk [vmem:[#allocation4 + $0x3] sm:$0x1] %vm3787_vm13, %v3807_v14 }
 0x6f2   : > { %3818 = vst.msk [vmem:[#allocation4 + $0x3] sm:$0x1] %vm3792_vm14, %v3800_v10 }
 0x6f3   : > { %3824 = vst.msk [vmem:[#allocation4 + $0x4] sm:$0x1] %vm3787_vm13, %v3814_v16  ;;  %vm11828_vm13 = vcmask 687104  }
 0x6f4   : > { %3825 = vst.msk [vmem:[#allocation4 + $0x4] sm:$0x1] %vm3792_vm14, %v3807_v14 }
 0x6f5   : > { %3829 = vst.msk [vmem:[#allocation4 + $0x5] sm:$0x1] %vm3792_vm14, %v3814_v16  ;;  %vm11827_vm14 = vcmask 695296  }
 0x6f6   : > { %3834 = vst.msk [vmem:[#allocation4 + $0xe] sm:$0x1] %vm3797_vm7, %v3814_v16  ;;  %vm11841_vm7 = vcmask 703488  }
 0x6fc   : > { %v3839_v17 = vld [vmem:[#allocation4] sm:$0xff] }
 0x6fd   : > { %v10831_v18 = vld [vmem:[#allocation4 + $0x8] sm:$0xff]  ;;  %3914 = vmatpush.msra.mxu1 %v3839_v17 }
 0x6fe   : > { %v9579_v19 = vpack.i.bf16 %v10831_v18, %v3839_v17 }
 0x700   : > { %9580 = vrot.lane.b32.xlu2 %v9579_v19, %s11882_s18  ;;  %9575 = vrot.lane.b32.xlu1 %v9579_v19, %s11883_s23 }
 0x701   : > { %9570 = vrot.lane.b32.xlu0 %v9579_v19, %s11880_s20 }
 0x708   : > { %9595 = vrot.lane.b32.xlu2 %v9579_v19, %s11814_s15  ;;  %9590 = vrot.lane.b32.xlu1 %v9579_v19, %s11885_s19  ;;  %s11934_s15 = smov 66  }
 0x709   : > { %9585 = vrot.lane.b32.xlu0 %v9579_v19, %s11879_s24 }
 0x710   : > { %9610 = vrot.lane.b32.xlu2 %v9579_v19, %s11919_s8  ;;  %9605 = vrot.lane.b32.xlu1 %v9579_v19, %s11804_s27  ;;  %s11922_s27 = sld [smem:[#allocation31_spill]] }
 0x711   : > { %9600 = vrot.lane.b32.xlu0 %v9579_v19, %s11808_s30  ;;  %s11928_s30 = smov 107  }
 0x716   : > { %v5199_v20 = vld [vmem:[%s11922_s27] sm:$0xff]  ;;  %s11932_s27 = smov 68  }
 0x718   : > { %9625 = vrot.lane.b32.xlu2 %v9579_v19, %s11830_s9  ;;  %9620 = vrot.lane.b32.xlu1 %v9579_v19, %s11832_s22 }
 0x719   : > { %9615 = vrot.lane.b32.xlu0 %v9579_v19, %s11920_s6 }
 0x720   : > { %9640 = vrot.lane.b32.xlu2 %v9579_v19, %s11796_s14  ;;  %9635 = vrot.lane.b32.xlu1 %v9579_v19, %s11834_s7  ;;  %s11812_s14 = smov 45  }
 0x721   : > { %9630 = vrot.lane.b32.xlu0 %v9579_v19, %s11798_s10  ;;  %s11837_s10 = smov 46  }
 0x728   : > { %9655 = vrot.lane.b32.xlu2 %v9579_v19, %s11800_s12  ;;  %9650 = vrot.lane.b32.xlu1 %v9579_v19, %s11802_s28  ;;  %s11929_s28 = smov 106   ;;  %s11931_s12 = smov 85  }
 0x729   : > { %9645 = vrot.lane.b32.xlu0 %v9579_v19, %s11806_s1  ;;  %s11930_s1 = smov 105  }
 0x730   : > { %9670 = vrot.lane.b32.xlu2 %v9579_v19, %s11810_s16  ;;  %9665 = vrot.lane.b32.xlu1 %v9579_v19, %s11912_s25  ;;  %s11923_s16 = sld [smem:[#allocation30_spill]] }
 0x731   : > { %9660 = vrot.lane.b32.xlu0 %v9579_v19, %s11876_s0 }
 0x736   : > { %v3841_v21 = vld [vmem:[%s11923_s16] sm:$0xff]  ;;  %v8998_v27 = vld [vmem:[%s11923_s16 + $0x10] sm:$0xff]  ;;  %v8993_v30 = vld [vmem:[%s11923_s16 + $0x8] sm:$0xff] }
 0x737   : > { %8996 = vmatmul.msk.f32.vlgmr.msra.gmra.mxu1 %vm660_vm8, %v3841_v21  ;;  %v9007_v41 = vld [vmem:[%s11923_s16 + $0x28] sm:$0xff]  ;;  %v9004_v48 = vld [vmem:[%s11923_s16 + $0x20] sm:$0xff]  ;;  %v9001_v57 = vld [vmem:[%s11923_s16 + $0x18] sm:$0xff] }
 0x738   : > { %9685 = vrot.lane.b32.xlu2 %v9579_v19, %s11921_s29  ;;  %9680 = vrot.lane.b32.xlu1 %v9579_v19, %s11812_s14  ;;  %v9013_v58 = vld [vmem:[%s11923_s16 + $0x38] sm:$0xff]  ;;  %v9010_v62 = vld [vmem:[%s11923_s16 + $0x30] sm:$0xff]  ;;  %s11933_s14 = smov 67  }
 0x739   : > { %9675 = vrot.lane.b32.xlu0 %v9579_v19, %s11837_s10  ;;  %v9019_v6 = vld [vmem:[%s11923_s16 + $0x48] sm:$0xff]  ;;  %v9016_v10 = vld [vmem:[%s11923_s16 + $0x40] sm:$0xff] }
 0x741   : > { %5202 = vperm.xlu0 %9568, %v5199_v20   ;;  %v9025_v20 = vld [vmem:[%s11923_s16 + $0x58] sm:$0xff] }
 0x75a   : > { %v9581_v22 = vpop.permute.xlu2 %9580 }
 0x75b   : > { %v9583_v31 = vunpack.i.h.bf16 %v9581_v22  ;;  %v9582_v32 = vunpack.i.l.bf16 %v9581_v22  ;;  %v9022_v22 = vld [vmem:[%s11923_s16 + $0x50] sm:$0xff] }
 0x75d   : > { %v3999_v36 = vsel %vm11926_vm10, %v9582_v32, %v9583_v31  ;;  %v9028_v32 = vld [vmem:[%s11923_s16 + $0x60] sm:$0xff]  ;;  %vm11824_vm10 = vcmask 531456  }
 0x762   : > { %v9596_v33 = vpop.permute.xlu2 %9595 }
 0x763   : > { %v9598_v44 = vunpack.i.h.bf16 %v9596_v33  ;;  %v9597_v45 = vunpack.i.l.bf16 %v9596_v33 }
 0x765   : > { %v4162_v50 = vsel %vm4161_vm1, %v9597_v45, %v9598_v44 }
 0x76a   : > { %v9611_v49 = vpop.permute.xlu2 %9610 }
 0x76b   : > { %v9613_v60 = vunpack.i.h.bf16 %v9611_v49  ;;  %v9612_v1 = vunpack.i.l.bf16 %v9611_v49 }
 0x76d   : > { %v4327_v11 = vsel %vm11829_vm6, %v9612_v1, %v9613_v60  ;;  %vm5237_vm6 = vcmask 851712  }
 0x772   : > { %v9576_v23 = vpop.permute.xlu1 %9575  ;;  %v10904_v63 = vpop.permute.xlu2 %9625 }
 0x773   : > { %v9578_v24 = vunpack.i.h.bf16 %v9576_v23  ;;  %v9577_v25 = vunpack.i.l.bf16 %v9576_v23  ;;  %v9571_v26 = vpop.permute.xlu0 %9570  ;;  %v9628_v7 = vunpack.i.h.bf16 %v10904_v63  ;;  %v9627_v8 = vunpack.i.l.bf16 %v10904_v63 }
 0x774   : > { %v9573_v28 = vunpack.i.h.bf16 %v9571_v26  ;;  %v9572_v29 = vunpack.i.l.bf16 %v9571_v26 }
 0x775   : > { %3986 = vmatpush.msrb.mxu1 %v9578_v24  ;;  %v3945_v34 = vsel %vm11924_vm15, %v9577_v25, %v9578_v24  ;;  %v4492_v12 = vsel %vm11841_vm7, %v9627_v8, %v9628_v7  ;;  %vm11816_vm15 = vcmask 547840  }
 0x776   : > { %3891 = vmatpush.msrb.mxu3 %v9573_v28  ;;  %v3850_v35 = vsel %vm11925_vm0, %v9572_v29, %v9573_v28  ;;  %9000 = vmatmul.msk.f32.vlgmr.msrb.gmra.mxu1 %vm660_vm8, %v8998_v27  ;;  %vm11825_vm0 = vcmask 556032  }
 0x777   : > { %3871 = vmatpush.msrb.mxu2 %v3850_v35  ;;  %8995 = vmatmul.msk.f32.vlgmr.msrb.gmra.mxu3 %vm660_vm8, %v8993_v30 }
 0x778   : > { %3966 = vmatpush.msra.mxu3 %v3945_v34  ;;  %8994 = vmatmul.msk.f32.vlgmr.msrb.gmra.mxu2 %vm660_vm8, %v8993_v30 }
 0x779   : > { %3934 = vmatpush.msra.mxu2 %v10831_v18 }
 0x77a   : > { %4040 = vmatpush.msrb.mxu3 %v9583_v31  ;;  %v9591_v37 = vpop.permute.xlu1 %9590  ;;  %v9641_v14 = vpop.permute.xlu2 %9640  ;;  %v9031_v31 = vld [vmem:[%s11923_s16 + $0x68] sm:$0xff] }
 0x77b   : > { %4020 = vmatpush.msrb.mxu2 %v3999_v36  ;;  %v9593_v38 = vunpack.i.h.bf16 %v9591_v37  ;;  %v9592_v39 = vunpack.i.l.bf16 %v9591_v37  ;;  %v9586_v40 = vpop.permute.xlu0 %9585  ;;  %v9642_v36 = vunpack.i.l.bf16 %v9641_v14 }
 0x77c   : > { %v9588_v42 = vunpack.i.h.bf16 %v9586_v40  ;;  %v9587_v43 = vunpack.i.l.bf16 %v9586_v40 }
 0x77d   : > { %4148 = vmatpush.msra.mxu0 %v9593_v38  ;;  %v4107_v46 = vsel %vm1138_vm2, %v9592_v39, %v9593_v38  ;;  %v9037_v39 = vld [vmem:[%s11923_s16 + $0x78] sm:$0xff] }
 0x77e   : > { %v4053_v47 = vsel %vm11927_vm12, %v9587_v43, %v9588_v42  ;;  %9009 = vmatmul.msk.f32.vlgmr.msra.gmra.mxu0 %vm660_vm8, %v9007_v41  ;;  %vm11817_vm12 = vcmask 539648  }
 0x77f   : > { %8999 = vmatmul.msk.f32.vlgmr.msra.gmra.mxu3 %vm660_vm8, %v8998_v27  ;;  %4074 = vmatpush.msra.mxu1 %v4053_v47 }
 0x780   : > { %4128 = vmatpush.msra.mxu3 %v4107_v46  ;;  %8997 = vmatmul.msk.f32.vlgmr.msra.gmra.mxu2 %vm660_vm8, %v3841_v21  ;;  %v9643_v21 = vunpack.i.h.bf16 %v9641_v14 }
 0x781   : > { %9005 = vmatmul.msk.f32.vlgmr.msra.gmra.mxu1 %vm660_vm8, %v9004_v48  ;;  %4094 = vmatpush.msra.mxu2 %v9588_v42  ;;  %v9034_v42 = vld [vmem:[%s11923_s16 + $0x70] sm:$0xff] }
 0x782   : > { %4183 = vmatpush.msrb.mxu1 %v4162_v50  ;;  %v9606_v51 = vpop.permute.xlu1 %9605  ;;  %v9656_v35 = vpop.permute.xlu2 %9655  ;;  %v4657_v43 = vsel %vm11825_vm0, %v9642_v36, %v9643_v21  ;;  %vm5225_vm0 = vcmask 195712  }
 0x783   : > { %v9608_v52 = vunpack.i.h.bf16 %v9606_v51  ;;  %v9607_v53 = vunpack.i.l.bf16 %v9606_v51  ;;  %v9601_v54 = vpop.permute.xlu0 %9600  ;;  %v9658_v40 = vunpack.i.h.bf16 %v9656_v35 }
 0x784   : > { %v9603_v55 = vunpack.i.h.bf16 %v9601_v54  ;;  %v9602_v56 = vunpack.i.l.bf16 %v9601_v54 }
 0x785   : > { %v4272_v59 = vsel %vm11843_vm3, %v9607_v53, %v9608_v52 }
 0x786   : > { %4258 = vmatpush.msrb.mxu0 %v9603_v55  ;;  %v4217_v61 = vsel %vm4216_vm4, %v9602_v56, %v9603_v55  ;;  %4293 = vmatpush.msra.mxu1 %v4272_v59 }
 0x787   : > { %9003 = vmatmul.msk.f32.vlgmr.msrb.gmra.mxu3 %vm660_vm8, %v9001_v57  ;;  %9015 = vmatmul.msk.f32.vlgmr.msrb.gmra.mxu0 %vm660_vm8, %v9013_v58 }
 0x788   : > { %4238 = vmatpush.msrb.mxu3 %v4217_v61  ;;  %4368 = vmatpush.msra.mxu0 %v9613_v60 }
 0x789   : > { %9002 = vmatmul.msk.f32.vlgmr.msrb.gmra.mxu2 %vm660_vm8, %v9001_v57  ;;  %9011 = vmatmul.msk.f32.vlgmr.msrb.gmra.mxu1 %vm660_vm8, %v9010_v62 }
 0x78a   : > { %4203 = vmatpush.msrb.mxu2 %v9598_v44  ;;  %v9621_v0 = vpop.permute.xlu1 %9620  ;;  %v9671_v46 = vpop.permute.xlu2 %9670 }
 0x78b   : > { %v9623_v2 = vunpack.i.h.bf16 %v9621_v0  ;;  %v9616_v3 = vpop.permute.xlu0 %9615  ;;  %v9622_v15 = vunpack.i.l.bf16 %v9621_v0  ;;  %v9673_v51 = vunpack.i.h.bf16 %v9671_v46 }
 0x78c   : > { %v9618_v4 = vunpack.i.h.bf16 %v9616_v3  ;;  %v9617_v5 = vunpack.i.l.bf16 %v9616_v3 }
 0x78d   : > { %4478 = vmatpush.msrb.mxu0 %v9623_v2  ;;  %v4437_v23 = vsel %vm11826_vm11, %v9622_v15, %v9623_v2  ;;  %v9672_v2 = vunpack.i.l.bf16 %v9671_v46  ;;  %vm5227_vm11 = vcmask 359712  }
 0x78e   : > { %v4382_v9 = vsel %vm11842_vm5, %v9617_v5, %v9618_v4  ;;  %v9052_v5 = vld [vmem:[%s11923_s16 + $0xa0] sm:$0xff] }
 0x78f   : > { %9008 = vmatmul.msk.f32.vlgmr.msra.gmra.mxu3 %vm660_vm8, %v9007_v41  ;;  %9021 = vmatmul.msk.f32.vlgmr.msra.gmra.mxu0 %vm660_vm8, %v9019_v6  ;;  %v9657_v41 = vunpack.i.l.bf16 %v9656_v35 }
 0x790   : > { %4348 = vmatpush.msra.mxu3 %v4327_v11  ;;  %4403 = vmatpush.msrb.mxu1 %v4382_v9  ;;  %v9061_v11 = vld [vmem:[%s11923_s16 + $0xb8] sm:$0xff] }
 0x791   : > { %9006 = vmatmul.msk.f32.vlgmr.msra.gmra.mxu2 %vm660_vm8, %v9004_v48  ;;  %9017 = vmatmul.msk.f32.vlgmr.msra.gmra.mxu1 %vm660_vm8, %v9016_v10  ;;  %v4822_v45 = vsel %vm11824_vm10, %v9657_v41, %v9658_v40  ;;  %v9043_v48 = vld [vmem:[%s11923_s16 + $0x88] sm:$0xff]  ;;  %vm5223_vm10 = vcmask 31744  }
 0x792   : > { %4313 = vmatpush.msra.mxu2 %v9608_v52  ;;  %4513 = vmatpush.msra.mxu1 %v4492_v12  ;;  %v10923_v13 = vpop.permute.xlu1 %9635  ;;  %v9040_v52 = vld [vmem:[%s11923_s16 + $0x80] sm:$0xff]  ;;  %v9686_v1 = vpop.permute.xlu2 %9685 }
 0x793   : > { %v9638_v16 = vunpack.i.h.bf16 %v10923_v13  ;;  %v9637_v17 = vunpack.i.l.bf16 %v10923_v13  ;;  %v9631_v18 = vpop.permute.xlu0 %9630  ;;  %v9688_v3 = vunpack.i.h.bf16 %v9686_v1  ;;  %v9064_v13 = vld [vmem:[%s11923_s16 + $0xc0] sm:$0xff] }
 0x794   : > { %v9633_v19 = vunpack.i.h.bf16 %v9631_v18  ;;  %v9632_v26 = vunpack.i.l.bf16 %v9631_v18 }
 0x795   : > { %v4602_v24 = vsel %vm11828_vm13, %v9637_v17, %v9638_v16  ;;  %vm5231_vm13 = vcmask 687712  }
 0x796   : > { %4588 = vmatpush.msra.mxu0 %v9633_v19  ;;  %v4547_v33 = vsel %vm11827_vm14, %v9632_v26, %v9633_v19  ;;  %vm5229_vm14 = vcmask 523712  }
 0x797   : > { %9014 = vmatmul.msk.f32.vlgmr.msrb.gmra.mxu3 %vm660_vm8, %v9013_v58  ;;  %9027 = vmatmul.msk.f32.vlgmr.msrb.gmra.mxu0 %vm660_vm8, %v9025_v20  ;;  %v9049_v58 = vld [vmem:[%s11923_s16 + $0x98] sm:$0xff] }
 0x798   : > { %4458 = vmatpush.msrb.mxu3 %v4437_v23  ;;  %4698 = vmatpush.msrb.mxu0 %v9643_v21 }
 0x799   : > { %9012 = vmatmul.msk.f32.vlgmr.msrb.gmra.mxu2 %vm660_vm8, %v9010_v62  ;;  %9023 = vmatmul.msk.f32.vlgmr.msrb.gmra.mxu1 %vm660_vm8, %v9022_v22  ;;  %v9046_v62 = vld [vmem:[%s11923_s16 + $0x90] sm:$0xff] }
 0x79a   : > { %4423 = vmatpush.msrb.mxu2 %v9618_v4  ;;  %4623 = vmatpush.msrb.mxu1 %v4602_v24  ;;  %v9651_v25 = vpop.permute.xlu1 %9650  ;;  %v9687_v4 = vunpack.i.l.bf16 %v9686_v1 }
 0x79b   : > { %v9646_v27 = vpop.permute.xlu0 %9645  ;;  %v9653_v28 = vunpack.i.h.bf16 %v9651_v25  ;;  %v9652_v47 = vunpack.i.l.bf16 %v9651_v25 }
 0x79c   : > { %v9648_v29 = vunpack.i.h.bf16 %v9646_v27  ;;  %v9647_v30 = vunpack.i.l.bf16 %v9646_v27 }
 0x79d   : > { %v4767_v53 = vsel %vm11817_vm12, %v9652_v47, %v9653_v28  ;;  %vm11820_vm12 = vcmask 375808  }
 0x79e   : > { %v4712_v34 = vsel %vm11816_vm15, %v9647_v30, %v9648_v29  ;;  %vm11818_vm15 = vcmask 392192  }
 0x79f   : > { %9020 = vmatmul.msk.f32.vlgmr.msra.gmra.mxu3 %vm660_vm8, %v9019_v6  ;;  %9033 = vmatmul.msk.f32.vlgmr.msra.gmra.mxu0 %vm660_vm8, %v9031_v31  ;;  %v9055_v6 = vld [vmem:[%s11923_s16 + $0xa8] sm:$0xff] }
 0x7a0   : > { %4568 = vmatpush.msra.mxu3 %v4547_v33  ;;  %4808 = vmatpush.msra.mxu0 %v9653_v28 }
 0x7a1   : > { %9018 = vmatmul.msk.f32.vlgmr.msra.gmra.mxu2 %vm660_vm8, %v9016_v10  ;;  %9029 = vmatmul.msk.f32.vlgmr.msra.gmra.mxu1 %vm660_vm8, %v9028_v32  ;;  %v9058_v10 = vld [vmem:[%s11923_s16 + $0xb0] sm:$0xff] }
 0x7a2   : > { %4533 = vmatpush.msra.mxu2 %v9628_v7  ;;  %4733 = vmatpush.msra.mxu1 %v4712_v34  ;;  %v9666_v44 = vpop.permute.xlu1 %9665 }
 0x7a3   : > { %v9661_v37 = vpop.permute.xlu0 %9660  ;;  %v9668_v49 = vunpack.i.h.bf16 %v9666_v44  ;;  %v9667_v50 = vunpack.i.l.bf16 %v9666_v44 }
 0x7a4   : > { %v9663_v38 = vunpack.i.h.bf16 %v9661_v37  ;;  %v9662_v56 = vunpack.i.l.bf16 %v9661_v37 }
 0x7a5   : > { %v4931_v54 = vsel %vm11818_vm15, %v9667_v50, %v9668_v49  ;;  %vm11823_vm15 = vcmask 384000  }
 0x7a6   : > { %v4876_v63 = vsel %vm11819_vm9, %v9662_v56, %v9663_v38  ;;  %vm11822_vm9 = vcmask 359424   ;;  %v4986_v7 = vsel %vm11823_vm15, %v9672_v2, %v9673_v51  ;;  %vm5221_vm15 = vcmask 1048544  }
 0x7a7   : > { %9026 = vmatmul.msk.f32.vlgmr.msrb.gmra.mxu3 %vm660_vm8, %v9025_v20  ;;  %9039 = vmatmul.msk.f32.vlgmr.msrb.gmra.mxu0 %vm660_vm8, %v9037_v39  ;;  %v5151_v8 = vsel %vm11822_vm9, %v9687_v4, %v9688_v3  ;;  %vm5219_vm9 = vcmask 917312  }
 0x7a8   : > { %4678 = vmatpush.msrb.mxu3 %v4657_v43  ;;  %4917 = vmatpush.msrb.mxu0 %v9663_v38 }
 0x7a9   : > { %9024 = vmatmul.msk.f32.vlgmr.msrb.gmra.mxu2 %vm660_vm8, %v9022_v22  ;;  %9035 = vmatmul.msk.f32.vlgmr.msrb.gmra.mxu1 %vm660_vm8, %v9034_v42 }
 0x7aa   : > { %4643 = vmatpush.msrb.mxu2 %v9638_v16  ;;  %4843 = vmatpush.msrb.mxu1 %v4822_v45  ;;  %v9681_v57 = vpop.permute.xlu1 %9680 }
 0x7ab   : > { %v9676_v55 = vpop.permute.xlu0 %9675  ;;  %v9683_v61 = vunpack.i.h.bf16 %v9681_v57  ;;  %v9682_v9 = vunpack.i.l.bf16 %v9681_v57 }
 0x7ac   : > { %v9678_v59 = vunpack.i.h.bf16 %v9676_v55  ;;  %v9677_v60 = vunpack.i.l.bf16 %v9676_v55 }
 0x7ae   : > { %v5041_v0 = vsel %vm11820_vm12, %v9677_v60, %v9678_v59  ;;  %vm11821_vm12 = vcmask 367616  }
 0x7af   : > { %9032 = vmatmul.msk.f32.vlgmr.msra.gmra.mxu3 %vm660_vm8, %v9031_v31  ;;  %9045 = vmatmul.msk.f32.vlgmr.msra.gmra.mxu0 %vm660_vm8, %v9043_v48  ;;  %v5096_v12 = vsel %vm11821_vm12, %v9682_v9, %v9683_v61  ;;  %vm5217_vm12 = vcmask 753312  }
 0x7b0   : > { %4788 = vmatpush.msra.mxu3 %v4767_v53  ;;  %5027 = vmatpush.msra.mxu0 %v9673_v51 }
 0x7b1   : > { %9030 = vmatmul.msk.f32.vlgmr.msra.gmra.mxu2 %vm660_vm8, %v9028_v32  ;;  %9041 = vmatmul.msk.f32.vlgmr.msra.gmra.mxu1 %vm660_vm8, %v9040_v52 }
 0x7b2   : > { %4753 = vmatpush.msra.mxu2 %v9648_v29  ;;  %4952 = vmatpush.msra.mxu1 %v4931_v54 }
 0x7b4   : > { %v3916_v14 = vpop.f32.mrf.mxu1 }
 0x7b7   : > { %9038 = vmatmul.msk.f32.vlgmr.msrb.gmra.mxu3 %vm660_vm8, %v9037_v39  ;;  %9051 = vmatmul.msk.f32.vlgmr.msrb.gmra.mxu0 %vm660_vm8, %v9049_v58 }
 0x7b8   : > { %4897 = vmatpush.msrb.mxu3 %v4876_v63  ;;  %5137 = vmatpush.msrb.mxu0 %v9683_v61 }
 0x7b9   : > { %9036 = vmatmul.msk.f32.vlgmr.msrb.gmra.mxu2 %vm660_vm8, %v9034_v42  ;;  %9047 = vmatmul.msk.f32.vlgmr.msrb.gmra.mxu1 %vm660_vm8, %v9046_v62 }
 0x7ba   : > { %4863 = vmatpush.msrb.mxu2 %v9658_v40  ;;  %5062 = vmatpush.msrb.mxu1 %v5041_v0 }
 0x7bf   : > { %9044 = vmatmul.msk.f32.vlgmr.msra.gmra.mxu3 %vm660_vm8, %v9043_v48  ;;  %9057 = vmatmul.msk.f32.vlgmr.msra.gmra.mxu0 %vm660_vm8, %v9055_v6 }
 0x7c0   : > { %5007 = vmatpush.msra.mxu3 %v4986_v7 }
 0x7c1   : > { %9042 = vmatmul.msk.f32.vlgmr.msra.gmra.mxu2 %vm660_vm8, %v9040_v52  ;;  %9053 = vmatmul.msk.f32.vlgmr.msra.gmra.mxu1 %vm660_vm8, %v9052_v5 }
 0x7c2   : > { %4972 = vmatpush.msra.mxu2 %v9668_v49  ;;  %5172 = vmatpush.msra.mxu1 %v5151_v8 }
 0x7c7   : > { %9050 = vmatmul.msk.f32.vlgmr.msrb.gmra.mxu3 %vm660_vm8, %v9049_v58  ;;  %9063 = vmatmul.msk.f32.vlgmr.msrb.gmra.mxu0 %vm660_vm8, %v9061_v11 }
 0x7c8   : > { %5117 = vmatpush.msrb.mxu3 %v5096_v12 }
 0x7c9   : > { %9048 = vmatmul.msk.f32.vlgmr.msrb.gmra.mxu2 %vm660_vm8, %v9046_v62  ;;  %9059 = vmatmul.msk.f32.vlgmr.msrb.gmra.mxu1 %vm660_vm8, %v9058_v10 }
 0x7ca   : > { %5082 = vmatpush.msrb.mxu2 %v9678_v59 }
 0x7cf   : > { %9056 = vmatmul.msk.f32.vlgmr.msra.gmra.mxu3 %vm660_vm8, %v9055_v6 }
 0x7d1   : > { %9054 = vmatmul.msk.f32.vlgmr.msra.gmra.mxu2 %vm660_vm8, %v9052_v5  ;;  %9065 = vmatmul.msk.f32.vlgmr.msra.gmra.mxu1 %vm660_vm8, %v9064_v13 }
 0x7d2   : > { %5192 = vmatpush.msra.mxu2 %v9688_v3 }
 0x7d7   : > { %9062 = vmatmul.msk.f32.vlgmr.msrb.gmra.mxu3 %vm660_vm8, %v9061_v11 }
 0x7d9   : > { %9060 = vmatmul.msk.f32.vlgmr.msrb.gmra.mxu2 %vm660_vm8, %v9058_v10 }
 0x7e1   : > { %9066 = vmatmul.msk.f32.vlgmr.msra.gmra.mxu2 %vm660_vm8, %v9064_v13 }
 0x7f3   : > { %v3988_v15 = vpop.f32.mrf.mxu1 }
 0x7fa   : > { %v3893_v16 = vpop.f32.mrf.mxu3 }
 0x7fb   : > { %v3873_v17 = vpop.f32.mrf.mxu2  ;;  %v4150_v22 = vpop.f32.mrf.mxu0 }
 0x7fc   : > { %v3917_v32 = vadd.f32 %v3916_v14, %v3873_v17 }
 0x7fe   : > { %v4076_v18 = vpop.f32.mrf.mxu1 }
 0x802   : > { %v3968_v19 = vpop.f32.mrf.mxu3 }
 0x803   : > { %v3936_v20 = vpop.f32.mrf.mxu2  ;;  %v3991_v34 = vadd.f32 %v3968_v19, %v3917_v32 }
 0x804   : > { %v4260_v26 = vpop.f32.mrf.mxu0  ;;  %v3937_v37 = vadd.f32 %v3936_v20, %v3893_v16 }
 0x806   : > { %v4185_v21 = vpop.f32.mrf.mxu1  ;;  %v3992_v42 = vadd.f32 %v3988_v15, %v3937_v37 }
 0x80a   : > { %v4042_v23 = vpop.f32.mrf.mxu3 }
 0x80b   : > { %v4046_v44 = vadd.f32 %v4042_v23, %v3992_v42 }
 0x80c   : > { %v4022_v24 = vpop.f32.mrf.mxu2  ;;  %v4370_v31 = vpop.f32.mrf.mxu0 }
 0x80d   : > { %v4045_v36 = vadd.f32 %v4022_v24, %v3991_v34 }
 0x80e   : > { %v4295_v25 = vpop.f32.mrf.mxu1 }
 0x80f   : > { %v4099_v39 = vadd.f32 %v4076_v18, %v4045_v36 }
 0x812   : > { %v4130_v27 = vpop.f32.mrf.mxu3 }
 0x813   : > { %v4153_v43 = vadd.f32 %v4130_v27, %v4099_v39 }
 0x814   : > { %v4096_v28 = vpop.f32.mrf.mxu2  ;;  %v4480_v41 = vpop.f32.mrf.mxu0 }
 0x815   : > { %v4100_v46 = vadd.f32 %v4096_v28, %v4046_v44  ;;  %v4208_v47 = vadd.f32 %v4185_v21, %v4153_v43  ;;  %v5203_v43 = vpop.permute.xlu0 %5202 }
 0x816   : > { %v4405_v29 = vpop.f32.mrf.mxu1 }
 0x817   : > { %v4154_v51 = vadd.f32 %v4150_v22, %v4100_v46 }
 0x81a   : > { %v4240_v30 = vpop.f32.mrf.mxu3 }
 0x81b   : > { %v4263_v49 = vadd.f32 %v4240_v30, %v4208_v47 }
 0x81c   : > { %v4205_v33 = vpop.f32.mrf.mxu2  ;;  %v4590_v52 = vpop.f32.mrf.mxu0 }
 0x81d   : > { %v4209_v53 = vadd.f32 %v4205_v33, %v4154_v51  ;;  %v4318_v54 = vadd.f32 %v4295_v25, %v4263_v49 }
 0x81e   : > { %v4515_v35 = vpop.f32.mrf.mxu1 }
 0x81f   : > { %v4264_v58 = vadd.f32 %v4260_v26, %v4209_v53 }
 0x822   : > { %v4350_v38 = vpop.f32.mrf.mxu3 }
 0x823   : > { %v4373_v55 = vadd.f32 %v4350_v38, %v4318_v54 }
 0x824   : > { %v4315_v40 = vpop.f32.mrf.mxu2  ;;  %v4700_v63 = vpop.f32.mrf.mxu0 }
 0x825   : > { %v4319_v60 = vadd.f32 %v4315_v40, %v4264_v58  ;;  %v4428_v61 = vadd.f32 %v4405_v29, %v4373_v55  ;;  %v11025_v58 = vld [vmem:[#allocation4 + $0x10] sm:$0xff] }
 0x826   : > { %v4625_v45 = vpop.f32.mrf.mxu1 }
 0x827   : > { %v4374_v0 = vadd.f32 %v4370_v31, %v4319_v60 }
 0x82a   : > { %v4460_v48 = vpop.f32.mrf.mxu3 }
 0x82b   : > { %v4483_v62 = vadd.f32 %v4460_v48, %v4428_v61 }
 0x82c   : > { %v4425_v50 = vpop.f32.mrf.mxu2  ;;  %v4810_v11 = vpop.f32.mrf.mxu0 }
 0x82d   : > { %v4429_v2 = vadd.f32 %v4425_v50, %v4374_v0  ;;  %v4538_v3 = vadd.f32 %v4515_v35, %v4483_v62  ;;  %v5242_v62 = vld [vmem:[%s11937_s4] sm:$0xff] }
 0x82e   : > { %v4735_v57 = vpop.f32.mrf.mxu1  ;;  %v6628_v0 = vld [vmem:[%s11939_s17] sm:$0xff] }
 0x82f   : > { %v4484_v7 = vadd.f32 %v4480_v41, %v4429_v2 }
 0x832   : > { %v4570_v56 = vpop.f32.mrf.mxu3 }
 0x833   : > { %v4593_v6 = vadd.f32 %v4570_v56, %v4538_v3 }
 0x834   : > { %v4535_v59 = vpop.f32.mrf.mxu2  ;;  %v4919_v22 = vpop.f32.mrf.mxu0 }
 0x835   : > { %v4539_v8 = vadd.f32 %v4535_v59, %v4484_v7  ;;  %v4648_v9 = vadd.f32 %v4625_v45, %v4593_v6 }
 0x836   : > { %v4845_v5 = vpop.f32.mrf.mxu1 }
 0x837   : > { %v4594_v14 = vadd.f32 %v4590_v52, %v4539_v8 }
 0x83a   : > { %v4680_v1 = vpop.f32.mrf.mxu3 }
 0x83b   : > { %v4703_v12 = vadd.f32 %v4680_v1, %v4648_v9  ;;  %v9067_v9 = vld [vmem:[%s11937_s4 + $0x8] sm:$0xff] }
 0x83c   : > { %v4645_v4 = vpop.f32.mrf.mxu2  ;;  %v5029_v33 = vpop.f32.mrf.mxu0 }
 0x83d   : > { %v4649_v16 = vadd.f32 %v4645_v4, %v4594_v14  ;;  %v4758_v17 = vadd.f32 %v4735_v57, %v4703_v12 }
 0x83e   : > { %v4954_v15 = vpop.f32.mrf.mxu1 }
 0x83f   : > { %v4704_v20 = vadd.f32 %v4700_v63, %v4649_v16 }
 0x842   : > { %v4790_v10 = vpop.f32.mrf.mxu3 }
 0x843   : > { %v4813_v18 = vadd.f32 %v4790_v10, %v4758_v17 }
 0x844   : > { %v4755_v13 = vpop.f32.mrf.mxu2  ;;  %v5139_v46 = vpop.f32.mrf.mxu0 }
 0x845   : > { %v4759_v23 = vadd.f32 %v4755_v13, %v4704_v20  ;;  %v4868_v24 = vadd.f32 %v4845_v5, %v4813_v18  ;;  %v9072_v18 = vld [vmem:[%s11937_s4 + $0x10] sm:$0xff] }
 0x846   : > { %v5064_v26 = vpop.f32.mrf.mxu1 }
 0x847   : > { %v4814_v27 = vadd.f32 %v4810_v11, %v4759_v23 }
 0x84a   : > { %v4899_v19 = vpop.f32.mrf.mxu3 }
 0x84b   : > { %v4922_v25 = vadd.f32 %v4899_v19, %v4868_v24 }
 0x84c   : > { %v4865_v21 = vpop.f32.mrf.mxu2 }
 0x84d   : > { %v4869_v29 = vadd.f32 %v4865_v21, %v4814_v27  ;;  %v4977_v30 = vadd.f32 %v4954_v15, %v4922_v25  ;;  %v9078_v25 = vld [vmem:[%s11937_s4 + $0x20] sm:$0xff] }
 0x84e   : > { %v5174_v38 = vpop.f32.mrf.mxu1 }
 0x84f   : > { %v4923_v34 = vadd.f32 %v4919_v22, %v4869_v29  ;;  %v9075_v29 = vld [vmem:[%s11937_s4 + $0x18] sm:$0xff] }
 0x852   : > { %v5009_v28 = vpop.f32.mrf.mxu3 }
 0x853   : > { %v5032_v32 = vadd.f32 %v5009_v28, %v4977_v30 }
 0x854   : > { %v4974_v31 = vpop.f32.mrf.mxu2 }
 0x855   : > { %v4978_v35 = vadd.f32 %v4974_v31, %v4923_v34  ;;  %v5087_v36 = vadd.f32 %v5064_v26, %v5032_v32 }
 0x857   : > { %v5033_v41 = vadd.f32 %v5029_v33, %v4978_v35 }
 0x85a   : > { %v5119_v37 = vpop.f32.mrf.mxu3 }
 0x85b   : > { %v5142_v39 = vadd.f32 %v5119_v37, %v5087_v36 }
 0x85c   : > { %v5084_v40 = vpop.f32.mrf.mxu2 }
 0x85d   : > { %v5197_v42 = vadd.f32 %v5174_v38, %v5142_v39  ;;  %v5088_v44 = vadd.f32 %v5084_v40, %v5033_v41  ;;  %v9084_v40 = vld [vmem:[%s11937_s4 + $0x30] sm:$0xff] }
 0x85f   : > { %v5205_v45 = vadd.f32 %v5203_v43, %v5197_v42  ;;  %v5143_v48 = vadd.f32 %v5139_v46, %v5088_v44 }
 0x861   : > { %v5207_v47 = vmax.f32 %v5205_v45, 0.0 }
 0x863   : > { %5214 = vrot.lane.b32.xlu1 %v5207_v47, %s11834_s7 }
 0x864   : > { %v5194_v49 = vpop.f32.mrf.mxu2 }
 0x865   : > { %v5198_v50 = vadd.f32 %v5194_v49, %v5143_v48 }
 0x867   : > { %v5206_v51 = vadd.f32 %v5203_v43, %v5198_v50  ;;  %v9081_v43 = vld [vmem:[%s11937_s4 + $0x28] sm:$0xff]  ;;  %v9090_v50 = vld [vmem:[%s11937_s4 + $0x40] sm:$0xff] }
 0x869   : > { %v5208_v52 = vmax.f32 %v5206_v51, 0.0  ;;  %v9087_v51 = vld [vmem:[%s11937_s4 + $0x38] sm:$0xff] }
 0x86b   : > { %5234 = vrot.lane.b32.xlu2 %v5208_v52, %s11834_s7 }
 0x8c5   : > { %v5235_v54 = vpop.permute.xlu2 %5234 }
 0x8d5   : > { %v5215_v53 = vpop.permute.xlu1 %5214 }
 0x8d6   : > { %5218 = vst.msk [vmem:[#allocation5] sm:$0xff] %vm5217_vm12, %v5215_v53  ;;  %vm11947_vm12 = vcmask 695296  }
 0x8d7   : > { %5220 = vst.msk [vmem:[#allocation5] sm:$0xff] %vm5219_vm9, %v5215_v53  ;;  %vm11940_vm9 = vcmask 1039360  }
 0x8d8   : > { %5222 = vst.msk [vmem:[#allocation5] sm:$0xff] %vm5221_vm15, %v5215_v53 }
 0x8d9   : > { %5224 = vst.msk [vmem:[#allocation5 + $0x8] sm:$0xff] %vm5223_vm10, %v5215_v53 }
 0x8da   : > { %5226 = vst.msk [vmem:[#allocation5 + $0x8] sm:$0xff] %vm5225_vm0, %v5215_v53  ;;  %vm11945_vm0 = vcmask 687104  }
 0x8db   : > { %5228 = vst.msk [vmem:[#allocation5 + $0x8] sm:$0xff] %vm5227_vm11, %v5215_v53  ;;  %vm11942_vm11 = vcmask 1014784   ;;  %vm11946_vm10 = vmmov %vm11945_vm0 }
 0x8dc   : > { %5230 = vst.msk [vmem:[#allocation5 + $0x8] sm:$0xff] %vm5229_vm14, %v5215_v53  ;;  %vm11944_vm14 = vcmask 850944  }
 0x8dd   : > { %5232 = vst.msk [vmem:[#allocation5 + $0x8] sm:$0xff] %vm5231_vm13, %v5215_v53  ;;  %vm11943_vm13 = vcmask 1022976  }
 0x8de   : > { %5238 = vst.msk [vmem:[#allocation5 + $0x8] sm:$0xff] %vm5237_vm6, %v5235_v54  ;;  %vm11941_vm6 = vcmask 1031168  }
 0x8df   : > { %v5239_v55 = vld [vmem:[#allocation5] sm:$0xff] }
 0x8e0   : > { %5315 = vmatpush.msrb.mxu1 %v5239_v55 }
 0x8e1   : > { %9070 = vmatmul.msk.f32.vlgmr.msrb.gmra.mxu1 %vm660_vm8, %v5242_v62 }
 0x8e5   : > { %v5240_v56 = vld [vmem:[#allocation5 + $0x8] sm:$0xff] }
 0x8e6   : > { %5335 = vmatpush.msrb.mxu2 %v5240_v56  ;;  %v9699_v57 = vpack.i.bf16 %v5240_v56, %v5239_v55  ;;  %v9714_v59 = vpack.i.bf16 %v5239_v55, %v5240_v56  ;;  %v9754_v60 = vpack.i.bf16 %v11025_v58, %v5240_v56 }
 0x8e7   : > { %9071 = vmatmul.msk.f32.vlgmr.msrb.gmra.mxu2 %vm660_vm8, %v5242_v62 }
 0x8e8   : > { %9700 = vrot.lane.b32.xlu2 %v9699_v57, %s11879_s24  ;;  %9695 = vrot.lane.b32.xlu1 %v9699_v57, %s11883_s23 }
 0x8e9   : > { %9690 = vrot.lane.b32.xlu0 %v9699_v57, %s11880_s20 }
 0x8f0   : > { %5779 = vrot.lane.b32.xlu2 %v11025_v58, %s11920_s6  ;;  %5832 = vrot.lane.b32.xlu1 %v5239_v55, %s11832_s22 }
 0x8f1   : > { %5893 = vrot.lane.b32.xlu0 %v11025_v58, %s11830_s9 }
 0x8f8   : > { %9715 = vrot.lane.b32.xlu2 %v9714_v59, %s11885_s19  ;;  %9710 = vrot.lane.b32.xlu1 %v9699_v57, %s11928_s30 }
 0x8f9   : > { %9705 = vrot.lane.b32.xlu0 %v9714_v59, %s11882_s18 }
 0x900   : > { %9730 = vrot.lane.b32.xlu2 %v9699_v57, %s11920_s6  ;;  %9725 = vrot.lane.b32.xlu1 %v9714_v59, %s11929_s28 }
 0x901   : > { %9720 = vrot.lane.b32.xlu0 %v9699_v57, %s11930_s1 }
 0x908   : > { %5946 = vrot.lane.b32.xlu2 %v5239_v55, %s11931_s12  ;;  %6007 = vrot.lane.b32.xlu1 %v11025_v58, %s11834_s7 }
 0x909   : > { %6060 = vrot.lane.b32.xlu0 %v5239_v55, %s11932_s27 }
 0x910   : > { %9750 = vrot.lane.b32.xlu2 %v9699_v57, %s11834_s7  ;;  %9740 = vrot.lane.b32.xlu1 %v9699_v57, %s11830_s9  ;;  %s11935_s9 = smov 65   ;;  %s11983_s7 = sld [smem:[#allocation35_spill]] }
 0x911   : > { %9735 = vrot.lane.b32.xlu0 %v9714_v59, %s11919_s8 }
 0x918   : > { %6121 = vrot.lane.b32.xlu2 %v11025_v58, %s11933_s14  ;;  %9755 = vrot.lane.b32.xlu1 %v9754_v60, %s11931_s12 }
 0x919   : > { %9745 = vrot.lane.b32.xlu0 %v9754_v60, %s11832_s22  ;;  %s11936_s22 = smov 47  }
 0x920   : > { %9765 = vrot.lane.b32.xlu2 %v9754_v60, %s11932_s27  ;;  %6174 = vrot.lane.b32.xlu1 %v5239_v55, %s11934_s15 }
 0x921   : > { %9760 = vrot.lane.b32.xlu0 %v9699_v57, %s11933_s14 }
 0x928   : > { %9780 = vrot.lane.b32.xlu2 %v9699_v57, %s11912_s25  ;;  %9770 = vrot.lane.b32.xlu1 %v9699_v57, %s11935_s9 }
 0x929   : > { %6235 = vrot.lane.b32.xlu0 %v11025_v58, %s11935_s9 }
 0x930   : > { %6288 = vrot.lane.b32.xlu2 %v5239_v55, %s11876_s0  ;;  %9785 = vrot.lane.b32.xlu1 %v9754_v60, %s11876_s0 }
 0x931   : > { %9775 = vrot.lane.b32.xlu0 %v9754_v60, %s11934_s15 }
 0x938   : > { %9795 = vrot.lane.b32.xlu2 %v9754_v60, %s11936_s22  ;;  %6349 = vrot.lane.b32.xlu1 %v11025_v58, %s11912_s25 }
 0x939   : > { %9790 = vrot.lane.b32.xlu0 %v9699_v57, %s11837_s10 }
 0x940   : > { %9800 = vrot.lane.b32.xlu1 %v9699_v57, %s11921_s29  ;;  %6463 = vrot.lane.b32.xlu2 %v11025_v58, %s11837_s10  ;;  %s11971_s10 = smov 84  }
 0x941   : > { %6402 = vrot.lane.b32.xlu0 %v5239_v55, %s11936_s22 }
 0x942   : > { %v9701_v61 = vpop.permute.xlu2 %9700 }
 0x943   : > { %v9703_v10 = vunpack.i.h.bf16 %v9701_v61  ;;  %v9702_v11 = vunpack.i.l.bf16 %v9701_v61 }
 0x945   : > { %v5454_v14 = vsel %vm11942_vm11, %v9702_v11, %v9703_v10  ;;  %vm11950_vm11 = vmmov %vm11947_vm12 }
 0x948   : > { %6516 = vrot.lane.b32.xlu1 %v5239_v55, %s11938_s5  ;;  %6577 = vrot.lane.b32.xlu2 %v11025_v58, %s11921_s29 }
 0x949   : > { %9805 = vrot.lane.b32.xlu0 %v9754_v60, %s11938_s5 }
 0x94a   : > { %v11077_v63 = vpop.permute.xlu2 %5779 }
 0x951   : > { %6631 = vperm.xlu0 %9568, %v6628_v0   ;;  %v9093_v0 = vld [vmem:[%s11937_s4 + $0x48] sm:$0xff] }
 0x952   : > { %v9716_v1 = vpop.permute.xlu2 %9715 }
 0x953   : > { %v9718_v26 = vunpack.i.h.bf16 %v9716_v1  ;;  %v9717_v27 = vunpack.i.l.bf16 %v9716_v1  ;;  %v9096_v1 = vld [vmem:[%s11937_s4 + $0x50] sm:$0xff] }
 0x955   : > { %v5508_v32 = vsel %vm1138_vm2, %v9718_v26, %v9717_v27  ;;  %v9105_v26 = vld [vmem:[%s11937_s4 + $0x68] sm:$0xff] }
 0x95a   : > { %v11082_v2 = vpop.permute.xlu2 %9730  ;;  %v9696_v3 = vpop.permute.xlu1 %9695 }
 0x95b   : > { %v9698_v4 = vunpack.i.h.bf16 %v9696_v3  ;;  %v9697_v5 = vunpack.i.l.bf16 %v9696_v3  ;;  %v9691_v6 = vpop.permute.xlu0 %9690  ;;  %v9733_v34 = vunpack.i.h.bf16 %v11082_v2  ;;  %v9732_v41 = vunpack.i.l.bf16 %v11082_v2 }
 0x95c   : > { %v9693_v7 = vunpack.i.h.bf16 %v9691_v6  ;;  %v9692_v8 = vunpack.i.l.bf16 %v9691_v6 }
 0x95d   : > { %v5346_v13 = vsel %vm11941_vm6, %v9697_v5, %v9698_v4  ;;  %v5782_v45 = vsel %vm11842_vm5, %v9733_v34, %v11077_v63  ;;  %v5781_v47 = vsel %vm11842_vm5, %v9732_v41, %v9733_v34  ;;  %vm6666_vm5 = vcmask 884480  }
 0x95e   : > { %5292 = vmatpush.msra.mxu0 %v9693_v7  ;;  %v5251_v12 = vsel %vm11940_vm9, %v9692_v8, %v9693_v7  ;;  %vm11948_vm9 = vcmask 711680  }
 0x95f   : > { %5272 = vmatpush.msra.mxu3 %v5251_v12  ;;  %9069 = vmatmul.msk.f32.vlgmr.msra.gmra.mxu0 %vm660_vm8, %v9067_v9  ;;  %vm11949_vm6 = vmmov %vm11948_vm9 }
 0x960   : > { %5387 = vmatpush.msrb.mxu0 %v9698_v4  ;;  %9068 = vmatmul.msk.f32.vlgmr.msra.gmra.mxu3 %vm660_vm8, %v9067_v9 }
 0x961   : > { %5367 = vmatpush.msrb.mxu3 %v5346_v13 }
 0x962   : > { %5495 = vmatpush.msra.mxu0 %v9703_v10  ;;  %v11092_v15 = vpop.permute.xlu1 %5832  ;;  %v11096_v17 = vpop.permute.xlu2 %5946 }
 0x963   : > { %5475 = vmatpush.msra.mxu3 %v5454_v14  ;;  %v11094_v16 = vpop.permute.xlu0 %5893  ;;  %v9099_v14 = vld [vmem:[%s11937_s4 + $0x58] sm:$0xff] }
 0x967   : > { %9074 = vmatmul.msk.f32.vlgmr.msrb.gmra.mxu0 %vm660_vm8, %v9072_v18 }
 0x968   : > { %9073 = vmatmul.msk.f32.vlgmr.msrb.gmra.mxu3 %vm660_vm8, %v9072_v18 }
 0x96a   : > { %v9711_v19 = vpop.permute.xlu1 %9710  ;;  %v11110_v30 = vpop.permute.xlu2 %9750 }
 0x96b   : > { %v9713_v20 = vunpack.i.h.bf16 %v9711_v19  ;;  %v9712_v21 = vunpack.i.l.bf16 %v9711_v19  ;;  %v9706_v22 = vpop.permute.xlu0 %9705  ;;  %v9753_v60 = vunpack.i.h.bf16 %v11110_v30  ;;  %v9752_v61 = vunpack.i.l.bf16 %v11110_v30  ;;  %v9108_v30 = vld [vmem:[%s11937_s4 + $0x70] sm:$0xff] }
 0x96c   : > { %v9708_v23 = vunpack.i.h.bf16 %v9706_v22  ;;  %v9707_v24 = vunpack.i.l.bf16 %v9706_v22 }
 0x96d   : > { %5603 = vmatpush.msrb.mxu0 %v9713_v20  ;;  %v5562_v28 = vsel %vm4161_vm1, %v9712_v21, %v9713_v20  ;;  %v6009_v4 = vsel %vm11946_vm10, %v9752_v61, %v9753_v60  ;;  %v9102_v20 = vld [vmem:[%s11937_s4 + $0x60] sm:$0xff] }
 0x96e   : > { %5441 = vmatpush.msra.mxu2 %v9707_v24  ;;  %v5400_v31 = vsel %vm11943_vm13, %v9708_v23, %v9707_v24  ;;  %5583 = vmatpush.msrb.mxu3 %v5562_v28  ;;  %vm11951_vm13 = vcmask 556032  }
 0x96f   : > { %5421 = vmatpush.msra.mxu1 %v5400_v31  ;;  %9080 = vmatmul.msk.f32.vlgmr.msra.gmra.mxu0 %vm660_vm8, %v9078_v25 }
 0x970   : > { %5549 = vmatpush.msrb.mxu2 %v9717_v27  ;;  %9076 = vmatmul.msk.f32.vlgmr.msra.gmra.mxu1 %vm660_vm8, %v9075_v29 }
 0x971   : > { %9077 = vmatmul.msk.f32.vlgmr.msra.gmra.mxu2 %vm660_vm8, %v9075_v29  ;;  %9079 = vmatmul.msk.f32.vlgmr.msra.gmra.mxu3 %vm660_vm8, %v9078_v25 }
 0x972   : > { %5529 = vmatpush.msrb.mxu1 %v5508_v32  ;;  %v9726_v33 = vpop.permute.xlu1 %9725  ;;  %v11131_v46 = vpop.permute.xlu2 %6121 }
 0x973   : > { %v9728_v35 = vunpack.i.h.bf16 %v9726_v33  ;;  %v9727_v36 = vunpack.i.l.bf16 %v9726_v33  ;;  %v9721_v37 = vpop.permute.xlu0 %9720 }
 0x974   : > { %v9723_v38 = vunpack.i.h.bf16 %v9721_v37  ;;  %v9722_v39 = vunpack.i.l.bf16 %v9721_v37 }
 0x975   : > { %5657 = vmatpush.msra.mxu2 %v9727_v36  ;;  %v5616_v42 = vsel %vm4216_vm4, %v9728_v35, %v9727_v36 }
 0x976   : > { %5711 = vmatpush.msra.mxu0 %v9723_v38  ;;  %5637 = vmatpush.msra.mxu1 %v5616_v42  ;;  %v5670_v44 = vsel %vm11843_vm3, %v9722_v39, %v9723_v38  ;;  %v9111_v39 = vld [vmem:[%s11937_s4 + $0x78] sm:$0xff]  ;;  %vm6668_vm3 = vcmask 1048480  }
 0x977   : > { %9086 = vmatmul.msk.f32.vlgmr.msrb.gmra.mxu0 %vm660_vm8, %v9084_v40  ;;  %5691 = vmatpush.msra.mxu3 %v5670_v44 }
 0x978   : > { %5823 = vmatpush.msrb.mxu0 %v5782_v45  ;;  %9082 = vmatmul.msk.f32.vlgmr.msrb.gmra.mxu1 %vm660_vm8, %v9081_v43 }
 0x979   : > { %9083 = vmatmul.msk.f32.vlgmr.msrb.gmra.mxu2 %vm660_vm8, %v9081_v43  ;;  %9085 = vmatmul.msk.f32.vlgmr.msrb.gmra.mxu3 %vm660_vm8, %v9084_v40  ;;  %v9114_v40 = vld [vmem:[%s11937_s4 + $0x80] sm:$0xff] }
 0x97a   : > { %5803 = vmatpush.msrb.mxu3 %v5781_v47  ;;  %v6008_v48 = vpop.permute.xlu1 %6007  ;;  %v9766_v52 = vpop.permute.xlu2 %9765 }
 0x97b   : > { %v6061_v49 = vpop.permute.xlu0 %6060  ;;  %v6010_v3 = vsel %vm11945_vm0, %v9753_v60, %v6008_v48  ;;  %v9768_v12 = vunpack.i.h.bf16 %v9766_v52  ;;  %v9767_v13 = vunpack.i.l.bf16 %v9766_v52  ;;  %vm11953_vm0 = vcmask 547840  }
 0x97c   : > { %vm11954_vm10 = vmmov %vm11953_vm0 }
 0x97f   : > { %9092 = vmatmul.msk.f32.vlgmr.msra.gmra.mxu0 %vm660_vm8, %v9090_v50 }
 0x980   : > { %9088 = vmatmul.msk.f32.vlgmr.msra.gmra.mxu1 %vm660_vm8, %v9087_v51 }
 0x981   : > { %9089 = vmatmul.msk.f32.vlgmr.msra.gmra.mxu2 %vm660_vm8, %v9087_v51  ;;  %9091 = vmatmul.msk.f32.vlgmr.msra.gmra.mxu3 %vm660_vm8, %v9090_v50  ;;  %v9117_v51 = vld [vmem:[%s11937_s4 + $0x88] sm:$0xff] }
 0x982   : > { %v9741_v53 = vpop.permute.xlu1 %9740  ;;  %v11165_v9 = vpop.permute.xlu2 %9780 }
 0x983   : > { %v9743_v54 = vunpack.i.h.bf16 %v9741_v53  ;;  %v9742_v55 = vunpack.i.l.bf16 %v9741_v53  ;;  %v9736_v56 = vpop.permute.xlu0 %9735  ;;  %v9783_v35 = vunpack.i.h.bf16 %v11165_v9  ;;  %v9782_v36 = vunpack.i.l.bf16 %v11165_v9 }
 0x984   : > { %v9738_v57 = vunpack.i.h.bf16 %v9736_v56  ;;  %v9737_v59 = vunpack.i.l.bf16 %v9736_v56 }
 0x985   : > { %v5895_v62 = vsel %vm11841_vm7, %v9742_v55, %v9743_v54  ;;  %v5896_v63 = vsel %vm11841_vm7, %v9743_v54, %v11094_v16  ;;  %v9120_v55 = vld [vmem:[%s11937_s4 + $0x90] sm:$0xff]  ;;  %vm6656_vm7 = vcmask 556480  }
 0x986   : > { %5765 = vmatpush.msrb.mxu2 %v9737_v59  ;;  %v5724_v2 = vsel %vm11944_vm14, %v9738_v57, %v9737_v59  ;;  %5917 = vmatpush.msra.mxu3 %v5895_v62  ;;  %vm11952_vm14 = vmmov %vm11951_vm13 }
 0x987   : > { %5745 = vmatpush.msrb.mxu1 %v5724_v2  ;;  %5937 = vmatpush.msra.mxu0 %v5896_v63  ;;  %v6066_v22 = vsel %vm11952_vm14, %v6061_v49, %v9767_v13 }
 0x988   : > { %9094 = vmatmul.msk.f32.vlgmr.msrb.gmra.mxu1 %vm660_vm8, %v9093_v0  ;;  %9098 = vmatmul.msk.f32.vlgmr.msrb.gmra.mxu0 %vm660_vm8, %v9096_v1 }
 0x989   : > { %9095 = vmatmul.msk.f32.vlgmr.msrb.gmra.mxu2 %vm660_vm8, %v9093_v0  ;;  %9097 = vmatmul.msk.f32.vlgmr.msrb.gmra.mxu3 %vm660_vm8, %v9096_v1  ;;  %v9123_v1 = vld [vmem:[%s11937_s4 + $0x98] sm:$0xff] }
 0x98a   : > { %6031 = vmatpush.msrb.mxu3 %v6009_v4  ;;  %6051 = vmatpush.msrb.mxu0 %v6010_v3  ;;  %v9756_v5 = vpop.permute.xlu1 %9755  ;;  %v6289_v27 = vpop.permute.xlu2 %6288  ;;  %v9126_v4 = vld [vmem:[%s11937_s4 + $0xa0] sm:$0xff] }
 0x98b   : > { %v9758_v6 = vunpack.i.h.bf16 %v9756_v5  ;;  %v9757_v7 = vunpack.i.l.bf16 %v9756_v5  ;;  %v9746_v8 = vpop.permute.xlu0 %9745 }
 0x98c   : > { %v9748_v10 = vunpack.i.h.bf16 %v9746_v8  ;;  %v9747_v11 = vunpack.i.l.bf16 %v9746_v8 }
 0x98d   : > { %v5953_v16 = vsel %vm11947_vm12, %v9757_v7, %v9758_v6  ;;  %v5952_v21 = vsel %vm11950_vm11, %v11096_v17, %v9757_v7  ;;  %vm11955_vm12 = vcmask 531456   ;;  %vm11958_vm11 = vcmask 523264  }
 0x98e   : > { %v5838_v18 = vsel %vm11948_vm9, %v11092_v15, %v9747_v11  ;;  %v5839_v19 = vsel %vm11949_vm6, %v9747_v11, %v9748_v10  ;;  %v6067_v15 = vsel %vm11951_vm13, %v9767_v13, %v9768_v12  ;;  %vm11956_vm9 = vmmov %vm11955_vm12  ;;  %vm11957_vm6 = vcmask 392192   ;;  %v9129_v13 = vld [vmem:[%s11937_s4 + $0xa8] sm:$0xff] }
 0x98f   : > { %5860 = vmatpush.msra.mxu1 %v5838_v18  ;;  %5880 = vmatpush.msra.mxu2 %v5839_v19  ;;  %v6351_v42 = vsel %vm11957_vm6, %v9782_v36, %v9783_v35  ;;  %vm11959_vm13 = vcmask 539648  }
 0x990   : > { %9100 = vmatmul.msk.f32.vlgmr.msra.gmra.mxu1 %vm660_vm8, %v9099_v14  ;;  %9104 = vmatmul.msk.f32.vlgmr.msra.gmra.mxu0 %vm660_vm8, %v9102_v20  ;;  %vm11960_vm14 = vmmov %vm11959_vm13 }
 0x991   : > { %5994 = vmatpush.msrb.mxu2 %v5953_v16  ;;  %9103 = vmatmul.msk.f32.vlgmr.msra.gmra.mxu3 %vm660_vm8, %v9102_v20 }
 0x992   : > { %9101 = vmatmul.msk.f32.vlgmr.msra.gmra.mxu2 %vm660_vm8, %v9099_v14  ;;  %5974 = vmatpush.msrb.mxu1 %v5952_v21  ;;  %v6175_v23 = vpop.permute.xlu1 %6174  ;;  %v9796_v41 = vpop.permute.xlu2 %9795  ;;  %v9132_v14 = vld [vmem:[%s11937_s4 + $0xb0] sm:$0xff]  ;;  %v9135_v21 = vld [vmem:[%s11937_s4 + $0xb8] sm:$0xff] }
 0x993   : > { %6108 = vmatpush.msra.mxu2 %v6067_v15  ;;  %v9761_v24 = vpop.permute.xlu0 %9760  ;;  %v9798_v49 = vunpack.i.h.bf16 %v9796_v41  ;;  %v9797_v50 = vunpack.i.l.bf16 %v9796_v41 }
 0x994   : > { %6088 = vmatpush.msra.mxu1 %v6066_v22  ;;  %v9763_v25 = vunpack.i.h.bf16 %v9761_v24  ;;  %v9762_v17 = vunpack.i.l.bf16 %v9761_v24 }
 0x996   : > { %v6123_v28 = vsel %vm11953_vm0, %v9762_v17, %v9763_v25  ;;  %v6124_v29 = vsel %vm11954_vm10, %v9763_v25, %v11131_v46  ;;  %vm11961_vm0 = vmmov %vm11958_vm11  ;;  %vm11962_vm10 = vcmask 384000  }
 0x997   : > { %6145 = vmatpush.msra.mxu3 %v6123_v28  ;;  %6165 = vmatpush.msra.mxu0 %v6124_v29  ;;  %v6409_v59 = vsel %vm11962_vm10, %v9797_v50, %v9798_v49 }
 0x998   : > { %9106 = vmatmul.msk.f32.vlgmr.msrb.gmra.mxu1 %vm660_vm8, %v9105_v26  ;;  %9110 = vmatmul.msk.f32.vlgmr.msrb.gmra.mxu0 %vm660_vm8, %v9108_v30 }
 0x999   : > { %9109 = vmatmul.msk.f32.vlgmr.msrb.gmra.mxu3 %vm660_vm8, %v9108_v30 }
 0x99a   : > { %9107 = vmatmul.msk.f32.vlgmr.msrb.gmra.mxu2 %vm660_vm8, %v9105_v26  ;;  %v9771_v31 = vpop.permute.xlu1 %9770  ;;  %v6464_v57 = vpop.permute.xlu2 %6463 }
 0x99b   : > { %v9773_v32 = vunpack.i.h.bf16 %v9771_v31  ;;  %v9772_v33 = vunpack.i.l.bf16 %v9771_v31  ;;  %v6236_v34 = vpop.permute.xlu0 %6235  ;;  %v5317_v26 = vpop.f32.mrf.mxu1 }
 0x99d   : > { %v6238_v37 = vsel %vm11955_vm12, %v9773_v32, %v6236_v34  ;;  %v6237_v38 = vsel %vm11956_vm9, %v9772_v33, %v9773_v32  ;;  %vm11963_vm12 = vmmov %vm11957_vm6  ;;  %vm11964_vm9 = vcmask 375808  }
 0x99e   : > { %6259 = vmatpush.msrb.mxu3 %v6237_v38  ;;  %6279 = vmatpush.msrb.mxu0 %v6238_v37  ;;  %vm11965_vm6 = vmmov %vm11964_vm9 }
 0x9a0   : > { %9112 = vmatmul.msk.f32.vlgmr.msra.gmra.mxu1 %vm660_vm8, %v9111_v39  ;;  %9116 = vmatmul.msk.f32.vlgmr.msra.gmra.mxu0 %vm660_vm8, %v9114_v40 }
 0x9a1   : > { %9115 = vmatmul.msk.f32.vlgmr.msra.gmra.mxu3 %vm660_vm8, %v9114_v40 }
 0x9a2   : > { %9113 = vmatmul.msk.f32.vlgmr.msra.gmra.mxu2 %vm660_vm8, %v9111_v39  ;;  %6373 = vmatpush.msra.mxu3 %v6351_v42  ;;  %v9786_v43 = vpop.permute.xlu1 %9785  ;;  %v6578_v6 = vpop.permute.xlu2 %6577 }
 0x9a3   : > { %v9788_v44 = vunpack.i.h.bf16 %v9786_v43  ;;  %v9787_v45 = vunpack.i.l.bf16 %v9786_v43  ;;  %v9776_v46 = vpop.permute.xlu0 %9775 }
 0x9a4   : > { %v9778_v47 = vunpack.i.h.bf16 %v9776_v46  ;;  %v9777_v48 = vunpack.i.l.bf16 %v9776_v46 }
 0x9a5   : > { %v6295_v52 = vsel %vm11958_vm11, %v9787_v45, %v9788_v44  ;;  %v6294_v56 = vsel %vm11961_vm0, %v6289_v27, %v9787_v45  ;;  %vm11966_vm11 = vmmov %vm11962_vm10  ;;  %vm11969_vm0 = vcmask 367616   ;;  %v5337_v27 = vpop.f32.mrf.mxu2 }
 0x9a6   : > { %v6180_v53 = vsel %vm11959_vm13, %v6175_v23, %v9777_v48  ;;  %v6181_v54 = vsel %vm11960_vm14, %v9777_v48, %v9778_v47  ;;  %vm11967_vm13 = vcmask 359424   ;;  %vm11970_vm10 = vmmov %vm11969_vm0  ;;  %v9138_v23 = vld [vmem:[%s11937_s4 + $0xc0] sm:$0xff] }
 0x9a7   : > { %6202 = vmatpush.msrb.mxu1 %v6180_v53  ;;  %6222 = vmatpush.msrb.mxu2 %v6181_v54  ;;  %vm11968_vm14 = vmmov %vm11967_vm13 }
 0x9a8   : > { %9118 = vmatmul.msk.f32.vlgmr.msrb.gmra.mxu1 %vm660_vm8, %v9117_v51  ;;  %9122 = vmatmul.msk.f32.vlgmr.msrb.gmra.mxu0 %vm660_vm8, %v9120_v55 }
 0x9a9   : > { %6336 = vmatpush.msra.mxu2 %v6295_v52  ;;  %9121 = vmatmul.msk.f32.vlgmr.msrb.gmra.mxu3 %vm660_vm8, %v9120_v55 }
 0x9aa   : > { %9119 = vmatmul.msk.f32.vlgmr.msrb.gmra.mxu2 %vm660_vm8, %v9117_v51  ;;  %6316 = vmatpush.msra.mxu1 %v6294_v56  ;;  %v6350_v60 = vpop.permute.xlu1 %6349 }
 0x9ab   : > { %6450 = vmatpush.msrb.mxu2 %v6409_v59  ;;  %v6352_v61 = vsel %vm11963_vm12, %v9783_v35, %v6350_v60  ;;  %v9791_v62 = vpop.permute.xlu0 %9790  ;;  %vm3776_vm12 = vcmask 130048  }
 0x9ac   : > { %v9793_v63 = vunpack.i.h.bf16 %v9791_v62  ;;  %v9792_v0 = vunpack.i.l.bf16 %v9791_v62  ;;  %6393 = vmatpush.msra.mxu0 %v6352_v61  ;;  %6641 = vst.msk [vmem:[#allocation6 + $0x18] sm:$0xff] %vm3776_vm12, %v11025_v58  ;;  %vm6663_vm12 = vcmask 720480  }
 0x9ae   : > { %v6466_v2 = vsel %vm11964_vm9, %v9793_v63, %v6464_v57  ;;  %v6465_v3 = vsel %vm11965_vm6, %v9792_v0, %v9793_v63  ;;  %vm6670_vm9 = vcmask 162880   ;;  %vm6672_vm6 = vcmask 326880  }
 0x9af   : > { %6487 = vmatpush.msrb.mxu3 %v6465_v3  ;;  %6507 = vmatpush.msrb.mxu0 %v6466_v2 }
 0x9b0   : > { %9124 = vmatmul.msk.f32.vlgmr.msra.gmra.mxu1 %vm660_vm8, %v9123_v1  ;;  %9128 = vmatmul.msk.f32.vlgmr.msra.gmra.mxu0 %vm660_vm8, %v9126_v4 }
 0x9b1   : > { %9127 = vmatmul.msk.f32.vlgmr.msra.gmra.mxu3 %vm660_vm8, %v9126_v4 }
 0x9b2   : > { %9125 = vmatmul.msk.f32.vlgmr.msra.gmra.mxu2 %vm660_vm8, %v9123_v1  ;;  %v9801_v5 = vpop.permute.xlu1 %9800 }
 0x9b3   : > { %v9803_v7 = vunpack.i.h.bf16 %v9801_v5  ;;  %v9802_v8 = vunpack.i.l.bf16 %v9801_v5  ;;  %v6403_v9 = vpop.permute.xlu0 %6402 }
 0x9b4   : > { %v6408_v10 = vsel %vm11966_vm11, %v6403_v9, %v9797_v50  ;;  %vm6674_vm11 = vcmask 490880  }
 0x9b5   : > { %v6580_v11 = vsel %vm11967_vm13, %v9803_v7, %v6578_v6  ;;  %6430 = vmatpush.msrb.mxu1 %v6408_v10  ;;  %v6579_v12 = vsel %vm11968_vm14, %v9802_v8, %v9803_v7  ;;  %vm6646_vm13 = vcmask 786080   ;;  %vm6648_vm14 = vcmask 950080  }
 0x9b6   : > { %6601 = vmatpush.msra.mxu3 %v6579_v12  ;;  %6621 = vmatpush.msra.mxu0 %v6580_v11 }
 0x9b8   : > { %9130 = vmatmul.msk.f32.vlgmr.msrb.gmra.mxu1 %vm660_vm8, %v9129_v13  ;;  %9134 = vmatmul.msk.f32.vlgmr.msrb.gmra.mxu0 %vm660_vm8, %v9132_v14 }
 0x9b9   : > { %9133 = vmatmul.msk.f32.vlgmr.msrb.gmra.mxu3 %vm660_vm8, %v9132_v14 }
 0x9ba   : > { %9131 = vmatmul.msk.f32.vlgmr.msrb.gmra.mxu2 %vm660_vm8, %v9129_v13  ;;  %v6517_v20 = vpop.permute.xlu1 %6516 }
 0x9bb   : > { %v9806_v16 = vpop.permute.xlu0 %9805 }
 0x9bc   : > { %v9808_v18 = vunpack.i.h.bf16 %v9806_v16  ;;  %v9807_v19 = vunpack.i.l.bf16 %v9806_v16 }
 0x9be   : > { %v6522_v15 = vsel %vm11969_vm0, %v6517_v20, %v9807_v19  ;;  %v6523_v22 = vsel %vm11970_vm10, %v9807_v19, %v9808_v18  ;;  %vm6652_vm0 = vcmask 228480   ;;  %vm6654_vm10 = vcmask 392480  }
 0x9bf   : > { %6544 = vmatpush.msra.mxu1 %v6522_v15  ;;  %6564 = vmatpush.msra.mxu2 %v6523_v22 }
 0x9c0   : > { %9136 = vmatmul.msk.f32.vlgmr.msra.gmra.mxu1 %vm660_vm8, %v9135_v21  ;;  %9140 = vmatmul.msk.f32.vlgmr.msra.gmra.mxu0 %vm660_vm8, %v9138_v23 }
 0x9c1   : > { %9139 = vmatmul.msk.f32.vlgmr.msra.gmra.mxu3 %vm660_vm8, %v9138_v23 }
 0x9c2   : > { %9137 = vmatmul.msk.f32.vlgmr.msra.gmra.mxu2 %vm660_vm8, %v9135_v21 }
 0x9dc   : > { %v5294_v24 = vpop.f32.mrf.mxu0 }
 0x9dd   : > { %v5338_v35 = vadd.f32 %v5337_v27, %v5294_v24 }
 0x9e3   : > { %v5274_v25 = vpop.f32.mrf.mxu3 }
 0x9e4   : > { %v5389_v17 = vpop.f32.mrf.mxu0  ;;  %v5318_v41 = vadd.f32 %v5317_v26, %v5274_v25 }
 0x9e5   : > { %v5393_v38 = vadd.f32 %v5389_v17, %v5338_v35 }
 0x9eb   : > { %v5369_v28 = vpop.f32.mrf.mxu3 }
 0x9ec   : > { %v5497_v29 = vpop.f32.mrf.mxu0  ;;  %v5392_v43 = vadd.f32 %v5369_v28, %v5318_v41 }
 0x9ed   : > { %v5423_v30 = vpop.f32.mrf.mxu1 }
 0x9ee   : > { %v5446_v49 = vadd.f32 %v5423_v30, %v5392_v43 }
 0x9f4   : > { %v5443_v31 = vpop.f32.mrf.mxu2  ;;  %v5477_v32 = vpop.f32.mrf.mxu3 }
 0x9f5   : > { %v5531_v33 = vpop.f32.mrf.mxu1  ;;  %v5605_v34 = vpop.f32.mrf.mxu0  ;;  %v5447_v42 = vadd.f32 %v5443_v31, %v5393_v38  ;;  %v5500_v50 = vadd.f32 %v5477_v32, %v5446_v49 }
 0x9f7   : > { %v5501_v46 = vadd.f32 %v5497_v29, %v5447_v42  ;;  %v5554_v54 = vadd.f32 %v5531_v33, %v5500_v50 }
 0x9fc   : > { %v5551_v36 = vpop.f32.mrf.mxu2  ;;  %v5585_v37 = vpop.f32.mrf.mxu3 }
 0x9fd   : > { %v5639_v39 = vpop.f32.mrf.mxu1  ;;  %v5713_v40 = vpop.f32.mrf.mxu0  ;;  %v5555_v51 = vadd.f32 %v5551_v36, %v5501_v46  ;;  %v5608_v57 = vadd.f32 %v5585_v37, %v5554_v54 }
 0x9ff   : > { %v5609_v55 = vadd.f32 %v5605_v34, %v5555_v51  ;;  %v5662_v61 = vadd.f32 %v5639_v39, %v5608_v57  ;;  %v6632_v57 = vpop.permute.xlu0 %6631 }
 0xa04   : > { %v5659_v44 = vpop.f32.mrf.mxu2  ;;  %v5693_v45 = vpop.f32.mrf.mxu3 }
 0xa05   : > { %v5747_v47 = vpop.f32.mrf.mxu1  ;;  %v5825_v48 = vpop.f32.mrf.mxu0  ;;  %v5663_v60 = vadd.f32 %v5659_v44, %v5609_v55  ;;  %v5716_v0 = vadd.f32 %v5693_v45, %v5662_v61 }
 0xa07   : > { %v5717_v1 = vadd.f32 %v5713_v40, %v5663_v60  ;;  %v5770_v4 = vadd.f32 %v5747_v47, %v5716_v0 }
 0xa0c   : > { %v5767_v52 = vpop.f32.mrf.mxu2  ;;  %v5805_v53 = vpop.f32.mrf.mxu3 }
 0xa0d   : > { %v5862_v56 = vpop.f32.mrf.mxu1  ;;  %v5939_v59 = vpop.f32.mrf.mxu0  ;;  %v5771_v5 = vadd.f32 %v5767_v52, %v5717_v1  ;;  %v5828_v6 = vadd.f32 %v5805_v53, %v5770_v4 }
 0xa0f   : > { %v5829_v9 = vadd.f32 %v5825_v48, %v5771_v5  ;;  %v5885_v11 = vadd.f32 %v5862_v56, %v5828_v6 }
 0xa14   : > { %v5919_v63 = vpop.f32.mrf.mxu3 }
 0xa15   : > { %v5882_v62 = vpop.f32.mrf.mxu2  ;;  %v5976_v2 = vpop.f32.mrf.mxu1  ;;  %v5942_v14 = vadd.f32 %v5919_v63, %v5885_v11 }
 0xa16   : > { %v6053_v3 = vpop.f32.mrf.mxu0  ;;  %v5886_v13 = vadd.f32 %v5882_v62, %v5829_v9 }
 0xa17   : > { %v5999_v20 = vadd.f32 %v5976_v2, %v5942_v14 }
 0xa18   : > { %v5943_v19 = vadd.f32 %v5939_v59, %v5886_v13 }
 0xa1c   : > { %v6033_v8 = vpop.f32.mrf.mxu3 }
 0xa1d   : > { %v5996_v7 = vpop.f32.mrf.mxu2  ;;  %v6090_v10 = vpop.f32.mrf.mxu1  ;;  %v6056_v22 = vadd.f32 %v6033_v8, %v5999_v20 }
 0xa1e   : > { %v6167_v12 = vpop.f32.mrf.mxu0  ;;  %v6000_v15 = vadd.f32 %v5996_v7, %v5943_v19 }
 0xa1f   : > { %v6113_v25 = vadd.f32 %v6090_v10, %v6056_v22  ;;  %v6679_v10 = vld [vmem:[#allocation6 + $0x18] sm:$0xff] }
 0xa20   : > { %v6057_v24 = vadd.f32 %v6053_v3, %v6000_v15 }
 0xa24   : > { %v6147_v18 = vpop.f32.mrf.mxu3 }
 0xa25   : > { %v6110_v16 = vpop.f32.mrf.mxu2  ;;  %v6204_v21 = vpop.f32.mrf.mxu1  ;;  %v6170_v28 = vadd.f32 %v6147_v18, %v6113_v25 }
 0xa26   : > { %v6281_v23 = vpop.f32.mrf.mxu0  ;;  %v6114_v27 = vadd.f32 %v6110_v16, %v6057_v24 }
 0xa27   : > { %v6227_v32 = vadd.f32 %v6204_v21, %v6170_v28 }
 0xa28   : > { %v6171_v31 = vadd.f32 %v6167_v12, %v6114_v27 }
 0xa2c   : > { %v6261_v26 = vpop.f32.mrf.mxu3 }
 0xa2d   : > { %v6224_v17 = vpop.f32.mrf.mxu2  ;;  %v6318_v29 = vpop.f32.mrf.mxu1  ;;  %v6284_v34 = vadd.f32 %v6261_v26, %v6227_v32 }
 0xa2e   : > { %v6395_v30 = vpop.f32.mrf.mxu0  ;;  %v6228_v33 = vadd.f32 %v6224_v17, %v6171_v31 }
 0xa2f   : > { %v6341_v39 = vadd.f32 %v6318_v29, %v6284_v34 }
 0xa30   : > { %v6285_v38 = vadd.f32 %v6281_v23, %v6228_v33 }
 0xa34   : > { %v6375_v36 = vpop.f32.mrf.mxu3 }
 0xa35   : > { %v6338_v35 = vpop.f32.mrf.mxu2  ;;  %v6432_v37 = vpop.f32.mrf.mxu1  ;;  %v6398_v41 = vadd.f32 %v6375_v36, %v6341_v39  ;;  %v8656_v36 = vld [vmem:[%s11983_s7] sm:$0xff] }
 0xa36   : > { %v6342_v40 = vadd.f32 %v6338_v35, %v6285_v38  ;;  %v6509_v42 = vpop.f32.mrf.mxu0 }
 0xa37   : > { %v6455_v46 = vadd.f32 %v6432_v37, %v6398_v41 }
 0xa38   : > { %v6399_v45 = vadd.f32 %v6395_v30, %v6342_v40 }
 0xa3c   : > { %v6489_v44 = vpop.f32.mrf.mxu3 }
 0xa3d   : > { %v6452_v43 = vpop.f32.mrf.mxu2  ;;  %v6512_v48 = vadd.f32 %v6489_v44, %v6455_v46  ;;  %v6546_v49 = vpop.f32.mrf.mxu1 }
 0xa3e   : > { %v6456_v47 = vadd.f32 %v6452_v43, %v6399_v45  ;;  %v6623_v52 = vpop.f32.mrf.mxu0 }
 0xa3f   : > { %v6569_v51 = vadd.f32 %v6546_v49, %v6512_v48 }
 0xa40   : > { %v6513_v50 = vadd.f32 %v6509_v42, %v6456_v47 }
 0xa44   : > { %v6603_v54 = vpop.f32.mrf.mxu3 }
 0xa45   : > { %v6566_v53 = vpop.f32.mrf.mxu2  ;;  %v6626_v56 = vadd.f32 %v6603_v54, %v6569_v51 }
 0xa46   : > { %v6570_v55 = vadd.f32 %v6566_v53, %v6513_v50 }
 0xa47   : > { %v6634_v59 = vadd.f32 %v6632_v57, %v6626_v56 }
 0xa48   : > { %v6627_v60 = vadd.f32 %v6623_v52, %v6570_v55 }
 0xa49   : > { %v6636_v61 = vmax.f32 %v6634_v59, 0.0 }
 0xa4a   : > { %v6635_v62 = vadd.f32 %v6632_v57, %v6627_v60 }
 0xa4b   : > { %6643 = vrot.lane.b32.xlu1 %v6636_v61, %s11971_s10 }
 0xa4c   : > { %v6637_v63 = vmax.f32 %v6635_v62, 0.0 }
 0xa4e   : > { %6659 = vrot.lane.b32.xlu2 %v6637_v63, %s11971_s10 }
 0xaa8   : > { %v6660_v0 = vpop.permute.xlu2 %6659 }
 0xaa9   : > { %6671 = vst.msk [vmem:[#allocation6 + $0x10] sm:$0xff] %vm6670_vm9, %v6660_v0  ;;  %vm11972_vm9 = vcmask 687104  }
 0xaaa   : > { %6673 = vst.msk [vmem:[#allocation6 + $0x10] sm:$0xff] %vm6672_vm6, %v6660_v0  ;;  %vm11981_vm6 = vcmask 1022976  }
 0xaab   : > { %6675 = vst.msk [vmem:[#allocation6 + $0x10] sm:$0xff] %vm6674_vm11, %v6660_v0  ;;  %vm11982_vm11 = vmmov %vm11981_vm6 }
 0xab2   : > { %v11277_v3 = vld [vmem:[#allocation6 + $0x10] sm:$0xff] }
 0xab3   : > { %v9914_v11 = vpack.i.bf16 %v6679_v10, %v11277_v3 }
 0xabd   : > { %v6644_v1 = vpop.permute.xlu1 %6643 }
 0xabe   : > { %6647 = vst.msk [vmem:[#allocation6] sm:$0xff] %vm6646_vm13, %v6644_v1  ;;  %v6661_v58 = vsel %vm11972_vm9, %v6644_v1, %v6660_v0  ;;  %vm11984_vm13 = vcmask 1014784  }
 0xabf   : > { %6649 = vst.msk [vmem:[#allocation6] sm:$0xff] %vm6648_vm14, %v6644_v1  ;;  %vm11985_vm14 = vmmov %vm11984_vm13 }
 0xac0   : > { %6650 = vst.msk [vmem:[#allocation6] sm:$0xff] %vm5221_vm15, %v6644_v1 }
 0xac1   : > { %6651 = vst.msk [vmem:[#allocation6 + $0x8] sm:$0xff] %vm660_vm8, %v6644_v1 }
 0xac2   : > { %6653 = vst.msk [vmem:[#allocation6 + $0x8] sm:$0xff] %vm6652_vm0, %v6644_v1  ;;  %vm11989_vm0 = vcmask 850944  }
 0xac3   : > { %6655 = vst.msk [vmem:[#allocation6 + $0x8] sm:$0xff] %vm6654_vm10, %v6644_v1  ;;  %vm11990_vm10 = vmmov %vm11989_vm0 }
 0xac4   : > { %6657 = vst.msk [vmem:[#allocation6 + $0x8] sm:$0xff] %vm6656_vm7, %v6644_v1 }
 0xac5   : > { %6664 = vst.msk [vmem:[#allocation6 + $0x8] sm:$0xff] %vm6663_vm12, %v6661_v58  ;;  %vm11991_vm12 = vcmask 711680  }
 0xac6   : > { %6667 = vst.msk [vmem:[#allocation6 + $0x8] sm:$0xff] %vm6666_vm5, %v6660_v0  ;;  %vm11978_vm5 = vcmask 1039360   ;;  %vm11992_vm9 = vmmov %vm11991_vm12 }
 0xac7   : > { %6669 = vst.msk [vmem:[#allocation6 + $0x8] sm:$0xff] %vm6668_vm3, %v6660_v0  ;;  %v11272_v2 = vld [vmem:[#allocation6] sm:$0xff]  ;;  %vm11976_vm3 = vcmask 1031168   ;;  %vm11979_vm7 = vmmov %vm11978_vm5 }
 0xac8   : > { %6686 = vrot.lane.b32.xlu1 %v11272_v2, %s11880_s20  ;;  %6778 = vmatpush.msrb.mxu0 %v11272_v2  ;;  %v9829_v7 = vpack.i.bf16 %v11272_v2, %v11277_v3  ;;  %v9909_v18 = vpack.i.bf16 %v11272_v2, %v6679_v10  ;;  %vm11980_vm15 = vmmov %vm11976_vm3 }
 0xace   : > { %v11279_v4 = vld [vmem:[#allocation6 + $0x8] sm:$0xff] }
 0xacf   : > { %v9814_v5 = vpack.i.bf16 %v11279_v4, %v11272_v2  ;;  %v9809_v6 = vpack.i.bf16 %v11277_v3, %v11279_v4 }
 0xad0   : > { %6908 = vrot.lane.b32.xlu1 %v11277_v3, %s11882_s18 }
 0xad1   : > { %9815 = vrot.lane.b32.xlu2 %v9814_v5, %s11883_s23  ;;  %9810 = vrot.lane.b32.xlu0 %v9809_v6, %s11880_s20  ;;  %s11973_s20 = smov 87  }
 0xad8   : > { %6983 = vrot.lane.b32.xlu1 %v11272_v2, %s11879_s24 }
 0xad9   : > { %6829 = vrot.lane.b32.xlu2 %v11277_v3, %s11883_s23  ;;  %9820 = vrot.lane.b32.xlu0 %v9814_v5, %s11882_s18  ;;  %s11974_s18 = smov 86  }
 0xae0   : > { %7064 = vrot.lane.b32.xlu1 %v11279_v4, %s11885_s19 }
 0xae1   : > { %9830 = vrot.lane.b32.xlu2 %v9829_v7, %s11885_s19  ;;  %9825 = vrot.lane.b32.xlu0 %v9809_v6, %s11879_s24 }
 0xae8   : > { %7145 = vrot.lane.b32.xlu1 %v11277_v3, %s11928_s30 }
 0xae9   : > { %9840 = vrot.lane.b32.xlu2 %v9814_v5, %s11929_s28  ;;  %9835 = vrot.lane.b32.xlu0 %v9814_v5, %s11928_s30 }
 0xaf0   : > { %9850 = vrot.lane.b32.xlu1 %v9829_v7, %s11919_s8 }
 0xaf1   : > { %9845 = vrot.lane.b32.xlu2 %v9809_v6, %s11930_s1  ;;  %7224 = vrot.lane.b32.xlu0 %v11277_v3, %s11929_s28  ;;  %s11975_s28 = sld [smem:[#allocation34_spill]] }
 0xaf7   : > { %v11339_v8 = vld [vmem:[%s11975_s28] sm:$0xff]  ;;  %v11355_v14 = vld [vmem:[%s11975_s28 + $0x10] sm:$0xff]  ;;  %v9152_v21 = vld [vmem:[%s11975_s28 + $0x18] sm:$0xff] }
 0xaf8   : > { %9860 = vrot.lane.b32.xlu1 %v9814_v5, %s11973_s20  ;;  %9145 = vmatmul.msk.f32.vlgmr.msrb.gmra.mxu0 %vm660_vm8, %v11339_v8  ;;  %v9141_v17 = vld [vmem:[%s11975_s28 + $0x8] sm:$0xff]  ;;  %v9156_v56 = vld [vmem:[%s11975_s28 + $0x20] sm:$0xff]  ;;  %v9164_v60 = vld [vmem:[%s11975_s28 + $0x30] sm:$0xff] }
 0xaf9   : > { %9855 = vrot.lane.b32.xlu2 %v9814_v5, %s11920_s6  ;;  %7299 = vrot.lane.b32.xlu0 %v11272_v2, %s11930_s1  ;;  %v9160_v39 = vld [vmem:[%s11975_s28 + $0x28] sm:$0xff] }
 0xb00   : > { %9865 = vrot.lane.b32.xlu1 %v9809_v6, %s11974_s18 }
 0xb01   : > { %7540 = vrot.lane.b32.xlu2 %v11277_v3, %s11973_s20  ;;  %7380 = vrot.lane.b32.xlu0 %v11279_v4, %s11919_s8 }
 0xb08   : > { %9875 = vrot.lane.b32.xlu1 %v9814_v5, %s11971_s10 }
 0xb09   : > { %7615 = vrot.lane.b32.xlu2 %v11272_v2, %s11974_s18  ;;  %7461 = vrot.lane.b32.xlu0 %v11277_v3, %s11920_s6 }
 0xb10   : > { %7856 = vrot.lane.b32.xlu1 %v11277_v3, %s11932_s27 }
 0xb11   : > { %7696 = vrot.lane.b32.xlu2 %v11279_v4, %s11931_s12  ;;  %9870 = vrot.lane.b32.xlu0 %v9829_v7, %s11931_s12  ;;  %s12025_s12 = sld [smem:[#allocation11_spill]] }
 0xb18   : > { %7931 = vrot.lane.b32.xlu1 %v11272_v2, %s11933_s14 }
 0xb19   : > { %7777 = vrot.lane.b32.xlu2 %v11277_v3, %s11971_s10  ;;  %9880 = vrot.lane.b32.xlu0 %v9814_v5, %s11932_s27 }
 0xb20   : > { %8012 = vrot.lane.b32.xlu1 %v11279_v4, %s11934_s15 }
 0xb21   : > { %9890 = vrot.lane.b32.xlu2 %v9829_v7, %s11934_s15  ;;  %9885 = vrot.lane.b32.xlu0 %v9809_v6, %s11933_s14  ;;  %s12027_s15 = smov 8  }
 0xb28   : > { %8093 = vrot.lane.b32.xlu1 %v11277_v3, %s11935_s9 }
 0xb29   : > { %9900 = vrot.lane.b32.xlu2 %v9814_v5, %s11876_s0  ;;  %9895 = vrot.lane.b32.xlu0 %v9814_v5, %s11935_s9  ;;  %s11977_s9 = smov 46  }
 0xb2b   : > { %v9816_v9 = vpop.permute.xlu2 %9815 }
 0xb2c   : > { %v9818_v12 = vunpack.i.h.bf16 %v9816_v9  ;;  %v9817_v23 = vunpack.i.l.bf16 %v9816_v9 }
 0xb2e   : > { %v6831_v28 = vsel %vm11980_vm15, %v9817_v23, %v9818_v12  ;;  %vm11996_vm15 = vcmask 695296  }
 0xb30   : > { %9915 = vrot.lane.b32.xlu1 %v9914_v11, %s11936_s22 }
 0xb31   : > { %9905 = vrot.lane.b32.xlu2 %v9809_v6, %s11912_s25  ;;  %8172 = vrot.lane.b32.xlu0 %v11277_v3, %s11876_s0 }
 0xb33   : > { %v6830_v13 = vpop.permute.xlu2 %6829 }
 0xb34   : > { %v6832_v16 = vsel %vm11976_vm3, %v9818_v12, %v6830_v13 }
 0xb35   : > { %6874 = vmatpush.msra.mxu0 %v6832_v16 }
 0xb36   : > { %9150 = vmatmul.msk.f32.vlgmr.msra.gmra.mxu0 %vm660_vm8, %v11355_v14 }
 0xb38   : > { %9935 = vrot.lane.b32.xlu1 %v9814_v5, %s11938_s5 }
 0xb39   : > { %9920 = vrot.lane.b32.xlu2 %v9814_v5, %s11977_s9  ;;  %9910 = vrot.lane.b32.xlu0 %v9909_v18, %s11912_s25  ;;  %v9176_v18 = vld [vmem:[%s11975_s28 + $0x48] sm:$0xff] }
 0xb3a   : > { %v6687_v19 = vpop.permute.xlu1 %6686 }
 0xb3b   : > { %v11364_v20 = vpop.permute.xlu2 %9830 }
 0xb3c   : > { %v9833_v37 = vunpack.i.h.bf16 %v11364_v20  ;;  %v9832_v43 = vunpack.i.l.bf16 %v11364_v20 }
 0xb40   : > { %9940 = vrot.lane.b32.xlu1 %v9809_v6, %s11921_s29 }
 0xb41   : > { %8498 = vrot.lane.b32.xlu2 %v11277_v3, %s11938_s5  ;;  %9925 = vrot.lane.b32.xlu0 %v9814_v5, %s11936_s22 }
 0xb42   : > { %v6909_v15 = vpop.permute.xlu1 %6908 }
 0xb43   : > { %v9811_v22 = vpop.permute.xlu0 %9810  ;;  %6973 = vmatpush.msrb.mxu0 %v6909_v15  ;;  %v11382_v29 = vpop.permute.xlu2 %9840 }
 0xb44   : > { %v9813_v24 = vunpack.i.h.bf16 %v9811_v22  ;;  %v9812_v25 = vunpack.i.l.bf16 %v9811_v22  ;;  %9155 = vmatmul.msk.f32.vlgmr.msrb.gmra.mxu0 %vm660_vm8, %v9152_v21  ;;  %v9843_v53 = vunpack.i.h.bf16 %v11382_v29  ;;  %v9842_v54 = vunpack.i.l.bf16 %v11382_v29  ;;  %v9172_v22 = vld [vmem:[%s11975_s28 + $0x40] sm:$0xff] }
 0xb46   : > { %6755 = vmatpush.msrb.mxu3 %v9813_v24  ;;  %v6692_v26 = vsel %vm11978_vm5, %v6687_v19, %v9812_v25  ;;  %v6693_v27 = vsel %vm11979_vm7, %v9812_v25, %v9813_v24  ;;  %v7226_v61 = vsel %vm4216_vm4, %v9842_v54, %v9843_v53  ;;  %vm11994_vm5 = vcmask 703488  }
 0xb47   : > { %6715 = vmatpush.msrb.mxu1 %v6692_v26  ;;  %6735 = vmatpush.msrb.mxu2 %v6693_v27  ;;  %v9180_v27 = vld [vmem:[%s11975_s28 + $0x50] sm:$0xff]  ;;  %vm11995_vm7 = vmmov %vm11994_vm5 }
 0xb48   : > { %9144 = vmatmul.msk.f32.vlgmr.msrb.gmra.mxu3 %vm660_vm8, %v9141_v17  ;;  %9142 = vmatmul.msk.f32.vlgmr.msrb.gmra.mxu1 %vm660_vm8, %v9141_v17 }
 0xb49   : > { %6854 = vmatpush.msra.mxu3 %v6831_v28  ;;  %9143 = vmatmul.msk.f32.vlgmr.msrb.gmra.mxu2 %vm660_vm8, %v9141_v17 }
 0xb4a   : > { %6798 = vmatpush.msra.mxu1 %v11279_v4  ;;  %6818 = vmatpush.msra.mxu2 %v11277_v3  ;;  %v6984_v30 = vpop.permute.xlu1 %6983  ;;  %v9168_v3 = vld [vmem:[%s11975_s28 + $0x38] sm:$0xff] }
 0xb4b   : > { %8582 = vrot.lane.b32.xlu2 %v6679_v10, %s11921_s29  ;;  %9930 = vrot.lane.b32.xlu0 %v9914_v11, %s11977_s9  ;;  %v9821_v31 = vpop.permute.xlu0 %9820  ;;  %v11406_v40 = vpop.permute.xlu2 %9845  ;;  %s539_s9 = sand.u32 1, %s12025_s12  }
 0xb4c   : > { %6894 = vmatpush.msrb.mxu1 %v6830_v13  ;;  %8576 = vrot.lane.b32.xlu1 %v11272_v2, %s11921_s29  ;;  %v9823_v32 = vunpack.i.h.bf16 %v9821_v31  ;;  %v9822_v33 = vunpack.i.l.bf16 %v9821_v31  ;;  %v9848_v1 = vunpack.i.h.bf16 %v11406_v40  ;;  %v9847_v58 = vunpack.i.l.bf16 %v11406_v40  ;;  %s8817_s0 = sshll.u32 %s539_s9, 4  ;;  %s8736_s22 = scalar_lea.sflag [#allocation8], %s539_s9 }
 0xb4d   : > { %s11595_s14 = scalar_lea.vmem [#allocation7], %s8817_s0 }
 0xb4e   : > { %v6910_v34 = vsel %vm11981_vm6, %v9822_v33, %v9823_v32  ;;  %v6911_v35 = vsel %vm11982_vm11, %v9823_v32, %v6909_v15  ;;  %vm11997_vm6 = vmmov %vm11996_vm15  ;;  %vm11998_vm11 = vcmask 687104  }
 0xb4f   : > { %6933 = vmatpush.msrb.mxu2 %v6910_v34  ;;  %6953 = vmatpush.msrb.mxu3 %v6911_v35  ;;  %v9184_v35 = vld [vmem:[%s11975_s28 + $0x58] sm:$0xff] }
 0xb50   : > { %9149 = vmatmul.msk.f32.vlgmr.msra.gmra.mxu3 %vm660_vm8, %v11355_v14  ;;  %9146 = vmatmul.msk.f32.vlgmr.msra.gmra.mxu1 %vm660_vm8, %v11339_v8 }
 0xb51   : > { %9147 = vmatmul.msk.f32.vlgmr.msra.gmra.mxu2 %vm660_vm8, %v11339_v8 }
 0xb52   : > { %v7065_v38 = vpop.permute.xlu1 %7064 }
 0xb53   : > { %8659 = vperm.xlu2 %9467, %v8656_v36   ;;  %8500 = vrot.lane.b32.xlu0 %v6679_v10, %s11938_s5  ;;  %v9826_v41 = vpop.permute.xlu0 %9825  ;;  %v7068_v42 = vsel %vm1138_vm2, %v9833_v37, %v7065_v38  ;;  %v7069_v46 = vsel %vm1138_vm2, %v7065_v38, %v9832_v43  ;;  %v11421_v55 = vpop.permute.xlu2 %9855  ;;  %vm11986_vm2 = vcmask 859136  }
 0xb54   : > { %v9828_v44 = vunpack.i.h.bf16 %v9826_v41  ;;  %v9827_v45 = vunpack.i.l.bf16 %v9826_v41  ;;  %7091 = vmatpush.msra.mxu0 %v7068_v42  ;;  %v7306_v4 = vsel %vm11986_vm2, %v9847_v58, %v9848_v1  ;;  %v9858_v7 = vunpack.i.h.bf16 %v11421_v55 }
 0xb55   : > { %9161 = vmatmul.msk.f32.vlgmr.msra.gmra.mxu0 %vm660_vm8, %v9160_v39  ;;  %v9857_v8 = vunpack.i.l.bf16 %v11421_v55 }
 0xb56   : > { %7052 = vmatpush.msra.mxu3 %v9828_v44  ;;  %v6989_v47 = vsel %vm11984_vm13, %v6984_v30, %v9827_v45  ;;  %v6990_v48 = vsel %vm11985_vm14, %v9827_v45, %v9828_v44  ;;  %vm11999_vm13 = vmmov %vm11998_vm11  ;;  %vm12000_vm14 = vcmask 556032  }
 0xb57   : > { %7012 = vmatpush.msra.mxu1 %v6989_v47  ;;  %7032 = vmatpush.msra.mxu2 %v6990_v48  ;;  %v9192_v47 = vld [vmem:[%s11975_s28 + $0x68] sm:$0xff] }
 0xb58   : > { %9154 = vmatmul.msk.f32.vlgmr.msrb.gmra.mxu3 %vm660_vm8, %v9152_v21  ;;  %9151 = vmatmul.msk.f32.vlgmr.msrb.gmra.mxu1 %vm660_vm8, %v11355_v14 }
 0xb59   : > { %9153 = vmatmul.msk.f32.vlgmr.msrb.gmra.mxu2 %vm660_vm8, %v9152_v21  ;;  %7111 = vmatpush.msrb.mxu1 %v7069_v46 }
 0xb5a   : > { %7131 = vmatpush.msrb.mxu2 %v9832_v43  ;;  %v7146_v49 = vpop.permute.xlu1 %7145 }
 0xb5b   : > { %v9836_v50 = vpop.permute.xlu0 %9835  ;;  %v7541_v2 = vpop.permute.xlu2 %7540 }
 0xb5c   : > { %v9838_v51 = vunpack.i.h.bf16 %v9836_v50  ;;  %v9837_v52 = vunpack.i.l.bf16 %v9836_v50  ;;  %v9188_v50 = vld [vmem:[%s11975_s28 + $0x60] sm:$0xff] }
 0xb5e   : > { %v7148_v57 = vsel %vm4161_vm1, %v9838_v51, %v7146_v49  ;;  %v7147_v59 = vsel %vm4161_vm1, %v9837_v52, %v9838_v51  ;;  %vm11987_vm1 = vmmov %vm11986_vm2 }
 0xb5f   : > { %7170 = vmatpush.msrb.mxu3 %v7147_v59  ;;  %7190 = vmatpush.msrb.mxu0 %v7148_v57  ;;  %vm12001_vm2 = vmmov %vm12000_vm14  ;;  %v9196_v57 = vld [vmem:[%s11975_s28 + $0x70] sm:$0xff] }
 0xb60   : > { %9159 = vmatmul.msk.f32.vlgmr.msra.gmra.mxu3 %vm660_vm8, %v9156_v56  ;;  %9157 = vmatmul.msk.f32.vlgmr.msra.gmra.mxu1 %vm660_vm8, %v9156_v56 }
 0xb61   : > { %9158 = vmatmul.msk.f32.vlgmr.msra.gmra.mxu2 %vm660_vm8, %v9156_v56  ;;  %7210 = vmatpush.msra.mxu1 %v7146_v49 }
 0xb62   : > { %7249 = vmatpush.msra.mxu2 %v7226_v61  ;;  %v9851_v62 = vpop.permute.xlu1 %9850  ;;  %9166 = vmatmul.msk.f32.vlgmr.msrb.gmra.mxu0 %vm660_vm8, %v9164_v60 }
 0xb63   : > { %v7225_v63 = vpop.permute.xlu0 %7224  ;;  %v9852_v10 = vunpack.i.l.bf16 %v9851_v62  ;;  %v7616_v12 = vpop.permute.xlu2 %7615  ;;  %v9853_v13 = vunpack.i.h.bf16 %v9851_v62 }
 0xb64   : > { %v7227_v0 = vsel %vm4216_vm4, %v9843_v53, %v7225_v63  ;;  %7289 = vmatpush.msra.mxu0 %v7225_v63  ;;  %vm11988_vm4 = vcmask 719872  }
 0xb65   : > { %7269 = vmatpush.msra.mxu3 %v7227_v0  ;;  %v7463_v11 = vsel %vm11988_vm4, %v9857_v8, %v9858_v7  ;;  %vm11993_vm3 = vmmov %vm11988_vm4  ;;  %vm12003_vm4 = vcmask 547840  }
 0xb68   : > { %9165 = vmatmul.msk.f32.vlgmr.msrb.gmra.mxu3 %vm660_vm8, %v9164_v60  ;;  %9162 = vmatmul.msk.f32.vlgmr.msrb.gmra.mxu1 %vm660_vm8, %v9160_v39 }
 0xb69   : > { %7368 = vmatpush.msrb.mxu3 %v9848_v1  ;;  %9163 = vmatmul.msk.f32.vlgmr.msrb.gmra.mxu2 %vm660_vm8, %v9160_v39 }
 0xb6a   : > { %7348 = vmatpush.msrb.mxu2 %v7306_v4  ;;  %v9861_v5 = vpop.permute.xlu1 %9860  ;;  %9171 = vmatmul.msk.f32.vlgmr.msra.gmra.mxu0 %vm660_vm8, %v9168_v3 }
 0xb6b   : > { %v7300_v6 = vpop.permute.xlu0 %7299  ;;  %v9863_v19 = vunpack.i.h.bf16 %v9861_v5  ;;  %v9862_v15 = vunpack.i.l.bf16 %v9861_v5  ;;  %v7697_v17 = vpop.permute.xlu2 %7696 }
 0xb6c   : > { %v7305_v9 = vsel %vm11987_vm1, %v7300_v6, %v9847_v58  ;;  %vm12002_vm1 = vcmask 539648   ;;  %v9200_v58 = vld [vmem:[%s11975_s28 + $0x78] sm:$0xff] }
 0xb6d   : > { %7328 = vmatpush.msrb.mxu1 %v7305_v9  ;;  %v7543_v23 = vsel %vm11991_vm12, %v9863_v19, %v7541_v2  ;;  %v7542_v24 = vsel %vm11992_vm9, %v9862_v15, %v9863_v19  ;;  %vm12007_vm9 = vmmov %vm12002_vm1 }
 0xb70   : > { %9170 = vmatmul.msk.f32.vlgmr.msra.gmra.mxu3 %vm660_vm8, %v9168_v3  ;;  %9167 = vmatmul.msk.f32.vlgmr.msra.gmra.mxu1 %vm660_vm8, %v9164_v60 }
 0xb71   : > { %7486 = vmatpush.msra.mxu3 %v7463_v11  ;;  %9169 = vmatmul.msk.f32.vlgmr.msra.gmra.mxu2 %vm660_vm8, %v9168_v3 }
 0xb72   : > { %7447 = vmatpush.msra.mxu2 %v9852_v10  ;;  %v9866_v14 = vpop.permute.xlu1 %9865 }
 0xb73   : > { %v7381_v16 = vpop.permute.xlu0 %7380  ;;  %v9868_v29 = vunpack.i.h.bf16 %v9866_v14  ;;  %v9867_v30 = vunpack.i.l.bf16 %v9866_v14  ;;  %v7778_v40 = vpop.permute.xlu2 %7777 }
 0xb74   : > { %v7384_v20 = vsel %vm11989_vm0, %v9853_v13, %v7381_v16  ;;  %v7385_v21 = vsel %vm11990_vm10, %v7381_v16, %v9852_v10  ;;  %vm12004_vm0 = vmmov %vm12003_vm4  ;;  %vm12005_vm10 = vcmask 531456   ;;  %v9208_v10 = vld [vmem:[%s11975_s28 + $0x88] sm:$0xff]  ;;  %v9204_v13 = vld [vmem:[%s11975_s28 + $0x80] sm:$0xff] }
 0xb75   : > { %7407 = vmatpush.msrb.mxu0 %v7384_v20  ;;  %7427 = vmatpush.msra.mxu1 %v7385_v21  ;;  %v7621_v31 = vsel %vm11994_vm5, %v7616_v12, %v9867_v30  ;;  %v7622_v32 = vsel %vm11995_vm7, %v9867_v30, %v9868_v29  ;;  %vm12006_vm12 = vmmov %vm12005_vm10  ;;  %vm12010_vm7 = vcmask 392192  }
 0xb76   : > { %9177 = vmatmul.msk.f32.vlgmr.msrb.gmra.mxu0 %vm660_vm8, %v9176_v18 }
 0xb78   : > { %9175 = vmatmul.msk.f32.vlgmr.msrb.gmra.mxu3 %vm660_vm8, %v9172_v22  ;;  %9173 = vmatmul.msk.f32.vlgmr.msrb.gmra.mxu1 %vm660_vm8, %v9172_v22 }
 0xb79   : > { %7585 = vmatpush.msrb.mxu3 %v7543_v23  ;;  %9174 = vmatmul.msk.f32.vlgmr.msrb.gmra.mxu2 %vm660_vm8, %v9172_v22 }
 0xb7a   : > { %7565 = vmatpush.msrb.mxu2 %v7542_v24  ;;  %v9876_v25 = vpop.permute.xlu1 %9875  ;;  %v9212_v24 = vld [vmem:[%s11975_s28 + $0x90] sm:$0xff] }
 0xb7b   : > { %v7462_v26 = vpop.permute.xlu0 %7461  ;;  %v9878_v36 = vunpack.i.h.bf16 %v9876_v25  ;;  %v9877_v37 = vunpack.i.l.bf16 %v9876_v25  ;;  %v9891_v52 = vpop.permute.xlu2 %9890 }
 0xb7c   : > { %v7464_v28 = vsel %vm11993_vm3, %v9858_v7, %v7462_v26  ;;  %7526 = vmatpush.msrb.mxu1 %v7462_v26  ;;  %v9893_v54 = vunpack.i.h.bf16 %v9891_v52  ;;  %v9892_v7 = vunpack.i.l.bf16 %v9891_v52  ;;  %vm12008_vm3 = vcmask 523264  }
 0xb7d   : > { %7506 = vmatpush.msra.mxu0 %v7464_v28  ;;  %v7779_v43 = vsel %vm11998_vm11, %v9877_v37, %v9878_v36  ;;  %v7780_v44 = vsel %vm11999_vm13, %v9878_v36, %v7778_v40  ;;  %vm12009_vm5 = vmmov %vm12008_vm3  ;;  %v9216_v36 = vld [vmem:[%s11975_s28 + $0x98] sm:$0xff]  ;;  %vm12013_vm11 = vcmask 384000  }
 0xb7e   : > { %9182 = vmatmul.msk.f32.vlgmr.msra.gmra.mxu0 %vm660_vm8, %v9180_v27  ;;  %vm12014_vm13 = vmmov %vm12013_vm11 }
 0xb7f   : > { %7605 = vmatpush.msrb.mxu0 %v7541_v2 }
 0xb80   : > { %9181 = vmatmul.msk.f32.vlgmr.msra.gmra.mxu3 %vm660_vm8, %v9180_v27  ;;  %9178 = vmatmul.msk.f32.vlgmr.msra.gmra.mxu1 %vm660_vm8, %v9176_v18 }
 0xb81   : > { %7684 = vmatpush.msra.mxu3 %v9868_v29  ;;  %9179 = vmatmul.msk.f32.vlgmr.msra.gmra.mxu2 %vm660_vm8, %v9176_v18 }
 0xb82   : > { %7644 = vmatpush.msra.mxu1 %v7621_v31  ;;  %7664 = vmatpush.msra.mxu2 %v7622_v32  ;;  %v7857_v33 = vpop.permute.xlu1 %7856 }
 0xb83   : > { %v9871_v34 = vpop.permute.xlu0 %9870  ;;  %v9901_v4 = vpop.permute.xlu2 %9900 }
 0xb84   : > { %v9873_v38 = vunpack.i.h.bf16 %v9871_v34  ;;  %v9872_v39 = vunpack.i.l.bf16 %v9871_v34  ;;  %v9903_v11 = vunpack.i.h.bf16 %v9901_v4  ;;  %v9902_v12 = vunpack.i.l.bf16 %v9901_v4 }
 0xb86   : > { %9187 = vmatmul.msk.f32.vlgmr.msrb.gmra.mxu0 %vm660_vm8, %v9184_v35  ;;  %v7700_v41 = vsel %vm11996_vm15, %v9873_v38, %v7697_v17  ;;  %v7701_v42 = vsel %vm11997_vm6, %v7697_v17, %v9872_v39  ;;  %v8174_v19 = vsel %vm12009_vm5, %v9902_v12, %v9903_v11  ;;  %vm12011_vm15 = vmmov %vm12010_vm7 }
 0xb87   : > { %7723 = vmatpush.msra.mxu0 %v7700_v41  ;;  %vm12012_vm6 = vmmov %vm12010_vm7  ;;  %v6780_v41 = vpop.f32.mrf.mxu0 }
 0xb88   : > { %9186 = vmatmul.msk.f32.vlgmr.msrb.gmra.mxu3 %vm660_vm8, %v9184_v35  ;;  %9183 = vmatmul.msk.f32.vlgmr.msrb.gmra.mxu1 %vm660_vm8, %v9180_v27 }
 0xb89   : > { %7802 = vmatpush.msrb.mxu3 %v7779_v43  ;;  %9185 = vmatmul.msk.f32.vlgmr.msrb.gmra.mxu2 %vm660_vm8, %v9184_v35  ;;  %v9224_v43 = vld [vmem:[%s11975_s28 + $0xa8] sm:$0xff] }
 0xb8a   : > { %7743 = vmatpush.msrb.mxu1 %v7701_v42  ;;  %7763 = vmatpush.msrb.mxu2 %v9872_v39  ;;  %v7932_v45 = vpop.permute.xlu1 %7931 }
 0xb8b   : > { %7822 = vmatpush.msrb.mxu0 %v7780_v44  ;;  %v9881_v46 = vpop.permute.xlu0 %9880  ;;  %v9906_v16 = vpop.permute.xlu2 %9905 }
 0xb8c   : > { %v9883_v48 = vunpack.i.h.bf16 %v9881_v46  ;;  %v9882_v49 = vunpack.i.l.bf16 %v9881_v46  ;;  %v9908_v21 = vunpack.i.h.bf16 %v9906_v16  ;;  %v9907_v23 = vunpack.i.l.bf16 %v9906_v16 }
 0xb8e   : > { %9193 = vmatmul.msk.f32.vlgmr.msra.gmra.mxu0 %vm660_vm8, %v9192_v47  ;;  %v7859_v51 = vsel %vm12000_vm14, %v9883_v48, %v7857_v33  ;;  %v7858_v53 = vsel %vm12001_vm2, %v9882_v49, %v9883_v48  ;;  %v8257_v28 = vsel %vm12012_vm6, %v9907_v23, %v9908_v21  ;;  %vm12015_vm14 = vcmask 375808   ;;  %vm12016_vm2 = vmmov %vm12013_vm11 }
 0xb8f   : > { %7921 = vmatpush.msra.mxu0 %v7857_v33 }
 0xb90   : > { %9191 = vmatmul.msk.f32.vlgmr.msra.gmra.mxu3 %vm660_vm8, %v9188_v50  ;;  %9189 = vmatmul.msk.f32.vlgmr.msra.gmra.mxu1 %vm660_vm8, %v9188_v50 }
 0xb91   : > { %7901 = vmatpush.msra.mxu3 %v7859_v51  ;;  %9190 = vmatmul.msk.f32.vlgmr.msra.gmra.mxu2 %vm660_vm8, %v9188_v50 }
 0xb92   : > { %7842 = vmatpush.msra.mxu1 %v7778_v40  ;;  %7881 = vmatpush.msra.mxu2 %v7858_v53  ;;  %v8013_v55 = vpop.permute.xlu1 %8012 }
 0xb93   : > { %v9886_v56 = vpop.permute.xlu0 %9885  ;;  %v8016_v61 = vsel %vm12002_vm1, %v9893_v54, %v8013_v55  ;;  %v8017_v8 = vsel %vm12007_vm9, %v8013_v55, %v9892_v7  ;;  %v9921_v27 = vpop.permute.xlu2 %9920  ;;  %vm12017_vm1 = vmmov %vm12015_vm14  ;;  %vm12022_vm9 = vcmask 359424  }
 0xb94   : > { %v9888_v59 = vunpack.i.h.bf16 %v9886_v56  ;;  %v9887_v60 = vunpack.i.l.bf16 %v9886_v56  ;;  %v9923_v30 = vunpack.i.h.bf16 %v9921_v27  ;;  %v9922_v31 = vunpack.i.l.bf16 %v9921_v27 }
 0xb96   : > { %9198 = vmatmul.msk.f32.vlgmr.msrb.gmra.mxu0 %vm660_vm8, %v9196_v57  ;;  %v7937_v62 = vsel %vm12003_vm4, %v7932_v45, %v9887_v60  ;;  %v7938_v63 = vsel %vm12004_vm0, %v9887_v60, %v9888_v59  ;;  %v8420_v39 = vsel %vm12015_vm14, %v9922_v31, %v9923_v30  ;;  %vm12018_vm4 = vcmask 367616   ;;  %vm12019_vm0 = vmmov %vm12017_vm1 }
 0xb97   : > { %8039 = vmatpush.msrb.mxu0 %v8016_v61  ;;  %v9228_v61 = vld [vmem:[%s11975_s28 + $0xb0] sm:$0xff] }
 0xb98   : > { %9197 = vmatmul.msk.f32.vlgmr.msrb.gmra.mxu3 %vm660_vm8, %v9196_v57  ;;  %9194 = vmatmul.msk.f32.vlgmr.msrb.gmra.mxu1 %vm660_vm8, %v9192_v47 }
 0xb99   : > { %8000 = vmatpush.msrb.mxu3 %v9888_v59  ;;  %9195 = vmatmul.msk.f32.vlgmr.msrb.gmra.mxu2 %vm660_vm8, %v9192_v47  ;;  %v9220_v47 = vld [vmem:[%s11975_s28 + $0xa0] sm:$0xff] }
 0xb9a   : > { %7960 = vmatpush.msrb.mxu1 %v7937_v62  ;;  %7980 = vmatpush.msrb.mxu2 %v7938_v63  ;;  %v8094_v1 = vpop.permute.xlu1 %8093 }
 0xb9b   : > { %v9896_v0 = vpop.permute.xlu0 %9895  ;;  %v8499_v45 = vpop.permute.xlu2 %8498 }
 0xb9c   : > { %v9898_v2 = vunpack.i.h.bf16 %v9896_v0  ;;  %v9897_v3 = vunpack.i.l.bf16 %v9896_v0 }
 0xb9e   : > { %v8096_v5 = vsel %vm12005_vm10, %v9898_v2, %v8094_v1  ;;  %9203 = vmatmul.msk.f32.vlgmr.msra.gmra.mxu0 %vm660_vm8, %v9200_v58  ;;  %v8095_v6 = vsel %vm12006_vm12, %v9897_v3, %v9898_v2  ;;  %vm12020_vm10 = vmmov %vm12018_vm4 }
 0xb9f   : > { %8138 = vmatpush.msra.mxu0 %v8096_v5  ;;  %vm12021_vm12 = vmmov %vm12018_vm4 }
 0xba0   : > { %9202 = vmatmul.msk.f32.vlgmr.msra.gmra.mxu3 %vm660_vm8, %v9200_v58  ;;  %9199 = vmatmul.msk.f32.vlgmr.msra.gmra.mxu1 %vm660_vm8, %v9196_v57 }
 0xba1   : > { %8118 = vmatpush.msra.mxu3 %v8095_v6  ;;  %9201 = vmatmul.msk.f32.vlgmr.msra.gmra.mxu2 %vm660_vm8, %v9200_v58 }
 0xba2   : > { %8059 = vmatpush.msra.mxu1 %v8017_v8  ;;  %8079 = vmatpush.msra.mxu2 %v9892_v7  ;;  %v9916_v14 = vpop.permute.xlu1 %9915  ;;  %v9232_v8 = vld [vmem:[%s11975_s28 + $0xb8] sm:$0xff] }
 0xba3   : > { %v8173_v9 = vpop.permute.xlu0 %8172  ;;  %v9918_v34 = vunpack.i.h.bf16 %v9916_v14  ;;  %v9917_v35 = vunpack.i.l.bf16 %v9916_v14 }
 0xba4   : > { %v8175_v18 = vsel %vm12008_vm3, %v9903_v11, %v8173_v9  ;;  %vm12023_vm3 = vmmov %vm12022_vm9 }
 0xba5   : > { %v8340_v40 = vsel %vm12016_vm2, %v9917_v35, %v9918_v34  ;;  %vm12024_vm5 = vmmov %vm12023_vm3 }
 0xba6   : > { %9209 = vmatmul.msk.f32.vlgmr.msrb.gmra.mxu0 %vm660_vm8, %v9208_v10 }
 0xba7   : > { %8237 = vmatpush.msrb.mxu0 %v8173_v9 }
 0xba8   : > { %9207 = vmatmul.msk.f32.vlgmr.msrb.gmra.mxu3 %vm660_vm8, %v9204_v13  ;;  %9205 = vmatmul.msk.f32.vlgmr.msrb.gmra.mxu1 %vm660_vm8, %v9204_v13 }
 0xba9   : > { %8217 = vmatpush.msrb.mxu3 %v8175_v18  ;;  %9206 = vmatmul.msk.f32.vlgmr.msrb.gmra.mxu2 %vm660_vm8, %v9204_v13  ;;  %v9236_v18 = vld [vmem:[%s11975_s28 + $0xc0] sm:$0xff] }
 0xbaa   : > { %8158 = vmatpush.msrb.mxu1 %v8094_v1  ;;  %8197 = vmatpush.msrb.mxu2 %v8174_v19  ;;  %v9936_v26 = vpop.permute.xlu1 %9935  ;;  %v8583_v1 = vpop.permute.xlu2 %8582 }
 0xbab   : > { %v9911_v20 = vpop.permute.xlu0 %9910  ;;  %v9938_v44 = vunpack.i.h.bf16 %v9936_v26  ;;  %v9937_v48 = vunpack.i.l.bf16 %v9936_v26 }
 0xbac   : > { %v9913_v15 = vunpack.i.h.bf16 %v9911_v20  ;;  %v9912_v22 = vunpack.i.l.bf16 %v9911_v20 }
 0xbad   : > { %v8503_v52 = vsel %vm12018_vm4, %v9938_v44, %v8499_v45  ;;  %v8502_v55 = vsel %vm12020_vm10, %v9937_v48, %v9938_v44 }
 0xbae   : > { %v8258_v25 = vsel %vm12010_vm7, %v9908_v21, %v9912_v22  ;;  %9214 = vmatmul.msk.f32.vlgmr.msra.gmra.mxu0 %vm660_vm8, %v9212_v24  ;;  %v8256_v17 = vsel %vm12011_vm15, %v9913_v15, %v9907_v23  ;;  %vm12026_vm7 = vcmask 122880  }
 0xbaf   : > { %vm12031_vm15 = vmmov %vm12026_vm7 }
 0xbb0   : > { %9213 = vmatmul.msk.f32.vlgmr.msra.gmra.mxu3 %vm660_vm8, %v9212_v24  ;;  %9210 = vmatmul.msk.f32.vlgmr.msra.gmra.mxu1 %vm660_vm8, %v9208_v10  ;;  %vm12032_vm6 = vmmov %vm12026_vm7 }
 0xbb1   : > { %8320 = vmatpush.msra.mxu3 %v8258_v25  ;;  %9211 = vmatmul.msk.f32.vlgmr.msra.gmra.mxu2 %vm660_vm8, %v9208_v10  ;;  %vm12035_vm14 = vmmov %vm12032_vm6 }
 0xbb2   : > { %8280 = vmatpush.msra.mxu1 %v8256_v17  ;;  %8300 = vmatpush.msra.mxu2 %v8257_v28  ;;  %v9941_v42 = vpop.permute.xlu1 %9940  ;;  %vm12036_vm2 = vmmov %vm12032_vm6 }
 0xbb3   : > { %v9926_v29 = vpop.permute.xlu0 %9925  ;;  %v6876_v54 = vpop.f32.mrf.mxu0  ;;  %v9943_v56 = vunpack.i.h.bf16 %v9941_v42  ;;  %v9942_v62 = vunpack.i.l.bf16 %v9941_v42 }
 0xbb4   : > { %v9928_v32 = vunpack.i.h.bf16 %v9926_v29  ;;  %v9927_v33 = vunpack.i.l.bf16 %v9926_v29 }
 0xbb5   : > { %v8586_v2 = vsel %vm12023_vm3, %v9943_v56, %v8583_v1  ;;  %v8585_v3 = vsel %vm12024_vm5, %v9942_v62, %v9943_v56 }
 0xbb6   : > { %v8338_v37 = vsel %vm12013_vm11, %v9927_v33, %v9928_v32  ;;  %9219 = vmatmul.msk.f32.vlgmr.msrb.gmra.mxu0 %vm660_vm8, %v9216_v36  ;;  %v8339_v38 = vsel %vm12014_vm13, %v9928_v32, %v9917_v35  ;;  %vm12033_vm11 = vmmov %vm12032_vm6 }
 0xbb7   : > { %8362 = vmatpush.msra.mxu0 %v8338_v37  ;;  %vm12034_vm13 = vmmov %vm12032_vm6 }
 0xbb8   : > { %9218 = vmatmul.msk.f32.vlgmr.msrb.gmra.mxu3 %vm660_vm8, %v9216_v36  ;;  %9215 = vmatmul.msk.f32.vlgmr.msrb.gmra.mxu1 %vm660_vm8, %v9212_v24 }
 0xbb9   : > { %8444 = vmatpush.msrb.mxu3 %v8420_v39  ;;  %9217 = vmatmul.msk.f32.vlgmr.msrb.gmra.mxu2 %vm660_vm8, %v9216_v36 }
 0xbba   : > { %8382 = vmatpush.msrb.mxu1 %v8339_v38  ;;  %8402 = vmatpush.msrb.mxu2 %v8340_v40 }
 0xbbd   : > { %v9931_v46 = vpop.permute.xlu0 %9930 }
 0xbbe   : > { %v9933_v49 = vunpack.i.h.bf16 %v9931_v46  ;;  %v9932_v50 = vunpack.i.l.bf16 %v9931_v46  ;;  %9225 = vmatmul.msk.f32.vlgmr.msra.gmra.mxu0 %vm660_vm8, %v9224_v43  ;;  %v8577_v57 = vpop.permute.xlu1 %8576 }
 0xbbf   : > { %v8584_v58 = vsel %vm12022_vm9, %v8577_v57, %v9942_v62 }
 0xbc0   : > { %9223 = vmatmul.msk.f32.vlgmr.msra.gmra.mxu3 %vm660_vm8, %v9220_v47  ;;  %v8421_v51 = vsel %vm12017_vm1, %v9923_v30, %v9932_v50  ;;  %9221 = vmatmul.msk.f32.vlgmr.msra.gmra.mxu1 %vm660_vm8, %v9220_v47  ;;  %v8422_v53 = vsel %vm12019_vm0, %v9932_v50, %v9933_v49  ;;  %vm12038_vm1 = vmmov %vm12036_vm2 }
 0xbc1   : > { %8464 = vmatpush.msrb.mxu0 %v8421_v51  ;;  %8546 = vmatpush.msra.mxu3 %v8503_v52  ;;  %v6975_v5 = vpop.f32.mrf.mxu0  ;;  %vm12039_vm4 = vmmov %vm12038_vm1 }
 0xbc2   : > { %9222 = vmatmul.msk.f32.vlgmr.msra.gmra.mxu2 %vm660_vm8, %v9220_v47  ;;  %8484 = vmatpush.msra.mxu1 %v8422_v53  ;;  %vm12040_vm0 = vmmov %vm12038_vm1 }
 0xbc3   : > { %8526 = vmatpush.msra.mxu2 %v8502_v55  ;;  %vm12041_vm10 = vmmov %vm12040_vm0 }
 0xbc4   : > { %vm12043_vm9 = vmmov %vm12040_vm0 }
 0xbc5   : > { %v8501_v59 = vpop.permute.xlu0 %8500  ;;  %v6717_v60 = vpop.f32.mrf.mxu1  ;;  %vm12046_vm3 = vmmov %vm12040_vm0 }
 0xbc6   : > { %v8504_v63 = vsel %vm12021_vm12, %v8499_v45, %v8501_v59  ;;  %v6781_v0 = vadd.f32 %v6780_v41, %v6717_v60  ;;  %9230 = vmatmul.msk.f32.vlgmr.msrb.gmra.mxu0 %vm660_vm8, %v9228_v61  ;;  %vm12042_vm12 = vmmov %vm12040_vm0 }
 0xbc7   : > { %8566 = vmatpush.msra.mxu0 %v8504_v63  ;;  %vm12048_vm5 = vmmov %vm12040_vm0 }
 0xbc8   : > { %9229 = vmatmul.msk.f32.vlgmr.msrb.gmra.mxu3 %vm660_vm8, %v9228_v61  ;;  %9226 = vmatmul.msk.f32.vlgmr.msrb.gmra.mxu1 %vm660_vm8, %v9224_v43 }
 0xbc9   : > { %8648 = vmatpush.msrb.mxu3 %v8586_v2  ;;  %8608 = vmatpush.msrb.mxu1 %v8584_v58 }
 0xbca   : > { %9227 = vmatmul.msk.f32.vlgmr.msrb.gmra.mxu2 %vm660_vm8, %v9224_v43 }
 0xbcb   : > { %8628 = vmatpush.msrb.mxu2 %v8585_v3  ;;  %v6757_v4 = vpop.f32.mrf.mxu3 }
 0xbcc   : > { %v6737_v6 = vpop.f32.mrf.mxu2 }
 0xbcd   : > { %v6800_v7 = vpop.f32.mrf.mxu1 }
 0xbce   : > { %v6801_v9 = vadd.f32 %v6800_v7, %v6737_v6  ;;  %9235 = vmatmul.msk.f32.vlgmr.msra.gmra.mxu0 %vm660_vm8, %v9232_v8 }
 0xbd0   : > { %v6900_v10 = vadd.f32 %v6876_v54, %v6801_v9  ;;  %9234 = vmatmul.msk.f32.vlgmr.msra.gmra.mxu3 %vm660_vm8, %v9232_v8  ;;  %9231 = vmatmul.msk.f32.vlgmr.msra.gmra.mxu1 %vm660_vm8, %v9228_v61 }
 0xbd2   : > { %9233 = vmatmul.msk.f32.vlgmr.msra.gmra.mxu2 %vm660_vm8, %v9232_v8  ;;  %v7093_v19 = vpop.f32.mrf.mxu0 }
 0xbd3   : > { %v6856_v11 = vpop.f32.mrf.mxu3 }
 0xbd4   : > { %v6899_v12 = vadd.f32 %v6856_v11, %v6781_v0  ;;  %v6820_v13 = vpop.f32.mrf.mxu2 }
 0xbd5   : > { %v6821_v14 = vadd.f32 %v6820_v13, %v6757_v4  ;;  %v6896_v16 = vpop.f32.mrf.mxu1 }
 0xbd7   : > { %v6901_v20 = vadd.f32 %v6896_v16, %v6821_v14 }
 0xbd8   : > { %9239 = vmatmul.msk.f32.vlgmr.msrb.gmra.mxu3 %vm660_vm8, %v9236_v18  ;;  %9237 = vmatmul.msk.f32.vlgmr.msrb.gmra.mxu1 %vm660_vm8, %v9236_v18 }
 0xbd9   : > { %v6980_v21 = vadd.f32 %v6975_v5, %v6901_v20 }
 0xbda   : > { %9238 = vmatmul.msk.f32.vlgmr.msrb.gmra.mxu2 %vm660_vm8, %v9236_v18 }
 0xbdb   : > { %v6955_v15 = vpop.f32.mrf.mxu3 }
 0xbdc   : > { %v6979_v22 = vadd.f32 %v6955_v15, %v6900_v10  ;;  %v6935_v23 = vpop.f32.mrf.mxu2 }
 0xbdd   : > { %v6978_v24 = vadd.f32 %v6935_v23, %v6899_v12  ;;  %v7014_v25 = vpop.f32.mrf.mxu1 }
 0xbdf   : > { %v7057_v17 = vadd.f32 %v7014_v25, %v6978_v24  ;;  %v7192_v26 = vpop.f32.mrf.mxu0 }
 0xbe1   : > { %v7136_v27 = vadd.f32 %v7093_v19, %v7057_v17 }
 0xbe3   : > { %v7054_v28 = vpop.f32.mrf.mxu3 }
 0xbe4   : > { %v7059_v29 = vadd.f32 %v7054_v28, %v6980_v21  ;;  %v7034_v30 = vpop.f32.mrf.mxu2 }
 0xbe5   : > { %v7058_v31 = vadd.f32 %v7034_v30, %v6979_v22  ;;  %v7113_v32 = vpop.f32.mrf.mxu1 }
 0xbe7   : > { %v7137_v33 = vadd.f32 %v7113_v32, %v7058_v31  ;;  %v7291_v35 = vpop.f32.mrf.mxu0 }
 0xbe9   : > { %v7216_v34 = vadd.f32 %v7192_v26, %v7137_v33 }
 0xbeb   : > { %v7172_v36 = vpop.f32.mrf.mxu3 }
 0xbec   : > { %v7215_v37 = vadd.f32 %v7172_v36, %v7136_v27  ;;  %v7133_v38 = vpop.f32.mrf.mxu2 }
 0xbed   : > { %v7138_v39 = vadd.f32 %v7133_v38, %v7059_v29  ;;  %v7212_v40 = vpop.f32.mrf.mxu1 }
 0xbef   : > { %v7217_v41 = vadd.f32 %v7212_v40, %v7138_v39 }
 0xbf1   : > { %v7296_v42 = vadd.f32 %v7291_v35, %v7217_v41 }
 0xbf3   : > { %v7271_v43 = vpop.f32.mrf.mxu3  ;;  %v7409_v44 = vpop.f32.mrf.mxu0 }
 0xbf4   : > { %v7295_v45 = vadd.f32 %v7271_v43, %v7216_v34  ;;  %v7251_v46 = vpop.f32.mrf.mxu2 }
 0xbf5   : > { %v7294_v47 = vadd.f32 %v7251_v46, %v7215_v37  ;;  %v7330_v48 = vpop.f32.mrf.mxu1 }
 0xbf7   : > { %v7373_v49 = vadd.f32 %v7330_v48, %v7294_v47 }
 0xbf9   : > { %v7452_v22 = vadd.f32 %v7409_v44, %v7373_v49 }
 0xbfb   : > { %v7370_v50 = vpop.f32.mrf.mxu3  ;;  %v7508_v53 = vpop.f32.mrf.mxu0 }
 0xbfc   : > { %v7375_v51 = vadd.f32 %v7370_v50, %v7296_v42  ;;  %v7350_v52 = vpop.f32.mrf.mxu2 }
 0xbfd   : > { %v7374_v54 = vadd.f32 %v7350_v52, %v7295_v45  ;;  %v7429_v55 = vpop.f32.mrf.mxu1 }
 0xbff   : > { %v7453_v56 = vadd.f32 %v7429_v55, %v7374_v54 }
 0xc01   : > { %v7532_v28 = vadd.f32 %v7508_v53, %v7453_v56 }
 0xc03   : > { %v7488_v57 = vpop.f32.mrf.mxu3  ;;  %v7607_v62 = vpop.f32.mrf.mxu0 }
 0xc04   : > { %v7449_v59 = vpop.f32.mrf.mxu2  ;;  %v7531_v24 = vadd.f32 %v7488_v57, %v7452_v22 }
 0xc05   : > { %v7454_v60 = vadd.f32 %v7449_v59, %v7375_v51  ;;  %v7528_v61 = vpop.f32.mrf.mxu1 }
 0xc07   : > { %v7533_v63 = vadd.f32 %v7528_v61, %v7454_v60 }
 0xc09   : > { %v7612_v0 = vadd.f32 %v7607_v62, %v7533_v63 }
 0xc0b   : > { %v7587_v1 = vpop.f32.mrf.mxu3  ;;  %v7725_v3 = vpop.f32.mrf.mxu0 }
 0xc0c   : > { %v7567_v58 = vpop.f32.mrf.mxu2  ;;  %v7611_v30 = vadd.f32 %v7587_v1, %v7532_v28 }
 0xc0d   : > { %v7646_v2 = vpop.f32.mrf.mxu1  ;;  %v7610_v25 = vadd.f32 %v7567_v58, %v7531_v24 }
 0xc0f   : > { %v7689_v29 = vadd.f32 %v7646_v2, %v7610_v25 }
 0xc11   : > { %v7768_v32 = vadd.f32 %v7725_v3, %v7689_v29 }
 0xc13   : > { %v7686_v4 = vpop.f32.mrf.mxu3  ;;  %v7824_v8 = vpop.f32.mrf.mxu0 }
 0xc14   : > { %v7691_v5 = vadd.f32 %v7686_v4, %v7612_v0  ;;  %v7666_v6 = vpop.f32.mrf.mxu2  ;;  %v8660_v4 = vpop.permute.xlu2 %8659 }
 0xc15   : > { %v7745_v7 = vpop.f32.mrf.mxu1  ;;  %v7690_v33 = vadd.f32 %v7666_v6, %v7611_v30 }
 0xc17   : > { %v7769_v38 = vadd.f32 %v7745_v7, %v7690_v33 }
 0xc19   : > { %v7848_v40 = vadd.f32 %v7824_v8, %v7769_v38 }
 0xc1b   : > { %v7804_v9 = vpop.f32.mrf.mxu3  ;;  %v7923_v16 = vpop.f32.mrf.mxu0 }
 0xc1c   : > { %v7765_v10 = vpop.f32.mrf.mxu2  ;;  %v7847_v35 = vadd.f32 %v7804_v9, %v7768_v32 }
 0xc1d   : > { %v7770_v11 = vadd.f32 %v7765_v10, %v7691_v5  ;;  %v7844_v12 = vpop.f32.mrf.mxu1 }
 0xc1f   : > { %v7849_v13 = vadd.f32 %v7844_v12, %v7770_v11 }
 0xc21   : > { %v7928_v6 = vadd.f32 %v7923_v16, %v7849_v13 }
 0xc23   : > { %v7903_v14 = vpop.f32.mrf.mxu3  ;;  %v8041_v23 = vpop.f32.mrf.mxu0 }
 0xc24   : > { %v7883_v18 = vpop.f32.mrf.mxu2  ;;  %v7927_v43 = vadd.f32 %v7903_v14, %v7848_v40 }
 0xc25   : > { %v7962_v19 = vpop.f32.mrf.mxu1  ;;  %v7926_v39 = vadd.f32 %v7883_v18, %v7847_v35 }
 0xc27   : > { %v8005_v41 = vadd.f32 %v7962_v19, %v7926_v39 }
 0xc29   : > { %v8084_v47 = vadd.f32 %v8041_v23, %v8005_v41 }
 0xc2b   : > { %v8002_v20 = vpop.f32.mrf.mxu3  ;;  %v8140_v31 = vpop.f32.mrf.mxu0 }
 0xc2c   : > { %v7982_v21 = vpop.f32.mrf.mxu2  ;;  %v8007_v9 = vadd.f32 %v8002_v20, %v7928_v6 }
 0xc2d   : > { %v8061_v15 = vpop.f32.mrf.mxu1  ;;  %v8006_v48 = vadd.f32 %v7982_v21, %v7927_v43 }
 0xc2f   : > { %v8085_v50 = vadd.f32 %v8061_v15, %v8006_v48 }
 0xc31   : > { %v8164_v55 = vadd.f32 %v8140_v31, %v8085_v50 }
 0xc33   : > { %v8120_v17 = vpop.f32.mrf.mxu3  ;;  %v8239_v42 = vpop.f32.mrf.mxu0 }
 0xc34   : > { %v8081_v26 = vpop.f32.mrf.mxu2  ;;  %v8163_v49 = vadd.f32 %v8120_v17, %v8084_v47 }
 0xc35   : > { %v8160_v27 = vpop.f32.mrf.mxu1  ;;  %v8086_v14 = vadd.f32 %v8081_v26, %v8007_v9 }
 0xc37   : > { %v8165_v16 = vadd.f32 %v8160_v27, %v8086_v14 }
 0xc39   : > { %v8244_v20 = vadd.f32 %v8239_v42, %v8165_v16 }
 0xc3b   : > { %v8219_v34 = vpop.f32.mrf.mxu3  ;;  %v8364_v52 = vpop.f32.mrf.mxu0 }
 0xc3c   : > { %v8199_v36 = vpop.f32.mrf.mxu2  ;;  %v8243_v59 = vadd.f32 %v8219_v34, %v8164_v55 }
 0xc3d   : > { %v8282_v37 = vpop.f32.mrf.mxu1  ;;  %v8242_v51 = vadd.f32 %v8199_v36, %v8163_v49 }
 0xc3f   : > { %v8325_v56 = vadd.f32 %v8282_v37, %v8242_v51 }
 0xc41   : > { %v8407_v60 = vadd.f32 %v8364_v52, %v8325_v56 }
 0xc43   : > { %v8322_v44 = vpop.f32.mrf.mxu3  ;;  %v8466_v2 = vpop.f32.mrf.mxu0 }
 0xc44   : > { %v8327_v21 = vadd.f32 %v8322_v44, %v8244_v20 }
 0xc45   : > { %v8302_v45 = vpop.f32.mrf.mxu2  ;;  %v8384_v46 = vpop.f32.mrf.mxu1 }
 0xc46   : > { %v8326_v61 = vadd.f32 %v8302_v45, %v8243_v59 }
 0xc48   : > { %v8408_v1 = vadd.f32 %v8384_v46, %v8326_v61 }
 0xc4a   : > { %v8490_v7 = vadd.f32 %v8466_v2, %v8408_v1 }
 0xc4b   : > { %v8446_v57 = vpop.f32.mrf.mxu3  ;;  %v8568_v23 = vpop.f32.mrf.mxu0 }
 0xc4c   : > { %v8489_v62 = vadd.f32 %v8446_v57, %v8407_v60 }
 0xc4d   : > { %v8404_v53 = vpop.f32.mrf.mxu2  ;;  %v8486_v54 = vpop.f32.mrf.mxu1 }
 0xc4e   : > { %v8409_v15 = vadd.f32 %v8404_v53, %v8327_v21 }
 0xc50   : > { %v8491_v22 = vadd.f32 %v8486_v54, %v8409_v15 }
 0xc52   : > { %v8573_v25 = vadd.f32 %v8568_v23, %v8491_v22 }
 0xc53   : > { %v8548_v5 = vpop.f32.mrf.mxu3 }
 0xc54   : > { %v8572_v10 = vadd.f32 %v8548_v5, %v8490_v7 }
 0xc55   : > { %v8528_v63 = vpop.f32.mrf.mxu2  ;;  %v8610_v0 = vpop.f32.mrf.mxu1 }
 0xc56   : > { %v8571_v58 = vadd.f32 %v8528_v63, %v8489_v62 }
 0xc58   : > { %v8653_v3 = vadd.f32 %v8610_v0, %v8571_v58 }
 0xc5a   : > { %v8662_v8 = vadd.f32 %v8660_v4, %v8653_v3 }
 0xc5b   : > { %v8650_v24 = vpop.f32.mrf.mxu3 }
 0xc5c   : > { %v8665_v11 = vmax.f32 %v8662_v8, 0.0  ;;  %v8655_v17 = vadd.f32 %v8650_v24, %v8573_v25 }
 0xc5d   : > { %v8630_v12 = vpop.f32.mrf.mxu2 }
 0xc5e   : > { %8668 = vst.msk [vmem:[%s11595_s14] sm:$0x1] %vm12026_vm7, %v8665_v11  ;;  %v8654_v18 = vadd.f32 %v8630_v12, %v8572_v10  ;;  %8678 = vrot.lane.b32.xlu2 %v8665_v11, %s11932_s27  ;;  %8674 = vrot.lane.b32.xlu1 %v8665_v11, %s11920_s6  ;;  %s12028_s27 = smov 116   ;;  %v8664_v26 = vadd.f32 %v8660_v4, %v8655_v17 }
 0xc5f   : > { %8670 = vrot.lane.b32.xlu0 %v8665_v11, %s11885_s19  ;;  %s12029_s19 = smov 28  }
 0xc60   : > { %v8663_v13 = vadd.f32 %v8660_v4, %v8654_v18  ;;  %v8667_v27 = vmax.f32 %v8664_v26, 0.0 }
 0xc62   : > { %v8666_v19 = vmax.f32 %v8663_v13, 0.0 }
 0xc66   : > { %8682 = vrot.lane.b32.xlu2 %v8665_v11, %s11912_s25  ;;  %8693 = vrot.lane.b32.xlu1 %v8666_v19, %s12027_s15  ;;  %s12030_s25 = smov 56  }
 0xc67   : > { %8691 = vrot.lane.b32.xlu0 %v8665_v11, %s12027_s15 }
 0xc6e   : > { %8702 = vrot.lane.b32.xlu2 %v8666_v19, %s11874_s26  ;;  %8698 = vrot.lane.b32.xlu1 %v8666_v19, %s12028_s27 }
 0xc6f   : > { %8686 = vrot.lane.b32.xlu0 %v8665_v11, %s12029_s19 }
 0xc76   : > { %8714 = vrot.lane.b32.xlu2 %v8666_v19, %s11918_s2  ;;  %8710 = vrot.lane.b32.xlu1 %v8666_v19, %s12030_s25 }
 0xc77   : > { %8706 = vrot.lane.b32.xlu0 %v8666_v19, %s11896_s13  ;;  %s12037_s13 = sld [smem:[#allocation14_spill]] }
 0xc7d   : > { %s9246_s26 = sshll.u32 %s12037_s13, 4 }
 0xc7e   : > { %8727 = vrot.lane.b32.xlu2 %v8667_v27, %s11919_s8  ;;  %8723 = vrot.lane.b32.xlu1 %v8667_v27, %s11879_s24  ;;  %s12047_s8 = sld [smem:[#allocation36_spill]] }
 0xc7f   : > { %8718 = vrot.lane.b32.xlu0 %v8666_v19, %s11910_s11 }
 0xc84   : > { %s8747_s6 = scalar_lea.hbm %s12047_s8, %s9246_s26  ;;  %s9967_s5 = scalar_lea.hbm %s12047_s8, 32 }
 0xc85   : > { %s8750_s16 = sshll.u32 %s8747_s6, 4  ;;  %s8751_s16 = int_to_ptr.hbm [resolvable:$true] %s8750_s16 }
 0xc86   : > { %s9961_s3 = sshra.s32 %s8751_s16, 4  ;;  %s9962_s3 = int_to_ptr.hbm [resolvable:$true] %s9961_s3 }
 0xc87   : > { %8731 = vrot.lane.b32.xlu0 %v8667_v27, %s11971_s10  ;;  %s8748_s10 = sshll.u32 %s11595_s14, 4  ;;  %s9963_s7 = scalar_lea.hbm %s9962_s3, 16  ;;  %s8749_s10 = int_to_ptr.vmem [resolvable:$true] %s8748_s10 }
 0xc88   : > { %p9964_p11 = scmp.ne.s32.totalorder %s9962_s3, %s9963_s7  ;;  %p9968_p0 = scmp.lt.s32.totalorder %s9962_s3, %s12047_s8 }
 0xc89   : > { %p9969_p1 = scmp.lt.s32.totalorder %s9967_s5, %s9963_s7 }
 0xc8a   : > { %p9965_p12 = pnand %p9964_p11, %p10200_p5 }
 0xc8b   : > { %p9970_p2 = por %p9969_p1, %p9968_p0 }
 0xc8c   : > { %p9966_p13 = pneg %p9965_p12 }
 0xc8e   : > { %p9971_p3 = pnand %p9970_p2, %p9966_p13 }
 0xcb8   : > { %v8679_v28 = vpop.permute.xlu2 %8678 }
 0xcb9   : > { %8681 = vst.msk [vmem:[%s11595_s14 + $0x3] sm:$0x1] %vm12031_vm15, %v8679_v28 }
 0xcc0   : > { %v8683_v29 = vpop.permute.xlu2 %8682 }
 0xcc1   : > { %8685 = vst.msk [vmem:[%s11595_s14 + $0x4] sm:$0x1] %vm12032_vm6, %v8683_v29 }
 0xcc8   : > { %v8703_v30 = vpop.permute.xlu2 %8702 }
 0xcc9   : > { %8705 = vst.msk [vmem:[%s11595_s14 + $0x8] sm:$0x1] %vm12033_vm11, %v8703_v30 }
 0xcd0   : > { %v8715_v31 = vpop.permute.xlu2 %8714  ;;  %v8675_v32 = vpop.permute.xlu1 %8674 }
 0xcd1   : > { %8717 = vst.msk [vmem:[%s11595_s14 + $0xb] sm:$0x1] %vm12034_vm13, %v8715_v31  ;;  %v8671_v33 = vpop.permute.xlu0 %8670 }
 0xcd2   : > { %8677 = vst.msk [vmem:[%s11595_s14 + $0x2] sm:$0x1] %vm12035_vm14, %v8675_v32 }
 0xcd3   : > { %8673 = vst.msk [vmem:[%s11595_s14 + $0x1] sm:$0x1] %vm12036_vm2, %v8671_v33 }
 0xcd8   : > { %v8728_v34 = vpop.permute.xlu2 %8727  ;;  %v8694_v35 = vpop.permute.xlu1 %8693 }
 0xcd9   : > { %8730 = vst.msk [vmem:[%s11595_s14 + $0xe] sm:$0x1] %vm12038_vm1, %v8728_v34  ;;  %v8692_v36 = vpop.permute.xlu0 %8691 }
 0xcda   : > { %v8695_v37 = vsel %vm660_vm8, %v8692_v36, %v8694_v35  ;;  %vm12044_vm8 = vmmov %vm12040_vm0 }
 0xcdb   : > { %8697 = vst.msk [vmem:[%s11595_s14 + $0x6] sm:$0x1] %vm12039_vm4, %v8695_v37 }
 0xce0   : > { %v8699_v38 = vpop.permute.xlu1 %8698 }
 0xce1   : > { %8701 = vst.msk [vmem:[%s11595_s14 + $0x7] sm:$0x1] %vm12040_vm0, %v8699_v38  ;;  %v8687_v39 = vpop.permute.xlu0 %8686 }
 0xce2   : > { %8689 = vst.msk [vmem:[%s11595_s14 + $0x5] sm:$0x1] %vm12041_vm10, %v8687_v39 }
 0xce8   : > { %v8711_v40 = vpop.permute.xlu1 %8710 }
 0xce9   : > { %8713 = vst.msk [vmem:[%s11595_s14 + $0xa] sm:$0x1] %vm12042_vm12, %v8711_v40  ;;  %v8707_v41 = vpop.permute.xlu0 %8706 }
 0xcea   : > { %8709 = vst.msk [vmem:[%s11595_s14 + $0x9] sm:$0x1] %vm12043_vm9, %v8707_v41 }
 0xcf0   : > { %v8724_v42 = vpop.permute.xlu1 %8723 }
 0xcf1   : > { %8726 = vst.msk [vmem:[%s11595_s14 + $0xd] sm:$0x1] %vm12044_vm8, %v8724_v42  ;;  %v8719_v43 = vpop.permute.xlu0 %8718 }
 0xcf2   : > { %8721 = vst.msk [vmem:[%s11595_s14 + $0xc] sm:$0x1] %vm12046_vm3, %v8719_v43 }
 0xcf9   : > { %v8732_v44 = vpop.permute.xlu0 %8731 }
 0xcfa   : > { %8734 = vst.msk [vmem:[%s11595_s14 + $0xf] sm:$0x1] %vm12048_vm5, %v8732_v44 }
 0xcfb   : > { %9974 = shalt.err (!%p9971_p3)
}
 0xcfc   : > { %s10071_s23 = smov 128  }
 0xcfd   : > { %9247 = dma.vmem_to_hbm [thread:$0]  (%p10200_p5), %s8749_s10, 256, %s8751_s16, %s8736_s22, %s10071_s23, %s10071_s23, %s12027_s15  }
 0xcfe PF: > { %s12049_s30 = sld [smem:[#allocation13_spill]] }
 0xcff   : > { %s12050_s1 = sld [smem:[#allocation10_spill]] }
 0xd04   : > { %p9253_p4 = scmp.ge.s32.totalorder %s12049_s30, 2 }
 0xd05   : > { %s8765_s9 = sand.u32 1, %s12050_s1  }
 0xd06   : > { %p9250_p7 = pnand %p9253_p4, %p10204_p6  ;;  %s8766_s0 = scalar_lea.sflag [#allocation8], %s8765_s9 }
 0xd08   : > { %p9251_p8 = pneg %p9250_p7 }
 0xd0a   : > { %9992 = dma.done.wait (%p9251_p8), %s8766_s0, 256  }
 0xd0b   : > { %9994 = vsyncadd (%p9251_p8), %s8766_s0, 4294967040  ;;  %s12052_s27 = sld [smem:[#allocation15_spill]] }
 0xd0c   : > { %s12053_s24 = sld [smem:[#allocation11_spill]] }
 0xd0d   : > { %s12054_s25 = sld [smem:[#allocation12_spill]] }
 0xd0e   : > { %s12055_s26 = sld [smem:[#allocation16_spill]] }
 0xd11   : > { %p27_p9 = scmp.ge.s32.totalorder %s12052_s27, 4  }
 0xd13   :  { %29 = sbr.rel (!%p27_p9) target bundleno = 22 (0x16), region = 267 }
 0xd18   :  { %8772 = vsyncpa [#allocation8], 1 }
 0xd19   :  { %8774 = vsyncpa [#allocation8 + $0x1], 1 }

</bundles_post_ra>
